<compile_context>
chip_gen: v7x
topology: tpu7x:2x2x1
jax: 0.10.0
libtpu: 0.0.40
codegen_flags: <defaults>
</compile_context>

<pallas_src>
import math
import functools

import jax
import jax.numpy as jnp
from jax.experimental import pallas as pl
from jax.experimental.pallas import tpu as pltpu


# ------------------------------ fused kernel -------------------------------

def _fused_transformer_kernel(
    # activations (batch folded into rows)
    src_ref, tgt_ref, mask_ref,
    # encoder stacked params
    e_wqkv, e_bqkv, e_wo, e_bo, e_lng, e_lnb, e_w1, e_b1, e_w2, e_b2,
    # decoder stacked params
    d_wqkv, d_bqkv, d_wos, d_bos, d_wq, d_bq, d_wkv, d_bkv, d_wox, d_box,
    d_lng, d_lnb, d_w1, d_b1, d_w2, d_b2,
    # final norms + (padded, lane-dense) output head
    fin_g, fin_b, w_out, b_out,
    # output
    o_ref,
    *, batch, num_heads, num_enc, num_dec):

    E = src_ref.shape[-1]
    Dh = E // num_heads
    Ssrc = src_ref.shape[0] // batch
    Stgt = tgt_ref.shape[0] // batch
    bf16 = jnp.bfloat16

    def mm(a16, b16):
        # both operands already bf16; f32 accumulation on the MXU.
        return jnp.dot(a16, b16, preferred_element_type=jnp.float32)

    def mm_t(a16, b16):
        # a @ b.T without an explicit transpose (contract last dims of both).
        return jax.lax.dot_general(a16, b16, (((1,), (1,)), ((), ())),
                                   preferred_element_type=jnp.float32)

    def layer_norm(x, g, b):
        # one-pass variance: the two cross-lane reductions are independent.
        mu = jnp.mean(x, axis=-1, keepdims=True)
        ms = jnp.mean(x * x, axis=-1, keepdims=True)
        inv = jax.lax.rsqrt(ms - mu * mu + 1e-5)
        return (x - mu) * (inv * g) + b

    def attention(q_all, k_all, v_all, Sq, Sk, wo16, bo, add_mask):
        # q_all: (B*Sq, E) bf16; k_all/v_all: (B*Sk, E) bf16; heads packed along lanes.
        # 1/sqrt(Dh) is already folded into the Q projection weights.
        ctx_rows = []
        for b in range(batch):                               # static unroll, B small
            q_b = q_all[b * Sq:(b + 1) * Sq]
            k_b = k_all[b * Sk:(b + 1) * Sk]
            v_b = v_all[b * Sk:(b + 1) * Sk]
            heads = []
            for h in range(num_heads):                       # static unroll, H small
                lo, hi = h * Dh, (h + 1) * Dh
                s = mm_t(q_b[:, lo:hi], k_b[:, lo:hi])       # (Sq, Sk)
                if add_mask is not None:
                    s = s + add_mask
                s = s - jnp.max(s, axis=-1, keepdims=True)
                p = jnp.exp(s)
                p = p * pl.reciprocal(jnp.sum(p, axis=-1, keepdims=True), approx=True)
                heads.append(mm(p.astype(bf16), v_b[:, lo:hi]))   # (Sq, Dh)
            ctx_rows.append(jnp.concatenate(heads, axis=-1))      # (Sq, E)
        # merged head projection: ONE matmul with W_o for the whole folded batch.
        ctx16 = jnp.concatenate(ctx_rows, axis=0).astype(bf16)    # (B*Sq, E)
        return mm(ctx16, wo16) + bo

    # ------------------------------- encoder -------------------------------
    x = src_ref[...]                                              # (B*Ssrc, E) f32
    for i in range(num_enc):
        lng, lnb = e_lng[i], e_lnb[i]                             # (2, 1, E)
        qkv16 = (mm(x.astype(bf16), e_wqkv[i]) + e_bqkv[i]).astype(bf16)  # fused QKV
        a = attention(qkv16[:, :E], qkv16[:, E:2 * E], qkv16[:, 2 * E:],
                      Ssrc, Ssrc, e_wo[i], e_bo[i], None)
        x = layer_norm(x + a, lng[0], lnb[0])                     # post-norm + residual
        h16 = jnp.maximum(mm(x.astype(bf16), e_w1[i]) + e_b1[i], 0.0).astype(bf16)
        f = mm(h16, e_w2[i]) + e_b2[i]
        x = layer_norm(x + f, lng[1], lnb[1])
    # encoder final LayerNorm; cast once -> reused by every decoder layer's cross-attn.
    mem16 = layer_norm(x, fin_g[0], fin_b[0]).astype(bf16)

    # ------------------------------- decoder -------------------------------
    mask = mask_ref[...]                                          # (Stgt, Stgt) additive
    y = tgt_ref[...]                                              # (B*Stgt, E) f32
    for i in range(num_dec):
        lng, lnb = d_lng[i], d_lnb[i]                             # (3, 1, E)
        qkv16 = (mm(y.astype(bf16), d_wqkv[i]) + d_bqkv[i]).astype(bf16)  # causal self-attn
        a = attention(qkv16[:, :E], qkv16[:, E:2 * E], qkv16[:, 2 * E:],
                      Stgt, Stgt, d_wos[i], d_bos[i], mask)
        y = layer_norm(y + a, lng[0], lnb[0])
        q16 = (mm(y.astype(bf16), d_wq[i]) + d_bq[i]).astype(bf16)        # cross-attn
        kv16 = (mm(mem16, d_wkv[i]) + d_bkv[i]).astype(bf16)              # fused K/V
        a = attention(q16, kv16[:, :E], kv16[:, E:], Stgt, Ssrc,
                      d_wox[i], d_box[i], None)
        y = layer_norm(y + a, lng[1], lnb[1])
        h16 = jnp.maximum(mm(y.astype(bf16), d_w1[i]) + d_b1[i], 0.0).astype(bf16)
        f = mm(h16, d_w2[i]) + d_b2[i]
        y = layer_norm(y + f, lng[2], lnb[2])
    y16 = layer_norm(y, fin_g[1], fin_b[1]).astype(bf16)          # decoder final LayerNorm

    # lane-dense (128-padded) output head; bf16 store halves the HBM writeback.
    o_ref[...] = (mm(y16, w_out[...]) + b_out[...]).astype(o_ref.dtype)


# ------------------------------- misc helpers -------------------------------

def positional_encoding(max_len, dim_model):
    position = jnp.arange(max_len, dtype=jnp.float32)[:, None]
    div_term = jnp.exp(
        jnp.arange(0, dim_model, 2, dtype=jnp.float32) * (-math.log(10000.0) / dim_model))
    pe = jnp.zeros((max_len, dim_model), jnp.float32)
    pe = pe.at[:, 0::2].set(jnp.sin(position * div_term))
    pe = pe.at[:, 1::2].set(jnp.cos(position * div_term))
    return pe


def get_tgt_mask(size):
    i = jnp.arange(size)
    return jnp.where(i[:, None] >= i[None, :], 0.0, -jnp.inf).astype(jnp.float32)


# ------------------------------ parameter init ------------------------------

def init_params(key, n_embeddings, embedding_dim, act_dim, num_heads,
                num_encoder_layers, num_decoder_layers, dim_feedforward, out_pad):
    E = embedding_dim
    F = dim_feedforward
    vocab = n_embeddings + act_dim + 1
    Dh = E // num_heads
    qscale = 1.0 / math.sqrt(Dh)          # folded into the Q projection (weights + bias)
    keys = iter(jax.random.split(key, 1024))

    def lin(fi, fo):
        bound = 1.0 / math.sqrt(fi)
        w = jax.random.uniform(next(keys), (fi, fo), jnp.float32, -bound, bound)
        b = jax.random.uniform(next(keys), (fo,), jnp.float32, -bound, bound)
        return w, b

    def lin_stack(n, fi, fo):
        ws, bs = [], []
        for _ in range(n):
            w, b = lin(fi, fo)
            ws.append(w)
            bs.append(b)
        return jnp.stack(ws), jnp.stack(bs).reshape(n, 1, fo)     # f32 for now

    def to_bf16(w):
        # weights stored bf16 (MXU operands); biases stay f32 (added post-accumulation).
        return w.astype(jnp.bfloat16)

    Le, Ld = num_encoder_layers, num_decoder_layers

    # encoder
    e_wqkv, e_bqkv = lin_stack(Le, E, 3 * E)
    e_wqkv = e_wqkv.at[:, :, :E].multiply(qscale)
    e_bqkv = e_bqkv.at[:, :, :E].multiply(qscale)
    e_wo, e_bo = lin_stack(Le, E, E)
    e_w1, e_b1 = lin_stack(Le, E, F)
    e_w2, e_b2 = lin_stack(Le, F, E)
    enc = dict(
        wqkv=to_bf16(e_wqkv), bqkv=e_bqkv, wo=to_bf16(e_wo), bo=e_bo,
        w1=to_bf16(e_w1), b1=e_b1, w2=to_bf16(e_w2), b2=e_b2,
        ln_g=jnp.ones((Le, 2, 1, E), jnp.float32),
        ln_b=jnp.zeros((Le, 2, 1, E), jnp.float32),
    )

    # decoder
    d_wqkv, d_bqkv = lin_stack(Ld, E, 3 * E)
    d_wqkv = d_wqkv.at[:, :, :E].multiply(qscale)
    d_bqkv = d_bqkv.at[:, :, :E].multiply(qscale)
    d_wos, d_bos = lin_stack(Ld, E, E)
    d_wq, d_bq = lin_stack(Ld, E, E)
    d_wq = d_wq * qscale
    d_bq = d_bq * qscale
    d_wkv, d_bkv = lin_stack(Ld, E, 2 * E)
    d_wox, d_box = lin_stack(Ld, E, E)
    d_w1, d_b1 = lin_stack(Ld, E, F)
    d_w2, d_b2 = lin_stack(Ld, F, E)
    dec = dict(
        wqkv=to_bf16(d_wqkv), bqkv=d_bqkv, wos=to_bf16(d_wos), bos=d_bos,
        wq=to_bf16(d_wq), bq=d_bq, wkv=to_bf16(d_wkv), bkv=d_bkv,
        wox=to_bf16(d_wox), box=d_box,
        w1=to_bf16(d_w1), b1=d_b1, w2=to_bf16(d_w2), b2=d_b2,
        ln_g=jnp.ones((Ld, 3, 1, E), jnp.float32),
        ln_b=jnp.zeros((Ld, 3, 1, E), jnp.float32),
    )

    w_out, b_out = lin(E, n_embeddings)
    w_out_p = jnp.zeros((E, out_pad), jnp.float32).at[:, :n_embeddings].set(w_out)
    b_out_p = jnp.zeros((1, out_pad), jnp.float32).at[:, :n_embeddings].set(b_out)

    return dict(
        embedding=jax.random.normal(next(keys), (vocab, E), jnp.float32),
        pe=positional_encoding(1024, E),
        enc=enc, dec=dec,
        fin_g=jnp.ones((2, 1, E), jnp.float32),     # rows: [encoder final, decoder final]
        fin_b=jnp.zeros((2, 1, E), jnp.float32),
        w_out=to_bf16(w_out_p),
        b_out=b_out_p,
    )


# --------------------------------- forward ----------------------------------

def transformer_transition_forward(params, state, acts, tgt, tgt_mask, *,
                                   num_heads, n_embeddings, act_dim,
                                   return_logits=False):
    E = params["embedding"].shape[1]
    B = state.shape[0]
    special_token = n_embeddings + act_dim

    # Embedding gather + positional encoding kept in JAX (cheap, one-shot ops).
    # TODO(synk): nn.Dropout (positional encoder + transformer layers) omitted — eval-mode identity.
    adjusted_acts = acts + n_embeddings
    src_tokens = jnp.concatenate([state, adjusted_acts[:, None]], axis=1)
    src = params["embedding"][src_tokens] * math.sqrt(E)
    src = src + params["pe"][None, : src.shape[1], :]

    start = jnp.full((B, 1), special_token, dtype=jnp.int32)
    tgt_tokens = jnp.concatenate([start, tgt], axis=1)[:, :-1]
    tgt_emb = params["embedding"][tgt_tokens] * math.sqrt(E)
    tgt_emb = tgt_emb + params["pe"][None, : tgt_emb.shape[1], :]

    Ssrc, Stgt = src.shape[1], tgt_emb.shape[1]
    # Fold the batch into the matmul M dimension (single-TC chips get full fill).
    src2d = src.reshape(B * Ssrc, E)
    tgt2d = tgt_emb.reshape(B * Stgt, E)

    enc, dec = params["enc"], params["dec"]
    num_enc = enc["wqkv"].shape[0]
    num_dec = dec["wqkv"].shape[0]
    out_pad = params["w_out"].shape[1]
    dim_ff = enc["w1"].shape[2]
    Dh = E // num_heads

    weights = [
        enc["wqkv"], enc["bqkv"], enc["wo"], enc["bo"],
        enc["ln_g"], enc["ln_b"], enc["w1"], enc["b1"], enc["w2"], enc["b2"],
        dec["wqkv"], dec["bqkv"], dec["wos"], dec["bos"],
        dec["wq"], dec["bq"], dec["wkv"], dec["bkv"], dec["wox"], dec["box"],
        dec["ln_g"], dec["ln_b"], dec["w1"], dec["b1"], dec["w2"], dec["b2"],
        params["fin_g"], params["fin_b"], params["w_out"], params["b_out"],
    ]

    def _const_spec(shape):
        nd = len(shape)
        return pl.BlockSpec(shape, lambda i, _nd=nd: (0,) * _nd)

    in_specs = ([_const_spec((B * Ssrc, E)),
                 _const_spec((B * Stgt, E)),
                 _const_spec(tuple(tgt_mask.shape))]
                + [_const_spec(tuple(w.shape)) for w in weights])

    # --- advisory cost estimate for the XLA scheduler ---
    Msrc, Mtgt = B * Ssrc, B * Stgt
    def attn_flops(sq, sk):
        return 2 * B * num_heads * sq * sk * Dh * 2            # scores + PV
    flops = 0
    flops += num_enc * (2 * Msrc * E * 3 * E + attn_flops(Ssrc, Ssrc)
                        + 2 * Msrc * E * E + 2 * 2 * Msrc * E * dim_ff)
    flops += num_dec * (2 * Mtgt * E * 3 * E + attn_flops(Stgt, Stgt) + 2 * Mtgt * E * E
                        + 2 * Mtgt * E * E + 2 * Msrc * E * 2 * E + attn_flops(Stgt, Ssrc)
                        + 2 * Mtgt * E * E + 2 * 2 * Mtgt * E * dim_ff)
    flops += 2 * Mtgt * E * out_pad
    transcendentals = B * num_heads * (num_enc * Ssrc * Ssrc
                                       + num_dec * (Stgt * Stgt + Stgt * Ssrc))
    bytes_accessed = (sum(int(a.size) * a.dtype.itemsize
                          for a in ([src2d, tgt2d, tgt_mask] + weights))
                      + Mtgt * out_pad * 2)

    logits_pad = pl.pallas_call(
        functools.partial(_fused_transformer_kernel,
                          batch=B, num_heads=num_heads,
                          num_enc=num_enc, num_dec=num_dec),
        out_shape=jax.ShapeDtypeStruct((B * Stgt, out_pad), jnp.bfloat16),
        grid=(1,),
        in_specs=in_specs,
        out_specs=_const_spec((B * Stgt, out_pad)),
        compiler_params=pltpu.CompilerParams(
            dimension_semantics=("arbitrary",),
            vmem_limit_bytes=32 * 1024 * 1024),
        cost_estimate=pl.CostEstimate(flops=int(flops),
                                      transcendentals=int(transcendentals),
                                      bytes_accessed=int(bytes_accessed)),
    )(src2d, tgt2d, tgt_mask, *weights)

    logits = (logits_pad[:, :n_embeddings]
              .astype(jnp.float32)
              .reshape(B, Stgt, n_embeddings))
    if return_logits:
        return logits, jnp.array(0), jnp.array(1)
    # stochastic=None branch -> argmax over token dim
    # TODO(synk): stochastic torch.multinomial sampling branch not implemented.
    # TODO(synk): autoregressive tgt=None rollout (host-side python loop) not implemented.
    return jnp.argmax(logits, axis=2), jnp.array(0), jnp.array(1)


# ----------------------------------- main ------------------------------------

if __name__ == "__main__":
    n_embeddings = 16
    embedding_dim = 32
    act_dim = 4            # spaces.Discrete(4)
    num_heads = 4
    num_encoder_layers = 2
    num_decoder_layers = 2
    dim_feedforward = 64
    B, S = 2, 8
    OUT_PAD = 128          # lane-dense output head (n_embeddings padded to 128 lanes)

    root = jax.random.PRNGKey(0)
    kp, ks, ka, kt = jax.random.split(root, 4)

    params = init_params(kp, n_embeddings, embedding_dim, act_dim, num_heads,
                         num_encoder_layers, num_decoder_layers, dim_feedforward,
                         OUT_PAD)

    state = jax.random.randint(ks, (B, S), 0, n_embeddings, dtype=jnp.int32)
    acts = jax.random.randint(ka, (B,), 0, act_dim, dtype=jnp.int32)
    tgt = jax.random.randint(kt, (B, S), 0, n_embeddings, dtype=jnp.int32)
    tgt_mask = get_tgt_mask(S)

    fwd = jax.jit(functools.partial(
        transformer_transition_forward,
        num_heads=num_heads, n_embeddings=n_embeddings, act_dim=act_dim,
        return_logits=True))

    logits, reward, gamma = fwd(params, state, acts, tgt, tgt_mask)
    jax.block_until_ready(logits)
    jax.block_until_ready(reward)
    jax.block_until_ready(gamma)

    assert logits.shape == (B, S, n_embeddings)
    assert bool(jnp.all(jnp.isfinite(logits)))
    print("KERNEL_OK")
</pallas_src>

<mosaic_0001>
module attributes {stable_mosaic.version = 11 : i64} {
  func.func @_fused_transformer_kernel(%arg0: i32, %arg1: memref<18x32xf32, #tpu.memory_space<vmem>>, %arg2: memref<16x32xf32, #tpu.memory_space<vmem>>, %arg3: memref<8x8xf32, #tpu.memory_space<vmem>>, %arg4: memref<2x32x96xbf16, #tpu.memory_space<vmem>>, %arg5: memref<2x1x96xf32, #tpu.memory_space<vmem>>, %arg6: memref<2x32x32xbf16, #tpu.memory_space<vmem>>, %arg7: memref<2x1x32xf32, #tpu.memory_space<vmem>>, %arg8: memref<2x2x1x32xf32, #tpu.memory_space<vmem>>, %arg9: memref<2x2x1x32xf32, #tpu.memory_space<vmem>>, %arg10: memref<2x32x64xbf16, #tpu.memory_space<vmem>>, %arg11: memref<2x1x64xf32, #tpu.memory_space<vmem>>, %arg12: memref<2x64x32xbf16, #tpu.memory_space<vmem>>, %arg13: memref<2x1x32xf32, #tpu.memory_space<vmem>>, %arg14: memref<2x32x96xbf16, #tpu.memory_space<vmem>>, %arg15: memref<2x1x96xf32, #tpu.memory_space<vmem>>, %arg16: memref<2x32x32xbf16, #tpu.memory_space<vmem>>, %arg17: memref<2x1x32xf32, #tpu.memory_space<vmem>>, %arg18: memref<2x32x32xbf16, #tpu.memory_space<vmem>>, %arg19: memref<2x1x32xf32, #tpu.memory_space<vmem>>, %arg20: memref<2x32x64xbf16, #tpu.memory_space<vmem>>, %arg21: memref<2x1x64xf32, #tpu.memory_space<vmem>>, %arg22: memref<2x32x32xbf16, #tpu.memory_space<vmem>>, %arg23: memref<2x1x32xf32, #tpu.memory_space<vmem>>, %arg24: memref<2x3x1x32xf32, #tpu.memory_space<vmem>>, %arg25: memref<2x3x1x32xf32, #tpu.memory_space<vmem>>, %arg26: memref<2x32x64xbf16, #tpu.memory_space<vmem>>, %arg27: memref<2x1x64xf32, #tpu.memory_space<vmem>>, %arg28: memref<2x64x32xbf16, #tpu.memory_space<vmem>>, %arg29: memref<2x1x32xf32, #tpu.memory_space<vmem>>, %arg30: memref<2x1x32xf32, #tpu.memory_space<vmem>>, %arg31: memref<2x1x32xf32, #tpu.memory_space<vmem>>, %arg32: memref<32x128xbf16, #tpu.memory_space<vmem>>, %arg33: memref<1x128xf32, #tpu.memory_space<vmem>>, %arg34: memref<16x128xbf16, #tpu.memory_space<vmem>>) attributes {dimension_semantics = [#tpu.dimension_semantics<arbitrary>], iteration_bounds = array<i64: 1>, scalar_prefetch = 0 : i64, scratch_operands = 0 : i64, tpu.core_type = #tpu.core_type<tc>, window_params = [{pipeline_mode = #tpu.pipeline_mode<synchronous>, transform_indices = @transform_0, window_bounds = array<i64: 18, 32>}, {pipeline_mode = #tpu.pipeline_mode<synchronous>, transform_indices = @transform_1, window_bounds = array<i64: 16, 32>}, {pipeline_mode = #tpu.pipeline_mode<synchronous>, transform_indices = @transform_2, window_bounds = array<i64: 8, 8>}, {pipeline_mode = #tpu.pipeline_mode<synchronous>, transform_indices = @transform_3, window_bounds = array<i64: 2, 32, 96>}, {pipeline_mode = #tpu.pipeline_mode<synchronous>, transform_indices = @transform_4, window_bounds = array<i64: 2, 1, 96>}, {pipeline_mode = #tpu.pipeline_mode<synchronous>, transform_indices = @transform_5, window_bounds = array<i64: 2, 32, 32>}, {pipeline_mode = #tpu.pipeline_mode<synchronous>, transform_indices = @transform_6, window_bounds = array<i64: 2, 1, 32>}, {pipeline_mode = #tpu.pipeline_mode<synchronous>, transform_indices = @transform_7, window_bounds = array<i64: 2, 2, 1, 32>}, {pipeline_mode = #tpu.pipeline_mode<synchronous>, transform_indices = @transform_8, window_bounds = array<i64: 2, 2, 1, 32>}, {pipeline_mode = #tpu.pipeline_mode<synchronous>, transform_indices = @transform_9, window_bounds = array<i64: 2, 32, 64>}, {pipeline_mode = #tpu.pipeline_mode<synchronous>, transform_indices = @transform_10, window_bounds = array<i64: 2, 1, 64>}, {pipeline_mode = #tpu.pipeline_mode<synchronous>, transform_indices = @transform_11, window_bounds = array<i64: 2, 64, 32>}, {pipeline_mode = #tpu.pipeline_mode<synchronous>, transform_indices = @transform_12, window_bounds = array<i64: 2, 1, 32>}, {pipeline_mode = #tpu.pipeline_mode<synchronous>, transform_indices = @transform_13, window_bounds = array<i64: 2, 32, 96>}, {pipeline_mode = #tpu.pipeline_mode<synchronous>, transform_indices = @transform_14, window_bounds = array<i64: 2, 1, 96>}, {pipeline_mode = #tpu.pipeline_mode<synchronous>, transform_indices = @transform_15, window_bounds = array<i64: 2, 32, 32>}, {pipeline_mode = #tpu.pipeline_mode<synchronous>, transform_indices = @transform_16, window_bounds = array<i64: 2, 1, 32>}, {pipeline_mode = #tpu.pipeline_mode<synchronous>, transform_indices = @transform_17, window_bounds = array<i64: 2, 32, 32>}, {pipeline_mode = #tpu.pipeline_mode<synchronous>, transform_indices = @transform_18, window_bounds = array<i64: 2, 1, 32>}, {pipeline_mode = #tpu.pipeline_mode<synchronous>, transform_indices = @transform_19, window_bounds = array<i64: 2, 32, 64>}, {pipeline_mode = #tpu.pipeline_mode<synchronous>, transform_indices = @transform_20, window_bounds = array<i64: 2, 1, 64>}, {pipeline_mode = #tpu.pipeline_mode<synchronous>, transform_indices = @transform_21, window_bounds = array<i64: 2, 32, 32>}, {pipeline_mode = #tpu.pipeline_mode<synchronous>, transform_indices = @transform_22, window_bounds = array<i64: 2, 1, 32>}, {pipeline_mode = #tpu.pipeline_mode<synchronous>, transform_indices = @transform_23, window_bounds = array<i64: 2, 3, 1, 32>}, {pipeline_mode = #tpu.pipeline_mode<synchronous>, transform_indices = @transform_24, window_bounds = array<i64: 2, 3, 1, 32>}, {pipeline_mode = #tpu.pipeline_mode<synchronous>, transform_indices = @transform_25, window_bounds = array<i64: 2, 32, 64>}, {pipeline_mode = #tpu.pipeline_mode<synchronous>, transform_indices = @transform_26, window_bounds = array<i64: 2, 1, 64>}, {pipeline_mode = #tpu.pipeline_mode<synchronous>, transform_indices = @transform_27, window_bounds = array<i64: 2, 64, 32>}, {pipeline_mode = #tpu.pipeline_mode<synchronous>, transform_indices = @transform_28, window_bounds = array<i64: 2, 1, 32>}, {pipeline_mode = #tpu.pipeline_mode<synchronous>, transform_indices = @transform_29, window_bounds = array<i64: 2, 1, 32>}, {pipeline_mode = #tpu.pipeline_mode<synchronous>, transform_indices = @transform_30, window_bounds = array<i64: 2, 1, 32>}, {pipeline_mode = #tpu.pipeline_mode<synchronous>, transform_indices = @transform_31, window_bounds = array<i64: 32, 128>}, {pipeline_mode = #tpu.pipeline_mode<synchronous>, transform_indices = @transform_32, window_bounds = array<i64: 1, 128>}, {pipeline_mode = #tpu.pipeline_mode<synchronous>, transform_indices = @transform_33, window_bounds = array<i64: 16, 128>}]} {
    %c0 = arith.constant 0 : index
    %c0_0 = arith.constant 0 : index
    %0 = vector.load %arg1[%c0, %c0_0] : memref<18x32xf32, #tpu.memory_space<vmem>>, vector<18x32xf32>
    %c0_1 = arith.constant 0 : index
    %c0_2 = arith.constant 0 : index
    %c0_3 = arith.constant 0 : index
    %c0_4 = arith.constant 0 : index
    %1 = vector.load %arg8[%c0_1, %c0_2, %c0_3, %c0_4] : memref<2x2x1x32xf32, #tpu.memory_space<vmem>>, vector<1x2x1x32xf32>
    %2 = vector.shape_cast %1 : vector<1x2x1x32xf32> to vector<2x1x32xf32>
    %c0_5 = arith.constant 0 : index
    %c0_6 = arith.constant 0 : index
    %c0_7 = arith.constant 0 : index
    %c0_8 = arith.constant 0 : index
    %3 = vector.load %arg9[%c0_5, %c0_6, %c0_7, %c0_8] : memref<2x2x1x32xf32, #tpu.memory_space<vmem>>, vector<1x2x1x32xf32>
    %4 = vector.shape_cast %3 : vector<1x2x1x32xf32> to vector<2x1x32xf32>
    %5 = arith.truncf %0 : vector<18x32xf32> to vector<18x32xbf16>
    %c0_9 = arith.constant 0 : index
    %c0_10 = arith.constant 0 : index
    %c0_11 = arith.constant 0 : index
    %6 = vector.load %arg4[%c0_9, %c0_10, %c0_11] : memref<2x32x96xbf16, #tpu.memory_space<vmem>>, vector<1x32x96xbf16>
    %7 = vector.shape_cast %6 : vector<1x32x96xbf16> to vector<32x96xbf16>
    %cst = arith.constant dense<0.000000e+00> : vector<18x96xf32>
    %8 = tpu.matmul %5, %7, %cst {dimension_numbers = #tpu.dot_dimension_numbers<[1], [0], [0], [1], [0, 0, 1, 1], [], []>} : vector<18x32xbf16>, vector<32x96xbf16>, vector<18x96xf32> -> vector<18x96xf32>
    %c0_12 = arith.constant 0 : index
    %c0_13 = arith.constant 0 : index
    %c0_14 = arith.constant 0 : index
    %9 = vector.load %arg5[%c0_12, %c0_13, %c0_14] : memref<2x1x96xf32, #tpu.memory_space<vmem>>, vector<1x1x96xf32>
    %10 = vector.shape_cast %9 : vector<1x1x96xf32> to vector<1x96xf32>
    %11 = vector.broadcast %10 : vector<1x96xf32> to vector<18x96xf32>
    %12 = arith.addf %8, %11 : vector<18x96xf32>
    %13 = arith.truncf %12 : vector<18x96xf32> to vector<18x96xbf16>
    %14 = vector.extract_strided_slice %13 {offsets = [0, 0], sizes = [18, 32], strides = [1, 1]} : vector<18x96xbf16> to vector<18x32xbf16>
    %15 = vector.extract_strided_slice %13 {offsets = [0, 32], sizes = [18, 32], strides = [1, 1]} : vector<18x96xbf16> to vector<18x32xbf16>
    %16 = vector.extract_strided_slice %13 {offsets = [0, 64], sizes = [18, 32], strides = [1, 1]} : vector<18x96xbf16> to vector<18x32xbf16>
    %c0_15 = arith.constant 0 : index
    %c0_16 = arith.constant 0 : index
    %c0_17 = arith.constant 0 : index
    %17 = vector.load %arg6[%c0_15, %c0_16, %c0_17] : memref<2x32x32xbf16, #tpu.memory_space<vmem>>, vector<1x32x32xbf16>
    %18 = vector.shape_cast %17 : vector<1x32x32xbf16> to vector<32x32xbf16>
    %c0_18 = arith.constant 0 : index
    %c0_19 = arith.constant 0 : index
    %c0_20 = arith.constant 0 : index
    %19 = vector.load %arg7[%c0_18, %c0_19, %c0_20] : memref<2x1x32xf32, #tpu.memory_space<vmem>>, vector<1x1x32xf32>
    %20 = vector.shape_cast %19 : vector<1x1x32xf32> to vector<1x32xf32>
    %21 = vector.extract_strided_slice %14 {offsets = [0, 0], sizes = [9, 32], strides = [1, 1]} : vector<18x32xbf16> to vector<9x32xbf16>
    %22 = vector.extract_strided_slice %15 {offsets = [0, 0], sizes = [9, 32], strides = [1, 1]} : vector<18x32xbf16> to vector<9x32xbf16>
    %23 = vector.extract_strided_slice %16 {offsets = [0, 0], sizes = [9, 32], strides = [1, 1]} : vector<18x32xbf16> to vector<9x32xbf16>
    %24 = vector.extract_strided_slice %21 {offsets = [0, 0], sizes = [9, 8], strides = [1, 1]} : vector<9x32xbf16> to vector<9x8xbf16>
    %25 = vector.extract_strided_slice %22 {offsets = [0, 0], sizes = [9, 8], strides = [1, 1]} : vector<9x32xbf16> to vector<9x8xbf16>
    %cst_21 = arith.constant dense<0.000000e+00> : vector<9x9xf32>
    %26 = tpu.matmul %24, %25, %cst_21 {dimension_numbers = #tpu.dot_dimension_numbers<[1], [1], [0], [0], [0, 0, 1, 0], [], []>} : vector<9x8xbf16>, vector<9x8xbf16>, vector<9x9xf32> -> vector<9x9xf32>
    %cst_22 = arith.constant dense<0xFF800000> : vector<9xf32>
    %27 = vector.multi_reduction <maximumf>, %26, %cst_22 [1] : vector<9x9xf32> to vector<9xf32>
    %28 = vector.shape_cast %27 : vector<9xf32> to vector<9x1xf32>
    %29 = vector.broadcast %28 : vector<9x1xf32> to vector<9x9xf32>
    %30 = arith.subf %26, %29 : vector<9x9xf32>
    %31 = math.exp %30 : vector<9x9xf32>
    %cst_23 = arith.constant dense<0.000000e+00> : vector<9xf32>
    %32 = vector.multi_reduction <add>, %31, %cst_23 [1] : vector<9x9xf32> to vector<9xf32>
    %33 = vector.shape_cast %32 : vector<9xf32> to vector<9x1xf32>
    %34 = tpu.reciprocal %33 {approx = true} : vector<9x1xf32> -> vector<9x1xf32>
    %35 = vector.broadcast %34 : vector<9x1xf32> to vector<9x9xf32>
    %36 = arith.mulf %31, %35 : vector<9x9xf32>
    %37 = arith.truncf %36 : vector<9x9xf32> to vector<9x9xbf16>
    %38 = vector.extract_strided_slice %23 {offsets = [0, 0], sizes = [9, 8], strides = [1, 1]} : vector<9x32xbf16> to vector<9x8xbf16>
    %cst_24 = arith.constant dense<0.000000e+00> : vector<9x8xf32>
    %39 = tpu.matmul %37, %38, %cst_24 {dimension_numbers = #tpu.dot_dimension_numbers<[1], [0], [0], [1], [0, 0, 1, 1], [], []>} : vector<9x9xbf16>, vector<9x8xbf16>, vector<9x8xf32> -> vector<9x8xf32>
    %40 = vector.extract_strided_slice %21 {offsets = [0, 8], sizes = [9, 8], strides = [1, 1]} : vector<9x32xbf16> to vector<9x8xbf16>
    %41 = vector.extract_strided_slice %22 {offsets = [0, 8], sizes = [9, 8], strides = [1, 1]} : vector<9x32xbf16> to vector<9x8xbf16>
    %cst_25 = arith.constant dense<0.000000e+00> : vector<9x9xf32>
    %42 = tpu.matmul %40, %41, %cst_25 {dimension_numbers = #tpu.dot_dimension_numbers<[1], [1], [0], [0], [0, 0, 1, 0], [], []>} : vector<9x8xbf16>, vector<9x8xbf16>, vector<9x9xf32> -> vector<9x9xf32>
    %cst_26 = arith.constant dense<0xFF800000> : vector<9xf32>
    %43 = vector.multi_reduction <maximumf>, %42, %cst_26 [1] : vector<9x9xf32> to vector<9xf32>
    %44 = vector.shape_cast %43 : vector<9xf32> to vector<9x1xf32>
    %45 = vector.broadcast %44 : vector<9x1xf32> to vector<9x9xf32>
    %46 = arith.subf %42, %45 : vector<9x9xf32>
    %47 = math.exp %46 : vector<9x9xf32>
    %cst_27 = arith.constant dense<0.000000e+00> : vector<9xf32>
    %48 = vector.multi_reduction <add>, %47, %cst_27 [1] : vector<9x9xf32> to vector<9xf32>
    %49 = vector.shape_cast %48 : vector<9xf32> to vector<9x1xf32>
    %50 = tpu.reciprocal %49 {approx = true} : vector<9x1xf32> -> vector<9x1xf32>
    %51 = vector.broadcast %50 : vector<9x1xf32> to vector<9x9xf32>
    %52 = arith.mulf %47, %51 : vector<9x9xf32>
    %53 = arith.truncf %52 : vector<9x9xf32> to vector<9x9xbf16>
    %54 = vector.extract_strided_slice %23 {offsets = [0, 8], sizes = [9, 8], strides = [1, 1]} : vector<9x32xbf16> to vector<9x8xbf16>
    %cst_28 = arith.constant dense<0.000000e+00> : vector<9x8xf32>
    %55 = tpu.matmul %53, %54, %cst_28 {dimension_numbers = #tpu.dot_dimension_numbers<[1], [0], [0], [1], [0, 0, 1, 1], [], []>} : vector<9x9xbf16>, vector<9x8xbf16>, vector<9x8xf32> -> vector<9x8xf32>
    %56 = vector.extract_strided_slice %21 {offsets = [0, 16], sizes = [9, 8], strides = [1, 1]} : vector<9x32xbf16> to vector<9x8xbf16>
    %57 = vector.extract_strided_slice %22 {offsets = [0, 16], sizes = [9, 8], strides = [1, 1]} : vector<9x32xbf16> to vector<9x8xbf16>
    %cst_29 = arith.constant dense<0.000000e+00> : vector<9x9xf32>
    %58 = tpu.matmul %56, %57, %cst_29 {dimension_numbers = #tpu.dot_dimension_numbers<[1], [1], [0], [0], [0, 0, 1, 0], [], []>} : vector<9x8xbf16>, vector<9x8xbf16>, vector<9x9xf32> -> vector<9x9xf32>
    %cst_30 = arith.constant dense<0xFF800000> : vector<9xf32>
    %59 = vector.multi_reduction <maximumf>, %58, %cst_30 [1] : vector<9x9xf32> to vector<9xf32>
    %60 = vector.shape_cast %59 : vector<9xf32> to vector<9x1xf32>
    %61 = vector.broadcast %60 : vector<9x1xf32> to vector<9x9xf32>
    %62 = arith.subf %58, %61 : vector<9x9xf32>
    %63 = math.exp %62 : vector<9x9xf32>
    %cst_31 = arith.constant dense<0.000000e+00> : vector<9xf32>
    %64 = vector.multi_reduction <add>, %63, %cst_31 [1] : vector<9x9xf32> to vector<9xf32>
    %65 = vector.shape_cast %64 : vector<9xf32> to vector<9x1xf32>
    %66 = tpu.reciprocal %65 {approx = true} : vector<9x1xf32> -> vector<9x1xf32>
    %67 = vector.broadcast %66 : vector<9x1xf32> to vector<9x9xf32>
    %68 = arith.mulf %63, %67 : vector<9x9xf32>
    %69 = arith.truncf %68 : vector<9x9xf32> to vector<9x9xbf16>
    %70 = vector.extract_strided_slice %23 {offsets = [0, 16], sizes = [9, 8], strides = [1, 1]} : vector<9x32xbf16> to vector<9x8xbf16>
    %cst_32 = arith.constant dense<0.000000e+00> : vector<9x8xf32>
    %71 = tpu.matmul %69, %70, %cst_32 {dimension_numbers = #tpu.dot_dimension_numbers<[1], [0], [0], [1], [0, 0, 1, 1], [], []>} : vector<9x9xbf16>, vector<9x8xbf16>, vector<9x8xf32> -> vector<9x8xf32>
    %72 = vector.extract_strided_slice %21 {offsets = [0, 24], sizes = [9, 8], strides = [1, 1]} : vector<9x32xbf16> to vector<9x8xbf16>
    %73 = vector.extract_strided_slice %22 {offsets = [0, 24], sizes = [9, 8], strides = [1, 1]} : vector<9x32xbf16> to vector<9x8xbf16>
    %cst_33 = arith.constant dense<0.000000e+00> : vector<9x9xf32>
    %74 = tpu.matmul %72, %73, %cst_33 {dimension_numbers = #tpu.dot_dimension_numbers<[1], [1], [0], [0], [0, 0, 1, 0], [], []>} : vector<9x8xbf16>, vector<9x8xbf16>, vector<9x9xf32> -> vector<9x9xf32>
    %cst_34 = arith.constant dense<0xFF800000> : vector<9xf32>
    %75 = vector.multi_reduction <maximumf>, %74, %cst_34 [1] : vector<9x9xf32> to vector<9xf32>
    %76 = vector.shape_cast %75 : vector<9xf32> to vector<9x1xf32>
    %77 = vector.broadcast %76 : vector<9x1xf32> to vector<9x9xf32>
    %78 = arith.subf %74, %77 : vector<9x9xf32>
    %79 = math.exp %78 : vector<9x9xf32>
    %cst_35 = arith.constant dense<0.000000e+00> : vector<9xf32>
    %80 = vector.multi_reduction <add>, %79, %cst_35 [1] : vector<9x9xf32> to vector<9xf32>
    %81 = vector.shape_cast %80 : vector<9xf32> to vector<9x1xf32>
    %82 = tpu.reciprocal %81 {approx = true} : vector<9x1xf32> -> vector<9x1xf32>
    %83 = vector.broadcast %82 : vector<9x1xf32> to vector<9x9xf32>
    %84 = arith.mulf %79, %83 : vector<9x9xf32>
    %85 = arith.truncf %84 : vector<9x9xf32> to vector<9x9xbf16>
    %86 = vector.extract_strided_slice %23 {offsets = [0, 24], sizes = [9, 8], strides = [1, 1]} : vector<9x32xbf16> to vector<9x8xbf16>
    %cst_36 = arith.constant dense<0.000000e+00> : vector<9x8xf32>
    %87 = tpu.matmul %85, %86, %cst_36 {dimension_numbers = #tpu.dot_dimension_numbers<[1], [0], [0], [1], [0, 0, 1, 1], [], []>} : vector<9x9xbf16>, vector<9x8xbf16>, vector<9x8xf32> -> vector<9x8xf32>
    %88 = tpu.concatenate %39, %55, %71, %87 in 1 : vector<9x8xf32>, vector<9x8xf32>, vector<9x8xf32>, vector<9x8xf32> -> vector<9x32xf32>
    %89 = vector.extract_strided_slice %14 {offsets = [9, 0], sizes = [9, 32], strides = [1, 1]} : vector<18x32xbf16> to vector<9x32xbf16>
    %90 = vector.extract_strided_slice %15 {offsets = [9, 0], sizes = [9, 32], strides = [1, 1]} : vector<18x32xbf16> to vector<9x32xbf16>
    %91 = vector.extract_strided_slice %16 {offsets = [9, 0], sizes = [9, 32], strides = [1, 1]} : vector<18x32xbf16> to vector<9x32xbf16>
    %92 = vector.extract_strided_slice %89 {offsets = [0, 0], sizes = [9, 8], strides = [1, 1]} : vector<9x32xbf16> to vector<9x8xbf16>
    %93 = vector.extract_strided_slice %90 {offsets = [0, 0], sizes = [9, 8], strides = [1, 1]} : vector<9x32xbf16> to vector<9x8xbf16>
    %cst_37 = arith.constant dense<0.000000e+00> : vector<9x9xf32>
    %94 = tpu.matmul %92, %93, %cst_37 {dimension_numbers = #tpu.dot_dimension_numbers<[1], [1], [0], [0], [0, 0, 1, 0], [], []>} : vector<9x8xbf16>, vector<9x8xbf16>, vector<9x9xf32> -> vector<9x9xf32>
    %cst_38 = arith.constant dense<0xFF800000> : vector<9xf32>
    %95 = vector.multi_reduction <maximumf>, %94, %cst_38 [1] : vector<9x9xf32> to vector<9xf32>
    %96 = vector.shape_cast %95 : vector<9xf32> to vector<9x1xf32>
    %97 = vector.broadcast %96 : vector<9x1xf32> to vector<9x9xf32>
    %98 = arith.subf %94, %97 : vector<9x9xf32>
    %99 = math.exp %98 : vector<9x9xf32>
    %cst_39 = arith.constant dense<0.000000e+00> : vector<9xf32>
    %100 = vector.multi_reduction <add>, %99, %cst_39 [1] : vector<9x9xf32> to vector<9xf32>
    %101 = vector.shape_cast %100 : vector<9xf32> to vector<9x1xf32>
    %102 = tpu.reciprocal %101 {approx = true} : vector<9x1xf32> -> vector<9x1xf32>
    %103 = vector.broadcast %102 : vector<9x1xf32> to vector<9x9xf32>
    %104 = arith.mulf %99, %103 : vector<9x9xf32>
    %105 = arith.truncf %104 : vector<9x9xf32> to vector<9x9xbf16>
    %106 = vector.extract_strided_slice %91 {offsets = [0, 0], sizes = [9, 8], strides = [1, 1]} : vector<9x32xbf16> to vector<9x8xbf16>
    %cst_40 = arith.constant dense<0.000000e+00> : vector<9x8xf32>
    %107 = tpu.matmul %105, %106, %cst_40 {dimension_numbers = #tpu.dot_dimension_numbers<[1], [0], [0], [1], [0, 0, 1, 1], [], []>} : vector<9x9xbf16>, vector<9x8xbf16>, vector<9x8xf32> -> vector<9x8xf32>
    %108 = vector.extract_strided_slice %89 {offsets = [0, 8], sizes = [9, 8], strides = [1, 1]} : vector<9x32xbf16> to vector<9x8xbf16>
    %109 = vector.extract_strided_slice %90 {offsets = [0, 8], sizes = [9, 8], strides = [1, 1]} : vector<9x32xbf16> to vector<9x8xbf16>
    %cst_41 = arith.constant dense<0.000000e+00> : vector<9x9xf32>
    %110 = tpu.matmul %108, %109, %cst_41 {dimension_numbers = #tpu.dot_dimension_numbers<[1], [1], [0], [0], [0, 0, 1, 0], [], []>} : vector<9x8xbf16>, vector<9x8xbf16>, vector<9x9xf32> -> vector<9x9xf32>
    %cst_42 = arith.constant dense<0xFF800000> : vector<9xf32>
    %111 = vector.multi_reduction <maximumf>, %110, %cst_42 [1] : vector<9x9xf32> to vector<9xf32>
    %112 = vector.shape_cast %111 : vector<9xf32> to vector<9x1xf32>
    %113 = vector.broadcast %112 : vector<9x1xf32> to vector<9x9xf32>
    %114 = arith.subf %110, %113 : vector<9x9xf32>
    %115 = math.exp %114 : vector<9x9xf32>
    %cst_43 = arith.constant dense<0.000000e+00> : vector<9xf32>
    %116 = vector.multi_reduction <add>, %115, %cst_43 [1] : vector<9x9xf32> to vector<9xf32>
    %117 = vector.shape_cast %116 : vector<9xf32> to vector<9x1xf32>
    %118 = tpu.reciprocal %117 {approx = true} : vector<9x1xf32> -> vector<9x1xf32>
    %119 = vector.broadcast %118 : vector<9x1xf32> to vector<9x9xf32>
    %120 = arith.mulf %115, %119 : vector<9x9xf32>
    %121 = arith.truncf %120 : vector<9x9xf32> to vector<9x9xbf16>
    %122 = vector.extract_strided_slice %91 {offsets = [0, 8], sizes = [9, 8], strides = [1, 1]} : vector<9x32xbf16> to vector<9x8xbf16>
    %cst_44 = arith.constant dense<0.000000e+00> : vector<9x8xf32>
    %123 = tpu.matmul %121, %122, %cst_44 {dimension_numbers = #tpu.dot_dimension_numbers<[1], [0], [0], [1], [0, 0, 1, 1], [], []>} : vector<9x9xbf16>, vector<9x8xbf16>, vector<9x8xf32> -> vector<9x8xf32>
    %124 = vector.extract_strided_slice %89 {offsets = [0, 16], sizes = [9, 8], strides = [1, 1]} : vector<9x32xbf16> to vector<9x8xbf16>
    %125 = vector.extract_strided_slice %90 {offsets = [0, 16], sizes = [9, 8], strides = [1, 1]} : vector<9x32xbf16> to vector<9x8xbf16>
    %cst_45 = arith.constant dense<0.000000e+00> : vector<9x9xf32>
    %126 = tpu.matmul %124, %125, %cst_45 {dimension_numbers = #tpu.dot_dimension_numbers<[1], [1], [0], [0], [0, 0, 1, 0], [], []>} : vector<9x8xbf16>, vector<9x8xbf16>, vector<9x9xf32> -> vector<9x9xf32>
    %cst_46 = arith.constant dense<0xFF800000> : vector<9xf32>
    %127 = vector.multi_reduction <maximumf>, %126, %cst_46 [1] : vector<9x9xf32> to vector<9xf32>
    %128 = vector.shape_cast %127 : vector<9xf32> to vector<9x1xf32>
    %129 = vector.broadcast %128 : vector<9x1xf32> to vector<9x9xf32>
    %130 = arith.subf %126, %129 : vector<9x9xf32>
    %131 = math.exp %130 : vector<9x9xf32>
    %cst_47 = arith.constant dense<0.000000e+00> : vector<9xf32>
    %132 = vector.multi_reduction <add>, %131, %cst_47 [1] : vector<9x9xf32> to vector<9xf32>
    %133 = vector.shape_cast %132 : vector<9xf32> to vector<9x1xf32>
    %134 = tpu.reciprocal %133 {approx = true} : vector<9x1xf32> -> vector<9x1xf32>
    %135 = vector.broadcast %134 : vector<9x1xf32> to vector<9x9xf32>
    %136 = arith.mulf %131, %135 : vector<9x9xf32>
    %137 = arith.truncf %136 : vector<9x9xf32> to vector<9x9xbf16>
    %138 = vector.extract_strided_slice %91 {offsets = [0, 16], sizes = [9, 8], strides = [1, 1]} : vector<9x32xbf16> to vector<9x8xbf16>
    %cst_48 = arith.constant dense<0.000000e+00> : vector<9x8xf32>
    %139 = tpu.matmul %137, %138, %cst_48 {dimension_numbers = #tpu.dot_dimension_numbers<[1], [0], [0], [1], [0, 0, 1, 1], [], []>} : vector<9x9xbf16>, vector<9x8xbf16>, vector<9x8xf32> -> vector<9x8xf32>
    %140 = vector.extract_strided_slice %89 {offsets = [0, 24], sizes = [9, 8], strides = [1, 1]} : vector<9x32xbf16> to vector<9x8xbf16>
    %141 = vector.extract_strided_slice %90 {offsets = [0, 24], sizes = [9, 8], strides = [1, 1]} : vector<9x32xbf16> to vector<9x8xbf16>
    %cst_49 = arith.constant dense<0.000000e+00> : vector<9x9xf32>
    %142 = tpu.matmul %140, %141, %cst_49 {dimension_numbers = #tpu.dot_dimension_numbers<[1], [1], [0], [0], [0, 0, 1, 0], [], []>} : vector<9x8xbf16>, vector<9x8xbf16>, vector<9x9xf32> -> vector<9x9xf32>
    %cst_50 = arith.constant dense<0xFF800000> : vector<9xf32>
    %143 = vector.multi_reduction <maximumf>, %142, %cst_50 [1] : vector<9x9xf32> to vector<9xf32>
    %144 = vector.shape_cast %143 : vector<9xf32> to vector<9x1xf32>
    %145 = vector.broadcast %144 : vector<9x1xf32> to vector<9x9xf32>
    %146 = arith.subf %142, %145 : vector<9x9xf32>
    %147 = math.exp %146 : vector<9x9xf32>
    %cst_51 = arith.constant dense<0.000000e+00> : vector<9xf32>
    %148 = vector.multi_reduction <add>, %147, %cst_51 [1] : vector<9x9xf32> to vector<9xf32>
    %149 = vector.shape_cast %148 : vector<9xf32> to vector<9x1xf32>
    %150 = tpu.reciprocal %149 {approx = true} : vector<9x1xf32> -> vector<9x1xf32>
    %151 = vector.broadcast %150 : vector<9x1xf32> to vector<9x9xf32>
    %152 = arith.mulf %147, %151 : vector<9x9xf32>
    %153 = arith.truncf %152 : vector<9x9xf32> to vector<9x9xbf16>
    %154 = vector.extract_strided_slice %91 {offsets = [0, 24], sizes = [9, 8], strides = [1, 1]} : vector<9x32xbf16> to vector<9x8xbf16>
    %cst_52 = arith.constant dense<0.000000e+00> : vector<9x8xf32>
    %155 = tpu.matmul %153, %154, %cst_52 {dimension_numbers = #tpu.dot_dimension_numbers<[1], [0], [0], [1], [0, 0, 1, 1], [], []>} : vector<9x9xbf16>, vector<9x8xbf16>, vector<9x8xf32> -> vector<9x8xf32>
    %156 = tpu.concatenate %107, %123, %139, %155 in 1 : vector<9x8xf32>, vector<9x8xf32>, vector<9x8xf32>, vector<9x8xf32> -> vector<9x32xf32>
    %157 = tpu.concatenate %88, %156 in 0 : vector<9x32xf32>, vector<9x32xf32> -> vector<18x32xf32>
    %158 = arith.truncf %157 : vector<18x32xf32> to vector<18x32xbf16>
    %cst_53 = arith.constant dense<0.000000e+00> : vector<18x32xf32>
    %159 = tpu.matmul %158, %18, %cst_53 {dimension_numbers = #tpu.dot_dimension_numbers<[1], [0], [0], [1], [0, 0, 1, 1], [], []>} : vector<18x32xbf16>, vector<32x32xbf16>, vector<18x32xf32> -> vector<18x32xf32>
    %160 = vector.broadcast %20 : vector<1x32xf32> to vector<18x32xf32>
    %161 = arith.addf %159, %160 : vector<18x32xf32>
    %162 = arith.addf %0, %161 : vector<18x32xf32>
    %163 = vector.extract_strided_slice %2 {offsets = [0, 0, 0], sizes = [1, 1, 32], strides = [1, 1, 1]} : vector<2x1x32xf32> to vector<1x1x32xf32>
    %164 = vector.shape_cast %163 : vector<1x1x32xf32> to vector<1x32xf32>
    %165 = vector.extract_strided_slice %4 {offsets = [0, 0, 0], sizes = [1, 1, 32], strides = [1, 1, 1]} : vector<2x1x32xf32> to vector<1x1x32xf32>
    %166 = vector.shape_cast %165 : vector<1x1x32xf32> to vector<1x32xf32>
    %cst_54 = arith.constant dense<0.000000e+00> : vector<18xf32>
    %167 = vector.multi_reduction <add>, %162, %cst_54 [1] : vector<18x32xf32> to vector<18xf32>
    %168 = vector.shape_cast %167 : vector<18xf32> to vector<18x1xf32>
    %cst_55 = arith.constant 3.200000e+01 : f32
    %169 = vector.broadcast %cst_55 : f32 to vector<18x1xf32>
    %170 = arith.divf %168, %169 : vector<18x1xf32>
    %171 = arith.mulf %162, %162 : vector<18x32xf32>
    %cst_56 = arith.constant dense<0.000000e+00> : vector<18xf32>
    %172 = vector.multi_reduction <add>, %171, %cst_56 [1] : vector<18x32xf32> to vector<18xf32>
    %173 = vector.shape_cast %172 : vector<18xf32> to vector<18x1xf32>
    %cst_57 = arith.constant 3.200000e+01 : f32
    %174 = vector.broadcast %cst_57 : f32 to vector<18x1xf32>
    %175 = arith.divf %173, %174 : vector<18x1xf32>
    %176 = arith.mulf %170, %170 : vector<18x1xf32>
    %177 = arith.subf %175, %176 : vector<18x1xf32>
    %cst_58 = arith.constant 9.99999974E-6 : f32
    %178 = vector.broadcast %cst_58 : f32 to vector<18x1xf32>
    %179 = arith.addf %177, %178 : vector<18x1xf32>
    %180 = math.rsqrt %179 : vector<18x1xf32>
    %181 = vector.broadcast %170 : vector<18x1xf32> to vector<18x32xf32>
    %182 = arith.subf %162, %181 : vector<18x32xf32>
    %183 = vector.broadcast %180 : vector<18x1xf32> to vector<18x32xf32>
    %184 = vector.broadcast %164 : vector<1x32xf32> to vector<18x32xf32>
    %185 = arith.mulf %183, %184 : vector<18x32xf32>
    %186 = arith.mulf %182, %185 : vector<18x32xf32>
    %187 = vector.broadcast %166 : vector<1x32xf32> to vector<18x32xf32>
    %188 = arith.addf %186, %187 : vector<18x32xf32>
    %189 = arith.truncf %188 : vector<18x32xf32> to vector<18x32xbf16>
    %c0_59 = arith.constant 0 : index
    %c0_60 = arith.constant 0 : index
    %c0_61 = arith.constant 0 : index
    %190 = vector.load %arg10[%c0_59, %c0_60, %c0_61] : memref<2x32x64xbf16, #tpu.memory_space<vmem>>, vector<1x32x64xbf16>
    %191 = vector.shape_cast %190 : vector<1x32x64xbf16> to vector<32x64xbf16>
    %cst_62 = arith.constant dense<0.000000e+00> : vector<18x64xf32>
    %192 = tpu.matmul %189, %191, %cst_62 {dimension_numbers = #tpu.dot_dimension_numbers<[1], [0], [0], [1], [0, 0, 1, 1], [], []>} : vector<18x32xbf16>, vector<32x64xbf16>, vector<18x64xf32> -> vector<18x64xf32>
    %c0_63 = arith.constant 0 : index
    %c0_64 = arith.constant 0 : index
    %c0_65 = arith.constant 0 : index
    %193 = vector.load %arg11[%c0_63, %c0_64, %c0_65] : memref<2x1x64xf32, #tpu.memory_space<vmem>>, vector<1x1x64xf32>
    %194 = vector.shape_cast %193 : vector<1x1x64xf32> to vector<1x64xf32>
    %195 = vector.broadcast %194 : vector<1x64xf32> to vector<18x64xf32>
    %196 = arith.addf %192, %195 : vector<18x64xf32>
    %cst_66 = arith.constant 0.000000e+00 : f32
    %197 = vector.broadcast %cst_66 : f32 to vector<18x64xf32>
    %198 = arith.maximumf %196, %197 : vector<18x64xf32>
    %199 = arith.truncf %198 : vector<18x64xf32> to vector<18x64xbf16>
    %c0_67 = arith.constant 0 : index
    %c0_68 = arith.constant 0 : index
    %c0_69 = arith.constant 0 : index
    %200 = vector.load %arg12[%c0_67, %c0_68, %c0_69] : memref<2x64x32xbf16, #tpu.memory_space<vmem>>, vector<1x64x32xbf16>
    %201 = vector.shape_cast %200 : vector<1x64x32xbf16> to vector<64x32xbf16>
    %cst_70 = arith.constant dense<0.000000e+00> : vector<18x32xf32>
    %202 = tpu.matmul %199, %201, %cst_70 {dimension_numbers = #tpu.dot_dimension_numbers<[1], [0], [0], [1], [0, 0, 1, 1], [], []>} : vector<18x64xbf16>, vector<64x32xbf16>, vector<18x32xf32> -> vector<18x32xf32>
    %c0_71 = arith.constant 0 : index
    %c0_72 = arith.constant 0 : index
    %c0_73 = arith.constant 0 : index
    %203 = vector.load %arg13[%c0_71, %c0_72, %c0_73] : memref<2x1x32xf32, #tpu.memory_space<vmem>>, vector<1x1x32xf32>
    %204 = vector.shape_cast %203 : vector<1x1x32xf32> to vector<1x32xf32>
    %205 = vector.broadcast %204 : vector<1x32xf32> to vector<18x32xf32>
    %206 = arith.addf %202, %205 : vector<18x32xf32>
    %207 = arith.addf %188, %206 : vector<18x32xf32>
    %208 = vector.extract_strided_slice %2 {offsets = [1, 0, 0], sizes = [1, 1, 32], strides = [1, 1, 1]} : vector<2x1x32xf32> to vector<1x1x32xf32>
    %209 = vector.shape_cast %208 : vector<1x1x32xf32> to vector<1x32xf32>
    %210 = vector.extract_strided_slice %4 {offsets = [1, 0, 0], sizes = [1, 1, 32], strides = [1, 1, 1]} : vector<2x1x32xf32> to vector<1x1x32xf32>
    %211 = vector.shape_cast %210 : vector<1x1x32xf32> to vector<1x32xf32>
    %cst_74 = arith.constant dense<0.000000e+00> : vector<18xf32>
    %212 = vector.multi_reduction <add>, %207, %cst_74 [1] : vector<18x32xf32> to vector<18xf32>
    %213 = vector.shape_cast %212 : vector<18xf32> to vector<18x1xf32>
    %cst_75 = arith.constant 3.200000e+01 : f32
    %214 = vector.broadcast %cst_75 : f32 to vector<18x1xf32>
    %215 = arith.divf %213, %214 : vector<18x1xf32>
    %216 = arith.mulf %207, %207 : vector<18x32xf32>
    %cst_76 = arith.constant dense<0.000000e+00> : vector<18xf32>
    %217 = vector.multi_reduction <add>, %216, %cst_76 [1] : vector<18x32xf32> to vector<18xf32>
    %218 = vector.shape_cast %217 : vector<18xf32> to vector<18x1xf32>
    %cst_77 = arith.constant 3.200000e+01 : f32
    %219 = vector.broadcast %cst_77 : f32 to vector<18x1xf32>
    %220 = arith.divf %218, %219 : vector<18x1xf32>
    %221 = arith.mulf %215, %215 : vector<18x1xf32>
    %222 = arith.subf %220, %221 : vector<18x1xf32>
    %cst_78 = arith.constant 9.99999974E-6 : f32
    %223 = vector.broadcast %cst_78 : f32 to vector<18x1xf32>
    %224 = arith.addf %222, %223 : vector<18x1xf32>
    %225 = math.rsqrt %224 : vector<18x1xf32>
    %226 = vector.broadcast %215 : vector<18x1xf32> to vector<18x32xf32>
    %227 = arith.subf %207, %226 : vector<18x32xf32>
    %228 = vector.broadcast %225 : vector<18x1xf32> to vector<18x32xf32>
    %229 = vector.broadcast %209 : vector<1x32xf32> to vector<18x32xf32>
    %230 = arith.mulf %228, %229 : vector<18x32xf32>
    %231 = arith.mulf %227, %230 : vector<18x32xf32>
    %232 = vector.broadcast %211 : vector<1x32xf32> to vector<18x32xf32>
    %233 = arith.addf %231, %232 : vector<18x32xf32>
    %c1 = arith.constant 1 : index
    %c0_79 = arith.constant 0 : index
    %c0_80 = arith.constant 0 : index
    %c0_81 = arith.constant 0 : index
    %234 = vector.load %arg8[%c1, %c0_79, %c0_80, %c0_81] : memref<2x2x1x32xf32, #tpu.memory_space<vmem>>, vector<1x2x1x32xf32>
    %235 = vector.shape_cast %234 : vector<1x2x1x32xf32> to vector<2x1x32xf32>
    %c1_82 = arith.constant 1 : index
    %c0_83 = arith.constant 0 : index
    %c0_84 = arith.constant 0 : index
    %c0_85 = arith.constant 0 : index
    %236 = vector.load %arg9[%c1_82, %c0_83, %c0_84, %c0_85] : memref<2x2x1x32xf32, #tpu.memory_space<vmem>>, vector<1x2x1x32xf32>
    %237 = vector.shape_cast %236 : vector<1x2x1x32xf32> to vector<2x1x32xf32>
    %238 = arith.truncf %233 : vector<18x32xf32> to vector<18x32xbf16>
    %c1_86 = arith.constant 1 : index
    %c0_87 = arith.constant 0 : index
    %c0_88 = arith.constant 0 : index
    %239 = vector.load %arg4[%c1_86, %c0_87, %c0_88] : memref<2x32x96xbf16, #tpu.memory_space<vmem>>, vector<1x32x96xbf16>
    %240 = vector.shape_cast %239 : vector<1x32x96xbf16> to vector<32x96xbf16>
    %cst_89 = arith.constant dense<0.000000e+00> : vector<18x96xf32>
    %241 = tpu.matmul %238, %240, %cst_89 {dimension_numbers = #tpu.dot_dimension_numbers<[1], [0], [0], [1], [0, 0, 1, 1], [], []>} : vector<18x32xbf16>, vector<32x96xbf16>, vector<18x96xf32> -> vector<18x96xf32>
    %c1_90 = arith.constant 1 : index
    %c0_91 = arith.constant 0 : index
    %c0_92 = arith.constant 0 : index
    %242 = vector.load %arg5[%c1_90, %c0_91, %c0_92] : memref<2x1x96xf32, #tpu.memory_space<vmem>>, vector<1x1x96xf32>
    %243 = vector.shape_cast %242 : vector<1x1x96xf32> to vector<1x96xf32>
    %244 = vector.broadcast %243 : vector<1x96xf32> to vector<18x96xf32>
    %245 = arith.addf %241, %244 : vector<18x96xf32>
    %246 = arith.truncf %245 : vector<18x96xf32> to vector<18x96xbf16>
    %247 = vector.extract_strided_slice %246 {offsets = [0, 0], sizes = [18, 32], strides = [1, 1]} : vector<18x96xbf16> to vector<18x32xbf16>
    %248 = vector.extract_strided_slice %246 {offsets = [0, 32], sizes = [18, 32], strides = [1, 1]} : vector<18x96xbf16> to vector<18x32xbf16>
    %249 = vector.extract_strided_slice %246 {offsets = [0, 64], sizes = [18, 32], strides = [1, 1]} : vector<18x96xbf16> to vector<18x32xbf16>
    %c1_93 = arith.constant 1 : index
    %c0_94 = arith.constant 0 : index
    %c0_95 = arith.constant 0 : index
    %250 = vector.load %arg6[%c1_93, %c0_94, %c0_95] : memref<2x32x32xbf16, #tpu.memory_space<vmem>>, vector<1x32x32xbf16>
    %251 = vector.shape_cast %250 : vector<1x32x32xbf16> to vector<32x32xbf16>
    %c1_96 = arith.constant 1 : index
    %c0_97 = arith.constant 0 : index
    %c0_98 = arith.constant 0 : index
    %252 = vector.load %arg7[%c1_96, %c0_97, %c0_98] : memref<2x1x32xf32, #tpu.memory_space<vmem>>, vector<1x1x32xf32>
    %253 = vector.shape_cast %252 : vector<1x1x32xf32> to vector<1x32xf32>
    %254 = vector.extract_strided_slice %247 {offsets = [0, 0], sizes = [9, 32], strides = [1, 1]} : vector<18x32xbf16> to vector<9x32xbf16>
    %255 = vector.extract_strided_slice %248 {offsets = [0, 0], sizes = [9, 32], strides = [1, 1]} : vector<18x32xbf16> to vector<9x32xbf16>
    %256 = vector.extract_strided_slice %249 {offsets = [0, 0], sizes = [9, 32], strides = [1, 1]} : vector<18x32xbf16> to vector<9x32xbf16>
    %257 = vector.extract_strided_slice %254 {offsets = [0, 0], sizes = [9, 8], strides = [1, 1]} : vector<9x32xbf16> to vector<9x8xbf16>
    %258 = vector.extract_strided_slice %255 {offsets = [0, 0], sizes = [9, 8], strides = [1, 1]} : vector<9x32xbf16> to vector<9x8xbf16>
    %cst_99 = arith.constant dense<0.000000e+00> : vector<9x9xf32>
    %259 = tpu.matmul %257, %258, %cst_99 {dimension_numbers = #tpu.dot_dimension_numbers<[1], [1], [0], [0], [0, 0, 1, 0], [], []>} : vector<9x8xbf16>, vector<9x8xbf16>, vector<9x9xf32> -> vector<9x9xf32>
    %cst_100 = arith.constant dense<0xFF800000> : vector<9xf32>
    %260 = vector.multi_reduction <maximumf>, %259, %cst_100 [1] : vector<9x9xf32> to vector<9xf32>
    %261 = vector.shape_cast %260 : vector<9xf32> to vector<9x1xf32>
    %262 = vector.broadcast %261 : vector<9x1xf32> to vector<9x9xf32>
    %263 = arith.subf %259, %262 : vector<9x9xf32>
    %264 = math.exp %263 : vector<9x9xf32>
    %cst_101 = arith.constant dense<0.000000e+00> : vector<9xf32>
    %265 = vector.multi_reduction <add>, %264, %cst_101 [1] : vector<9x9xf32> to vector<9xf32>
    %266 = vector.shape_cast %265 : vector<9xf32> to vector<9x1xf32>
    %267 = tpu.reciprocal %266 {approx = true} : vector<9x1xf32> -> vector<9x1xf32>
    %268 = vector.broadcast %267 : vector<9x1xf32> to vector<9x9xf32>
    %269 = arith.mulf %264, %268 : vector<9x9xf32>
    %270 = arith.truncf %269 : vector<9x9xf32> to vector<9x9xbf16>
    %271 = vector.extract_strided_slice %256 {offsets = [0, 0], sizes = [9, 8], strides = [1, 1]} : vector<9x32xbf16> to vector<9x8xbf16>
    %cst_102 = arith.constant dense<0.000000e+00> : vector<9x8xf32>
    %272 = tpu.matmul %270, %271, %cst_102 {dimension_numbers = #tpu.dot_dimension_numbers<[1], [0], [0], [1], [0, 0, 1, 1], [], []>} : vector<9x9xbf16>, vector<9x8xbf16>, vector<9x8xf32> -> vector<9x8xf32>
    %273 = vector.extract_strided_slice %254 {offsets = [0, 8], sizes = [9, 8], strides = [1, 1]} : vector<9x32xbf16> to vector<9x8xbf16>
    %274 = vector.extract_strided_slice %255 {offsets = [0, 8], sizes = [9, 8], strides = [1, 1]} : vector<9x32xbf16> to vector<9x8xbf16>
    %cst_103 = arith.constant dense<0.000000e+00> : vector<9x9xf32>
    %275 = tpu.matmul %273, %274, %cst_103 {dimension_numbers = #tpu.dot_dimension_numbers<[1], [1], [0], [0], [0, 0, 1, 0], [], []>} : vector<9x8xbf16>, vector<9x8xbf16>, vector<9x9xf32> -> vector<9x9xf32>
    %cst_104 = arith.constant dense<0xFF800000> : vector<9xf32>
    %276 = vector.multi_reduction <maximumf>, %275, %cst_104 [1] : vector<9x9xf32> to vector<9xf32>
    %277 = vector.shape_cast %276 : vector<9xf32> to vector<9x1xf32>
    %278 = vector.broadcast %277 : vector<9x1xf32> to vector<9x9xf32>
    %279 = arith.subf %275, %278 : vector<9x9xf32>
    %280 = math.exp %279 : vector<9x9xf32>
    %cst_105 = arith.constant dense<0.000000e+00> : vector<9xf32>
    %281 = vector.multi_reduction <add>, %280, %cst_105 [1] : vector<9x9xf32> to vector<9xf32>
    %282 = vector.shape_cast %281 : vector<9xf32> to vector<9x1xf32>
    %283 = tpu.reciprocal %282 {approx = true} : vector<9x1xf32> -> vector<9x1xf32>
    %284 = vector.broadcast %283 : vector<9x1xf32> to vector<9x9xf32>
    %285 = arith.mulf %280, %284 : vector<9x9xf32>
    %286 = arith.truncf %285 : vector<9x9xf32> to vector<9x9xbf16>
    %287 = vector.extract_strided_slice %256 {offsets = [0, 8], sizes = [9, 8], strides = [1, 1]} : vector<9x32xbf16> to vector<9x8xbf16>
    %cst_106 = arith.constant dense<0.000000e+00> : vector<9x8xf32>
    %288 = tpu.matmul %286, %287, %cst_106 {dimension_numbers = #tpu.dot_dimension_numbers<[1], [0], [0], [1], [0, 0, 1, 1], [], []>} : vector<9x9xbf16>, vector<9x8xbf16>, vector<9x8xf32> -> vector<9x8xf32>
    %289 = vector.extract_strided_slice %254 {offsets = [0, 16], sizes = [9, 8], strides = [1, 1]} : vector<9x32xbf16> to vector<9x8xbf16>
    %290 = vector.extract_strided_slice %255 {offsets = [0, 16], sizes = [9, 8], strides = [1, 1]} : vector<9x32xbf16> to vector<9x8xbf16>
    %cst_107 = arith.constant dense<0.000000e+00> : vector<9x9xf32>
    %291 = tpu.matmul %289, %290, %cst_107 {dimension_numbers = #tpu.dot_dimension_numbers<[1], [1], [0], [0], [0, 0, 1, 0], [], []>} : vector<9x8xbf16>, vector<9x8xbf16>, vector<9x9xf32> -> vector<9x9xf32>
    %cst_108 = arith.constant dense<0xFF800000> : vector<9xf32>
    %292 = vector.multi_reduction <maximumf>, %291, %cst_108 [1] : vector<9x9xf32> to vector<9xf32>
    %293 = vector.shape_cast %292 : vector<9xf32> to vector<9x1xf32>
    %294 = vector.broadcast %293 : vector<9x1xf32> to vector<9x9xf32>
    %295 = arith.subf %291, %294 : vector<9x9xf32>
    %296 = math.exp %295 : vector<9x9xf32>
    %cst_109 = arith.constant dense<0.000000e+00> : vector<9xf32>
    %297 = vector.multi_reduction <add>, %296, %cst_109 [1] : vector<9x9xf32> to vector<9xf32>
    %298 = vector.shape_cast %297 : vector<9xf32> to vector<9x1xf32>
    %299 = tpu.reciprocal %298 {approx = true} : vector<9x1xf32> -> vector<9x1xf32>
    %300 = vector.broadcast %299 : vector<9x1xf32> to vector<9x9xf32>
    %301 = arith.mulf %296, %300 : vector<9x9xf32>
    %302 = arith.truncf %301 : vector<9x9xf32> to vector<9x9xbf16>
    %303 = vector.extract_strided_slice %256 {offsets = [0, 16], sizes = [9, 8], strides = [1, 1]} : vector<9x32xbf16> to vector<9x8xbf16>
    %cst_110 = arith.constant dense<0.000000e+00> : vector<9x8xf32>
    %304 = tpu.matmul %302, %303, %cst_110 {dimension_numbers = #tpu.dot_dimension_numbers<[1], [0], [0], [1], [0, 0, 1, 1], [], []>} : vector<9x9xbf16>, vector<9x8xbf16>, vector<9x8xf32> -> vector<9x8xf32>
    %305 = vector.extract_strided_slice %254 {offsets = [0, 24], sizes = [9, 8], strides = [1, 1]} : vector<9x32xbf16> to vector<9x8xbf16>
    %306 = vector.extract_strided_slice %255 {offsets = [0, 24], sizes = [9, 8], strides = [1, 1]} : vector<9x32xbf16> to vector<9x8xbf16>
    %cst_111 = arith.constant dense<0.000000e+00> : vector<9x9xf32>
    %307 = tpu.matmul %305, %306, %cst_111 {dimension_numbers = #tpu.dot_dimension_numbers<[1], [1], [0], [0], [0, 0, 1, 0], [], []>} : vector<9x8xbf16>, vector<9x8xbf16>, vector<9x9xf32> -> vector<9x9xf32>
    %cst_112 = arith.constant dense<0xFF800000> : vector<9xf32>
    %308 = vector.multi_reduction <maximumf>, %307, %cst_112 [1] : vector<9x9xf32> to vector<9xf32>
    %309 = vector.shape_cast %308 : vector<9xf32> to vector<9x1xf32>
    %310 = vector.broadcast %309 : vector<9x1xf32> to vector<9x9xf32>
    %311 = arith.subf %307, %310 : vector<9x9xf32>
    %312 = math.exp %311 : vector<9x9xf32>
    %cst_113 = arith.constant dense<0.000000e+00> : vector<9xf32>
    %313 = vector.multi_reduction <add>, %312, %cst_113 [1] : vector<9x9xf32> to vector<9xf32>
    %314 = vector.shape_cast %313 : vector<9xf32> to vector<9x1xf32>
    %315 = tpu.reciprocal %314 {approx = true} : vector<9x1xf32> -> vector<9x1xf32>
    %316 = vector.broadcast %315 : vector<9x1xf32> to vector<9x9xf32>
    %317 = arith.mulf %312, %316 : vector<9x9xf32>
    %318 = arith.truncf %317 : vector<9x9xf32> to vector<9x9xbf16>
    %319 = vector.extract_strided_slice %256 {offsets = [0, 24], sizes = [9, 8], strides = [1, 1]} : vector<9x32xbf16> to vector<9x8xbf16>
    %cst_114 = arith.constant dense<0.000000e+00> : vector<9x8xf32>
    %320 = tpu.matmul %318, %319, %cst_114 {dimension_numbers = #tpu.dot_dimension_numbers<[1], [0], [0], [1], [0, 0, 1, 1], [], []>} : vector<9x9xbf16>, vector<9x8xbf16>, vector<9x8xf32> -> vector<9x8xf32>
    %321 = tpu.concatenate %272, %288, %304, %320 in 1 : vector<9x8xf32>, vector<9x8xf32>, vector<9x8xf32>, vector<9x8xf32> -> vector<9x32xf32>
    %322 = vector.extract_strided_slice %247 {offsets = [9, 0], sizes = [9, 32], strides = [1, 1]} : vector<18x32xbf16> to vector<9x32xbf16>
    %323 = vector.extract_strided_slice %248 {offsets = [9, 0], sizes = [9, 32], strides = [1, 1]} : vector<18x32xbf16> to vector<9x32xbf16>
    %324 = vector.extract_strided_slice %249 {offsets = [9, 0], sizes = [9, 32], strides = [1, 1]} : vector<18x32xbf16> to vector<9x32xbf16>
    %325 = vector.extract_strided_slice %322 {offsets = [0, 0], sizes = [9, 8], strides = [1, 1]} : vector<9x32xbf16> to vector<9x8xbf16>
    %326 = vector.extract_strided_slice %323 {offsets = [0, 0], sizes = [9, 8], strides = [1, 1]} : vector<9x32xbf16> to vector<9x8xbf16>
    %cst_115 = arith.constant dense<0.000000e+00> : vector<9x9xf32>
    %327 = tpu.matmul %325, %326, %cst_115 {dimension_numbers = #tpu.dot_dimension_numbers<[1], [1], [0], [0], [0, 0, 1, 0], [], []>} : vector<9x8xbf16>, vector<9x8xbf16>, vector<9x9xf32> -> vector<9x9xf32>
    %cst_116 = arith.constant dense<0xFF800000> : vector<9xf32>
    %328 = vector.multi_reduction <maximumf>, %327, %cst_116 [1] : vector<9x9xf32> to vector<9xf32>
    %329 = vector.shape_cast %328 : vector<9xf32> to vector<9x1xf32>
    %330 = vector.broadcast %329 : vector<9x1xf32> to vector<9x9xf32>
    %331 = arith.subf %327, %330 : vector<9x9xf32>
    %332 = math.exp %331 : vector<9x9xf32>
    %cst_117 = arith.constant dense<0.000000e+00> : vector<9xf32>
    %333 = vector.multi_reduction <add>, %332, %cst_117 [1] : vector<9x9xf32> to vector<9xf32>
    %334 = vector.shape_cast %333 : vector<9xf32> to vector<9x1xf32>
    %335 = tpu.reciprocal %334 {approx = true} : vector<9x1xf32> -> vector<9x1xf32>
    %336 = vector.broadcast %335 : vector<9x1xf32> to vector<9x9xf32>
    %337 = arith.mulf %332, %336 : vector<9x9xf32>
    %338 = arith.truncf %337 : vector<9x9xf32> to vector<9x9xbf16>
    %339 = vector.extract_strided_slice %324 {offsets = [0, 0], sizes = [9, 8], strides = [1, 1]} : vector<9x32xbf16> to vector<9x8xbf16>
    %cst_118 = arith.constant dense<0.000000e+00> : vector<9x8xf32>
    %340 = tpu.matmul %338, %339, %cst_118 {dimension_numbers = #tpu.dot_dimension_numbers<[1], [0], [0], [1], [0, 0, 1, 1], [], []>} : vector<9x9xbf16>, vector<9x8xbf16>, vector<9x8xf32> -> vector<9x8xf32>
    %341 = vector.extract_strided_slice %322 {offsets = [0, 8], sizes = [9, 8], strides = [1, 1]} : vector<9x32xbf16> to vector<9x8xbf16>
    %342 = vector.extract_strided_slice %323 {offsets = [0, 8], sizes = [9, 8], strides = [1, 1]} : vector<9x32xbf16> to vector<9x8xbf16>
    %cst_119 = arith.constant dense<0.000000e+00> : vector<9x9xf32>
    %343 = tpu.matmul %341, %342, %cst_119 {dimension_numbers = #tpu.dot_dimension_numbers<[1], [1], [0], [0], [0, 0, 1, 0], [], []>} : vector<9x8xbf16>, vector<9x8xbf16>, vector<9x9xf32> -> vector<9x9xf32>
    %cst_120 = arith.constant dense<0xFF800000> : vector<9xf32>
    %344 = vector.multi_reduction <maximumf>, %343, %cst_120 [1] : vector<9x9xf32> to vector<9xf32>
    %345 = vector.shape_cast %344 : vector<9xf32> to vector<9x1xf32>
    %346 = vector.broadcast %345 : vector<9x1xf32> to vector<9x9xf32>
    %347 = arith.subf %343, %346 : vector<9x9xf32>
    %348 = math.exp %347 : vector<9x9xf32>
    %cst_121 = arith.constant dense<0.000000e+00> : vector<9xf32>
    %349 = vector.multi_reduction <add>, %348, %cst_121 [1] : vector<9x9xf32> to vector<9xf32>
    %350 = vector.shape_cast %349 : vector<9xf32> to vector<9x1xf32>
    %351 = tpu.reciprocal %350 {approx = true} : vector<9x1xf32> -> vector<9x1xf32>
    %352 = vector.broadcast %351 : vector<9x1xf32> to vector<9x9xf32>
    %353 = arith.mulf %348, %352 : vector<9x9xf32>
    %354 = arith.truncf %353 : vector<9x9xf32> to vector<9x9xbf16>
    %355 = vector.extract_strided_slice %324 {offsets = [0, 8], sizes = [9, 8], strides = [1, 1]} : vector<9x32xbf16> to vector<9x8xbf16>
    %cst_122 = arith.constant dense<0.000000e+00> : vector<9x8xf32>
    %356 = tpu.matmul %354, %355, %cst_122 {dimension_numbers = #tpu.dot_dimension_numbers<[1], [0], [0], [1], [0, 0, 1, 1], [], []>} : vector<9x9xbf16>, vector<9x8xbf16>, vector<9x8xf32> -> vector<9x8xf32>
    %357 = vector.extract_strided_slice %322 {offsets = [0, 16], sizes = [9, 8], strides = [1, 1]} : vector<9x32xbf16> to vector<9x8xbf16>
    %358 = vector.extract_strided_slice %323 {offsets = [0, 16], sizes = [9, 8], strides = [1, 1]} : vector<9x32xbf16> to vector<9x8xbf16>
    %cst_123 = arith.constant dense<0.000000e+00> : vector<9x9xf32>
    %359 = tpu.matmul %357, %358, %cst_123 {dimension_numbers = #tpu.dot_dimension_numbers<[1], [1], [0], [0], [0, 0, 1, 0], [], []>} : vector<9x8xbf16>, vector<9x8xbf16>, vector<9x9xf32> -> vector<9x9xf32>
    %cst_124 = arith.constant dense<0xFF800000> : vector<9xf32>
    %360 = vector.multi_reduction <maximumf>, %359, %cst_124 [1] : vector<9x9xf32> to vector<9xf32>
    %361 = vector.shape_cast %360 : vector<9xf32> to vector<9x1xf32>
    %362 = vector.broadcast %361 : vector<9x1xf32> to vector<9x9xf32>
    %363 = arith.subf %359, %362 : vector<9x9xf32>
    %364 = math.exp %363 : vector<9x9xf32>
    %cst_125 = arith.constant dense<0.000000e+00> : vector<9xf32>
    %365 = vector.multi_reduction <add>, %364, %cst_125 [1] : vector<9x9xf32> to vector<9xf32>
    %366 = vector.shape_cast %365 : vector<9xf32> to vector<9x1xf32>
    %367 = tpu.reciprocal %366 {approx = true} : vector<9x1xf32> -> vector<9x1xf32>
    %368 = vector.broadcast %367 : vector<9x1xf32> to vector<9x9xf32>
    %369 = arith.mulf %364, %368 : vector<9x9xf32>
    %370 = arith.truncf %369 : vector<9x9xf32> to vector<9x9xbf16>
    %371 = vector.extract_strided_slice %324 {offsets = [0, 16], sizes = [9, 8], strides = [1, 1]} : vector<9x32xbf16> to vector<9x8xbf16>
    %cst_126 = arith.constant dense<0.000000e+00> : vector<9x8xf32>
    %372 = tpu.matmul %370, %371, %cst_126 {dimension_numbers = #tpu.dot_dimension_numbers<[1], [0], [0], [1], [0, 0, 1, 1], [], []>} : vector<9x9xbf16>, vector<9x8xbf16>, vector<9x8xf32> -> vector<9x8xf32>
    %373 = vector.extract_strided_slice %322 {offsets = [0, 24], sizes = [9, 8], strides = [1, 1]} : vector<9x32xbf16> to vector<9x8xbf16>
    %374 = vector.extract_strided_slice %323 {offsets = [0, 24], sizes = [9, 8], strides = [1, 1]} : vector<9x32xbf16> to vector<9x8xbf16>
    %cst_127 = arith.constant dense<0.000000e+00> : vector<9x9xf32>
    %375 = tpu.matmul %373, %374, %cst_127 {dimension_numbers = #tpu.dot_dimension_numbers<[1], [1], [0], [0], [0, 0, 1, 0], [], []>} : vector<9x8xbf16>, vector<9x8xbf16>, vector<9x9xf32> -> vector<9x9xf32>
    %cst_128 = arith.constant dense<0xFF800000> : vector<9xf32>
    %376 = vector.multi_reduction <maximumf>, %375, %cst_128 [1] : vector<9x9xf32> to vector<9xf32>
    %377 = vector.shape_cast %376 : vector<9xf32> to vector<9x1xf32>
    %378 = vector.broadcast %377 : vector<9x1xf32> to vector<9x9xf32>
    %379 = arith.subf %375, %378 : vector<9x9xf32>
    %380 = math.exp %379 : vector<9x9xf32>
    %cst_129 = arith.constant dense<0.000000e+00> : vector<9xf32>
    %381 = vector.multi_reduction <add>, %380, %cst_129 [1] : vector<9x9xf32> to vector<9xf32>
    %382 = vector.shape_cast %381 : vector<9xf32> to vector<9x1xf32>
    %383 = tpu.reciprocal %382 {approx = true} : vector<9x1xf32> -> vector<9x1xf32>
    %384 = vector.broadcast %383 : vector<9x1xf32> to vector<9x9xf32>
    %385 = arith.mulf %380, %384 : vector<9x9xf32>
    %386 = arith.truncf %385 : vector<9x9xf32> to vector<9x9xbf16>
    %387 = vector.extract_strided_slice %324 {offsets = [0, 24], sizes = [9, 8], strides = [1, 1]} : vector<9x32xbf16> to vector<9x8xbf16>
    %cst_130 = arith.constant dense<0.000000e+00> : vector<9x8xf32>
    %388 = tpu.matmul %386, %387, %cst_130 {dimension_numbers = #tpu.dot_dimension_numbers<[1], [0], [0], [1], [0, 0, 1, 1], [], []>} : vector<9x9xbf16>, vector<9x8xbf16>, vector<9x8xf32> -> vector<9x8xf32>
    %389 = tpu.concatenate %340, %356, %372, %388 in 1 : vector<9x8xf32>, vector<9x8xf32>, vector<9x8xf32>, vector<9x8xf32> -> vector<9x32xf32>
    %390 = tpu.concatenate %321, %389 in 0 : vector<9x32xf32>, vector<9x32xf32> -> vector<18x32xf32>
    %391 = arith.truncf %390 : vector<18x32xf32> to vector<18x32xbf16>
    %cst_131 = arith.constant dense<0.000000e+00> : vector<18x32xf32>
    %392 = tpu.matmul %391, %251, %cst_131 {dimension_numbers = #tpu.dot_dimension_numbers<[1], [0], [0], [1], [0, 0, 1, 1], [], []>} : vector<18x32xbf16>, vector<32x32xbf16>, vector<18x32xf32> -> vector<18x32xf32>
    %393 = vector.broadcast %253 : vector<1x32xf32> to vector<18x32xf32>
    %394 = arith.addf %392, %393 : vector<18x32xf32>
    %395 = arith.addf %233, %394 : vector<18x32xf32>
    %396 = vector.extract_strided_slice %235 {offsets = [0, 0, 0], sizes = [1, 1, 32], strides = [1, 1, 1]} : vector<2x1x32xf32> to vector<1x1x32xf32>
    %397 = vector.shape_cast %396 : vector<1x1x32xf32> to vector<1x32xf32>
    %398 = vector.extract_strided_slice %237 {offsets = [0, 0, 0], sizes = [1, 1, 32], strides = [1, 1, 1]} : vector<2x1x32xf32> to vector<1x1x32xf32>
    %399 = vector.shape_cast %398 : vector<1x1x32xf32> to vector<1x32xf32>
    %cst_132 = arith.constant dense<0.000000e+00> : vector<18xf32>
    %400 = vector.multi_reduction <add>, %395, %cst_132 [1] : vector<18x32xf32> to vector<18xf32>
    %401 = vector.shape_cast %400 : vector<18xf32> to vector<18x1xf32>
    %cst_133 = arith.constant 3.200000e+01 : f32
    %402 = vector.broadcast %cst_133 : f32 to vector<18x1xf32>
    %403 = arith.divf %401, %402 : vector<18x1xf32>
    %404 = arith.mulf %395, %395 : vector<18x32xf32>
    %cst_134 = arith.constant dense<0.000000e+00> : vector<18xf32>
    %405 = vector.multi_reduction <add>, %404, %cst_134 [1] : vector<18x32xf32> to vector<18xf32>
    %406 = vector.shape_cast %405 : vector<18xf32> to vector<18x1xf32>
    %cst_135 = arith.constant 3.200000e+01 : f32
    %407 = vector.broadcast %cst_135 : f32 to vector<18x1xf32>
    %408 = arith.divf %406, %407 : vector<18x1xf32>
    %409 = arith.mulf %403, %403 : vector<18x1xf32>
    %410 = arith.subf %408, %409 : vector<18x1xf32>
    %cst_136 = arith.constant 9.99999974E-6 : f32
    %411 = vector.broadcast %cst_136 : f32 to vector<18x1xf32>
    %412 = arith.addf %410, %411 : vector<18x1xf32>
    %413 = math.rsqrt %412 : vector<18x1xf32>
    %414 = vector.broadcast %403 : vector<18x1xf32> to vector<18x32xf32>
    %415 = arith.subf %395, %414 : vector<18x32xf32>
    %416 = vector.broadcast %413 : vector<18x1xf32> to vector<18x32xf32>
    %417 = vector.broadcast %397 : vector<1x32xf32> to vector<18x32xf32>
    %418 = arith.mulf %416, %417 : vector<18x32xf32>
    %419 = arith.mulf %415, %418 : vector<18x32xf32>
    %420 = vector.broadcast %399 : vector<1x32xf32> to vector<18x32xf32>
    %421 = arith.addf %419, %420 : vector<18x32xf32>
    %422 = arith.truncf %421 : vector<18x32xf32> to vector<18x32xbf16>
    %c1_137 = arith.constant 1 : index
    %c0_138 = arith.constant 0 : index
    %c0_139 = arith.constant 0 : index
    %423 = vector.load %arg10[%c1_137, %c0_138, %c0_139] : memref<2x32x64xbf16, #tpu.memory_space<vmem>>, vector<1x32x64xbf16>
    %424 = vector.shape_cast %423 : vector<1x32x64xbf16> to vector<32x64xbf16>
    %cst_140 = arith.constant dense<0.000000e+00> : vector<18x64xf32>
    %425 = tpu.matmul %422, %424, %cst_140 {dimension_numbers = #tpu.dot_dimension_numbers<[1], [0], [0], [1], [0, 0, 1, 1], [], []>} : vector<18x32xbf16>, vector<32x64xbf16>, vector<18x64xf32> -> vector<18x64xf32>
    %c1_141 = arith.constant 1 : index
    %c0_142 = arith.constant 0 : index
    %c0_143 = arith.constant 0 : index
    %426 = vector.load %arg11[%c1_141, %c0_142, %c0_143] : memref<2x1x64xf32, #tpu.memory_space<vmem>>, vector<1x1x64xf32>
    %427 = vector.shape_cast %426 : vector<1x1x64xf32> to vector<1x64xf32>
    %428 = vector.broadcast %427 : vector<1x64xf32> to vector<18x64xf32>
    %429 = arith.addf %425, %428 : vector<18x64xf32>
    %cst_144 = arith.constant 0.000000e+00 : f32
    %430 = vector.broadcast %cst_144 : f32 to vector<18x64xf32>
    %431 = arith.maximumf %429, %430 : vector<18x64xf32>
    %432 = arith.truncf %431 : vector<18x64xf32> to vector<18x64xbf16>
    %c1_145 = arith.constant 1 : index
    %c0_146 = arith.constant 0 : index
    %c0_147 = arith.constant 0 : index
    %433 = vector.load %arg12[%c1_145, %c0_146, %c0_147] : memref<2x64x32xbf16, #tpu.memory_space<vmem>>, vector<1x64x32xbf16>
    %434 = vector.shape_cast %433 : vector<1x64x32xbf16> to vector<64x32xbf16>
    %cst_148 = arith.constant dense<0.000000e+00> : vector<18x32xf32>
    %435 = tpu.matmul %432, %434, %cst_148 {dimension_numbers = #tpu.dot_dimension_numbers<[1], [0], [0], [1], [0, 0, 1, 1], [], []>} : vector<18x64xbf16>, vector<64x32xbf16>, vector<18x32xf32> -> vector<18x32xf32>
    %c1_149 = arith.constant 1 : index
    %c0_150 = arith.constant 0 : index
    %c0_151 = arith.constant 0 : index
    %436 = vector.load %arg13[%c1_149, %c0_150, %c0_151] : memref<2x1x32xf32, #tpu.memory_space<vmem>>, vector<1x1x32xf32>
    %437 = vector.shape_cast %436 : vector<1x1x32xf32> to vector<1x32xf32>
    %438 = vector.broadcast %437 : vector<1x32xf32> to vector<18x32xf32>
    %439 = arith.addf %435, %438 : vector<18x32xf32>
    %440 = arith.addf %421, %439 : vector<18x32xf32>
    %441 = vector.extract_strided_slice %235 {offsets = [1, 0, 0], sizes = [1, 1, 32], strides = [1, 1, 1]} : vector<2x1x32xf32> to vector<1x1x32xf32>
    %442 = vector.shape_cast %441 : vector<1x1x32xf32> to vector<1x32xf32>
    %443 = vector.extract_strided_slice %237 {offsets = [1, 0, 0], sizes = [1, 1, 32], strides = [1, 1, 1]} : vector<2x1x32xf32> to vector<1x1x32xf32>
    %444 = vector.shape_cast %443 : vector<1x1x32xf32> to vector<1x32xf32>
    %cst_152 = arith.constant dense<0.000000e+00> : vector<18xf32>
    %445 = vector.multi_reduction <add>, %440, %cst_152 [1] : vector<18x32xf32> to vector<18xf32>
    %446 = vector.shape_cast %445 : vector<18xf32> to vector<18x1xf32>
    %cst_153 = arith.constant 3.200000e+01 : f32
    %447 = vector.broadcast %cst_153 : f32 to vector<18x1xf32>
    %448 = arith.divf %446, %447 : vector<18x1xf32>
    %449 = arith.mulf %440, %440 : vector<18x32xf32>
    %cst_154 = arith.constant dense<0.000000e+00> : vector<18xf32>
    %450 = vector.multi_reduction <add>, %449, %cst_154 [1] : vector<18x32xf32> to vector<18xf32>
    %451 = vector.shape_cast %450 : vector<18xf32> to vector<18x1xf32>
    %cst_155 = arith.constant 3.200000e+01 : f32
    %452 = vector.broadcast %cst_155 : f32 to vector<18x1xf32>
    %453 = arith.divf %451, %452 : vector<18x1xf32>
    %454 = arith.mulf %448, %448 : vector<18x1xf32>
    %455 = arith.subf %453, %454 : vector<18x1xf32>
    %cst_156 = arith.constant 9.99999974E-6 : f32
    %456 = vector.broadcast %cst_156 : f32 to vector<18x1xf32>
    %457 = arith.addf %455, %456 : vector<18x1xf32>
    %458 = math.rsqrt %457 : vector<18x1xf32>
    %459 = vector.broadcast %448 : vector<18x1xf32> to vector<18x32xf32>
    %460 = arith.subf %440, %459 : vector<18x32xf32>
    %461 = vector.broadcast %458 : vector<18x1xf32> to vector<18x32xf32>
    %462 = vector.broadcast %442 : vector<1x32xf32> to vector<18x32xf32>
    %463 = arith.mulf %461, %462 : vector<18x32xf32>
    %464 = arith.mulf %460, %463 : vector<18x32xf32>
    %465 = vector.broadcast %444 : vector<1x32xf32> to vector<18x32xf32>
    %466 = arith.addf %464, %465 : vector<18x32xf32>
    %c0_157 = arith.constant 0 : index
    %c0_158 = arith.constant 0 : index
    %c0_159 = arith.constant 0 : index
    %467 = vector.load %arg30[%c0_157, %c0_158, %c0_159] : memref<2x1x32xf32, #tpu.memory_space<vmem>>, vector<1x1x32xf32>
    %468 = vector.shape_cast %467 : vector<1x1x32xf32> to vector<1x32xf32>
    %c0_160 = arith.constant 0 : index
    %c0_161 = arith.constant 0 : index
    %c0_162 = arith.constant 0 : index
    %469 = vector.load %arg31[%c0_160, %c0_161, %c0_162] : memref<2x1x32xf32, #tpu.memory_space<vmem>>, vector<1x1x32xf32>
    %470 = vector.shape_cast %469 : vector<1x1x32xf32> to vector<1x32xf32>
    %cst_163 = arith.constant dense<0.000000e+00> : vector<18xf32>
    %471 = vector.multi_reduction <add>, %466, %cst_163 [1] : vector<18x32xf32> to vector<18xf32>
    %472 = vector.shape_cast %471 : vector<18xf32> to vector<18x1xf32>
    %cst_164 = arith.constant 3.200000e+01 : f32
    %473 = vector.broadcast %cst_164 : f32 to vector<18x1xf32>
    %474 = arith.divf %472, %473 : vector<18x1xf32>
    %475 = arith.mulf %466, %466 : vector<18x32xf32>
    %cst_165 = arith.constant dense<0.000000e+00> : vector<18xf32>
    %476 = vector.multi_reduction <add>, %475, %cst_165 [1] : vector<18x32xf32> to vector<18xf32>
    %477 = vector.shape_cast %476 : vector<18xf32> to vector<18x1xf32>
    %cst_166 = arith.constant 3.200000e+01 : f32
    %478 = vector.broadcast %cst_166 : f32 to vector<18x1xf32>
    %479 = arith.divf %477, %478 : vector<18x1xf32>
    %480 = arith.mulf %474, %474 : vector<18x1xf32>
    %481 = arith.subf %479, %480 : vector<18x1xf32>
    %cst_167 = arith.constant 9.99999974E-6 : f32
    %482 = vector.broadcast %cst_167 : f32 to vector<18x1xf32>
    %483 = arith.addf %481, %482 : vector<18x1xf32>
    %484 = math.rsqrt %483 : vector<18x1xf32>
    %485 = vector.broadcast %474 : vector<18x1xf32> to vector<18x32xf32>
    %486 = arith.subf %466, %485 : vector<18x32xf32>
    %487 = vector.broadcast %484 : vector<18x1xf32> to vector<18x32xf32>
    %488 = vector.broadcast %468 : vector<1x32xf32> to vector<18x32xf32>
    %489 = arith.mulf %487, %488 : vector<18x32xf32>
    %490 = arith.mulf %486, %489 : vector<18x32xf32>
    %491 = vector.broadcast %470 : vector<1x32xf32> to vector<18x32xf32>
    %492 = arith.addf %490, %491 : vector<18x32xf32>
    %493 = arith.truncf %492 : vector<18x32xf32> to vector<18x32xbf16>
    %c0_168 = arith.constant 0 : index
    %c0_169 = arith.constant 0 : index
    %494 = vector.load %arg3[%c0_168, %c0_169] : memref<8x8xf32, #tpu.memory_space<vmem>>, vector<8x8xf32>
    %c0_170 = arith.constant 0 : index
    %c0_171 = arith.constant 0 : index
    %495 = vector.load %arg2[%c0_170, %c0_171] : memref<16x32xf32, #tpu.memory_space<vmem>>, vector<16x32xf32>
    %c0_172 = arith.constant 0 : index
    %c0_173 = arith.constant 0 : index
    %c0_174 = arith.constant 0 : index
    %c0_175 = arith.constant 0 : index
    %496 = vector.load %arg24[%c0_172, %c0_173, %c0_174, %c0_175] : memref<2x3x1x32xf32, #tpu.memory_space<vmem>>, vector<1x3x1x32xf32>
    %497 = vector.shape_cast %496 : vector<1x3x1x32xf32> to vector<3x1x32xf32>
    %c0_176 = arith.constant 0 : index
    %c0_177 = arith.constant 0 : index
    %c0_178 = arith.constant 0 : index
    %c0_179 = arith.constant 0 : index
    %498 = vector.load %arg25[%c0_176, %c0_177, %c0_178, %c0_179] : memref<2x3x1x32xf32, #tpu.memory_space<vmem>>, vector<1x3x1x32xf32>
    %499 = vector.shape_cast %498 : vector<1x3x1x32xf32> to vector<3x1x32xf32>
    %500 = arith.truncf %495 : vector<16x32xf32> to vector<16x32xbf16>
    %c0_180 = arith.constant 0 : index
    %c0_181 = arith.constant 0 : index
    %c0_182 = arith.constant 0 : index
    %501 = vector.load %arg14[%c0_180, %c0_181, %c0_182] : memref<2x32x96xbf16, #tpu.memory_space<vmem>>, vector<1x32x96xbf16>
    %502 = vector.shape_cast %501 : vector<1x32x96xbf16> to vector<32x96xbf16>
    %cst_183 = arith.constant dense<0.000000e+00> : vector<16x96xf32>
    %503 = tpu.matmul %500, %502, %cst_183 {dimension_numbers = #tpu.dot_dimension_numbers<[1], [0], [0], [1], [0, 0, 1, 1], [], []>} : vector<16x32xbf16>, vector<32x96xbf16>, vector<16x96xf32> -> vector<16x96xf32>
    %c0_184 = arith.constant 0 : index
    %c0_185 = arith.constant 0 : index
    %c0_186 = arith.constant 0 : index
    %504 = vector.load %arg15[%c0_184, %c0_185, %c0_186] : memref<2x1x96xf32, #tpu.memory_space<vmem>>, vector<1x1x96xf32>
    %505 = vector.shape_cast %504 : vector<1x1x96xf32> to vector<1x96xf32>
    %506 = vector.broadcast %505 : vector<1x96xf32> to vector<16x96xf32>
    %507 = arith.addf %503, %506 : vector<16x96xf32>
    %508 = arith.truncf %507 : vector<16x96xf32> to vector<16x96xbf16>
    %509 = vector.extract_strided_slice %508 {offsets = [0, 0], sizes = [16, 32], strides = [1, 1]} : vector<16x96xbf16> to vector<16x32xbf16>
    %510 = vector.extract_strided_slice %508 {offsets = [0, 32], sizes = [16, 32], strides = [1, 1]} : vector<16x96xbf16> to vector<16x32xbf16>
    %511 = vector.extract_strided_slice %508 {offsets = [0, 64], sizes = [16, 32], strides = [1, 1]} : vector<16x96xbf16> to vector<16x32xbf16>
    %c0_187 = arith.constant 0 : index
    %c0_188 = arith.constant 0 : index
    %c0_189 = arith.constant 0 : index
    %512 = vector.load %arg16[%c0_187, %c0_188, %c0_189] : memref<2x32x32xbf16, #tpu.memory_space<vmem>>, vector<1x32x32xbf16>
    %513 = vector.shape_cast %512 : vector<1x32x32xbf16> to vector<32x32xbf16>
    %c0_190 = arith.constant 0 : index
    %c0_191 = arith.constant 0 : index
    %c0_192 = arith.constant 0 : index
    %514 = vector.load %arg17[%c0_190, %c0_191, %c0_192] : memref<2x1x32xf32, #tpu.memory_space<vmem>>, vector<1x1x32xf32>
    %515 = vector.shape_cast %514 : vector<1x1x32xf32> to vector<1x32xf32>
    %516 = vector.extract_strided_slice %509 {offsets = [0, 0], sizes = [8, 32], strides = [1, 1]} : vector<16x32xbf16> to vector<8x32xbf16>
    %517 = vector.extract_strided_slice %510 {offsets = [0, 0], sizes = [8, 32], strides = [1, 1]} : vector<16x32xbf16> to vector<8x32xbf16>
    %518 = vector.extract_strided_slice %511 {offsets = [0, 0], sizes = [8, 32], strides = [1, 1]} : vector<16x32xbf16> to vector<8x32xbf16>
    %519 = vector.extract_strided_slice %516 {offsets = [0, 0], sizes = [8, 8], strides = [1, 1]} : vector<8x32xbf16> to vector<8x8xbf16>
    %520 = vector.extract_strided_slice %517 {offsets = [0, 0], sizes = [8, 8], strides = [1, 1]} : vector<8x32xbf16> to vector<8x8xbf16>
    %cst_193 = arith.constant dense<0.000000e+00> : vector<8x8xf32>
    %521 = tpu.matmul %519, %520, %cst_193 {dimension_numbers = #tpu.dot_dimension_numbers<[1], [1], [0], [0], [0, 0, 1, 0], [], []>} : vector<8x8xbf16>, vector<8x8xbf16>, vector<8x8xf32> -> vector<8x8xf32>
    %522 = arith.addf %521, %494 : vector<8x8xf32>
    %cst_194 = arith.constant dense<0xFF800000> : vector<8xf32>
    %523 = vector.multi_reduction <maximumf>, %522, %cst_194 [1] : vector<8x8xf32> to vector<8xf32>
    %524 = vector.shape_cast %523 : vector<8xf32> to vector<8x1xf32>
    %525 = vector.broadcast %524 : vector<8x1xf32> to vector<8x8xf32>
    %526 = arith.subf %522, %525 : vector<8x8xf32>
    %527 = math.exp %526 : vector<8x8xf32>
    %cst_195 = arith.constant dense<0.000000e+00> : vector<8xf32>
    %528 = vector.multi_reduction <add>, %527, %cst_195 [1] : vector<8x8xf32> to vector<8xf32>
    %529 = vector.shape_cast %528 : vector<8xf32> to vector<8x1xf32>
    %530 = tpu.reciprocal %529 {approx = true} : vector<8x1xf32> -> vector<8x1xf32>
    %531 = vector.broadcast %530 : vector<8x1xf32> to vector<8x8xf32>
    %532 = arith.mulf %527, %531 : vector<8x8xf32>
    %533 = arith.truncf %532 : vector<8x8xf32> to vector<8x8xbf16>
    %534 = vector.extract_strided_slice %518 {offsets = [0, 0], sizes = [8, 8], strides = [1, 1]} : vector<8x32xbf16> to vector<8x8xbf16>
    %cst_196 = arith.constant dense<0.000000e+00> : vector<8x8xf32>
    %535 = tpu.matmul %533, %534, %cst_196 {dimension_numbers = #tpu.dot_dimension_numbers<[1], [0], [0], [1], [0, 0, 1, 1], [], []>} : vector<8x8xbf16>, vector<8x8xbf16>, vector<8x8xf32> -> vector<8x8xf32>
    %536 = vector.extract_strided_slice %516 {offsets = [0, 8], sizes = [8, 8], strides = [1, 1]} : vector<8x32xbf16> to vector<8x8xbf16>
    %537 = vector.extract_strided_slice %517 {offsets = [0, 8], sizes = [8, 8], strides = [1, 1]} : vector<8x32xbf16> to vector<8x8xbf16>
    %cst_197 = arith.constant dense<0.000000e+00> : vector<8x8xf32>
    %538 = tpu.matmul %536, %537, %cst_197 {dimension_numbers = #tpu.dot_dimension_numbers<[1], [1], [0], [0], [0, 0, 1, 0], [], []>} : vector<8x8xbf16>, vector<8x8xbf16>, vector<8x8xf32> -> vector<8x8xf32>
    %539 = arith.addf %538, %494 : vector<8x8xf32>
    %cst_198 = arith.constant dense<0xFF800000> : vector<8xf32>
    %540 = vector.multi_reduction <maximumf>, %539, %cst_198 [1] : vector<8x8xf32> to vector<8xf32>
    %541 = vector.shape_cast %540 : vector<8xf32> to vector<8x1xf32>
    %542 = vector.broadcast %541 : vector<8x1xf32> to vector<8x8xf32>
    %543 = arith.subf %539, %542 : vector<8x8xf32>
    %544 = math.exp %543 : vector<8x8xf32>
    %cst_199 = arith.constant dense<0.000000e+00> : vector<8xf32>
    %545 = vector.multi_reduction <add>, %544, %cst_199 [1] : vector<8x8xf32> to vector<8xf32>
    %546 = vector.shape_cast %545 : vector<8xf32> to vector<8x1xf32>
    %547 = tpu.reciprocal %546 {approx = true} : vector<8x1xf32> -> vector<8x1xf32>
    %548 = vector.broadcast %547 : vector<8x1xf32> to vector<8x8xf32>
    %549 = arith.mulf %544, %548 : vector<8x8xf32>
    %550 = arith.truncf %549 : vector<8x8xf32> to vector<8x8xbf16>
    %551 = vector.extract_strided_slice %518 {offsets = [0, 8], sizes = [8, 8], strides = [1, 1]} : vector<8x32xbf16> to vector<8x8xbf16>
    %cst_200 = arith.constant dense<0.000000e+00> : vector<8x8xf32>
    %552 = tpu.matmul %550, %551, %cst_200 {dimension_numbers = #tpu.dot_dimension_numbers<[1], [0], [0], [1], [0, 0, 1, 1], [], []>} : vector<8x8xbf16>, vector<8x8xbf16>, vector<8x8xf32> -> vector<8x8xf32>
    %553 = vector.extract_strided_slice %516 {offsets = [0, 16], sizes = [8, 8], strides = [1, 1]} : vector<8x32xbf16> to vector<8x8xbf16>
    %554 = vector.extract_strided_slice %517 {offsets = [0, 16], sizes = [8, 8], strides = [1, 1]} : vector<8x32xbf16> to vector<8x8xbf16>
    %cst_201 = arith.constant dense<0.000000e+00> : vector<8x8xf32>
    %555 = tpu.matmul %553, %554, %cst_201 {dimension_numbers = #tpu.dot_dimension_numbers<[1], [1], [0], [0], [0, 0, 1, 0], [], []>} : vector<8x8xbf16>, vector<8x8xbf16>, vector<8x8xf32> -> vector<8x8xf32>
    %556 = arith.addf %555, %494 : vector<8x8xf32>
    %cst_202 = arith.constant dense<0xFF800000> : vector<8xf32>
    %557 = vector.multi_reduction <maximumf>, %556, %cst_202 [1] : vector<8x8xf32> to vector<8xf32>
    %558 = vector.shape_cast %557 : vector<8xf32> to vector<8x1xf32>
    %559 = vector.broadcast %558 : vector<8x1xf32> to vector<8x8xf32>
    %560 = arith.subf %556, %559 : vector<8x8xf32>
    %561 = math.exp %560 : vector<8x8xf32>
    %cst_203 = arith.constant dense<0.000000e+00> : vector<8xf32>
    %562 = vector.multi_reduction <add>, %561, %cst_203 [1] : vector<8x8xf32> to vector<8xf32>
    %563 = vector.shape_cast %562 : vector<8xf32> to vector<8x1xf32>
    %564 = tpu.reciprocal %563 {approx = true} : vector<8x1xf32> -> vector<8x1xf32>
    %565 = vector.broadcast %564 : vector<8x1xf32> to vector<8x8xf32>
    %566 = arith.mulf %561, %565 : vector<8x8xf32>
    %567 = arith.truncf %566 : vector<8x8xf32> to vector<8x8xbf16>
    %568 = vector.extract_strided_slice %518 {offsets = [0, 16], sizes = [8, 8], strides = [1, 1]} : vector<8x32xbf16> to vector<8x8xbf16>
    %cst_204 = arith.constant dense<0.000000e+00> : vector<8x8xf32>
    %569 = tpu.matmul %567, %568, %cst_204 {dimension_numbers = #tpu.dot_dimension_numbers<[1], [0], [0], [1], [0, 0, 1, 1], [], []>} : vector<8x8xbf16>, vector<8x8xbf16>, vector<8x8xf32> -> vector<8x8xf32>
    %570 = vector.extract_strided_slice %516 {offsets = [0, 24], sizes = [8, 8], strides = [1, 1]} : vector<8x32xbf16> to vector<8x8xbf16>
    %571 = vector.extract_strided_slice %517 {offsets = [0, 24], sizes = [8, 8], strides = [1, 1]} : vector<8x32xbf16> to vector<8x8xbf16>
    %cst_205 = arith.constant dense<0.000000e+00> : vector<8x8xf32>
    %572 = tpu.matmul %570, %571, %cst_205 {dimension_numbers = #tpu.dot_dimension_numbers<[1], [1], [0], [0], [0, 0, 1, 0], [], []>} : vector<8x8xbf16>, vector<8x8xbf16>, vector<8x8xf32> -> vector<8x8xf32>
    %573 = arith.addf %572, %494 : vector<8x8xf32>
    %cst_206 = arith.constant dense<0xFF800000> : vector<8xf32>
    %574 = vector.multi_reduction <maximumf>, %573, %cst_206 [1] : vector<8x8xf32> to vector<8xf32>
    %575 = vector.shape_cast %574 : vector<8xf32> to vector<8x1xf32>
    %576 = vector.broadcast %575 : vector<8x1xf32> to vector<8x8xf32>
    %577 = arith.subf %573, %576 : vector<8x8xf32>
    %578 = math.exp %577 : vector<8x8xf32>
    %cst_207 = arith.constant dense<0.000000e+00> : vector<8xf32>
    %579 = vector.multi_reduction <add>, %578, %cst_207 [1] : vector<8x8xf32> to vector<8xf32>
    %580 = vector.shape_cast %579 : vector<8xf32> to vector<8x1xf32>
    %581 = tpu.reciprocal %580 {approx = true} : vector<8x1xf32> -> vector<8x1xf32>
    %582 = vector.broadcast %581 : vector<8x1xf32> to vector<8x8xf32>
    %583 = arith.mulf %578, %582 : vector<8x8xf32>
    %584 = arith.truncf %583 : vector<8x8xf32> to vector<8x8xbf16>
    %585 = vector.extract_strided_slice %518 {offsets = [0, 24], sizes = [8, 8], strides = [1, 1]} : vector<8x32xbf16> to vector<8x8xbf16>
    %cst_208 = arith.constant dense<0.000000e+00> : vector<8x8xf32>
    %586 = tpu.matmul %584, %585, %cst_208 {dimension_numbers = #tpu.dot_dimension_numbers<[1], [0], [0], [1], [0, 0, 1, 1], [], []>} : vector<8x8xbf16>, vector<8x8xbf16>, vector<8x8xf32> -> vector<8x8xf32>
    %587 = tpu.concatenate %535, %552, %569, %586 in 1 : vector<8x8xf32>, vector<8x8xf32>, vector<8x8xf32>, vector<8x8xf32> -> vector<8x32xf32>
    %588 = vector.extract_strided_slice %509 {offsets = [8, 0], sizes = [8, 32], strides = [1, 1]} : vector<16x32xbf16> to vector<8x32xbf16>
    %589 = vector.extract_strided_slice %510 {offsets = [8, 0], sizes = [8, 32], strides = [1, 1]} : vector<16x32xbf16> to vector<8x32xbf16>
    %590 = vector.extract_strided_slice %511 {offsets = [8, 0], sizes = [8, 32], strides = [1, 1]} : vector<16x32xbf16> to vector<8x32xbf16>
    %591 = vector.extract_strided_slice %588 {offsets = [0, 0], sizes = [8, 8], strides = [1, 1]} : vector<8x32xbf16> to vector<8x8xbf16>
    %592 = vector.extract_strided_slice %589 {offsets = [0, 0], sizes = [8, 8], strides = [1, 1]} : vector<8x32xbf16> to vector<8x8xbf16>
    %cst_209 = arith.constant dense<0.000000e+00> : vector<8x8xf32>
    %593 = tpu.matmul %591, %592, %cst_209 {dimension_numbers = #tpu.dot_dimension_numbers<[1], [1], [0], [0], [0, 0, 1, 0], [], []>} : vector<8x8xbf16>, vector<8x8xbf16>, vector<8x8xf32> -> vector<8x8xf32>
    %594 = arith.addf %593, %494 : vector<8x8xf32>
    %cst_210 = arith.constant dense<0xFF800000> : vector<8xf32>
    %595 = vector.multi_reduction <maximumf>, %594, %cst_210 [1] : vector<8x8xf32> to vector<8xf32>
    %596 = vector.shape_cast %595 : vector<8xf32> to vector<8x1xf32>
    %597 = vector.broadcast %596 : vector<8x1xf32> to vector<8x8xf32>
    %598 = arith.subf %594, %597 : vector<8x8xf32>
    %599 = math.exp %598 : vector<8x8xf32>
    %cst_211 = arith.constant dense<0.000000e+00> : vector<8xf32>
    %600 = vector.multi_reduction <add>, %599, %cst_211 [1] : vector<8x8xf32> to vector<8xf32>
    %601 = vector.shape_cast %600 : vector<8xf32> to vector<8x1xf32>
    %602 = tpu.reciprocal %601 {approx = true} : vector<8x1xf32> -> vector<8x1xf32>
    %603 = vector.broadcast %602 : vector<8x1xf32> to vector<8x8xf32>
    %604 = arith.mulf %599, %603 : vector<8x8xf32>
    %605 = arith.truncf %604 : vector<8x8xf32> to vector<8x8xbf16>
    %606 = vector.extract_strided_slice %590 {offsets = [0, 0], sizes = [8, 8], strides = [1, 1]} : vector<8x32xbf16> to vector<8x8xbf16>
    %cst_212 = arith.constant dense<0.000000e+00> : vector<8x8xf32>
    %607 = tpu.matmul %605, %606, %cst_212 {dimension_numbers = #tpu.dot_dimension_numbers<[1], [0], [0], [1], [0, 0, 1, 1], [], []>} : vector<8x8xbf16>, vector<8x8xbf16>, vector<8x8xf32> -> vector<8x8xf32>
    %608 = vector.extract_strided_slice %588 {offsets = [0, 8], sizes = [8, 8], strides = [1, 1]} : vector<8x32xbf16> to vector<8x8xbf16>
    %609 = vector.extract_strided_slice %589 {offsets = [0, 8], sizes = [8, 8], strides = [1, 1]} : vector<8x32xbf16> to vector<8x8xbf16>
    %cst_213 = arith.constant dense<0.000000e+00> : vector<8x8xf32>
    %610 = tpu.matmul %608, %609, %cst_213 {dimension_numbers = #tpu.dot_dimension_numbers<[1], [1], [0], [0], [0, 0, 1, 0], [], []>} : vector<8x8xbf16>, vector<8x8xbf16>, vector<8x8xf32> -> vector<8x8xf32>
    %611 = arith.addf %610, %494 : vector<8x8xf32>
    %cst_214 = arith.constant dense<0xFF800000> : vector<8xf32>
    %612 = vector.multi_reduction <maximumf>, %611, %cst_214 [1] : vector<8x8xf32> to vector<8xf32>
    %613 = vector.shape_cast %612 : vector<8xf32> to vector<8x1xf32>
    %614 = vector.broadcast %613 : vector<8x1xf32> to vector<8x8xf32>
    %615 = arith.subf %611, %614 : vector<8x8xf32>
    %616 = math.exp %615 : vector<8x8xf32>
    %cst_215 = arith.constant dense<0.000000e+00> : vector<8xf32>
    %617 = vector.multi_reduction <add>, %616, %cst_215 [1] : vector<8x8xf32> to vector<8xf32>
    %618 = vector.shape_cast %617 : vector<8xf32> to vector<8x1xf32>
    %619 = tpu.reciprocal %618 {approx = true} : vector<8x1xf32> -> vector<8x1xf32>
    %620 = vector.broadcast %619 : vector<8x1xf32> to vector<8x8xf32>
    %621 = arith.mulf %616, %620 : vector<8x8xf32>
    %622 = arith.truncf %621 : vector<8x8xf32> to vector<8x8xbf16>
    %623 = vector.extract_strided_slice %590 {offsets = [0, 8], sizes = [8, 8], strides = [1, 1]} : vector<8x32xbf16> to vector<8x8xbf16>
    %cst_216 = arith.constant dense<0.000000e+00> : vector<8x8xf32>
    %624 = tpu.matmul %622, %623, %cst_216 {dimension_numbers = #tpu.dot_dimension_numbers<[1], [0], [0], [1], [0, 0, 1, 1], [], []>} : vector<8x8xbf16>, vector<8x8xbf16>, vector<8x8xf32> -> vector<8x8xf32>
    %625 = vector.extract_strided_slice %588 {offsets = [0, 16], sizes = [8, 8], strides = [1, 1]} : vector<8x32xbf16> to vector<8x8xbf16>
    %626 = vector.extract_strided_slice %589 {offsets = [0, 16], sizes = [8, 8], strides = [1, 1]} : vector<8x32xbf16> to vector<8x8xbf16>
    %cst_217 = arith.constant dense<0.000000e+00> : vector<8x8xf32>
    %627 = tpu.matmul %625, %626, %cst_217 {dimension_numbers = #tpu.dot_dimension_numbers<[1], [1], [0], [0], [0, 0, 1, 0], [], []>} : vector<8x8xbf16>, vector<8x8xbf16>, vector<8x8xf32> -> vector<8x8xf32>
    %628 = arith.addf %627, %494 : vector<8x8xf32>
    %cst_218 = arith.constant dense<0xFF800000> : vector<8xf32>
    %629 = vector.multi_reduction <maximumf>, %628, %cst_218 [1] : vector<8x8xf32> to vector<8xf32>
    %630 = vector.shape_cast %629 : vector<8xf32> to vector<8x1xf32>
    %631 = vector.broadcast %630 : vector<8x1xf32> to vector<8x8xf32>
    %632 = arith.subf %628, %631 : vector<8x8xf32>
    %633 = math.exp %632 : vector<8x8xf32>
    %cst_219 = arith.constant dense<0.000000e+00> : vector<8xf32>
    %634 = vector.multi_reduction <add>, %633, %cst_219 [1] : vector<8x8xf32> to vector<8xf32>
    %635 = vector.shape_cast %634 : vector<8xf32> to vector<8x1xf32>
    %636 = tpu.reciprocal %635 {approx = true} : vector<8x1xf32> -> vector<8x1xf32>
    %637 = vector.broadcast %636 : vector<8x1xf32> to vector<8x8xf32>
    %638 = arith.mulf %633, %637 : vector<8x8xf32>
    %639 = arith.truncf %638 : vector<8x8xf32> to vector<8x8xbf16>
    %640 = vector.extract_strided_slice %590 {offsets = [0, 16], sizes = [8, 8], strides = [1, 1]} : vector<8x32xbf16> to vector<8x8xbf16>
    %cst_220 = arith.constant dense<0.000000e+00> : vector<8x8xf32>
    %641 = tpu.matmul %639, %640, %cst_220 {dimension_numbers = #tpu.dot_dimension_numbers<[1], [0], [0], [1], [0, 0, 1, 1], [], []>} : vector<8x8xbf16>, vector<8x8xbf16>, vector<8x8xf32> -> vector<8x8xf32>
    %642 = vector.extract_strided_slice %588 {offsets = [0, 24], sizes = [8, 8], strides = [1, 1]} : vector<8x32xbf16> to vector<8x8xbf16>
    %643 = vector.extract_strided_slice %589 {offsets = [0, 24], sizes = [8, 8], strides = [1, 1]} : vector<8x32xbf16> to vector<8x8xbf16>
    %cst_221 = arith.constant dense<0.000000e+00> : vector<8x8xf32>
    %644 = tpu.matmul %642, %643, %cst_221 {dimension_numbers = #tpu.dot_dimension_numbers<[1], [1], [0], [0], [0, 0, 1, 0], [], []>} : vector<8x8xbf16>, vector<8x8xbf16>, vector<8x8xf32> -> vector<8x8xf32>
    %645 = arith.addf %644, %494 : vector<8x8xf32>
    %cst_222 = arith.constant dense<0xFF800000> : vector<8xf32>
    %646 = vector.multi_reduction <maximumf>, %645, %cst_222 [1] : vector<8x8xf32> to vector<8xf32>
    %647 = vector.shape_cast %646 : vector<8xf32> to vector<8x1xf32>
    %648 = vector.broadcast %647 : vector<8x1xf32> to vector<8x8xf32>
    %649 = arith.subf %645, %648 : vector<8x8xf32>
    %650 = math.exp %649 : vector<8x8xf32>
    %cst_223 = arith.constant dense<0.000000e+00> : vector<8xf32>
    %651 = vector.multi_reduction <add>, %650, %cst_223 [1] : vector<8x8xf32> to vector<8xf32>
    %652 = vector.shape_cast %651 : vector<8xf32> to vector<8x1xf32>
    %653 = tpu.reciprocal %652 {approx = true} : vector<8x1xf32> -> vector<8x1xf32>
    %654 = vector.broadcast %653 : vector<8x1xf32> to vector<8x8xf32>
    %655 = arith.mulf %650, %654 : vector<8x8xf32>
    %656 = arith.truncf %655 : vector<8x8xf32> to vector<8x8xbf16>
    %657 = vector.extract_strided_slice %590 {offsets = [0, 24], sizes = [8, 8], strides = [1, 1]} : vector<8x32xbf16> to vector<8x8xbf16>
    %cst_224 = arith.constant dense<0.000000e+00> : vector<8x8xf32>
    %658 = tpu.matmul %656, %657, %cst_224 {dimension_numbers = #tpu.dot_dimension_numbers<[1], [0], [0], [1], [0, 0, 1, 1], [], []>} : vector<8x8xbf16>, vector<8x8xbf16>, vector<8x8xf32> -> vector<8x8xf32>
    %659 = tpu.concatenate %607, %624, %641, %658 in 1 : vector<8x8xf32>, vector<8x8xf32>, vector<8x8xf32>, vector<8x8xf32> -> vector<8x32xf32>
    %660 = tpu.concatenate %587, %659 in 0 : vector<8x32xf32>, vector<8x32xf32> -> vector<16x32xf32>
    %661 = arith.truncf %660 : vector<16x32xf32> to vector<16x32xbf16>
    %cst_225 = arith.constant dense<0.000000e+00> : vector<16x32xf32>
    %662 = tpu.matmul %661, %513, %cst_225 {dimension_numbers = #tpu.dot_dimension_numbers<[1], [0], [0], [1], [0, 0, 1, 1], [], []>} : vector<16x32xbf16>, vector<32x32xbf16>, vector<16x32xf32> -> vector<16x32xf32>
    %663 = vector.broadcast %515 : vector<1x32xf32> to vector<16x32xf32>
    %664 = arith.addf %662, %663 : vector<16x32xf32>
    %665 = arith.addf %495, %664 : vector<16x32xf32>
    %666 = vector.extract_strided_slice %497 {offsets = [0, 0, 0], sizes = [1, 1, 32], strides = [1, 1, 1]} : vector<3x1x32xf32> to vector<1x1x32xf32>
    %667 = vector.shape_cast %666 : vector<1x1x32xf32> to vector<1x32xf32>
    %668 = vector.extract_strided_slice %499 {offsets = [0, 0, 0], sizes = [1, 1, 32], strides = [1, 1, 1]} : vector<3x1x32xf32> to vector<1x1x32xf32>
    %669 = vector.shape_cast %668 : vector<1x1x32xf32> to vector<1x32xf32>
    %cst_226 = arith.constant dense<0.000000e+00> : vector<16xf32>
    %670 = vector.multi_reduction <add>, %665, %cst_226 [1] : vector<16x32xf32> to vector<16xf32>
    %671 = vector.shape_cast %670 : vector<16xf32> to vector<16x1xf32>
    %cst_227 = arith.constant 3.200000e+01 : f32
    %672 = vector.broadcast %cst_227 : f32 to vector<16x1xf32>
    %673 = arith.divf %671, %672 : vector<16x1xf32>
    %674 = arith.mulf %665, %665 : vector<16x32xf32>
    %cst_228 = arith.constant dense<0.000000e+00> : vector<16xf32>
    %675 = vector.multi_reduction <add>, %674, %cst_228 [1] : vector<16x32xf32> to vector<16xf32>
    %676 = vector.shape_cast %675 : vector<16xf32> to vector<16x1xf32>
    %cst_229 = arith.constant 3.200000e+01 : f32
    %677 = vector.broadcast %cst_229 : f32 to vector<16x1xf32>
    %678 = arith.divf %676, %677 : vector<16x1xf32>
    %679 = arith.mulf %673, %673 : vector<16x1xf32>
    %680 = arith.subf %678, %679 : vector<16x1xf32>
    %cst_230 = arith.constant 9.99999974E-6 : f32
    %681 = vector.broadcast %cst_230 : f32 to vector<16x1xf32>
    %682 = arith.addf %680, %681 : vector<16x1xf32>
    %683 = math.rsqrt %682 : vector<16x1xf32>
    %684 = vector.broadcast %673 : vector<16x1xf32> to vector<16x32xf32>
    %685 = arith.subf %665, %684 : vector<16x32xf32>
    %686 = vector.broadcast %683 : vector<16x1xf32> to vector<16x32xf32>
    %687 = vector.broadcast %667 : vector<1x32xf32> to vector<16x32xf32>
    %688 = arith.mulf %686, %687 : vector<16x32xf32>
    %689 = arith.mulf %685, %688 : vector<16x32xf32>
    %690 = vector.broadcast %669 : vector<1x32xf32> to vector<16x32xf32>
    %691 = arith.addf %689, %690 : vector<16x32xf32>
    %692 = arith.truncf %691 : vector<16x32xf32> to vector<16x32xbf16>
    %c0_231 = arith.constant 0 : index
    %c0_232 = arith.constant 0 : index
    %c0_233 = arith.constant 0 : index
    %693 = vector.load %arg18[%c0_231, %c0_232, %c0_233] : memref<2x32x32xbf16, #tpu.memory_space<vmem>>, vector<1x32x32xbf16>
    %694 = vector.shape_cast %693 : vector<1x32x32xbf16> to vector<32x32xbf16>
    %cst_234 = arith.constant dense<0.000000e+00> : vector<16x32xf32>
    %695 = tpu.matmul %692, %694, %cst_234 {dimension_numbers = #tpu.dot_dimension_numbers<[1], [0], [0], [1], [0, 0, 1, 1], [], []>} : vector<16x32xbf16>, vector<32x32xbf16>, vector<16x32xf32> -> vector<16x32xf32>
    %c0_235 = arith.constant 0 : index
    %c0_236 = arith.constant 0 : index
    %c0_237 = arith.constant 0 : index
    %696 = vector.load %arg19[%c0_235, %c0_236, %c0_237] : memref<2x1x32xf32, #tpu.memory_space<vmem>>, vector<1x1x32xf32>
    %697 = vector.shape_cast %696 : vector<1x1x32xf32> to vector<1x32xf32>
    %698 = vector.broadcast %697 : vector<1x32xf32> to vector<16x32xf32>
    %699 = arith.addf %695, %698 : vector<16x32xf32>
    %700 = arith.truncf %699 : vector<16x32xf32> to vector<16x32xbf16>
    %c0_238 = arith.constant 0 : index
    %c0_239 = arith.constant 0 : index
    %c0_240 = arith.constant 0 : index
    %701 = vector.load %arg20[%c0_238, %c0_239, %c0_240] : memref<2x32x64xbf16, #tpu.memory_space<vmem>>, vector<1x32x64xbf16>
    %702 = vector.shape_cast %701 : vector<1x32x64xbf16> to vector<32x64xbf16>
    %cst_241 = arith.constant dense<0.000000e+00> : vector<18x64xf32>
    %703 = tpu.matmul %493, %702, %cst_241 {dimension_numbers = #tpu.dot_dimension_numbers<[1], [0], [0], [1], [0, 0, 1, 1], [], []>} : vector<18x32xbf16>, vector<32x64xbf16>, vector<18x64xf32> -> vector<18x64xf32>
    %c0_242 = arith.constant 0 : index
    %c0_243 = arith.constant 0 : index
    %c0_244 = arith.constant 0 : index
    %704 = vector.load %arg21[%c0_242, %c0_243, %c0_244] : memref<2x1x64xf32, #tpu.memory_space<vmem>>, vector<1x1x64xf32>
    %705 = vector.shape_cast %704 : vector<1x1x64xf32> to vector<1x64xf32>
    %706 = vector.broadcast %705 : vector<1x64xf32> to vector<18x64xf32>
    %707 = arith.addf %703, %706 : vector<18x64xf32>
    %708 = arith.truncf %707 : vector<18x64xf32> to vector<18x64xbf16>
    %709 = vector.extract_strided_slice %708 {offsets = [0, 0], sizes = [18, 32], strides = [1, 1]} : vector<18x64xbf16> to vector<18x32xbf16>
    %710 = vector.extract_strided_slice %708 {offsets = [0, 32], sizes = [18, 32], strides = [1, 1]} : vector<18x64xbf16> to vector<18x32xbf16>
    %c0_245 = arith.constant 0 : index
    %c0_246 = arith.constant 0 : index
    %c0_247 = arith.constant 0 : index
    %711 = vector.load %arg22[%c0_245, %c0_246, %c0_247] : memref<2x32x32xbf16, #tpu.memory_space<vmem>>, vector<1x32x32xbf16>
    %712 = vector.shape_cast %711 : vector<1x32x32xbf16> to vector<32x32xbf16>
    %c0_248 = arith.constant 0 : index
    %c0_249 = arith.constant 0 : index
    %c0_250 = arith.constant 0 : index
    %713 = vector.load %arg23[%c0_248, %c0_249, %c0_250] : memref<2x1x32xf32, #tpu.memory_space<vmem>>, vector<1x1x32xf32>
    %714 = vector.shape_cast %713 : vector<1x1x32xf32> to vector<1x32xf32>
    %715 = vector.extract_strided_slice %700 {offsets = [0, 0], sizes = [8, 32], strides = [1, 1]} : vector<16x32xbf16> to vector<8x32xbf16>
    %716 = vector.extract_strided_slice %709 {offsets = [0, 0], sizes = [9, 32], strides = [1, 1]} : vector<18x32xbf16> to vector<9x32xbf16>
    %717 = vector.extract_strided_slice %710 {offsets = [0, 0], sizes = [9, 32], strides = [1, 1]} : vector<18x32xbf16> to vector<9x32xbf16>
    %718 = vector.extract_strided_slice %715 {offsets = [0, 0], sizes = [8, 8], strides = [1, 1]} : vector<8x32xbf16> to vector<8x8xbf16>
    %719 = vector.extract_strided_slice %716 {offsets = [0, 0], sizes = [9, 8], strides = [1, 1]} : vector<9x32xbf16> to vector<9x8xbf16>
    %cst_251 = arith.constant dense<0.000000e+00> : vector<8x9xf32>
    %720 = tpu.matmul %718, %719, %cst_251 {dimension_numbers = #tpu.dot_dimension_numbers<[1], [1], [0], [0], [0, 0, 1, 0], [], []>} : vector<8x8xbf16>, vector<9x8xbf16>, vector<8x9xf32> -> vector<8x9xf32>
    %cst_252 = arith.constant dense<0xFF800000> : vector<8xf32>
    %721 = vector.multi_reduction <maximumf>, %720, %cst_252 [1] : vector<8x9xf32> to vector<8xf32>
    %722 = vector.shape_cast %721 : vector<8xf32> to vector<8x1xf32>
    %723 = vector.broadcast %722 : vector<8x1xf32> to vector<8x9xf32>
    %724 = arith.subf %720, %723 : vector<8x9xf32>
    %725 = math.exp %724 : vector<8x9xf32>
    %cst_253 = arith.constant dense<0.000000e+00> : vector<8xf32>
    %726 = vector.multi_reduction <add>, %725, %cst_253 [1] : vector<8x9xf32> to vector<8xf32>
    %727 = vector.shape_cast %726 : vector<8xf32> to vector<8x1xf32>
    %728 = tpu.reciprocal %727 {approx = true} : vector<8x1xf32> -> vector<8x1xf32>
    %729 = vector.broadcast %728 : vector<8x1xf32> to vector<8x9xf32>
    %730 = arith.mulf %725, %729 : vector<8x9xf32>
    %731 = arith.truncf %730 : vector<8x9xf32> to vector<8x9xbf16>
    %732 = vector.extract_strided_slice %717 {offsets = [0, 0], sizes = [9, 8], strides = [1, 1]} : vector<9x32xbf16> to vector<9x8xbf16>
    %cst_254 = arith.constant dense<0.000000e+00> : vector<8x8xf32>
    %733 = tpu.matmul %731, %732, %cst_254 {dimension_numbers = #tpu.dot_dimension_numbers<[1], [0], [0], [1], [0, 0, 1, 1], [], []>} : vector<8x9xbf16>, vector<9x8xbf16>, vector<8x8xf32> -> vector<8x8xf32>
    %734 = vector.extract_strided_slice %715 {offsets = [0, 8], sizes = [8, 8], strides = [1, 1]} : vector<8x32xbf16> to vector<8x8xbf16>
    %735 = vector.extract_strided_slice %716 {offsets = [0, 8], sizes = [9, 8], strides = [1, 1]} : vector<9x32xbf16> to vector<9x8xbf16>
    %cst_255 = arith.constant dense<0.000000e+00> : vector<8x9xf32>
    %736 = tpu.matmul %734, %735, %cst_255 {dimension_numbers = #tpu.dot_dimension_numbers<[1], [1], [0], [0], [0, 0, 1, 0], [], []>} : vector<8x8xbf16>, vector<9x8xbf16>, vector<8x9xf32> -> vector<8x9xf32>
    %cst_256 = arith.constant dense<0xFF800000> : vector<8xf32>
    %737 = vector.multi_reduction <maximumf>, %736, %cst_256 [1] : vector<8x9xf32> to vector<8xf32>
    %738 = vector.shape_cast %737 : vector<8xf32> to vector<8x1xf32>
    %739 = vector.broadcast %738 : vector<8x1xf32> to vector<8x9xf32>
    %740 = arith.subf %736, %739 : vector<8x9xf32>
    %741 = math.exp %740 : vector<8x9xf32>
    %cst_257 = arith.constant dense<0.000000e+00> : vector<8xf32>
    %742 = vector.multi_reduction <add>, %741, %cst_257 [1] : vector<8x9xf32> to vector<8xf32>
    %743 = vector.shape_cast %742 : vector<8xf32> to vector<8x1xf32>
    %744 = tpu.reciprocal %743 {approx = true} : vector<8x1xf32> -> vector<8x1xf32>
    %745 = vector.broadcast %744 : vector<8x1xf32> to vector<8x9xf32>
    %746 = arith.mulf %741, %745 : vector<8x9xf32>
    %747 = arith.truncf %746 : vector<8x9xf32> to vector<8x9xbf16>
    %748 = vector.extract_strided_slice %717 {offsets = [0, 8], sizes = [9, 8], strides = [1, 1]} : vector<9x32xbf16> to vector<9x8xbf16>
    %cst_258 = arith.constant dense<0.000000e+00> : vector<8x8xf32>
    %749 = tpu.matmul %747, %748, %cst_258 {dimension_numbers = #tpu.dot_dimension_numbers<[1], [0], [0], [1], [0, 0, 1, 1], [], []>} : vector<8x9xbf16>, vector<9x8xbf16>, vector<8x8xf32> -> vector<8x8xf32>
    %750 = vector.extract_strided_slice %715 {offsets = [0, 16], sizes = [8, 8], strides = [1, 1]} : vector<8x32xbf16> to vector<8x8xbf16>
    %751 = vector.extract_strided_slice %716 {offsets = [0, 16], sizes = [9, 8], strides = [1, 1]} : vector<9x32xbf16> to vector<9x8xbf16>
    %cst_259 = arith.constant dense<0.000000e+00> : vector<8x9xf32>
    %752 = tpu.matmul %750, %751, %cst_259 {dimension_numbers = #tpu.dot_dimension_numbers<[1], [1], [0], [0], [0, 0, 1, 0], [], []>} : vector<8x8xbf16>, vector<9x8xbf16>, vector<8x9xf32> -> vector<8x9xf32>
    %cst_260 = arith.constant dense<0xFF800000> : vector<8xf32>
    %753 = vector.multi_reduction <maximumf>, %752, %cst_260 [1] : vector<8x9xf32> to vector<8xf32>
    %754 = vector.shape_cast %753 : vector<8xf32> to vector<8x1xf32>
    %755 = vector.broadcast %754 : vector<8x1xf32> to vector<8x9xf32>
    %756 = arith.subf %752, %755 : vector<8x9xf32>
    %757 = math.exp %756 : vector<8x9xf32>
    %cst_261 = arith.constant dense<0.000000e+00> : vector<8xf32>
    %758 = vector.multi_reduction <add>, %757, %cst_261 [1] : vector<8x9xf32> to vector<8xf32>
    %759 = vector.shape_cast %758 : vector<8xf32> to vector<8x1xf32>
    %760 = tpu.reciprocal %759 {approx = true} : vector<8x1xf32> -> vector<8x1xf32>
    %761 = vector.broadcast %760 : vector<8x1xf32> to vector<8x9xf32>
    %762 = arith.mulf %757, %761 : vector<8x9xf32>
    %763 = arith.truncf %762 : vector<8x9xf32> to vector<8x9xbf16>
    %764 = vector.extract_strided_slice %717 {offsets = [0, 16], sizes = [9, 8], strides = [1, 1]} : vector<9x32xbf16> to vector<9x8xbf16>
    %cst_262 = arith.constant dense<0.000000e+00> : vector<8x8xf32>
    %765 = tpu.matmul %763, %764, %cst_262 {dimension_numbers = #tpu.dot_dimension_numbers<[1], [0], [0], [1], [0, 0, 1, 1], [], []>} : vector<8x9xbf16>, vector<9x8xbf16>, vector<8x8xf32> -> vector<8x8xf32>
    %766 = vector.extract_strided_slice %715 {offsets = [0, 24], sizes = [8, 8], strides = [1, 1]} : vector<8x32xbf16> to vector<8x8xbf16>
    %767 = vector.extract_strided_slice %716 {offsets = [0, 24], sizes = [9, 8], strides = [1, 1]} : vector<9x32xbf16> to vector<9x8xbf16>
    %cst_263 = arith.constant dense<0.000000e+00> : vector<8x9xf32>
    %768 = tpu.matmul %766, %767, %cst_263 {dimension_numbers = #tpu.dot_dimension_numbers<[1], [1], [0], [0], [0, 0, 1, 0], [], []>} : vector<8x8xbf16>, vector<9x8xbf16>, vector<8x9xf32> -> vector<8x9xf32>
    %cst_264 = arith.constant dense<0xFF800000> : vector<8xf32>
    %769 = vector.multi_reduction <maximumf>, %768, %cst_264 [1] : vector<8x9xf32> to vector<8xf32>
    %770 = vector.shape_cast %769 : vector<8xf32> to vector<8x1xf32>
    %771 = vector.broadcast %770 : vector<8x1xf32> to vector<8x9xf32>
    %772 = arith.subf %768, %771 : vector<8x9xf32>
    %773 = math.exp %772 : vector<8x9xf32>
    %cst_265 = arith.constant dense<0.000000e+00> : vector<8xf32>
    %774 = vector.multi_reduction <add>, %773, %cst_265 [1] : vector<8x9xf32> to vector<8xf32>
    %775 = vector.shape_cast %774 : vector<8xf32> to vector<8x1xf32>
    %776 = tpu.reciprocal %775 {approx = true} : vector<8x1xf32> -> vector<8x1xf32>
    %777 = vector.broadcast %776 : vector<8x1xf32> to vector<8x9xf32>
    %778 = arith.mulf %773, %777 : vector<8x9xf32>
    %779 = arith.truncf %778 : vector<8x9xf32> to vector<8x9xbf16>
    %780 = vector.extract_strided_slice %717 {offsets = [0, 24], sizes = [9, 8], strides = [1, 1]} : vector<9x32xbf16> to vector<9x8xbf16>
    %cst_266 = arith.constant dense<0.000000e+00> : vector<8x8xf32>
    %781 = tpu.matmul %779, %780, %cst_266 {dimension_numbers = #tpu.dot_dimension_numbers<[1], [0], [0], [1], [0, 0, 1, 1], [], []>} : vector<8x9xbf16>, vector<9x8xbf16>, vector<8x8xf32> -> vector<8x8xf32>
    %782 = tpu.concatenate %733, %749, %765, %781 in 1 : vector<8x8xf32>, vector<8x8xf32>, vector<8x8xf32>, vector<8x8xf32> -> vector<8x32xf32>
    %783 = vector.extract_strided_slice %700 {offsets = [8, 0], sizes = [8, 32], strides = [1, 1]} : vector<16x32xbf16> to vector<8x32xbf16>
    %784 = vector.extract_strided_slice %709 {offsets = [9, 0], sizes = [9, 32], strides = [1, 1]} : vector<18x32xbf16> to vector<9x32xbf16>
    %785 = vector.extract_strided_slice %710 {offsets = [9, 0], sizes = [9, 32], strides = [1, 1]} : vector<18x32xbf16> to vector<9x32xbf16>
    %786 = vector.extract_strided_slice %783 {offsets = [0, 0], sizes = [8, 8], strides = [1, 1]} : vector<8x32xbf16> to vector<8x8xbf16>
    %787 = vector.extract_strided_slice %784 {offsets = [0, 0], sizes = [9, 8], strides = [1, 1]} : vector<9x32xbf16> to vector<9x8xbf16>
    %cst_267 = arith.constant dense<0.000000e+00> : vector<8x9xf32>
    %788 = tpu.matmul %786, %787, %cst_267 {dimension_numbers = #tpu.dot_dimension_numbers<[1], [1], [0], [0], [0, 0, 1, 0], [], []>} : vector<8x8xbf16>, vector<9x8xbf16>, vector<8x9xf32> -> vector<8x9xf32>
    %cst_268 = arith.constant dense<0xFF800000> : vector<8xf32>
    %789 = vector.multi_reduction <maximumf>, %788, %cst_268 [1] : vector<8x9xf32> to vector<8xf32>
    %790 = vector.shape_cast %789 : vector<8xf32> to vector<8x1xf32>
    %791 = vector.broadcast %790 : vector<8x1xf32> to vector<8x9xf32>
    %792 = arith.subf %788, %791 : vector<8x9xf32>
    %793 = math.exp %792 : vector<8x9xf32>
    %cst_269 = arith.constant dense<0.000000e+00> : vector<8xf32>
    %794 = vector.multi_reduction <add>, %793, %cst_269 [1] : vector<8x9xf32> to vector<8xf32>
    %795 = vector.shape_cast %794 : vector<8xf32> to vector<8x1xf32>
    %796 = tpu.reciprocal %795 {approx = true} : vector<8x1xf32> -> vector<8x1xf32>
    %797 = vector.broadcast %796 : vector<8x1xf32> to vector<8x9xf32>
    %798 = arith.mulf %793, %797 : vector<8x9xf32>
    %799 = arith.truncf %798 : vector<8x9xf32> to vector<8x9xbf16>
    %800 = vector.extract_strided_slice %785 {offsets = [0, 0], sizes = [9, 8], strides = [1, 1]} : vector<9x32xbf16> to vector<9x8xbf16>
    %cst_270 = arith.constant dense<0.000000e+00> : vector<8x8xf32>
    %801 = tpu.matmul %799, %800, %cst_270 {dimension_numbers = #tpu.dot_dimension_numbers<[1], [0], [0], [1], [0, 0, 1, 1], [], []>} : vector<8x9xbf16>, vector<9x8xbf16>, vector<8x8xf32> -> vector<8x8xf32>
    %802 = vector.extract_strided_slice %783 {offsets = [0, 8], sizes = [8, 8], strides = [1, 1]} : vector<8x32xbf16> to vector<8x8xbf16>
    %803 = vector.extract_strided_slice %784 {offsets = [0, 8], sizes = [9, 8], strides = [1, 1]} : vector<9x32xbf16> to vector<9x8xbf16>
    %cst_271 = arith.constant dense<0.000000e+00> : vector<8x9xf32>
    %804 = tpu.matmul %802, %803, %cst_271 {dimension_numbers = #tpu.dot_dimension_numbers<[1], [1], [0], [0], [0, 0, 1, 0], [], []>} : vector<8x8xbf16>, vector<9x8xbf16>, vector<8x9xf32> -> vector<8x9xf32>
    %cst_272 = arith.constant dense<0xFF800000> : vector<8xf32>
    %805 = vector.multi_reduction <maximumf>, %804, %cst_272 [1] : vector<8x9xf32> to vector<8xf32>
    %806 = vector.shape_cast %805 : vector<8xf32> to vector<8x1xf32>
    %807 = vector.broadcast %806 : vector<8x1xf32> to vector<8x9xf32>
    %808 = arith.subf %804, %807 : vector<8x9xf32>
    %809 = math.exp %808 : vector<8x9xf32>
    %cst_273 = arith.constant dense<0.000000e+00> : vector<8xf32>
    %810 = vector.multi_reduction <add>, %809, %cst_273 [1] : vector<8x9xf32> to vector<8xf32>
    %811 = vector.shape_cast %810 : vector<8xf32> to vector<8x1xf32>
    %812 = tpu.reciprocal %811 {approx = true} : vector<8x1xf32> -> vector<8x1xf32>
    %813 = vector.broadcast %812 : vector<8x1xf32> to vector<8x9xf32>
    %814 = arith.mulf %809, %813 : vector<8x9xf32>
    %815 = arith.truncf %814 : vector<8x9xf32> to vector<8x9xbf16>
    %816 = vector.extract_strided_slice %785 {offsets = [0, 8], sizes = [9, 8], strides = [1, 1]} : vector<9x32xbf16> to vector<9x8xbf16>
    %cst_274 = arith.constant dense<0.000000e+00> : vector<8x8xf32>
    %817 = tpu.matmul %815, %816, %cst_274 {dimension_numbers = #tpu.dot_dimension_numbers<[1], [0], [0], [1], [0, 0, 1, 1], [], []>} : vector<8x9xbf16>, vector<9x8xbf16>, vector<8x8xf32> -> vector<8x8xf32>
    %818 = vector.extract_strided_slice %783 {offsets = [0, 16], sizes = [8, 8], strides = [1, 1]} : vector<8x32xbf16> to vector<8x8xbf16>
    %819 = vector.extract_strided_slice %784 {offsets = [0, 16], sizes = [9, 8], strides = [1, 1]} : vector<9x32xbf16> to vector<9x8xbf16>
    %cst_275 = arith.constant dense<0.000000e+00> : vector<8x9xf32>
    %820 = tpu.matmul %818, %819, %cst_275 {dimension_numbers = #tpu.dot_dimension_numbers<[1], [1], [0], [0], [0, 0, 1, 0], [], []>} : vector<8x8xbf16>, vector<9x8xbf16>, vector<8x9xf32> -> vector<8x9xf32>
    %cst_276 = arith.constant dense<0xFF800000> : vector<8xf32>
    %821 = vector.multi_reduction <maximumf>, %820, %cst_276 [1] : vector<8x9xf32> to vector<8xf32>
    %822 = vector.shape_cast %821 : vector<8xf32> to vector<8x1xf32>
    %823 = vector.broadcast %822 : vector<8x1xf32> to vector<8x9xf32>
    %824 = arith.subf %820, %823 : vector<8x9xf32>
    %825 = math.exp %824 : vector<8x9xf32>
    %cst_277 = arith.constant dense<0.000000e+00> : vector<8xf32>
    %826 = vector.multi_reduction <add>, %825, %cst_277 [1] : vector<8x9xf32> to vector<8xf32>
    %827 = vector.shape_cast %826 : vector<8xf32> to vector<8x1xf32>
    %828 = tpu.reciprocal %827 {approx = true} : vector<8x1xf32> -> vector<8x1xf32>
    %829 = vector.broadcast %828 : vector<8x1xf32> to vector<8x9xf32>
    %830 = arith.mulf %825, %829 : vector<8x9xf32>
    %831 = arith.truncf %830 : vector<8x9xf32> to vector<8x9xbf16>
    %832 = vector.extract_strided_slice %785 {offsets = [0, 16], sizes = [9, 8], strides = [1, 1]} : vector<9x32xbf16> to vector<9x8xbf16>
    %cst_278 = arith.constant dense<0.000000e+00> : vector<8x8xf32>
    %833 = tpu.matmul %831, %832, %cst_278 {dimension_numbers = #tpu.dot_dimension_numbers<[1], [0], [0], [1], [0, 0, 1, 1], [], []>} : vector<8x9xbf16>, vector<9x8xbf16>, vector<8x8xf32> -> vector<8x8xf32>
    %834 = vector.extract_strided_slice %783 {offsets = [0, 24], sizes = [8, 8], strides = [1, 1]} : vector<8x32xbf16> to vector<8x8xbf16>
    %835 = vector.extract_strided_slice %784 {offsets = [0, 24], sizes = [9, 8], strides = [1, 1]} : vector<9x32xbf16> to vector<9x8xbf16>
    %cst_279 = arith.constant dense<0.000000e+00> : vector<8x9xf32>
    %836 = tpu.matmul %834, %835, %cst_279 {dimension_numbers = #tpu.dot_dimension_numbers<[1], [1], [0], [0], [0, 0, 1, 0], [], []>} : vector<8x8xbf16>, vector<9x8xbf16>, vector<8x9xf32> -> vector<8x9xf32>
    %cst_280 = arith.constant dense<0xFF800000> : vector<8xf32>
    %837 = vector.multi_reduction <maximumf>, %836, %cst_280 [1] : vector<8x9xf32> to vector<8xf32>
    %838 = vector.shape_cast %837 : vector<8xf32> to vector<8x1xf32>
    %839 = vector.broadcast %838 : vector<8x1xf32> to vector<8x9xf32>
    %840 = arith.subf %836, %839 : vector<8x9xf32>
    %841 = math.exp %840 : vector<8x9xf32>
    %cst_281 = arith.constant dense<0.000000e+00> : vector<8xf32>
    %842 = vector.multi_reduction <add>, %841, %cst_281 [1] : vector<8x9xf32> to vector<8xf32>
    %843 = vector.shape_cast %842 : vector<8xf32> to vector<8x1xf32>
    %844 = tpu.reciprocal %843 {approx = true} : vector<8x1xf32> -> vector<8x1xf32>
    %845 = vector.broadcast %844 : vector<8x1xf32> to vector<8x9xf32>
    %846 = arith.mulf %841, %845 : vector<8x9xf32>
    %847 = arith.truncf %846 : vector<8x9xf32> to vector<8x9xbf16>
    %848 = vector.extract_strided_slice %785 {offsets = [0, 24], sizes = [9, 8], strides = [1, 1]} : vector<9x32xbf16> to vector<9x8xbf16>
    %cst_282 = arith.constant dense<0.000000e+00> : vector<8x8xf32>
    %849 = tpu.matmul %847, %848, %cst_282 {dimension_numbers = #tpu.dot_dimension_numbers<[1], [0], [0], [1], [0, 0, 1, 1], [], []>} : vector<8x9xbf16>, vector<9x8xbf16>, vector<8x8xf32> -> vector<8x8xf32>
    %850 = tpu.concatenate %801, %817, %833, %849 in 1 : vector<8x8xf32>, vector<8x8xf32>, vector<8x8xf32>, vector<8x8xf32> -> vector<8x32xf32>
    %851 = tpu.concatenate %782, %850 in 0 : vector<8x32xf32>, vector<8x32xf32> -> vector<16x32xf32>
    %852 = arith.truncf %851 : vector<16x32xf32> to vector<16x32xbf16>
    %cst_283 = arith.constant dense<0.000000e+00> : vector<16x32xf32>
    %853 = tpu.matmul %852, %712, %cst_283 {dimension_numbers = #tpu.dot_dimension_numbers<[1], [0], [0], [1], [0, 0, 1, 1], [], []>} : vector<16x32xbf16>, vector<32x32xbf16>, vector<16x32xf32> -> vector<16x32xf32>
    %854 = vector.broadcast %714 : vector<1x32xf32> to vector<16x32xf32>
    %855 = arith.addf %853, %854 : vector<16x32xf32>
    %856 = arith.addf %691, %855 : vector<16x32xf32>
    %857 = vector.extract_strided_slice %497 {offsets = [1, 0, 0], sizes = [1, 1, 32], strides = [1, 1, 1]} : vector<3x1x32xf32> to vector<1x1x32xf32>
    %858 = vector.shape_cast %857 : vector<1x1x32xf32> to vector<1x32xf32>
    %859 = vector.extract_strided_slice %499 {offsets = [1, 0, 0], sizes = [1, 1, 32], strides = [1, 1, 1]} : vector<3x1x32xf32> to vector<1x1x32xf32>
    %860 = vector.shape_cast %859 : vector<1x1x32xf32> to vector<1x32xf32>
    %cst_284 = arith.constant dense<0.000000e+00> : vector<16xf32>
    %861 = vector.multi_reduction <add>, %856, %cst_284 [1] : vector<16x32xf32> to vector<16xf32>
    %862 = vector.shape_cast %861 : vector<16xf32> to vector<16x1xf32>
    %cst_285 = arith.constant 3.200000e+01 : f32
    %863 = vector.broadcast %cst_285 : f32 to vector<16x1xf32>
    %864 = arith.divf %862, %863 : vector<16x1xf32>
    %865 = arith.mulf %856, %856 : vector<16x32xf32>
    %cst_286 = arith.constant dense<0.000000e+00> : vector<16xf32>
    %866 = vector.multi_reduction <add>, %865, %cst_286 [1] : vector<16x32xf32> to vector<16xf32>
    %867 = vector.shape_cast %866 : vector<16xf32> to vector<16x1xf32>
    %cst_287 = arith.constant 3.200000e+01 : f32
    %868 = vector.broadcast %cst_287 : f32 to vector<16x1xf32>
    %869 = arith.divf %867, %868 : vector<16x1xf32>
    %870 = arith.mulf %864, %864 : vector<16x1xf32>
    %871 = arith.subf %869, %870 : vector<16x1xf32>
    %cst_288 = arith.constant 9.99999974E-6 : f32
    %872 = vector.broadcast %cst_288 : f32 to vector<16x1xf32>
    %873 = arith.addf %871, %872 : vector<16x1xf32>
    %874 = math.rsqrt %873 : vector<16x1xf32>
    %875 = vector.broadcast %864 : vector<16x1xf32> to vector<16x32xf32>
    %876 = arith.subf %856, %875 : vector<16x32xf32>
    %877 = vector.broadcast %874 : vector<16x1xf32> to vector<16x32xf32>
    %878 = vector.broadcast %858 : vector<1x32xf32> to vector<16x32xf32>
    %879 = arith.mulf %877, %878 : vector<16x32xf32>
    %880 = arith.mulf %876, %879 : vector<16x32xf32>
    %881 = vector.broadcast %860 : vector<1x32xf32> to vector<16x32xf32>
    %882 = arith.addf %880, %881 : vector<16x32xf32>
    %883 = arith.truncf %882 : vector<16x32xf32> to vector<16x32xbf16>
    %c0_289 = arith.constant 0 : index
    %c0_290 = arith.constant 0 : index
    %c0_291 = arith.constant 0 : index
    %884 = vector.load %arg26[%c0_289, %c0_290, %c0_291] : memref<2x32x64xbf16, #tpu.memory_space<vmem>>, vector<1x32x64xbf16>
    %885 = vector.shape_cast %884 : vector<1x32x64xbf16> to vector<32x64xbf16>
    %cst_292 = arith.constant dense<0.000000e+00> : vector<16x64xf32>
    %886 = tpu.matmul %883, %885, %cst_292 {dimension_numbers = #tpu.dot_dimension_numbers<[1], [0], [0], [1], [0, 0, 1, 1], [], []>} : vector<16x32xbf16>, vector<32x64xbf16>, vector<16x64xf32> -> vector<16x64xf32>
    %c0_293 = arith.constant 0 : index
    %c0_294 = arith.constant 0 : index
    %c0_295 = arith.constant 0 : index
    %887 = vector.load %arg27[%c0_293, %c0_294, %c0_295] : memref<2x1x64xf32, #tpu.memory_space<vmem>>, vector<1x1x64xf32>
    %888 = vector.shape_cast %887 : vector<1x1x64xf32> to vector<1x64xf32>
    %889 = vector.broadcast %888 : vector<1x64xf32> to vector<16x64xf32>
    %890 = arith.addf %886, %889 : vector<16x64xf32>
    %cst_296 = arith.constant 0.000000e+00 : f32
    %891 = vector.broadcast %cst_296 : f32 to vector<16x64xf32>
    %892 = arith.maximumf %890, %891 : vector<16x64xf32>
    %893 = arith.truncf %892 : vector<16x64xf32> to vector<16x64xbf16>
    %c0_297 = arith.constant 0 : index
    %c0_298 = arith.constant 0 : index
    %c0_299 = arith.constant 0 : index
    %894 = vector.load %arg28[%c0_297, %c0_298, %c0_299] : memref<2x64x32xbf16, #tpu.memory_space<vmem>>, vector<1x64x32xbf16>
    %895 = vector.shape_cast %894 : vector<1x64x32xbf16> to vector<64x32xbf16>
    %cst_300 = arith.constant dense<0.000000e+00> : vector<16x32xf32>
    %896 = tpu.matmul %893, %895, %cst_300 {dimension_numbers = #tpu.dot_dimension_numbers<[1], [0], [0], [1], [0, 0, 1, 1], [], []>} : vector<16x64xbf16>, vector<64x32xbf16>, vector<16x32xf32> -> vector<16x32xf32>
    %c0_301 = arith.constant 0 : index
    %c0_302 = arith.constant 0 : index
    %c0_303 = arith.constant 0 : index
    %897 = vector.load %arg29[%c0_301, %c0_302, %c0_303] : memref<2x1x32xf32, #tpu.memory_space<vmem>>, vector<1x1x32xf32>
    %898 = vector.shape_cast %897 : vector<1x1x32xf32> to vector<1x32xf32>
    %899 = vector.broadcast %898 : vector<1x32xf32> to vector<16x32xf32>
    %900 = arith.addf %896, %899 : vector<16x32xf32>
    %901 = arith.addf %882, %900 : vector<16x32xf32>
    %902 = vector.extract_strided_slice %497 {offsets = [2, 0, 0], sizes = [1, 1, 32], strides = [1, 1, 1]} : vector<3x1x32xf32> to vector<1x1x32xf32>
    %903 = vector.shape_cast %902 : vector<1x1x32xf32> to vector<1x32xf32>
    %904 = vector.extract_strided_slice %499 {offsets = [2, 0, 0], sizes = [1, 1, 32], strides = [1, 1, 1]} : vector<3x1x32xf32> to vector<1x1x32xf32>
    %905 = vector.shape_cast %904 : vector<1x1x32xf32> to vector<1x32xf32>
    %cst_304 = arith.constant dense<0.000000e+00> : vector<16xf32>
    %906 = vector.multi_reduction <add>, %901, %cst_304 [1] : vector<16x32xf32> to vector<16xf32>
    %907 = vector.shape_cast %906 : vector<16xf32> to vector<16x1xf32>
    %cst_305 = arith.constant 3.200000e+01 : f32
    %908 = vector.broadcast %cst_305 : f32 to vector<16x1xf32>
    %909 = arith.divf %907, %908 : vector<16x1xf32>
    %910 = arith.mulf %901, %901 : vector<16x32xf32>
    %cst_306 = arith.constant dense<0.000000e+00> : vector<16xf32>
    %911 = vector.multi_reduction <add>, %910, %cst_306 [1] : vector<16x32xf32> to vector<16xf32>
    %912 = vector.shape_cast %911 : vector<16xf32> to vector<16x1xf32>
    %cst_307 = arith.constant 3.200000e+01 : f32
    %913 = vector.broadcast %cst_307 : f32 to vector<16x1xf32>
    %914 = arith.divf %912, %913 : vector<16x1xf32>
    %915 = arith.mulf %909, %909 : vector<16x1xf32>
    %916 = arith.subf %914, %915 : vector<16x1xf32>
    %cst_308 = arith.constant 9.99999974E-6 : f32
    %917 = vector.broadcast %cst_308 : f32 to vector<16x1xf32>
    %918 = arith.addf %916, %917 : vector<16x1xf32>
    %919 = math.rsqrt %918 : vector<16x1xf32>
    %920 = vector.broadcast %909 : vector<16x1xf32> to vector<16x32xf32>
    %921 = arith.subf %901, %920 : vector<16x32xf32>
    %922 = vector.broadcast %919 : vector<16x1xf32> to vector<16x32xf32>
    %923 = vector.broadcast %903 : vector<1x32xf32> to vector<16x32xf32>
    %924 = arith.mulf %922, %923 : vector<16x32xf32>
    %925 = arith.mulf %921, %924 : vector<16x32xf32>
    %926 = vector.broadcast %905 : vector<1x32xf32> to vector<16x32xf32>
    %927 = arith.addf %925, %926 : vector<16x32xf32>
    %c1_309 = arith.constant 1 : index
    %c0_310 = arith.constant 0 : index
    %c0_311 = arith.constant 0 : index
    %c0_312 = arith.constant 0 : index
    %928 = vector.load %arg24[%c1_309, %c0_310, %c0_311, %c0_312] : memref<2x3x1x32xf32, #tpu.memory_space<vmem>>, vector<1x3x1x32xf32>
    %929 = vector.shape_cast %928 : vector<1x3x1x32xf32> to vector<3x1x32xf32>
    %c1_313 = arith.constant 1 : index
    %c0_314 = arith.constant 0 : index
    %c0_315 = arith.constant 0 : index
    %c0_316 = arith.constant 0 : index
    %930 = vector.load %arg25[%c1_313, %c0_314, %c0_315, %c0_316] : memref<2x3x1x32xf32, #tpu.memory_space<vmem>>, vector<1x3x1x32xf32>
    %931 = vector.shape_cast %930 : vector<1x3x1x32xf32> to vector<3x1x32xf32>
    %932 = arith.truncf %927 : vector<16x32xf32> to vector<16x32xbf16>
    %c1_317 = arith.constant 1 : index
    %c0_318 = arith.constant 0 : index
    %c0_319 = arith.constant 0 : index
    %933 = vector.load %arg14[%c1_317, %c0_318, %c0_319] : memref<2x32x96xbf16, #tpu.memory_space<vmem>>, vector<1x32x96xbf16>
    %934 = vector.shape_cast %933 : vector<1x32x96xbf16> to vector<32x96xbf16>
    %cst_320 = arith.constant dense<0.000000e+00> : vector<16x96xf32>
    %935 = tpu.matmul %932, %934, %cst_320 {dimension_numbers = #tpu.dot_dimension_numbers<[1], [0], [0], [1], [0, 0, 1, 1], [], []>} : vector<16x32xbf16>, vector<32x96xbf16>, vector<16x96xf32> -> vector<16x96xf32>
    %c1_321 = arith.constant 1 : index
    %c0_322 = arith.constant 0 : index
    %c0_323 = arith.constant 0 : index
    %936 = vector.load %arg15[%c1_321, %c0_322, %c0_323] : memref<2x1x96xf32, #tpu.memory_space<vmem>>, vector<1x1x96xf32>
    %937 = vector.shape_cast %936 : vector<1x1x96xf32> to vector<1x96xf32>
    %938 = vector.broadcast %937 : vector<1x96xf32> to vector<16x96xf32>
    %939 = arith.addf %935, %938 : vector<16x96xf32>
    %940 = arith.truncf %939 : vector<16x96xf32> to vector<16x96xbf16>
    %941 = vector.extract_strided_slice %940 {offsets = [0, 0], sizes = [16, 32], strides = [1, 1]} : vector<16x96xbf16> to vector<16x32xbf16>
    %942 = vector.extract_strided_slice %940 {offsets = [0, 32], sizes = [16, 32], strides = [1, 1]} : vector<16x96xbf16> to vector<16x32xbf16>
    %943 = vector.extract_strided_slice %940 {offsets = [0, 64], sizes = [16, 32], strides = [1, 1]} : vector<16x96xbf16> to vector<16x32xbf16>
    %c1_324 = arith.constant 1 : index
    %c0_325 = arith.constant 0 : index
    %c0_326 = arith.constant 0 : index
    %944 = vector.load %arg16[%c1_324, %c0_325, %c0_326] : memref<2x32x32xbf16, #tpu.memory_space<vmem>>, vector<1x32x32xbf16>
    %945 = vector.shape_cast %944 : vector<1x32x32xbf16> to vector<32x32xbf16>
    %c1_327 = arith.constant 1 : index
    %c0_328 = arith.constant 0 : index
    %c0_329 = arith.constant 0 : index
    %946 = vector.load %arg17[%c1_327, %c0_328, %c0_329] : memref<2x1x32xf32, #tpu.memory_space<vmem>>, vector<1x1x32xf32>
    %947 = vector.shape_cast %946 : vector<1x1x32xf32> to vector<1x32xf32>
    %948 = vector.extract_strided_slice %941 {offsets = [0, 0], sizes = [8, 32], strides = [1, 1]} : vector<16x32xbf16> to vector<8x32xbf16>
    %949 = vector.extract_strided_slice %942 {offsets = [0, 0], sizes = [8, 32], strides = [1, 1]} : vector<16x32xbf16> to vector<8x32xbf16>
    %950 = vector.extract_strided_slice %943 {offsets = [0, 0], sizes = [8, 32], strides = [1, 1]} : vector<16x32xbf16> to vector<8x32xbf16>
    %951 = vector.extract_strided_slice %948 {offsets = [0, 0], sizes = [8, 8], strides = [1, 1]} : vector<8x32xbf16> to vector<8x8xbf16>
    %952 = vector.extract_strided_slice %949 {offsets = [0, 0], sizes = [8, 8], strides = [1, 1]} : vector<8x32xbf16> to vector<8x8xbf16>
    %cst_330 = arith.constant dense<0.000000e+00> : vector<8x8xf32>
    %953 = tpu.matmul %951, %952, %cst_330 {dimension_numbers = #tpu.dot_dimension_numbers<[1], [1], [0], [0], [0, 0, 1, 0], [], []>} : vector<8x8xbf16>, vector<8x8xbf16>, vector<8x8xf32> -> vector<8x8xf32>
    %954 = arith.addf %953, %494 : vector<8x8xf32>
    %cst_331 = arith.constant dense<0xFF800000> : vector<8xf32>
    %955 = vector.multi_reduction <maximumf>, %954, %cst_331 [1] : vector<8x8xf32> to vector<8xf32>
    %956 = vector.shape_cast %955 : vector<8xf32> to vector<8x1xf32>
    %957 = vector.broadcast %956 : vector<8x1xf32> to vector<8x8xf32>
    %958 = arith.subf %954, %957 : vector<8x8xf32>
    %959 = math.exp %958 : vector<8x8xf32>
    %cst_332 = arith.constant dense<0.000000e+00> : vector<8xf32>
    %960 = vector.multi_reduction <add>, %959, %cst_332 [1] : vector<8x8xf32> to vector<8xf32>
    %961 = vector.shape_cast %960 : vector<8xf32> to vector<8x1xf32>
    %962 = tpu.reciprocal %961 {approx = true} : vector<8x1xf32> -> vector<8x1xf32>
    %963 = vector.broadcast %962 : vector<8x1xf32> to vector<8x8xf32>
    %964 = arith.mulf %959, %963 : vector<8x8xf32>
    %965 = arith.truncf %964 : vector<8x8xf32> to vector<8x8xbf16>
    %966 = vector.extract_strided_slice %950 {offsets = [0, 0], sizes = [8, 8], strides = [1, 1]} : vector<8x32xbf16> to vector<8x8xbf16>
    %cst_333 = arith.constant dense<0.000000e+00> : vector<8x8xf32>
    %967 = tpu.matmul %965, %966, %cst_333 {dimension_numbers = #tpu.dot_dimension_numbers<[1], [0], [0], [1], [0, 0, 1, 1], [], []>} : vector<8x8xbf16>, vector<8x8xbf16>, vector<8x8xf32> -> vector<8x8xf32>
    %968 = vector.extract_strided_slice %948 {offsets = [0, 8], sizes = [8, 8], strides = [1, 1]} : vector<8x32xbf16> to vector<8x8xbf16>
    %969 = vector.extract_strided_slice %949 {offsets = [0, 8], sizes = [8, 8], strides = [1, 1]} : vector<8x32xbf16> to vector<8x8xbf16>
    %cst_334 = arith.constant dense<0.000000e+00> : vector<8x8xf32>
    %970 = tpu.matmul %968, %969, %cst_334 {dimension_numbers = #tpu.dot_dimension_numbers<[1], [1], [0], [0], [0, 0, 1, 0], [], []>} : vector<8x8xbf16>, vector<8x8xbf16>, vector<8x8xf32> -> vector<8x8xf32>
    %971 = arith.addf %970, %494 : vector<8x8xf32>
    %cst_335 = arith.constant dense<0xFF800000> : vector<8xf32>
    %972 = vector.multi_reduction <maximumf>, %971, %cst_335 [1] : vector<8x8xf32> to vector<8xf32>
    %973 = vector.shape_cast %972 : vector<8xf32> to vector<8x1xf32>
    %974 = vector.broadcast %973 : vector<8x1xf32> to vector<8x8xf32>
    %975 = arith.subf %971, %974 : vector<8x8xf32>
    %976 = math.exp %975 : vector<8x8xf32>
    %cst_336 = arith.constant dense<0.000000e+00> : vector<8xf32>
    %977 = vector.multi_reduction <add>, %976, %cst_336 [1] : vector<8x8xf32> to vector<8xf32>
    %978 = vector.shape_cast %977 : vector<8xf32> to vector<8x1xf32>
    %979 = tpu.reciprocal %978 {approx = true} : vector<8x1xf32> -> vector<8x1xf32>
    %980 = vector.broadcast %979 : vector<8x1xf32> to vector<8x8xf32>
    %981 = arith.mulf %976, %980 : vector<8x8xf32>
    %982 = arith.truncf %981 : vector<8x8xf32> to vector<8x8xbf16>
    %983 = vector.extract_strided_slice %950 {offsets = [0, 8], sizes = [8, 8], strides = [1, 1]} : vector<8x32xbf16> to vector<8x8xbf16>
    %cst_337 = arith.constant dense<0.000000e+00> : vector<8x8xf32>
    %984 = tpu.matmul %982, %983, %cst_337 {dimension_numbers = #tpu.dot_dimension_numbers<[1], [0], [0], [1], [0, 0, 1, 1], [], []>} : vector<8x8xbf16>, vector<8x8xbf16>, vector<8x8xf32> -> vector<8x8xf32>
    %985 = vector.extract_strided_slice %948 {offsets = [0, 16], sizes = [8, 8], strides = [1, 1]} : vector<8x32xbf16> to vector<8x8xbf16>
    %986 = vector.extract_strided_slice %949 {offsets = [0, 16], sizes = [8, 8], strides = [1, 1]} : vector<8x32xbf16> to vector<8x8xbf16>
    %cst_338 = arith.constant dense<0.000000e+00> : vector<8x8xf32>
    %987 = tpu.matmul %985, %986, %cst_338 {dimension_numbers = #tpu.dot_dimension_numbers<[1], [1], [0], [0], [0, 0, 1, 0], [], []>} : vector<8x8xbf16>, vector<8x8xbf16>, vector<8x8xf32> -> vector<8x8xf32>
    %988 = arith.addf %987, %494 : vector<8x8xf32>
    %cst_339 = arith.constant dense<0xFF800000> : vector<8xf32>
    %989 = vector.multi_reduction <maximumf>, %988, %cst_339 [1] : vector<8x8xf32> to vector<8xf32>
    %990 = vector.shape_cast %989 : vector<8xf32> to vector<8x1xf32>
    %991 = vector.broadcast %990 : vector<8x1xf32> to vector<8x8xf32>
    %992 = arith.subf %988, %991 : vector<8x8xf32>
    %993 = math.exp %992 : vector<8x8xf32>
    %cst_340 = arith.constant dense<0.000000e+00> : vector<8xf32>
    %994 = vector.multi_reduction <add>, %993, %cst_340 [1] : vector<8x8xf32> to vector<8xf32>
    %995 = vector.shape_cast %994 : vector<8xf32> to vector<8x1xf32>
    %996 = tpu.reciprocal %995 {approx = true} : vector<8x1xf32> -> vector<8x1xf32>
    %997 = vector.broadcast %996 : vector<8x1xf32> to vector<8x8xf32>
    %998 = arith.mulf %993, %997 : vector<8x8xf32>
    %999 = arith.truncf %998 : vector<8x8xf32> to vector<8x8xbf16>
    %1000 = vector.extract_strided_slice %950 {offsets = [0, 16], sizes = [8, 8], strides = [1, 1]} : vector<8x32xbf16> to vector<8x8xbf16>
    %cst_341 = arith.constant dense<0.000000e+00> : vector<8x8xf32>
    %1001 = tpu.matmul %999, %1000, %cst_341 {dimension_numbers = #tpu.dot_dimension_numbers<[1], [0], [0], [1], [0, 0, 1, 1], [], []>} : vector<8x8xbf16>, vector<8x8xbf16>, vector<8x8xf32> -> vector<8x8xf32>
    %1002 = vector.extract_strided_slice %948 {offsets = [0, 24], sizes = [8, 8], strides = [1, 1]} : vector<8x32xbf16> to vector<8x8xbf16>
    %1003 = vector.extract_strided_slice %949 {offsets = [0, 24], sizes = [8, 8], strides = [1, 1]} : vector<8x32xbf16> to vector<8x8xbf16>
    %cst_342 = arith.constant dense<0.000000e+00> : vector<8x8xf32>
    %1004 = tpu.matmul %1002, %1003, %cst_342 {dimension_numbers = #tpu.dot_dimension_numbers<[1], [1], [0], [0], [0, 0, 1, 0], [], []>} : vector<8x8xbf16>, vector<8x8xbf16>, vector<8x8xf32> -> vector<8x8xf32>
    %1005 = arith.addf %1004, %494 : vector<8x8xf32>
    %cst_343 = arith.constant dense<0xFF800000> : vector<8xf32>
    %1006 = vector.multi_reduction <maximumf>, %1005, %cst_343 [1] : vector<8x8xf32> to vector<8xf32>
    %1007 = vector.shape_cast %1006 : vector<8xf32> to vector<8x1xf32>
    %1008 = vector.broadcast %1007 : vector<8x1xf32> to vector<8x8xf32>
    %1009 = arith.subf %1005, %1008 : vector<8x8xf32>
    %1010 = math.exp %1009 : vector<8x8xf32>
    %cst_344 = arith.constant dense<0.000000e+00> : vector<8xf32>
    %1011 = vector.multi_reduction <add>, %1010, %cst_344 [1] : vector<8x8xf32> to vector<8xf32>
    %1012 = vector.shape_cast %1011 : vector<8xf32> to vector<8x1xf32>
    %1013 = tpu.reciprocal %1012 {approx = true} : vector<8x1xf32> -> vector<8x1xf32>
    %1014 = vector.broadcast %1013 : vector<8x1xf32> to vector<8x8xf32>
    %1015 = arith.mulf %1010, %1014 : vector<8x8xf32>
    %1016 = arith.truncf %1015 : vector<8x8xf32> to vector<8x8xbf16>
    %1017 = vector.extract_strided_slice %950 {offsets = [0, 24], sizes = [8, 8], strides = [1, 1]} : vector<8x32xbf16> to vector<8x8xbf16>
    %cst_345 = arith.constant dense<0.000000e+00> : vector<8x8xf32>
    %1018 = tpu.matmul %1016, %1017, %cst_345 {dimension_numbers = #tpu.dot_dimension_numbers<[1], [0], [0], [1], [0, 0, 1, 1], [], []>} : vector<8x8xbf16>, vector<8x8xbf16>, vector<8x8xf32> -> vector<8x8xf32>
    %1019 = tpu.concatenate %967, %984, %1001, %1018 in 1 : vector<8x8xf32>, vector<8x8xf32>, vector<8x8xf32>, vector<8x8xf32> -> vector<8x32xf32>
    %1020 = vector.extract_strided_slice %941 {offsets = [8, 0], sizes = [8, 32], strides = [1, 1]} : vector<16x32xbf16> to vector<8x32xbf16>
    %1021 = vector.extract_strided_slice %942 {offsets = [8, 0], sizes = [8, 32], strides = [1, 1]} : vector<16x32xbf16> to vector<8x32xbf16>
    %1022 = vector.extract_strided_slice %943 {offsets = [8, 0], sizes = [8, 32], strides = [1, 1]} : vector<16x32xbf16> to vector<8x32xbf16>
    %1023 = vector.extract_strided_slice %1020 {offsets = [0, 0], sizes = [8, 8], strides = [1, 1]} : vector<8x32xbf16> to vector<8x8xbf16>
    %1024 = vector.extract_strided_slice %1021 {offsets = [0, 0], sizes = [8, 8], strides = [1, 1]} : vector<8x32xbf16> to vector<8x8xbf16>
    %cst_346 = arith.constant dense<0.000000e+00> : vector<8x8xf32>
    %1025 = tpu.matmul %1023, %1024, %cst_346 {dimension_numbers = #tpu.dot_dimension_numbers<[1], [1], [0], [0], [0, 0, 1, 0], [], []>} : vector<8x8xbf16>, vector<8x8xbf16>, vector<8x8xf32> -> vector<8x8xf32>
    %1026 = arith.addf %1025, %494 : vector<8x8xf32>
    %cst_347 = arith.constant dense<0xFF800000> : vector<8xf32>
    %1027 = vector.multi_reduction <maximumf>, %1026, %cst_347 [1] : vector<8x8xf32> to vector<8xf32>
    %1028 = vector.shape_cast %1027 : vector<8xf32> to vector<8x1xf32>
    %1029 = vector.broadcast %1028 : vector<8x1xf32> to vector<8x8xf32>
    %1030 = arith.subf %1026, %1029 : vector<8x8xf32>
    %1031 = math.exp %1030 : vector<8x8xf32>
    %cst_348 = arith.constant dense<0.000000e+00> : vector<8xf32>
    %1032 = vector.multi_reduction <add>, %1031, %cst_348 [1] : vector<8x8xf32> to vector<8xf32>
    %1033 = vector.shape_cast %1032 : vector<8xf32> to vector<8x1xf32>
    %1034 = tpu.reciprocal %1033 {approx = true} : vector<8x1xf32> -> vector<8x1xf32>
    %1035 = vector.broadcast %1034 : vector<8x1xf32> to vector<8x8xf32>
    %1036 = arith.mulf %1031, %1035 : vector<8x8xf32>
    %1037 = arith.truncf %1036 : vector<8x8xf32> to vector<8x8xbf16>
    %1038 = vector.extract_strided_slice %1022 {offsets = [0, 0], sizes = [8, 8], strides = [1, 1]} : vector<8x32xbf16> to vector<8x8xbf16>
    %cst_349 = arith.constant dense<0.000000e+00> : vector<8x8xf32>
    %1039 = tpu.matmul %1037, %1038, %cst_349 {dimension_numbers = #tpu.dot_dimension_numbers<[1], [0], [0], [1], [0, 0, 1, 1], [], []>} : vector<8x8xbf16>, vector<8x8xbf16>, vector<8x8xf32> -> vector<8x8xf32>
    %1040 = vector.extract_strided_slice %1020 {offsets = [0, 8], sizes = [8, 8], strides = [1, 1]} : vector<8x32xbf16> to vector<8x8xbf16>
    %1041 = vector.extract_strided_slice %1021 {offsets = [0, 8], sizes = [8, 8], strides = [1, 1]} : vector<8x32xbf16> to vector<8x8xbf16>
    %cst_350 = arith.constant dense<0.000000e+00> : vector<8x8xf32>
    %1042 = tpu.matmul %1040, %1041, %cst_350 {dimension_numbers = #tpu.dot_dimension_numbers<[1], [1], [0], [0], [0, 0, 1, 0], [], []>} : vector<8x8xbf16>, vector<8x8xbf16>, vector<8x8xf32> -> vector<8x8xf32>
    %1043 = arith.addf %1042, %494 : vector<8x8xf32>
    %cst_351 = arith.constant dense<0xFF800000> : vector<8xf32>
    %1044 = vector.multi_reduction <maximumf>, %1043, %cst_351 [1] : vector<8x8xf32> to vector<8xf32>
    %1045 = vector.shape_cast %1044 : vector<8xf32> to vector<8x1xf32>
    %1046 = vector.broadcast %1045 : vector<8x1xf32> to vector<8x8xf32>
    %1047 = arith.subf %1043, %1046 : vector<8x8xf32>
    %1048 = math.exp %1047 : vector<8x8xf32>
    %cst_352 = arith.constant dense<0.000000e+00> : vector<8xf32>
    %1049 = vector.multi_reduction <add>, %1048, %cst_352 [1] : vector<8x8xf32> to vector<8xf32>
    %1050 = vector.shape_cast %1049 : vector<8xf32> to vector<8x1xf32>
    %1051 = tpu.reciprocal %1050 {approx = true} : vector<8x1xf32> -> vector<8x1xf32>
    %1052 = vector.broadcast %1051 : vector<8x1xf32> to vector<8x8xf32>
    %1053 = arith.mulf %1048, %1052 : vector<8x8xf32>
    %1054 = arith.truncf %1053 : vector<8x8xf32> to vector<8x8xbf16>
    %1055 = vector.extract_strided_slice %1022 {offsets = [0, 8], sizes = [8, 8], strides = [1, 1]} : vector<8x32xbf16> to vector<8x8xbf16>
    %cst_353 = arith.constant dense<0.000000e+00> : vector<8x8xf32>
    %1056 = tpu.matmul %1054, %1055, %cst_353 {dimension_numbers = #tpu.dot_dimension_numbers<[1], [0], [0], [1], [0, 0, 1, 1], [], []>} : vector<8x8xbf16>, vector<8x8xbf16>, vector<8x8xf32> -> vector<8x8xf32>
    %1057 = vector.extract_strided_slice %1020 {offsets = [0, 16], sizes = [8, 8], strides = [1, 1]} : vector<8x32xbf16> to vector<8x8xbf16>
    %1058 = vector.extract_strided_slice %1021 {offsets = [0, 16], sizes = [8, 8], strides = [1, 1]} : vector<8x32xbf16> to vector<8x8xbf16>
    %cst_354 = arith.constant dense<0.000000e+00> : vector<8x8xf32>
    %1059 = tpu.matmul %1057, %1058, %cst_354 {dimension_numbers = #tpu.dot_dimension_numbers<[1], [1], [0], [0], [0, 0, 1, 0], [], []>} : vector<8x8xbf16>, vector<8x8xbf16>, vector<8x8xf32> -> vector<8x8xf32>
    %1060 = arith.addf %1059, %494 : vector<8x8xf32>
    %cst_355 = arith.constant dense<0xFF800000> : vector<8xf32>
    %1061 = vector.multi_reduction <maximumf>, %1060, %cst_355 [1] : vector<8x8xf32> to vector<8xf32>
    %1062 = vector.shape_cast %1061 : vector<8xf32> to vector<8x1xf32>
    %1063 = vector.broadcast %1062 : vector<8x1xf32> to vector<8x8xf32>
    %1064 = arith.subf %1060, %1063 : vector<8x8xf32>
    %1065 = math.exp %1064 : vector<8x8xf32>
    %cst_356 = arith.constant dense<0.000000e+00> : vector<8xf32>
    %1066 = vector.multi_reduction <add>, %1065, %cst_356 [1] : vector<8x8xf32> to vector<8xf32>
    %1067 = vector.shape_cast %1066 : vector<8xf32> to vector<8x1xf32>
    %1068 = tpu.reciprocal %1067 {approx = true} : vector<8x1xf32> -> vector<8x1xf32>
    %1069 = vector.broadcast %1068 : vector<8x1xf32> to vector<8x8xf32>
    %1070 = arith.mulf %1065, %1069 : vector<8x8xf32>
    %1071 = arith.truncf %1070 : vector<8x8xf32> to vector<8x8xbf16>
    %1072 = vector.extract_strided_slice %1022 {offsets = [0, 16], sizes = [8, 8], strides = [1, 1]} : vector<8x32xbf16> to vector<8x8xbf16>
    %cst_357 = arith.constant dense<0.000000e+00> : vector<8x8xf32>
    %1073 = tpu.matmul %1071, %1072, %cst_357 {dimension_numbers = #tpu.dot_dimension_numbers<[1], [0], [0], [1], [0, 0, 1, 1], [], []>} : vector<8x8xbf16>, vector<8x8xbf16>, vector<8x8xf32> -> vector<8x8xf32>
    %1074 = vector.extract_strided_slice %1020 {offsets = [0, 24], sizes = [8, 8], strides = [1, 1]} : vector<8x32xbf16> to vector<8x8xbf16>
    %1075 = vector.extract_strided_slice %1021 {offsets = [0, 24], sizes = [8, 8], strides = [1, 1]} : vector<8x32xbf16> to vector<8x8xbf16>
    %cst_358 = arith.constant dense<0.000000e+00> : vector<8x8xf32>
    %1076 = tpu.matmul %1074, %1075, %cst_358 {dimension_numbers = #tpu.dot_dimension_numbers<[1], [1], [0], [0], [0, 0, 1, 0], [], []>} : vector<8x8xbf16>, vector<8x8xbf16>, vector<8x8xf32> -> vector<8x8xf32>
    %1077 = arith.addf %1076, %494 : vector<8x8xf32>
    %cst_359 = arith.constant dense<0xFF800000> : vector<8xf32>
    %1078 = vector.multi_reduction <maximumf>, %1077, %cst_359 [1] : vector<8x8xf32> to vector<8xf32>
    %1079 = vector.shape_cast %1078 : vector<8xf32> to vector<8x1xf32>
    %1080 = vector.broadcast %1079 : vector<8x1xf32> to vector<8x8xf32>
    %1081 = arith.subf %1077, %1080 : vector<8x8xf32>
    %1082 = math.exp %1081 : vector<8x8xf32>
    %cst_360 = arith.constant dense<0.000000e+00> : vector<8xf32>
    %1083 = vector.multi_reduction <add>, %1082, %cst_360 [1] : vector<8x8xf32> to vector<8xf32>
    %1084 = vector.shape_cast %1083 : vector<8xf32> to vector<8x1xf32>
    %1085 = tpu.reciprocal %1084 {approx = true} : vector<8x1xf32> -> vector<8x1xf32>
    %1086 = vector.broadcast %1085 : vector<8x1xf32> to vector<8x8xf32>
    %1087 = arith.mulf %1082, %1086 : vector<8x8xf32>
    %1088 = arith.truncf %1087 : vector<8x8xf32> to vector<8x8xbf16>
    %1089 = vector.extract_strided_slice %1022 {offsets = [0, 24], sizes = [8, 8], strides = [1, 1]} : vector<8x32xbf16> to vector<8x8xbf16>
    %cst_361 = arith.constant dense<0.000000e+00> : vector<8x8xf32>
    %1090 = tpu.matmul %1088, %1089, %cst_361 {dimension_numbers = #tpu.dot_dimension_numbers<[1], [0], [0], [1], [0, 0, 1, 1], [], []>} : vector<8x8xbf16>, vector<8x8xbf16>, vector<8x8xf32> -> vector<8x8xf32>
    %1091 = tpu.concatenate %1039, %1056, %1073, %1090 in 1 : vector<8x8xf32>, vector<8x8xf32>, vector<8x8xf32>, vector<8x8xf32> -> vector<8x32xf32>
    %1092 = tpu.concatenate %1019, %1091 in 0 : vector<8x32xf32>, vector<8x32xf32> -> vector<16x32xf32>
    %1093 = arith.truncf %1092 : vector<16x32xf32> to vector<16x32xbf16>
    %cst_362 = arith.constant dense<0.000000e+00> : vector<16x32xf32>
    %1094 = tpu.matmul %1093, %945, %cst_362 {dimension_numbers = #tpu.dot_dimension_numbers<[1], [0], [0], [1], [0, 0, 1, 1], [], []>} : vector<16x32xbf16>, vector<32x32xbf16>, vector<16x32xf32> -> vector<16x32xf32>
    %1095 = vector.broadcast %947 : vector<1x32xf32> to vector<16x32xf32>
    %1096 = arith.addf %1094, %1095 : vector<16x32xf32>
    %1097 = arith.addf %927, %1096 : vector<16x32xf32>
    %1098 = vector.extract_strided_slice %929 {offsets = [0, 0, 0], sizes = [1, 1, 32], strides = [1, 1, 1]} : vector<3x1x32xf32> to vector<1x1x32xf32>
    %1099 = vector.shape_cast %1098 : vector<1x1x32xf32> to vector<1x32xf32>
    %1100 = vector.extract_strided_slice %931 {offsets = [0, 0, 0], sizes = [1, 1, 32], strides = [1, 1, 1]} : vector<3x1x32xf32> to vector<1x1x32xf32>
    %1101 = vector.shape_cast %1100 : vector<1x1x32xf32> to vector<1x32xf32>
    %cst_363 = arith.constant dense<0.000000e+00> : vector<16xf32>
    %1102 = vector.multi_reduction <add>, %1097, %cst_363 [1] : vector<16x32xf32> to vector<16xf32>
    %1103 = vector.shape_cast %1102 : vector<16xf32> to vector<16x1xf32>
    %cst_364 = arith.constant 3.200000e+01 : f32
    %1104 = vector.broadcast %cst_364 : f32 to vector<16x1xf32>
    %1105 = arith.divf %1103, %1104 : vector<16x1xf32>
    %1106 = arith.mulf %1097, %1097 : vector<16x32xf32>
    %cst_365 = arith.constant dense<0.000000e+00> : vector<16xf32>
    %1107 = vector.multi_reduction <add>, %1106, %cst_365 [1] : vector<16x32xf32> to vector<16xf32>
    %1108 = vector.shape_cast %1107 : vector<16xf32> to vector<16x1xf32>
    %cst_366 = arith.constant 3.200000e+01 : f32
    %1109 = vector.broadcast %cst_366 : f32 to vector<16x1xf32>
    %1110 = arith.divf %1108, %1109 : vector<16x1xf32>
    %1111 = arith.mulf %1105, %1105 : vector<16x1xf32>
    %1112 = arith.subf %1110, %1111 : vector<16x1xf32>
    %cst_367 = arith.constant 9.99999974E-6 : f32
    %1113 = vector.broadcast %cst_367 : f32 to vector<16x1xf32>
    %1114 = arith.addf %1112, %1113 : vector<16x1xf32>
    %1115 = math.rsqrt %1114 : vector<16x1xf32>
    %1116 = vector.broadcast %1105 : vector<16x1xf32> to vector<16x32xf32>
    %1117 = arith.subf %1097, %1116 : vector<16x32xf32>
    %1118 = vector.broadcast %1115 : vector<16x1xf32> to vector<16x32xf32>
    %1119 = vector.broadcast %1099 : vector<1x32xf32> to vector<16x32xf32>
    %1120 = arith.mulf %1118, %1119 : vector<16x32xf32>
    %1121 = arith.mulf %1117, %1120 : vector<16x32xf32>
    %1122 = vector.broadcast %1101 : vector<1x32xf32> to vector<16x32xf32>
    %1123 = arith.addf %1121, %1122 : vector<16x32xf32>
    %1124 = arith.truncf %1123 : vector<16x32xf32> to vector<16x32xbf16>
    %c1_368 = arith.constant 1 : index
    %c0_369 = arith.constant 0 : index
    %c0_370 = arith.constant 0 : index
    %1125 = vector.load %arg18[%c1_368, %c0_369, %c0_370] : memref<2x32x32xbf16, #tpu.memory_space<vmem>>, vector<1x32x32xbf16>
    %1126 = vector.shape_cast %1125 : vector<1x32x32xbf16> to vector<32x32xbf16>
    %cst_371 = arith.constant dense<0.000000e+00> : vector<16x32xf32>
    %1127 = tpu.matmul %1124, %1126, %cst_371 {dimension_numbers = #tpu.dot_dimension_numbers<[1], [0], [0], [1], [0, 0, 1, 1], [], []>} : vector<16x32xbf16>, vector<32x32xbf16>, vector<16x32xf32> -> vector<16x32xf32>
    %c1_372 = arith.constant 1 : index
    %c0_373 = arith.constant 0 : index
    %c0_374 = arith.constant 0 : index
    %1128 = vector.load %arg19[%c1_372, %c0_373, %c0_374] : memref<2x1x32xf32, #tpu.memory_space<vmem>>, vector<1x1x32xf32>
    %1129 = vector.shape_cast %1128 : vector<1x1x32xf32> to vector<1x32xf32>
    %1130 = vector.broadcast %1129 : vector<1x32xf32> to vector<16x32xf32>
    %1131 = arith.addf %1127, %1130 : vector<16x32xf32>
    %1132 = arith.truncf %1131 : vector<16x32xf32> to vector<16x32xbf16>
    %c1_375 = arith.constant 1 : index
    %c0_376 = arith.constant 0 : index
    %c0_377 = arith.constant 0 : index
    %1133 = vector.load %arg20[%c1_375, %c0_376, %c0_377] : memref<2x32x64xbf16, #tpu.memory_space<vmem>>, vector<1x32x64xbf16>
    %1134 = vector.shape_cast %1133 : vector<1x32x64xbf16> to vector<32x64xbf16>
    %cst_378 = arith.constant dense<0.000000e+00> : vector<18x64xf32>
    %1135 = tpu.matmul %493, %1134, %cst_378 {dimension_numbers = #tpu.dot_dimension_numbers<[1], [0], [0], [1], [0, 0, 1, 1], [], []>} : vector<18x32xbf16>, vector<32x64xbf16>, vector<18x64xf32> -> vector<18x64xf32>
    %c1_379 = arith.constant 1 : index
    %c0_380 = arith.constant 0 : index
    %c0_381 = arith.constant 0 : index
    %1136 = vector.load %arg21[%c1_379, %c0_380, %c0_381] : memref<2x1x64xf32, #tpu.memory_space<vmem>>, vector<1x1x64xf32>
    %1137 = vector.shape_cast %1136 : vector<1x1x64xf32> to vector<1x64xf32>
    %1138 = vector.broadcast %1137 : vector<1x64xf32> to vector<18x64xf32>
    %1139 = arith.addf %1135, %1138 : vector<18x64xf32>
    %1140 = arith.truncf %1139 : vector<18x64xf32> to vector<18x64xbf16>
    %1141 = vector.extract_strided_slice %1140 {offsets = [0, 0], sizes = [18, 32], strides = [1, 1]} : vector<18x64xbf16> to vector<18x32xbf16>
    %1142 = vector.extract_strided_slice %1140 {offsets = [0, 32], sizes = [18, 32], strides = [1, 1]} : vector<18x64xbf16> to vector<18x32xbf16>
    %c1_382 = arith.constant 1 : index
    %c0_383 = arith.constant 0 : index
    %c0_384 = arith.constant 0 : index
    %1143 = vector.load %arg22[%c1_382, %c0_383, %c0_384] : memref<2x32x32xbf16, #tpu.memory_space<vmem>>, vector<1x32x32xbf16>
    %1144 = vector.shape_cast %1143 : vector<1x32x32xbf16> to vector<32x32xbf16>
    %c1_385 = arith.constant 1 : index
    %c0_386 = arith.constant 0 : index
    %c0_387 = arith.constant 0 : index
    %1145 = vector.load %arg23[%c1_385, %c0_386, %c0_387] : memref<2x1x32xf32, #tpu.memory_space<vmem>>, vector<1x1x32xf32>
    %1146 = vector.shape_cast %1145 : vector<1x1x32xf32> to vector<1x32xf32>
    %1147 = vector.extract_strided_slice %1132 {offsets = [0, 0], sizes = [8, 32], strides = [1, 1]} : vector<16x32xbf16> to vector<8x32xbf16>
    %1148 = vector.extract_strided_slice %1141 {offsets = [0, 0], sizes = [9, 32], strides = [1, 1]} : vector<18x32xbf16> to vector<9x32xbf16>
    %1149 = vector.extract_strided_slice %1142 {offsets = [0, 0], sizes = [9, 32], strides = [1, 1]} : vector<18x32xbf16> to vector<9x32xbf16>
    %1150 = vector.extract_strided_slice %1147 {offsets = [0, 0], sizes = [8, 8], strides = [1, 1]} : vector<8x32xbf16> to vector<8x8xbf16>
    %1151 = vector.extract_strided_slice %1148 {offsets = [0, 0], sizes = [9, 8], strides = [1, 1]} : vector<9x32xbf16> to vector<9x8xbf16>
    %cst_388 = arith.constant dense<0.000000e+00> : vector<8x9xf32>
    %1152 = tpu.matmul %1150, %1151, %cst_388 {dimension_numbers = #tpu.dot_dimension_numbers<[1], [1], [0], [0], [0, 0, 1, 0], [], []>} : vector<8x8xbf16>, vector<9x8xbf16>, vector<8x9xf32> -> vector<8x9xf32>
    %cst_389 = arith.constant dense<0xFF800000> : vector<8xf32>
    %1153 = vector.multi_reduction <maximumf>, %1152, %cst_389 [1] : vector<8x9xf32> to vector<8xf32>
    %1154 = vector.shape_cast %1153 : vector<8xf32> to vector<8x1xf32>
    %1155 = vector.broadcast %1154 : vector<8x1xf32> to vector<8x9xf32>
    %1156 = arith.subf %1152, %1155 : vector<8x9xf32>
    %1157 = math.exp %1156 : vector<8x9xf32>
    %cst_390 = arith.constant dense<0.000000e+00> : vector<8xf32>
    %1158 = vector.multi_reduction <add>, %1157, %cst_390 [1] : vector<8x9xf32> to vector<8xf32>
    %1159 = vector.shape_cast %1158 : vector<8xf32> to vector<8x1xf32>
    %1160 = tpu.reciprocal %1159 {approx = true} : vector<8x1xf32> -> vector<8x1xf32>
    %1161 = vector.broadcast %1160 : vector<8x1xf32> to vector<8x9xf32>
    %1162 = arith.mulf %1157, %1161 : vector<8x9xf32>
    %1163 = arith.truncf %1162 : vector<8x9xf32> to vector<8x9xbf16>
    %1164 = vector.extract_strided_slice %1149 {offsets = [0, 0], sizes = [9, 8], strides = [1, 1]} : vector<9x32xbf16> to vector<9x8xbf16>
    %cst_391 = arith.constant dense<0.000000e+00> : vector<8x8xf32>
    %1165 = tpu.matmul %1163, %1164, %cst_391 {dimension_numbers = #tpu.dot_dimension_numbers<[1], [0], [0], [1], [0, 0, 1, 1], [], []>} : vector<8x9xbf16>, vector<9x8xbf16>, vector<8x8xf32> -> vector<8x8xf32>
    %1166 = vector.extract_strided_slice %1147 {offsets = [0, 8], sizes = [8, 8], strides = [1, 1]} : vector<8x32xbf16> to vector<8x8xbf16>
    %1167 = vector.extract_strided_slice %1148 {offsets = [0, 8], sizes = [9, 8], strides = [1, 1]} : vector<9x32xbf16> to vector<9x8xbf16>
    %cst_392 = arith.constant dense<0.000000e+00> : vector<8x9xf32>
    %1168 = tpu.matmul %1166, %1167, %cst_392 {dimension_numbers = #tpu.dot_dimension_numbers<[1], [1], [0], [0], [0, 0, 1, 0], [], []>} : vector<8x8xbf16>, vector<9x8xbf16>, vector<8x9xf32> -> vector<8x9xf32>
    %cst_393 = arith.constant dense<0xFF800000> : vector<8xf32>
    %1169 = vector.multi_reduction <maximumf>, %1168, %cst_393 [1] : vector<8x9xf32> to vector<8xf32>
    %1170 = vector.shape_cast %1169 : vector<8xf32> to vector<8x1xf32>
    %1171 = vector.broadcast %1170 : vector<8x1xf32> to vector<8x9xf32>
    %1172 = arith.subf %1168, %1171 : vector<8x9xf32>
    %1173 = math.exp %1172 : vector<8x9xf32>
    %cst_394 = arith.constant dense<0.000000e+00> : vector<8xf32>
    %1174 = vector.multi_reduction <add>, %1173, %cst_394 [1] : vector<8x9xf32> to vector<8xf32>
    %1175 = vector.shape_cast %1174 : vector<8xf32> to vector<8x1xf32>
    %1176 = tpu.reciprocal %1175 {approx = true} : vector<8x1xf32> -> vector<8x1xf32>
    %1177 = vector.broadcast %1176 : vector<8x1xf32> to vector<8x9xf32>
    %1178 = arith.mulf %1173, %1177 : vector<8x9xf32>
    %1179 = arith.truncf %1178 : vector<8x9xf32> to vector<8x9xbf16>
    %1180 = vector.extract_strided_slice %1149 {offsets = [0, 8], sizes = [9, 8], strides = [1, 1]} : vector<9x32xbf16> to vector<9x8xbf16>
    %cst_395 = arith.constant dense<0.000000e+00> : vector<8x8xf32>
    %1181 = tpu.matmul %1179, %1180, %cst_395 {dimension_numbers = #tpu.dot_dimension_numbers<[1], [0], [0], [1], [0, 0, 1, 1], [], []>} : vector<8x9xbf16>, vector<9x8xbf16>, vector<8x8xf32> -> vector<8x8xf32>
    %1182 = vector.extract_strided_slice %1147 {offsets = [0, 16], sizes = [8, 8], strides = [1, 1]} : vector<8x32xbf16> to vector<8x8xbf16>
    %1183 = vector.extract_strided_slice %1148 {offsets = [0, 16], sizes = [9, 8], strides = [1, 1]} : vector<9x32xbf16> to vector<9x8xbf16>
    %cst_396 = arith.constant dense<0.000000e+00> : vector<8x9xf32>
    %1184 = tpu.matmul %1182, %1183, %cst_396 {dimension_numbers = #tpu.dot_dimension_numbers<[1], [1], [0], [0], [0, 0, 1, 0], [], []>} : vector<8x8xbf16>, vector<9x8xbf16>, vector<8x9xf32> -> vector<8x9xf32>
    %cst_397 = arith.constant dense<0xFF800000> : vector<8xf32>
    %1185 = vector.multi_reduction <maximumf>, %1184, %cst_397 [1] : vector<8x9xf32> to vector<8xf32>
    %1186 = vector.shape_cast %1185 : vector<8xf32> to vector<8x1xf32>
    %1187 = vector.broadcast %1186 : vector<8x1xf32> to vector<8x9xf32>
    %1188 = arith.subf %1184, %1187 : vector<8x9xf32>
    %1189 = math.exp %1188 : vector<8x9xf32>
    %cst_398 = arith.constant dense<0.000000e+00> : vector<8xf32>
    %1190 = vector.multi_reduction <add>, %1189, %cst_398 [1] : vector<8x9xf32> to vector<8xf32>
    %1191 = vector.shape_cast %1190 : vector<8xf32> to vector<8x1xf32>
    %1192 = tpu.reciprocal %1191 {approx = true} : vector<8x1xf32> -> vector<8x1xf32>
    %1193 = vector.broadcast %1192 : vector<8x1xf32> to vector<8x9xf32>
    %1194 = arith.mulf %1189, %1193 : vector<8x9xf32>
    %1195 = arith.truncf %1194 : vector<8x9xf32> to vector<8x9xbf16>
    %1196 = vector.extract_strided_slice %1149 {offsets = [0, 16], sizes = [9, 8], strides = [1, 1]} : vector<9x32xbf16> to vector<9x8xbf16>
    %cst_399 = arith.constant dense<0.000000e+00> : vector<8x8xf32>
    %1197 = tpu.matmul %1195, %1196, %cst_399 {dimension_numbers = #tpu.dot_dimension_numbers<[1], [0], [0], [1], [0, 0, 1, 1], [], []>} : vector<8x9xbf16>, vector<9x8xbf16>, vector<8x8xf32> -> vector<8x8xf32>
    %1198 = vector.extract_strided_slice %1147 {offsets = [0, 24], sizes = [8, 8], strides = [1, 1]} : vector<8x32xbf16> to vector<8x8xbf16>
    %1199 = vector.extract_strided_slice %1148 {offsets = [0, 24], sizes = [9, 8], strides = [1, 1]} : vector<9x32xbf16> to vector<9x8xbf16>
    %cst_400 = arith.constant dense<0.000000e+00> : vector<8x9xf32>
    %1200 = tpu.matmul %1198, %1199, %cst_400 {dimension_numbers = #tpu.dot_dimension_numbers<[1], [1], [0], [0], [0, 0, 1, 0], [], []>} : vector<8x8xbf16>, vector<9x8xbf16>, vector<8x9xf32> -> vector<8x9xf32>
    %cst_401 = arith.constant dense<0xFF800000> : vector<8xf32>
    %1201 = vector.multi_reduction <maximumf>, %1200, %cst_401 [1] : vector<8x9xf32> to vector<8xf32>
    %1202 = vector.shape_cast %1201 : vector<8xf32> to vector<8x1xf32>
    %1203 = vector.broadcast %1202 : vector<8x1xf32> to vector<8x9xf32>
    %1204 = arith.subf %1200, %1203 : vector<8x9xf32>
    %1205 = math.exp %1204 : vector<8x9xf32>
    %cst_402 = arith.constant dense<0.000000e+00> : vector<8xf32>
    %1206 = vector.multi_reduction <add>, %1205, %cst_402 [1] : vector<8x9xf32> to vector<8xf32>
    %1207 = vector.shape_cast %1206 : vector<8xf32> to vector<8x1xf32>
    %1208 = tpu.reciprocal %1207 {approx = true} : vector<8x1xf32> -> vector<8x1xf32>
    %1209 = vector.broadcast %1208 : vector<8x1xf32> to vector<8x9xf32>
    %1210 = arith.mulf %1205, %1209 : vector<8x9xf32>
    %1211 = arith.truncf %1210 : vector<8x9xf32> to vector<8x9xbf16>
    %1212 = vector.extract_strided_slice %1149 {offsets = [0, 24], sizes = [9, 8], strides = [1, 1]} : vector<9x32xbf16> to vector<9x8xbf16>
    %cst_403 = arith.constant dense<0.000000e+00> : vector<8x8xf32>
    %1213 = tpu.matmul %1211, %1212, %cst_403 {dimension_numbers = #tpu.dot_dimension_numbers<[1], [0], [0], [1], [0, 0, 1, 1], [], []>} : vector<8x9xbf16>, vector<9x8xbf16>, vector<8x8xf32> -> vector<8x8xf32>
    %1214 = tpu.concatenate %1165, %1181, %1197, %1213 in 1 : vector<8x8xf32>, vector<8x8xf32>, vector<8x8xf32>, vector<8x8xf32> -> vector<8x32xf32>
    %1215 = vector.extract_strided_slice %1132 {offsets = [8, 0], sizes = [8, 32], strides = [1, 1]} : vector<16x32xbf16> to vector<8x32xbf16>
    %1216 = vector.extract_strided_slice %1141 {offsets = [9, 0], sizes = [9, 32], strides = [1, 1]} : vector<18x32xbf16> to vector<9x32xbf16>
    %1217 = vector.extract_strided_slice %1142 {offsets = [9, 0], sizes = [9, 32], strides = [1, 1]} : vector<18x32xbf16> to vector<9x32xbf16>
    %1218 = vector.extract_strided_slice %1215 {offsets = [0, 0], sizes = [8, 8], strides = [1, 1]} : vector<8x32xbf16> to vector<8x8xbf16>
    %1219 = vector.extract_strided_slice %1216 {offsets = [0, 0], sizes = [9, 8], strides = [1, 1]} : vector<9x32xbf16> to vector<9x8xbf16>
    %cst_404 = arith.constant dense<0.000000e+00> : vector<8x9xf32>
    %1220 = tpu.matmul %1218, %1219, %cst_404 {dimension_numbers = #tpu.dot_dimension_numbers<[1], [1], [0], [0], [0, 0, 1, 0], [], []>} : vector<8x8xbf16>, vector<9x8xbf16>, vector<8x9xf32> -> vector<8x9xf32>
    %cst_405 = arith.constant dense<0xFF800000> : vector<8xf32>
    %1221 = vector.multi_reduction <maximumf>, %1220, %cst_405 [1] : vector<8x9xf32> to vector<8xf32>
    %1222 = vector.shape_cast %1221 : vector<8xf32> to vector<8x1xf32>
    %1223 = vector.broadcast %1222 : vector<8x1xf32> to vector<8x9xf32>
    %1224 = arith.subf %1220, %1223 : vector<8x9xf32>
    %1225 = math.exp %1224 : vector<8x9xf32>
    %cst_406 = arith.constant dense<0.000000e+00> : vector<8xf32>
    %1226 = vector.multi_reduction <add>, %1225, %cst_406 [1] : vector<8x9xf32> to vector<8xf32>
    %1227 = vector.shape_cast %1226 : vector<8xf32> to vector<8x1xf32>
    %1228 = tpu.reciprocal %1227 {approx = true} : vector<8x1xf32> -> vector<8x1xf32>
    %1229 = vector.broadcast %1228 : vector<8x1xf32> to vector<8x9xf32>
    %1230 = arith.mulf %1225, %1229 : vector<8x9xf32>
    %1231 = arith.truncf %1230 : vector<8x9xf32> to vector<8x9xbf16>
    %1232 = vector.extract_strided_slice %1217 {offsets = [0, 0], sizes = [9, 8], strides = [1, 1]} : vector<9x32xbf16> to vector<9x8xbf16>
    %cst_407 = arith.constant dense<0.000000e+00> : vector<8x8xf32>
    %1233 = tpu.matmul %1231, %1232, %cst_407 {dimension_numbers = #tpu.dot_dimension_numbers<[1], [0], [0], [1], [0, 0, 1, 1], [], []>} : vector<8x9xbf16>, vector<9x8xbf16>, vector<8x8xf32> -> vector<8x8xf32>
    %1234 = vector.extract_strided_slice %1215 {offsets = [0, 8], sizes = [8, 8], strides = [1, 1]} : vector<8x32xbf16> to vector<8x8xbf16>
    %1235 = vector.extract_strided_slice %1216 {offsets = [0, 8], sizes = [9, 8], strides = [1, 1]} : vector<9x32xbf16> to vector<9x8xbf16>
    %cst_408 = arith.constant dense<0.000000e+00> : vector<8x9xf32>
    %1236 = tpu.matmul %1234, %1235, %cst_408 {dimension_numbers = #tpu.dot_dimension_numbers<[1], [1], [0], [0], [0, 0, 1, 0], [], []>} : vector<8x8xbf16>, vector<9x8xbf16>, vector<8x9xf32> -> vector<8x9xf32>
    %cst_409 = arith.constant dense<0xFF800000> : vector<8xf32>
    %1237 = vector.multi_reduction <maximumf>, %1236, %cst_409 [1] : vector<8x9xf32> to vector<8xf32>
    %1238 = vector.shape_cast %1237 : vector<8xf32> to vector<8x1xf32>
    %1239 = vector.broadcast %1238 : vector<8x1xf32> to vector<8x9xf32>
    %1240 = arith.subf %1236, %1239 : vector<8x9xf32>
    %1241 = math.exp %1240 : vector<8x9xf32>
    %cst_410 = arith.constant dense<0.000000e+00> : vector<8xf32>
    %1242 = vector.multi_reduction <add>, %1241, %cst_410 [1] : vector<8x9xf32> to vector<8xf32>
    %1243 = vector.shape_cast %1242 : vector<8xf32> to vector<8x1xf32>
    %1244 = tpu.reciprocal %1243 {approx = true} : vector<8x1xf32> -> vector<8x1xf32>
    %1245 = vector.broadcast %1244 : vector<8x1xf32> to vector<8x9xf32>
    %1246 = arith.mulf %1241, %1245 : vector<8x9xf32>
    %1247 = arith.truncf %1246 : vector<8x9xf32> to vector<8x9xbf16>
    %1248 = vector.extract_strided_slice %1217 {offsets = [0, 8], sizes = [9, 8], strides = [1, 1]} : vector<9x32xbf16> to vector<9x8xbf16>
    %cst_411 = arith.constant dense<0.000000e+00> : vector<8x8xf32>
    %1249 = tpu.matmul %1247, %1248, %cst_411 {dimension_numbers = #tpu.dot_dimension_numbers<[1], [0], [0], [1], [0, 0, 1, 1], [], []>} : vector<8x9xbf16>, vector<9x8xbf16>, vector<8x8xf32> -> vector<8x8xf32>
    %1250 = vector.extract_strided_slice %1215 {offsets = [0, 16], sizes = [8, 8], strides = [1, 1]} : vector<8x32xbf16> to vector<8x8xbf16>
    %1251 = vector.extract_strided_slice %1216 {offsets = [0, 16], sizes = [9, 8], strides = [1, 1]} : vector<9x32xbf16> to vector<9x8xbf16>
    %cst_412 = arith.constant dense<0.000000e+00> : vector<8x9xf32>
    %1252 = tpu.matmul %1250, %1251, %cst_412 {dimension_numbers = #tpu.dot_dimension_numbers<[1], [1], [0], [0], [0, 0, 1, 0], [], []>} : vector<8x8xbf16>, vector<9x8xbf16>, vector<8x9xf32> -> vector<8x9xf32>
    %cst_413 = arith.constant dense<0xFF800000> : vector<8xf32>
    %1253 = vector.multi_reduction <maximumf>, %1252, %cst_413 [1] : vector<8x9xf32> to vector<8xf32>
    %1254 = vector.shape_cast %1253 : vector<8xf32> to vector<8x1xf32>
    %1255 = vector.broadcast %1254 : vector<8x1xf32> to vector<8x9xf32>
    %1256 = arith.subf %1252, %1255 : vector<8x9xf32>
    %1257 = math.exp %1256 : vector<8x9xf32>
    %cst_414 = arith.constant dense<0.000000e+00> : vector<8xf32>
    %1258 = vector.multi_reduction <add>, %1257, %cst_414 [1] : vector<8x9xf32> to vector<8xf32>
    %1259 = vector.shape_cast %1258 : vector<8xf32> to vector<8x1xf32>
    %1260 = tpu.reciprocal %1259 {approx = true} : vector<8x1xf32> -> vector<8x1xf32>
    %1261 = vector.broadcast %1260 : vector<8x1xf32> to vector<8x9xf32>
    %1262 = arith.mulf %1257, %1261 : vector<8x9xf32>
    %1263 = arith.truncf %1262 : vector<8x9xf32> to vector<8x9xbf16>
    %1264 = vector.extract_strided_slice %1217 {offsets = [0, 16], sizes = [9, 8], strides = [1, 1]} : vector<9x32xbf16> to vector<9x8xbf16>
    %cst_415 = arith.constant dense<0.000000e+00> : vector<8x8xf32>
    %1265 = tpu.matmul %1263, %1264, %cst_415 {dimension_numbers = #tpu.dot_dimension_numbers<[1], [0], [0], [1], [0, 0, 1, 1], [], []>} : vector<8x9xbf16>, vector<9x8xbf16>, vector<8x8xf32> -> vector<8x8xf32>
    %1266 = vector.extract_strided_slice %1215 {offsets = [0, 24], sizes = [8, 8], strides = [1, 1]} : vector<8x32xbf16> to vector<8x8xbf16>
    %1267 = vector.extract_strided_slice %1216 {offsets = [0, 24], sizes = [9, 8], strides = [1, 1]} : vector<9x32xbf16> to vector<9x8xbf16>
    %cst_416 = arith.constant dense<0.000000e+00> : vector<8x9xf32>
    %1268 = tpu.matmul %1266, %1267, %cst_416 {dimension_numbers = #tpu.dot_dimension_numbers<[1], [1], [0], [0], [0, 0, 1, 0], [], []>} : vector<8x8xbf16>, vector<9x8xbf16>, vector<8x9xf32> -> vector<8x9xf32>
    %cst_417 = arith.constant dense<0xFF800000> : vector<8xf32>
    %1269 = vector.multi_reduction <maximumf>, %1268, %cst_417 [1] : vector<8x9xf32> to vector<8xf32>
    %1270 = vector.shape_cast %1269 : vector<8xf32> to vector<8x1xf32>
    %1271 = vector.broadcast %1270 : vector<8x1xf32> to vector<8x9xf32>
    %1272 = arith.subf %1268, %1271 : vector<8x9xf32>
    %1273 = math.exp %1272 : vector<8x9xf32>
    %cst_418 = arith.constant dense<0.000000e+00> : vector<8xf32>
    %1274 = vector.multi_reduction <add>, %1273, %cst_418 [1] : vector<8x9xf32> to vector<8xf32>
    %1275 = vector.shape_cast %1274 : vector<8xf32> to vector<8x1xf32>
    %1276 = tpu.reciprocal %1275 {approx = true} : vector<8x1xf32> -> vector<8x1xf32>
    %1277 = vector.broadcast %1276 : vector<8x1xf32> to vector<8x9xf32>
    %1278 = arith.mulf %1273, %1277 : vector<8x9xf32>
    %1279 = arith.truncf %1278 : vector<8x9xf32> to vector<8x9xbf16>
    %1280 = vector.extract_strided_slice %1217 {offsets = [0, 24], sizes = [9, 8], strides = [1, 1]} : vector<9x32xbf16> to vector<9x8xbf16>
    %cst_419 = arith.constant dense<0.000000e+00> : vector<8x8xf32>
    %1281 = tpu.matmul %1279, %1280, %cst_419 {dimension_numbers = #tpu.dot_dimension_numbers<[1], [0], [0], [1], [0, 0, 1, 1], [], []>} : vector<8x9xbf16>, vector<9x8xbf16>, vector<8x8xf32> -> vector<8x8xf32>
    %1282 = tpu.concatenate %1233, %1249, %1265, %1281 in 1 : vector<8x8xf32>, vector<8x8xf32>, vector<8x8xf32>, vector<8x8xf32> -> vector<8x32xf32>
    %1283 = tpu.concatenate %1214, %1282 in 0 : vector<8x32xf32>, vector<8x32xf32> -> vector<16x32xf32>
    %1284 = arith.truncf %1283 : vector<16x32xf32> to vector<16x32xbf16>
    %cst_420 = arith.constant dense<0.000000e+00> : vector<16x32xf32>
    %1285 = tpu.matmul %1284, %1144, %cst_420 {dimension_numbers = #tpu.dot_dimension_numbers<[1], [0], [0], [1], [0, 0, 1, 1], [], []>} : vector<16x32xbf16>, vector<32x32xbf16>, vector<16x32xf32> -> vector<16x32xf32>
    %1286 = vector.broadcast %1146 : vector<1x32xf32> to vector<16x32xf32>
    %1287 = arith.addf %1285, %1286 : vector<16x32xf32>
    %1288 = arith.addf %1123, %1287 : vector<16x32xf32>
    %1289 = vector.extract_strided_slice %929 {offsets = [1, 0, 0], sizes = [1, 1, 32], strides = [1, 1, 1]} : vector<3x1x32xf32> to vector<1x1x32xf32>
    %1290 = vector.shape_cast %1289 : vector<1x1x32xf32> to vector<1x32xf32>
    %1291 = vector.extract_strided_slice %931 {offsets = [1, 0, 0], sizes = [1, 1, 32], strides = [1, 1, 1]} : vector<3x1x32xf32> to vector<1x1x32xf32>
    %1292 = vector.shape_cast %1291 : vector<1x1x32xf32> to vector<1x32xf32>
    %cst_421 = arith.constant dense<0.000000e+00> : vector<16xf32>
    %1293 = vector.multi_reduction <add>, %1288, %cst_421 [1] : vector<16x32xf32> to vector<16xf32>
    %1294 = vector.shape_cast %1293 : vector<16xf32> to vector<16x1xf32>
    %cst_422 = arith.constant 3.200000e+01 : f32
    %1295 = vector.broadcast %cst_422 : f32 to vector<16x1xf32>
    %1296 = arith.divf %1294, %1295 : vector<16x1xf32>
    %1297 = arith.mulf %1288, %1288 : vector<16x32xf32>
    %cst_423 = arith.constant dense<0.000000e+00> : vector<16xf32>
    %1298 = vector.multi_reduction <add>, %1297, %cst_423 [1] : vector<16x32xf32> to vector<16xf32>
    %1299 = vector.shape_cast %1298 : vector<16xf32> to vector<16x1xf32>
    %cst_424 = arith.constant 3.200000e+01 : f32
    %1300 = vector.broadcast %cst_424 : f32 to vector<16x1xf32>
    %1301 = arith.divf %1299, %1300 : vector<16x1xf32>
    %1302 = arith.mulf %1296, %1296 : vector<16x1xf32>
    %1303 = arith.subf %1301, %1302 : vector<16x1xf32>
    %cst_425 = arith.constant 9.99999974E-6 : f32
    %1304 = vector.broadcast %cst_425 : f32 to vector<16x1xf32>
    %1305 = arith.addf %1303, %1304 : vector<16x1xf32>
    %1306 = math.rsqrt %1305 : vector<16x1xf32>
    %1307 = vector.broadcast %1296 : vector<16x1xf32> to vector<16x32xf32>
    %1308 = arith.subf %1288, %1307 : vector<16x32xf32>
    %1309 = vector.broadcast %1306 : vector<16x1xf32> to vector<16x32xf32>
    %1310 = vector.broadcast %1290 : vector<1x32xf32> to vector<16x32xf32>
    %1311 = arith.mulf %1309, %1310 : vector<16x32xf32>
    %1312 = arith.mulf %1308, %1311 : vector<16x32xf32>
    %1313 = vector.broadcast %1292 : vector<1x32xf32> to vector<16x32xf32>
    %1314 = arith.addf %1312, %1313 : vector<16x32xf32>
    %1315 = arith.truncf %1314 : vector<16x32xf32> to vector<16x32xbf16>
    %c1_426 = arith.constant 1 : index
    %c0_427 = arith.constant 0 : index
    %c0_428 = arith.constant 0 : index
    %1316 = vector.load %arg26[%c1_426, %c0_427, %c0_428] : memref<2x32x64xbf16, #tpu.memory_space<vmem>>, vector<1x32x64xbf16>
    %1317 = vector.shape_cast %1316 : vector<1x32x64xbf16> to vector<32x64xbf16>
    %cst_429 = arith.constant dense<0.000000e+00> : vector<16x64xf32>
    %1318 = tpu.matmul %1315, %1317, %cst_429 {dimension_numbers = #tpu.dot_dimension_numbers<[1], [0], [0], [1], [0, 0, 1, 1], [], []>} : vector<16x32xbf16>, vector<32x64xbf16>, vector<16x64xf32> -> vector<16x64xf32>
    %c1_430 = arith.constant 1 : index
    %c0_431 = arith.constant 0 : index
    %c0_432 = arith.constant 0 : index
    %1319 = vector.load %arg27[%c1_430, %c0_431, %c0_432] : memref<2x1x64xf32, #tpu.memory_space<vmem>>, vector<1x1x64xf32>
    %1320 = vector.shape_cast %1319 : vector<1x1x64xf32> to vector<1x64xf32>
    %1321 = vector.broadcast %1320 : vector<1x64xf32> to vector<16x64xf32>
    %1322 = arith.addf %1318, %1321 : vector<16x64xf32>
    %cst_433 = arith.constant 0.000000e+00 : f32
    %1323 = vector.broadcast %cst_433 : f32 to vector<16x64xf32>
    %1324 = arith.maximumf %1322, %1323 : vector<16x64xf32>
    %1325 = arith.truncf %1324 : vector<16x64xf32> to vector<16x64xbf16>
    %c1_434 = arith.constant 1 : index
    %c0_435 = arith.constant 0 : index
    %c0_436 = arith.constant 0 : index
    %1326 = vector.load %arg28[%c1_434, %c0_435, %c0_436] : memref<2x64x32xbf16, #tpu.memory_space<vmem>>, vector<1x64x32xbf16>
    %1327 = vector.shape_cast %1326 : vector<1x64x32xbf16> to vector<64x32xbf16>
    %cst_437 = arith.constant dense<0.000000e+00> : vector<16x32xf32>
    %1328 = tpu.matmul %1325, %1327, %cst_437 {dimension_numbers = #tpu.dot_dimension_numbers<[1], [0], [0], [1], [0, 0, 1, 1], [], []>} : vector<16x64xbf16>, vector<64x32xbf16>, vector<16x32xf32> -> vector<16x32xf32>
    %c1_438 = arith.constant 1 : index
    %c0_439 = arith.constant 0 : index
    %c0_440 = arith.constant 0 : index
    %1329 = vector.load %arg29[%c1_438, %c0_439, %c0_440] : memref<2x1x32xf32, #tpu.memory_space<vmem>>, vector<1x1x32xf32>
    %1330 = vector.shape_cast %1329 : vector<1x1x32xf32> to vector<1x32xf32>
    %1331 = vector.broadcast %1330 : vector<1x32xf32> to vector<16x32xf32>
    %1332 = arith.addf %1328, %1331 : vector<16x32xf32>
    %1333 = arith.addf %1314, %1332 : vector<16x32xf32>
    %1334 = vector.extract_strided_slice %929 {offsets = [2, 0, 0], sizes = [1, 1, 32], strides = [1, 1, 1]} : vector<3x1x32xf32> to vector<1x1x32xf32>
    %1335 = vector.shape_cast %1334 : vector<1x1x32xf32> to vector<1x32xf32>
    %1336 = vector.extract_strided_slice %931 {offsets = [2, 0, 0], sizes = [1, 1, 32], strides = [1, 1, 1]} : vector<3x1x32xf32> to vector<1x1x32xf32>
    %1337 = vector.shape_cast %1336 : vector<1x1x32xf32> to vector<1x32xf32>
    %cst_441 = arith.constant dense<0.000000e+00> : vector<16xf32>
    %1338 = vector.multi_reduction <add>, %1333, %cst_441 [1] : vector<16x32xf32> to vector<16xf32>
    %1339 = vector.shape_cast %1338 : vector<16xf32> to vector<16x1xf32>
    %cst_442 = arith.constant 3.200000e+01 : f32
    %1340 = vector.broadcast %cst_442 : f32 to vector<16x1xf32>
    %1341 = arith.divf %1339, %1340 : vector<16x1xf32>
    %1342 = arith.mulf %1333, %1333 : vector<16x32xf32>
    %cst_443 = arith.constant dense<0.000000e+00> : vector<16xf32>
    %1343 = vector.multi_reduction <add>, %1342, %cst_443 [1] : vector<16x32xf32> to vector<16xf32>
    %1344 = vector.shape_cast %1343 : vector<16xf32> to vector<16x1xf32>
    %cst_444 = arith.constant 3.200000e+01 : f32
    %1345 = vector.broadcast %cst_444 : f32 to vector<16x1xf32>
    %1346 = arith.divf %1344, %1345 : vector<16x1xf32>
    %1347 = arith.mulf %1341, %1341 : vector<16x1xf32>
    %1348 = arith.subf %1346, %1347 : vector<16x1xf32>
    %cst_445 = arith.constant 9.99999974E-6 : f32
    %1349 = vector.broadcast %cst_445 : f32 to vector<16x1xf32>
    %1350 = arith.addf %1348, %1349 : vector<16x1xf32>
    %1351 = math.rsqrt %1350 : vector<16x1xf32>
    %1352 = vector.broadcast %1341 : vector<16x1xf32> to vector<16x32xf32>
    %1353 = arith.subf %1333, %1352 : vector<16x32xf32>
    %1354 = vector.broadcast %1351 : vector<16x1xf32> to vector<16x32xf32>
    %1355 = vector.broadcast %1335 : vector<1x32xf32> to vector<16x32xf32>
    %1356 = arith.mulf %1354, %1355 : vector<16x32xf32>
    %1357 = arith.mulf %1353, %1356 : vector<16x32xf32>
    %1358 = vector.broadcast %1337 : vector<1x32xf32> to vector<16x32xf32>
    %1359 = arith.addf %1357, %1358 : vector<16x32xf32>
    %c1_446 = arith.constant 1 : index
    %c0_447 = arith.constant 0 : index
    %c0_448 = arith.constant 0 : index
    %1360 = vector.load %arg30[%c1_446, %c0_447, %c0_448] : memref<2x1x32xf32, #tpu.memory_space<vmem>>, vector<1x1x32xf32>
    %1361 = vector.shape_cast %1360 : vector<1x1x32xf32> to vector<1x32xf32>
    %c1_449 = arith.constant 1 : index
    %c0_450 = arith.constant 0 : index
    %c0_451 = arith.constant 0 : index
    %1362 = vector.load %arg31[%c1_449, %c0_450, %c0_451] : memref<2x1x32xf32, #tpu.memory_space<vmem>>, vector<1x1x32xf32>
    %1363 = vector.shape_cast %1362 : vector<1x1x32xf32> to vector<1x32xf32>
    %cst_452 = arith.constant dense<0.000000e+00> : vector<16xf32>
    %1364 = vector.multi_reduction <add>, %1359, %cst_452 [1] : vector<16x32xf32> to vector<16xf32>
    %1365 = vector.shape_cast %1364 : vector<16xf32> to vector<16x1xf32>
    %cst_453 = arith.constant 3.200000e+01 : f32
    %1366 = vector.broadcast %cst_453 : f32 to vector<16x1xf32>
    %1367 = arith.divf %1365, %1366 : vector<16x1xf32>
    %1368 = arith.mulf %1359, %1359 : vector<16x32xf32>
    %cst_454 = arith.constant dense<0.000000e+00> : vector<16xf32>
    %1369 = vector.multi_reduction <add>, %1368, %cst_454 [1] : vector<16x32xf32> to vector<16xf32>
    %1370 = vector.shape_cast %1369 : vector<16xf32> to vector<16x1xf32>
    %cst_455 = arith.constant 3.200000e+01 : f32
    %1371 = vector.broadcast %cst_455 : f32 to vector<16x1xf32>
    %1372 = arith.divf %1370, %1371 : vector<16x1xf32>
    %1373 = arith.mulf %1367, %1367 : vector<16x1xf32>
    %1374 = arith.subf %1372, %1373 : vector<16x1xf32>
    %cst_456 = arith.constant 9.99999974E-6 : f32
    %1375 = vector.broadcast %cst_456 : f32 to vector<16x1xf32>
    %1376 = arith.addf %1374, %1375 : vector<16x1xf32>
    %1377 = math.rsqrt %1376 : vector<16x1xf32>
    %1378 = vector.broadcast %1367 : vector<16x1xf32> to vector<16x32xf32>
    %1379 = arith.subf %1359, %1378 : vector<16x32xf32>
    %1380 = vector.broadcast %1377 : vector<16x1xf32> to vector<16x32xf32>
    %1381 = vector.broadcast %1361 : vector<1x32xf32> to vector<16x32xf32>
    %1382 = arith.mulf %1380, %1381 : vector<16x32xf32>
    %1383 = arith.mulf %1379, %1382 : vector<16x32xf32>
    %1384 = vector.broadcast %1363 : vector<1x32xf32> to vector<16x32xf32>
    %1385 = arith.addf %1383, %1384 : vector<16x32xf32>
    %1386 = arith.truncf %1385 : vector<16x32xf32> to vector<16x32xbf16>
    %c0_457 = arith.constant 0 : index
    %c0_458 = arith.constant 0 : index
    %1387 = vector.load %arg32[%c0_457, %c0_458] : memref<32x128xbf16, #tpu.memory_space<vmem>>, vector<32x128xbf16>
    %cst_459 = arith.constant dense<0.000000e+00> : vector<16x128xf32>
    %1388 = tpu.matmul %1386, %1387, %cst_459 {dimension_numbers = #tpu.dot_dimension_numbers<[1], [0], [0], [1], [0, 0, 1, 1], [], []>} : vector<16x32xbf16>, vector<32x128xbf16>, vector<16x128xf32> -> vector<16x128xf32>
    %c0_460 = arith.constant 0 : index
    %c0_461 = arith.constant 0 : index
    %1389 = vector.load %arg33[%c0_460, %c0_461] : memref<1x128xf32, #tpu.memory_space<vmem>>, vector<1x128xf32>
    %1390 = vector.broadcast %1389 : vector<1x128xf32> to vector<16x128xf32>
    %1391 = arith.addf %1388, %1390 : vector<16x128xf32>
    %1392 = arith.truncf %1391 : vector<16x128xf32> to vector<16x128xbf16>
    %c0_462 = arith.constant 0 : index
    %c0_463 = arith.constant 0 : index
    %1393 = vector.load %arg34[%c0_462, %c0_463] : memref<16x128xbf16, #tpu.memory_space<vmem>>, vector<16x128xbf16>
    tpu.vector_store %arg34[%c0_462, %c0_463], %1392 {strides = array<i32>} : memref<16x128xbf16, #tpu.memory_space<vmem>>, vector<16x128xbf16>,
    return
  }
  func.func @transform_0(%arg0: i32) -> (i32, i32) {
    %c0_i32 = arith.constant 0 : i32
    %c0_i32_0 = arith.constant 0 : i32
    %c0_i32_1 = arith.constant 0 : i32
    return %c0_i32, %c0_i32_0 : i32, i32
  }
  func.func @transform_1(%arg0: i32) -> (i32, i32) {
    %c0_i32 = arith.constant 0 : i32
    %c0_i32_0 = arith.constant 0 : i32
    %c0_i32_1 = arith.constant 0 : i32
    return %c0_i32, %c0_i32_0 : i32, i32
  }
  func.func @transform_2(%arg0: i32) -> (i32, i32) {
    %c0_i32 = arith.constant 0 : i32
    %c0_i32_0 = arith.constant 0 : i32
    %c0_i32_1 = arith.constant 0 : i32
    return %c0_i32, %c0_i32_0 : i32, i32
  }
  func.func @transform_3(%arg0: i32) -> (i32, i32, i32) {
    %c0_i32 = arith.constant 0 : i32
    %c0_i32_0 = arith.constant 0 : i32
    %c0_i32_1 = arith.constant 0 : i32
    %c0_i32_2 = arith.constant 0 : i32
    return %c0_i32, %c0_i32_0, %c0_i32_1 : i32, i32, i32
  }
  func.func @transform_4(%arg0: i32) -> (i32, i32, i32) {
    %c0_i32 = arith.constant 0 : i32
    %c0_i32_0 = arith.constant 0 : i32
    %c0_i32_1 = arith.constant 0 : i32
    %c0_i32_2 = arith.constant 0 : i32
    return %c0_i32, %c0_i32_0, %c0_i32_1 : i32, i32, i32
  }
  func.func @transform_5(%arg0: i32) -> (i32, i32, i32) {
    %c0_i32 = arith.constant 0 : i32
    %c0_i32_0 = arith.constant 0 : i32
    %c0_i32_1 = arith.constant 0 : i32
    %c0_i32_2 = arith.constant 0 : i32
    return %c0_i32, %c0_i32_0, %c0_i32_1 : i32, i32, i32
  }
  func.func @transform_6(%arg0: i32) -> (i32, i32, i32) {
    %c0_i32 = arith.constant 0 : i32
    %c0_i32_0 = arith.constant 0 : i32
    %c0_i32_1 = arith.constant 0 : i32
    %c0_i32_2 = arith.constant 0 : i32
    return %c0_i32, %c0_i32_0, %c0_i32_1 : i32, i32, i32
  }
  func.func @transform_7(%arg0: i32) -> (i32, i32, i32, i32) {
    %c0_i32 = arith.constant 0 : i32
    %c0_i32_0 = arith.constant 0 : i32
    %c0_i32_1 = arith.constant 0 : i32
    %c0_i32_2 = arith.constant 0 : i32
    %c0_i32_3 = arith.constant 0 : i32
    return %c0_i32, %c0_i32_0, %c0_i32_1, %c0_i32_2 : i32, i32, i32, i32
  }
  func.func @transform_8(%arg0: i32) -> (i32, i32, i32, i32) {
    %c0_i32 = arith.constant 0 : i32
    %c0_i32_0 = arith.constant 0 : i32
    %c0_i32_1 = arith.constant 0 : i32
    %c0_i32_2 = arith.constant 0 : i32
    %c0_i32_3 = arith.constant 0 : i32
    return %c0_i32, %c0_i32_0, %c0_i32_1, %c0_i32_2 : i32, i32, i32, i32
  }
  func.func @transform_9(%arg0: i32) -> (i32, i32, i32) {
    %c0_i32 = arith.constant 0 : i32
    %c0_i32_0 = arith.constant 0 : i32
    %c0_i32_1 = arith.constant 0 : i32
    %c0_i32_2 = arith.constant 0 : i32
    return %c0_i32, %c0_i32_0, %c0_i32_1 : i32, i32, i32
  }
  func.func @transform_10(%arg0: i32) -> (i32, i32, i32) {
    %c0_i32 = arith.constant 0 : i32
    %c0_i32_0 = arith.constant 0 : i32
    %c0_i32_1 = arith.constant 0 : i32
    %c0_i32_2 = arith.constant 0 : i32
    return %c0_i32, %c0_i32_0, %c0_i32_1 : i32, i32, i32
  }
  func.func @transform_11(%arg0: i32) -> (i32, i32, i32) {
    %c0_i32 = arith.constant 0 : i32
    %c0_i32_0 = arith.constant 0 : i32
    %c0_i32_1 = arith.constant 0 : i32
    %c0_i32_2 = arith.constant 0 : i32
    return %c0_i32, %c0_i32_0, %c0_i32_1 : i32, i32, i32
  }
  func.func @transform_12(%arg0: i32) -> (i32, i32, i32) {
    %c0_i32 = arith.constant 0 : i32
    %c0_i32_0 = arith.constant 0 : i32
    %c0_i32_1 = arith.constant 0 : i32
    %c0_i32_2 = arith.constant 0 : i32
    return %c0_i32, %c0_i32_0, %c0_i32_1 : i32, i32, i32
  }
  func.func @transform_13(%arg0: i32) -> (i32, i32, i32) {
    %c0_i32 = arith.constant 0 : i32
    %c0_i32_0 = arith.constant 0 : i32
    %c0_i32_1 = arith.constant 0 : i32
    %c0_i32_2 = arith.constant 0 : i32
    return %c0_i32, %c0_i32_0, %c0_i32_1 : i32, i32, i32
  }
  func.func @transform_14(%arg0: i32) -> (i32, i32, i32) {
    %c0_i32 = arith.constant 0 : i32
    %c0_i32_0 = arith.constant 0 : i32
    %c0_i32_1 = arith.constant 0 : i32
    %c0_i32_2 = arith.constant 0 : i32
    return %c0_i32, %c0_i32_0, %c0_i32_1 : i32, i32, i32
  }
  func.func @transform_15(%arg0: i32) -> (i32, i32, i32) {
    %c0_i32 = arith.constant 0 : i32
    %c0_i32_0 = arith.constant 0 : i32
    %c0_i32_1 = arith.constant 0 : i32
    %c0_i32_2 = arith.constant 0 : i32
    return %c0_i32, %c0_i32_0, %c0_i32_1 : i32, i32, i32
  }
  func.func @transform_16(%arg0: i32) -> (i32, i32, i32) {
    %c0_i32 = arith.constant 0 : i32
    %c0_i32_0 = arith.constant 0 : i32
    %c0_i32_1 = arith.constant 0 : i32
    %c0_i32_2 = arith.constant 0 : i32
    return %c0_i32, %c0_i32_0, %c0_i32_1 : i32, i32, i32
  }
  func.func @transform_17(%arg0: i32) -> (i32, i32, i32) {
    %c0_i32 = arith.constant 0 : i32
    %c0_i32_0 = arith.constant 0 : i32
    %c0_i32_1 = arith.constant 0 : i32
    %c0_i32_2 = arith.constant 0 : i32
    return %c0_i32, %c0_i32_0, %c0_i32_1 : i32, i32, i32
  }
  func.func @transform_18(%arg0: i32) -> (i32, i32, i32) {
    %c0_i32 = arith.constant 0 : i32
    %c0_i32_0 = arith.constant 0 : i32
    %c0_i32_1 = arith.constant 0 : i32
    %c0_i32_2 = arith.constant 0 : i32
    return %c0_i32, %c0_i32_0, %c0_i32_1 : i32, i32, i32
  }
  func.func @transform_19(%arg0: i32) -> (i32, i32, i32) {
    %c0_i32 = arith.constant 0 : i32
    %c0_i32_0 = arith.constant 0 : i32
    %c0_i32_1 = arith.constant 0 : i32
    %c0_i32_2 = arith.constant 0 : i32
    return %c0_i32, %c0_i32_0, %c0_i32_1 : i32, i32, i32
  }
  func.func @transform_20(%arg0: i32) -> (i32, i32, i32) {
    %c0_i32 = arith.constant 0 : i32
    %c0_i32_0 = arith.constant 0 : i32
    %c0_i32_1 = arith.constant 0 : i32
    %c0_i32_2 = arith.constant 0 : i32
    return %c0_i32, %c0_i32_0, %c0_i32_1 : i32, i32, i32
  }
  func.func @transform_21(%arg0: i32) -> (i32, i32, i32) {
    %c0_i32 = arith.constant 0 : i32
    %c0_i32_0 = arith.constant 0 : i32
    %c0_i32_1 = arith.constant 0 : i32
    %c0_i32_2 = arith.constant 0 : i32
    return %c0_i32, %c0_i32_0, %c0_i32_1 : i32, i32, i32
  }
  func.func @transform_22(%arg0: i32) -> (i32, i32, i32) {
    %c0_i32 = arith.constant 0 : i32
    %c0_i32_0 = arith.constant 0 : i32
    %c0_i32_1 = arith.constant 0 : i32
    %c0_i32_2 = arith.constant 0 : i32
    return %c0_i32, %c0_i32_0, %c0_i32_1 : i32, i32, i32
  }
  func.func @transform_23(%arg0: i32) -> (i32, i32, i32, i32) {
    %c0_i32 = arith.constant 0 : i32
    %c0_i32_0 = arith.constant 0 : i32
    %c0_i32_1 = arith.constant 0 : i32
    %c0_i32_2 = arith.constant 0 : i32
    %c0_i32_3 = arith.constant 0 : i32
    return %c0_i32, %c0_i32_0, %c0_i32_1, %c0_i32_2 : i32, i32, i32, i32
  }
  func.func @transform_24(%arg0: i32) -> (i32, i32, i32, i32) {
    %c0_i32 = arith.constant 0 : i32
    %c0_i32_0 = arith.constant 0 : i32
    %c0_i32_1 = arith.constant 0 : i32
    %c0_i32_2 = arith.constant 0 : i32
    %c0_i32_3 = arith.constant 0 : i32
    return %c0_i32, %c0_i32_0, %c0_i32_1, %c0_i32_2 : i32, i32, i32, i32
  }
  func.func @transform_25(%arg0: i32) -> (i32, i32, i32) {
    %c0_i32 = arith.constant 0 : i32
    %c0_i32_0 = arith.constant 0 : i32
    %c0_i32_1 = arith.constant 0 : i32
    %c0_i32_2 = arith.constant 0 : i32
    return %c0_i32, %c0_i32_0, %c0_i32_1 : i32, i32, i32
  }
  func.func @transform_26(%arg0: i32) -> (i32, i32, i32) {
    %c0_i32 = arith.constant 0 : i32
    %c0_i32_0 = arith.constant 0 : i32
    %c0_i32_1 = arith.constant 0 : i32
    %c0_i32_2 = arith.constant 0 : i32
    return %c0_i32, %c0_i32_0, %c0_i32_1 : i32, i32, i32
  }
  func.func @transform_27(%arg0: i32) -> (i32, i32, i32) {
    %c0_i32 = arith.constant 0 : i32
    %c0_i32_0 = arith.constant 0 : i32
    %c0_i32_1 = arith.constant 0 : i32
    %c0_i32_2 = arith.constant 0 : i32
    return %c0_i32, %c0_i32_0, %c0_i32_1 : i32, i32, i32
  }
  func.func @transform_28(%arg0: i32) -> (i32, i32, i32) {
    %c0_i32 = arith.constant 0 : i32
    %c0_i32_0 = arith.constant 0 : i32
    %c0_i32_1 = arith.constant 0 : i32
    %c0_i32_2 = arith.constant 0 : i32
    return %c0_i32, %c0_i32_0, %c0_i32_1 : i32, i32, i32
  }
  func.func @transform_29(%arg0: i32) -> (i32, i32, i32) {
    %c0_i32 = arith.constant 0 : i32
    %c0_i32_0 = arith.constant 0 : i32
    %c0_i32_1 = arith.constant 0 : i32
    %c0_i32_2 = arith.constant 0 : i32
    return %c0_i32, %c0_i32_0, %c0_i32_1 : i32, i32, i32
  }
  func.func @transform_30(%arg0: i32) -> (i32, i32, i32) {
    %c0_i32 = arith.constant 0 : i32
    %c0_i32_0 = arith.constant 0 : i32
    %c0_i32_1 = arith.constant 0 : i32
    %c0_i32_2 = arith.constant 0 : i32
    return %c0_i32, %c0_i32_0, %c0_i32_1 : i32, i32, i32
  }
  func.func @transform_31(%arg0: i32) -> (i32, i32) {
    %c0_i32 = arith.constant 0 : i32
    %c0_i32_0 = arith.constant 0 : i32
    %c0_i32_1 = arith.constant 0 : i32
    return %c0_i32, %c0_i32_0 : i32, i32
  }
  func.func @transform_32(%arg0: i32) -> (i32, i32) {
    %c0_i32 = arith.constant 0 : i32
    %c0_i32_0 = arith.constant 0 : i32
    %c0_i32_1 = arith.constant 0 : i32
    return %c0_i32, %c0_i32_0 : i32, i32
  }
  func.func @transform_33(%arg0: i32) -> (i32, i32) {
    %c0_i32 = arith.constant 0 : i32
    %c0_i32_0 = arith.constant 0 : i32
    %c0_i32_1 = arith.constant 0 : i32
    return %c0_i32, %c0_i32_0 : i32, i32
  }
}

</mosaic_0001>

<bundles_post_ra>
// kernel: transformer_transition_forward.1
= control target key start
LH: loop header
LB: loop body
LE: loop exit
PB: predicated region body
PF: predicated region fallthrough
CT: control target
= control target key end

     0   :  { %s10368_s3 = smov 3   ;;  %vm171_vm0 = vcmask 261120   ;;  %s10369_s10 = smov 4   ;;  %v10370_v7 = vmov 0.0   ;;  %vm10371_vm1 = vmmov 0   ;;  %vm236_vm3 = vcmask 64512   ;;  %s12415_s0 = inlined_call_operand.smem [shape: u32[34], index: -1, kind: input, shape index: {}] }
   0x1   :  { %s10423_s6 = sld [smem:[%s12415_s0 + %s10368_s3]]   ;;  %9061 = vmatprep.subr.bf16.mxu1 %v10370_v7  ;;  %9063 = vmatprep.mubr.msk.bf16.mxu1 %vm10371_vm1, %v10370_v7  ;;  %s10372_s14 = smov 120   ;;  %vm763_vm2 = vsmask.f32 3328  ;;  %vm314_vm4 = vcmask 1043456   ;;  %vm315_vm5 = vcmask 1044480   ;;  %v10380_v40 = vmov 65535  }
   0x2   :  { %s10428_s9 = sld [smem:[%s12415_s0]]   ;;  %s10373_s15 = smov 96   ;;  %v316_v41 = vsel %vm314_vm4, 4294967295, %v10380_v40  ;;  %vm284_vm6 = vcmask 72704   ;;  %vm288_vm7 = vcmask 65536   ;;  %vm757_vm8 = vcmask 130048  }
   0x3   :  { %s10440_s13 = sld [smem:[%s12415_s0 + %s10369_s10]]   ;;  %s10374_s16 = smov 80   ;;  %v10502_v45 = vsel %vm315_vm5, %v316_v41, 0  ;;  %vm760_vm9 = vcmask 195584   ;;  %vm1302_vm10 = vcmask 1040384   ;;  %vm1392_vm11 = vcmask 254976  }
   0x4   :  { %s10375_s17 = smov 88   ;;  %s10376_s18 = smov 72   ;;  %vm1574_vm12 = vcmask 523264  }
   0x5   :  { %s10377_s19 = smov 112   ;;  %s10378_s20 = smov 104  }
   0x6   :  { %s12426_s21 = smov 64   ;;  %s12424_s22 = smov 48  }
   0x7   :  { %v9996_v0 = vld [vmem:[%s10423_s6] sm:$0xff]   ;;  %v9997_v1 = vld [vmem:[%s10423_s6 + $0x8] sm:$0xff]   ;;  %s12428_s23 = smov 56   ;;  %s12416_s24 = smov 40  }
   0x8   :  { %9053 = vmatprep.subr.bf16.mxu0 %v9996_v0  ;;  %v139_v2 = vld [vmem:[%s10428_s9] sm:$0xff]  ;;  %v140_v3 = vld [vmem:[%s10428_s9 + $0x8] sm:$0xff]  ;;  %v141_v4 = vld [vmem:[%s10428_s9 + $0x10] sm:$0x3]  ;;  %s12422_s25 = smov 8   ;;  %s12420_s26 = smov 16  }
   0x9   :  { %9054 = vmatpush3.bf16.msra.mxu0 %v9996_v0  ;;  %v146_v5 = vpack.c.bf16 %v140_v3, %v139_v2  ;;  %v147_v6 = vpack.c.bf16 %v141_v4, %v141_v4  ;;  %v8460_v8 = vld [vmem:[%s10440_s13] ss:$0 sm:$0xff]  ;;  %s10386_s27 = smov 5   ;;  %s12418_s1 = smov 24  }
   0xa   :  { %9055 = vmatprep.subr.bf16.mxu0 %v9997_v1  ;;  %s10755_s30 = sld [smem:[%s12415_s0 + %s10386_s27]]   ;;  %s10388_s2 = smov 6  }
   0xb   :  { %9057 = vmatprep.mubr.msk.bf16.mxu0 %vm171_vm0, %v146_v5  ;;  %s10783_s5 = sld [smem:[%s12415_s0 + %s10388_s2]]   ;;  %s10389_s7 = smov 9  }
   0xc   :  { %s10813_s10 = sld [smem:[%s12415_s0 + %s10389_s7]]   ;;  %s10390_s11 = smov 11  }
   0xd   :  { %9056 = vmatpush3.bf16.msra.mxu0 %v9997_v1  ;;  %s10820_s28 = sld [smem:[%s12415_s0 + %s10390_s11]]   ;;  %s10391_s29 = smov 7  }
   0xe   :  { %9067 = vmatprep.subr.bf16.mxu0 %v10370_v7  ;;  %s10827_s4 = sld [smem:[%s12415_s0 + %s10391_s29]]   ;;  %s10392_s11 = smov 10  }
   0xf   :  { %s10848_s29 = sld [smem:[%s12415_s0 + %s10392_s11]]   ;;  %s10393_s2 = smov 12  }
  0x10   :  { %9058 = vmatmul.mubr.msk.bf16.vlgmr.msra.gmra.mrb[0].mxu0 %vm171_vm0, %v147_v6  ;;  %s10858_s8 = sld [smem:[%s12415_s0 + %s10393_s2]]   ;;  %s10396_s2 = smov 14  }
  0x11   :  { %9069 = vmatprep.mubr.msk.bf16.mxu0 %vm10371_vm1, %v10370_v7  ;;  %s10401_s12 = smov 30   ;;  %s10402_s3 = smov 17  }
  0x12   :  { %s10405_s7 = smov 18  }
  0xe3   :  { %v9059_v9 = vpop.f32.mrb[0].mxu0 }
  0xe4   :  { %v221_v10 = vadd.f32 %v9059_v9, %v8460_v8  ;;  %v212_v11 = vpop.f32.mrb[1].mxu0 }
  0xe5   :  { %v9060_v12 = vpop.f32.mrb[2].mxu0  ;;  %v213_v14 = vadd.f32 %v8460_v8, %v212_v11 }
  0xe6   :  { %v215_v13 = vpop.f32.mrb[3].mxu0  ;;  %v227_v16 = vpack.c.bf16 %v221_v10, %v221_v10 }
  0xe7   :  { %v216_v15 = vadd.f32 %v8460_v8, %v215_v13 }
  0xe8   :  { %v772_v20 = vshrl.u32 %v227_v16, 16  ;;  %v775_v21 = vshll.u32 %v227_v16, 16 }
  0xe9   :  { %v10449_v17 = vpack.c.bf16 %v216_v15, %v213_v14 }
  0xea   :  { %v774_v24 = vrot.slane %v772_v20, 4  ;;  %v777_v25 = vrot.slane %v775_v21, 5 }
  0xeb   :  { %362 = vrot.lane.b32.xlu1 %v10449_v17, %s10372_s14  ;;  %234 = vrot.lane.b32.xlu0 %v10449_v17, %s10373_s15  ;;  %v764_v18 = vshrl.u32 %v10449_v17, 16  ;;  %v767_v19 = vshll.u32 %v10449_v17, 16 }
  0xec   :  { %v778_v27 = vor.u32 %v777_v25, %v774_v24 }
  0xed   :  { %v766_v22 = vrot.slane %v764_v18, 4  ;;  %v769_v23 = vrot.slane %v767_v19, 5 }
  0xef   :  { %487 = vrot.lane.b32.xlu1 %v10449_v17, %s10374_s16  ;;  %364 = vrot.lane.b32.xlu0 %v10449_v17, %s10375_s17  ;;  %v770_v26 = vor.u32 %v769_v23, %v766_v22 }
  0xf1   :  { %v10466_v28 = vsel %vm763_vm2, %v770_v26, %v778_v27 }
  0xf3   :  { %610 = vrot.lane.b32.xlu1 %v10449_v17, %s10376_s18  ;;  %485 = vrot.lane.b32.xlu0 %v10449_v17, %s10377_s19 }
  0xf7   :  { %608 = vrot.lane.b32.xlu0 %v10449_v17, %s10378_s20  ;;  %780 = vrot.lane.b32.xlu1 %v10466_v28, %s10373_s15 }
  0xfb   :  { %903 = vrot.lane.b32.xlu0 %v10466_v28, %s10375_s17  ;;  %901 = vrot.lane.b32.xlu1 %v10466_v28, %s10372_s14 }
  0xff   :  { %1026 = vrot.lane.b32.xlu0 %v10466_v28, %s10374_s16  ;;  %1024 = vrot.lane.b32.xlu1 %v10466_v28, %s10377_s19 }
 0x103   :  { %1149 = vrot.lane.b32.xlu0 %v10466_v28, %s10376_s18  ;;  %1147 = vrot.lane.b32.xlu1 %v10466_v28, %s10378_s20 }
 0x107   :  { %309 = vrot.lane.b32.xlu1 %v10449_v17, %s12426_s21 }
 0x15d   :  { %v363_v29 = vpop.permute.xlu1 %362  ;;  %v235_v30 = vpop.permute.xlu0 %234 }
 0x15e   :  { %v241_v31 = vsel %vm236_vm3, %v235_v30, 0 }
 0x15f   :  { %9062 = vmatpush3.bf16.xpose.msra.mxu1 %v241_v31 }
 0x160   :  { %9073 = vmatprep.subr.bf16.mxu1 %v10370_v7 }
 0x161   :  { %v488_v32 = vpop.permute.xlu1 %487  ;;  %v365_v33 = vpop.permute.xlu0 %364 }
 0x162   :  { %v370_v35 = vsel %vm236_vm3, %v365_v33, 0  ;;  %v493_v38 = vsel %vm236_vm3, %v488_v32, 0 }
 0x165   :  { %v611_v34 = vpop.permute.xlu1 %610  ;;  %v486_v42 = vpop.permute.xlu0 %485 }
 0x166   :  { %9064 = vmatmul.mubr.msk.bf16.vlgmr.msra.gmra.mrb[0].mxu1 %vm236_vm3, %v10449_v17  ;;  %v616_v44 = vsel %vm236_vm3, %v611_v34, 0 }
 0x167   :  { %9074 = vmatpush3.bf16.xpose.msra.mxu1 %v370_v35  ;;  %9075 = vmatprep.mubr.msk.bf16.mxu1 %vm10371_vm1, %v10370_v7 }
 0x168   :  { %9085 = vmatprep.subr.bf16.mxu1 %v10370_v7 }
 0x169   :  { %v781_v36 = vpop.permute.xlu1 %780  ;;  %v609_v48 = vpop.permute.xlu0 %608 }
 0x16a   :  { %v786_v49 = vsel %vm236_vm3, %v781_v36, 0 }
 0x16d   :  { %v902_v37 = vpop.permute.xlu1 %901  ;;  %v904_v50 = vpop.permute.xlu0 %903 }
 0x16e   :  { %9076 = vmatmul.mubr.msk.bf16.vlgmr.msra.gmra.mrb[4].mxu1 %vm236_vm3, %v363_v29  ;;  %v909_v51 = vsel %vm236_vm3, %v904_v50, 0 }
 0x16f   :  { %9086 = vmatpush3.bf16.xpose.msra.mxu1 %v493_v38  ;;  %9087 = vmatprep.mubr.msk.bf16.mxu1 %vm10371_vm1, %v10370_v7 }
 0x170   :  { %9097 = vmatprep.subr.bf16.mxu1 %v10370_v7 }
 0x171   :  { %v1025_v39 = vpop.permute.xlu1 %1024  ;;  %v1027_v52 = vpop.permute.xlu0 %1026 }
 0x172   :  { %v1032_v53 = vsel %vm236_vm3, %v1027_v52, 0 }
 0x175   :  { %v1148_v43 = vpop.permute.xlu1 %1147  ;;  %v1150_v54 = vpop.permute.xlu0 %1149 }
 0x176   :  { %9088 = vmatmul.mubr.msk.bf16.vlgmr.msra.gmra.mrb[8].mxu1 %vm236_vm3, %v486_v42  ;;  %v1155_v55 = vsel %vm236_vm3, %v1150_v54, 0 }
 0x177   :  { %9098 = vmatpush3.bf16.xpose.msra.mxu1 %v616_v44  ;;  %9099 = vmatprep.mubr.msk.bf16.mxu1 %vm10371_vm1, %v10370_v7 }
 0x178   :  { %9109 = vmatprep.subr.bf16.mxu1 %v10370_v7 }
 0x179   :  { %v310_v46 = vpop.permute.xlu1 %309 }
 0x17a   :  { %v319_v47 = vand.u32 %v10502_v45, %v310_v46 }
 0x17c   :  { %9068 = vmatpush3.bf16.msra.mxu0 %v319_v47 }
 0x17d   :  { %9079 = vmatprep.subr.bf16.mxu0 %v10370_v7 }
 0x17e   :  { %9100 = vmatmul.mubr.msk.bf16.vlgmr.msra.gmra.mrb[12].mxu1 %vm236_vm3, %v609_v48 }
 0x17f   :  { %9110 = vmatpush3.bf16.xpose.msra.mxu1 %v786_v49  ;;  %9111 = vmatprep.mubr.msk.bf16.mxu1 %vm10371_vm1, %v10370_v7 }
 0x180   :  { %9121 = vmatprep.subr.bf16.mxu1 %v10370_v7 }
 0x186   :  { %9112 = vmatmul.mubr.msk.bf16.vlgmr.msra.gmra.mrb[16].mxu1 %vm236_vm3, %v10466_v28 }
 0x187   :  { %9122 = vmatpush3.bf16.xpose.msra.mxu1 %v909_v51  ;;  %9123 = vmatprep.mubr.msk.bf16.mxu1 %vm10371_vm1, %v10370_v7 }
 0x188   :  { %9133 = vmatprep.subr.bf16.mxu1 %v10370_v7 }
 0x18e   :  { %9124 = vmatmul.mubr.msk.bf16.vlgmr.msra.gmra.mrb[20].mxu1 %vm236_vm3, %v902_v37 }
 0x18f   :  { %9134 = vmatpush3.bf16.xpose.msra.mxu1 %v1032_v53  ;;  %9135 = vmatprep.mubr.msk.bf16.mxu1 %vm10371_vm1, %v10370_v7 }
 0x190   :  { %9145 = vmatprep.subr.bf16.mxu1 %v10370_v7 }
 0x196   :  { %9136 = vmatmul.mubr.msk.bf16.vlgmr.msra.gmra.mrb[24].mxu1 %vm236_vm3, %v1025_v39 }
 0x197   :  { %9146 = vmatpush3.bf16.xpose.msra.mxu1 %v1155_v55  ;;  %9147 = vmatprep.mubr.msk.bf16.mxu1 %vm10371_vm1, %v10370_v7 }
 0x19e   :  { %9148 = vmatmul.mubr.msk.bf16.vlgmr.msra.gmra.mrb[28].mxu1 %vm236_vm3, %v1148_v43 }
 0x239   :  { %v10530_v56 = vpop.f32.mrb[0].mxu1 }
 0x23a   :  { %v9065_v57 = vpop.f32.mrb[1].mxu1  ;;  %v285_v58 = vsel %vm284_vm6, %v10530_v56, -inf }
 0x23b   :  { %v10534_v59 = vpop.f32.mrb[2].mxu1  ;;  %286 = vmax.xlane.f32.xlu0 %v285_v58 }
 0x23c   :  { %v9066_v60 = vpop.f32.mrb[3].mxu1  ;;  %v289_v61 = vsel %vm288_vm7, %v10534_v59, -inf }
 0x23d   :  { %290 = vmax.xlane.f32.xlu1 %v289_v61 }
 0x241   :  { %v10538_v62 = vpop.f32.mrb[4].mxu1 }
 0x242   :  { %v9077_v63 = vpop.f32.mrb[5].mxu1  ;;  %v413_v0 = vsel %vm284_vm6, %v10538_v62, -inf }
 0x243   :  { %v10542_v1 = vpop.f32.mrb[6].mxu1  ;;  %414 = vmax.xlane.f32.xlu0 %v413_v0 }
 0x244   :  { %v9078_v2 = vpop.f32.mrb[7].mxu1  ;;  %v416_v3 = vsel %vm288_vm7, %v10542_v1, -inf }
 0x247   :  { %417 = vmax.xlane.f32.xlu0 %v416_v3 }
 0x249   :  { %v10546_v4 = vpop.f32.mrb[8].mxu1 }
 0x24a   :  { %v9089_v5 = vpop.f32.mrb[9].mxu1  ;;  %v536_v6 = vsel %vm284_vm6, %v10546_v4, -inf }
 0x24b   :  { %v10550_v8 = vpop.f32.mrb[10].mxu1  ;;  %537 = vmax.xlane.f32.xlu1 %v536_v6 }
 0x24c   :  { %v9090_v9 = vpop.f32.mrb[11].mxu1  ;;  %v539_v10 = vsel %vm288_vm7, %v10550_v8, -inf }
 0x24d   :  { %540 = vmax.xlane.f32.xlu0 %v539_v10 }
 0x251   :  { %v10554_v11 = vpop.f32.mrb[12].mxu1 }
 0x252   :  { %v9101_v12 = vpop.f32.mrb[13].mxu1  ;;  %v659_v33 = vsel %vm284_vm6, %v10554_v11, -inf }
 0x253   :  { %v10556_v13 = vpop.f32.mrb[14].mxu1 }
 0x254   :  { %v9102_v14 = vpop.f32.mrb[15].mxu1  ;;  %v662_v34 = vsel %vm288_vm7, %v10556_v13, -inf }
 0x259   :  { %v10558_v15 = vpop.f32.mrb[16].mxu1 }
 0x25a   :  { %v9113_v16 = vpop.f32.mrb[17].mxu1  ;;  %v829_v35 = vsel %vm284_vm6, %v10558_v15, -inf }
 0x25b   :  { %v10560_v18 = vpop.f32.mrb[18].mxu1 }
 0x25c   :  { %559 = vrot.lane.b32.xlu1 %v10449_v17, %s12424_s22  ;;  %v9114_v19 = vpop.f32.mrb[19].mxu1  ;;  %v832_v36 = vsel %vm288_vm7, %v10560_v18, -inf }
 0x261   :  { %v10564_v20 = vpop.f32.mrb[20].mxu1 }
 0x262   :  { %v9125_v21 = vpop.f32.mrb[21].mxu1  ;;  %v952_v37 = vsel %vm284_vm6, %v10564_v20, -inf }
 0x263   :  { %436 = vrot.lane.b32.xlu0 %v10449_v17, %s12428_s23  ;;  %v10568_v22 = vpop.f32.mrb[22].mxu1 }
 0x264   :  { %v9126_v23 = vpop.f32.mrb[23].mxu1  ;;  %v955_v38 = vsel %vm288_vm7, %v10568_v22, -inf }
 0x269   :  { %v10570_v24 = vpop.f32.mrb[24].mxu1 }
 0x26a   :  { %v9137_v25 = vpop.f32.mrb[25].mxu1  ;;  %v1075_v39 = vsel %vm284_vm6, %v10570_v24, -inf }
 0x26b   :  { %v10572_v26 = vpop.f32.mrb[26].mxu1 }
 0x26c   :  { %v9138_v27 = vpop.f32.mrb[27].mxu1  ;;  %v1078_v40 = vsel %vm288_vm7, %v10572_v26, -inf }
 0x271   :  { %v10574_v29 = vpop.f32.mrb[28].mxu1 }
 0x272   :  { %v9149_v30 = vpop.f32.mrb[29].mxu1  ;;  %v1198_v41 = vsel %vm284_vm6, %v10574_v29, -inf }
 0x273   :  { %v10576_v31 = vpop.f32.mrb[30].mxu1 }
 0x274   :  { %v9150_v32 = vpop.f32.mrb[31].mxu1  ;;  %v1201_v42 = vsel %vm288_vm7, %v10576_v31, -inf }
 0x280   :  { %660 = vmax.xlane.f32.xlu1 %v659_v33 }
 0x282   :  { %663 = vmax.xlane.f32.xlu0 %v662_v34 }
 0x284   :  { %830 = vmax.xlane.f32.xlu1 %v829_v35 }
 0x286   :  { %833 = vmax.xlane.f32.xlu0 %v832_v36 }
 0x288   :  { %953 = vmax.xlane.f32.xlu1 %v952_v37 }
 0x28a   :  { %956 = vmax.xlane.f32.xlu0 %v955_v38 }
 0x28c   :  { %1076 = vmax.xlane.f32.xlu1 %v1075_v39 }
 0x28e   :  { %1079 = vmax.xlane.f32.xlu0 %v1078_v40 }
 0x290   :  { %1199 = vmax.xlane.f32.xlu1 %v1198_v41 }
 0x292   :  { %1202 = vmax.xlane.f32.xlu0 %v1201_v42 }
 0x2a1   :  { %682 = vrot.lane.b32.xlu1 %v10449_v17, %s12416_s24 }
 0x2c8   :  { %v287_v43 = vpop.xlane.xlu0 %286 }
 0x2c9   :  { %v292_v44 = vsub.f32 %v10530_v56, %v287_v43 }
 0x2ca   :  { %v291_v46 = vpop.xlane.xlu1 %290 }
 0x2cb   :  { %v294_v47 = vmul.f32 1.442695, %v292_v44  ;;  %v293_v48 = vsub.f32 %v10534_v59, %v291_v46 }
 0x2cd   :  { %10050 = vpow2.f32 %v294_v47  ;;  %v296_v49 = vmul.f32 1.442695, %v293_v48 }
 0x2cf   :  { %10052 = vpow2.f32 %v296_v49 }
 0x2d0   :  { %v415_v50 = vpop.xlane.xlu0 %414 }
 0x2d1   :  { %v419_v51 = vsub.f32 %v10538_v62, %v415_v50 }
 0x2d3   :  { %v421_v52 = vmul.f32 1.442695, %v419_v51 }
 0x2d4   :  { %v418_v53 = vpop.xlane.xlu0 %417 }
 0x2d5   :  { %10054 = vpow2.f32 %v421_v52  ;;  %v420_v54 = vsub.f32 %v10542_v1, %v418_v53 }
 0x2d7   :  { %v10604_v55 = vpop.eup %10050  ;;  %v423_v17 = vmul.f32 1.442695, %v420_v54 }
 0x2d8   :  { %v538_v57 = vpop.xlane.xlu1 %537  ;;  %v298_v56 = vsel %vm284_vm6, %v10604_v55, 0.0 }
 0x2d9   :  { %v10608_v58 = vpop.eup %10052  ;;  %10056 = vpow2.f32 %v423_v17  ;;  %v542_v59 = vsub.f32 %v10546_v4, %v538_v57  ;;  %299 = vadd.xlane.f32.xlu1 %v298_v56 }
 0x2da   :  { %v301_v60 = vsel %vm288_vm7, %v10608_v58, 0.0  ;;  %v541_v4 = vpop.xlane.xlu0 %540 }
 0x2db   :  { %v544_v61 = vmul.f32 1.442695, %v542_v59  ;;  %302 = vadd.xlane.f32.xlu0 %v301_v60  ;;  %v543_v5 = vsub.f32 %v10550_v8, %v541_v4 }
 0x2dc   :  { %v10628_v9 = vpop.permute.xlu1 %559 }
 0x2dd   :  { %10058 = vpow2.f32 %v544_v61  ;;  %v546_v6 = vmul.f32 1.442695, %v543_v5 }
 0x2de   :  { %v10630_v10 = vpop.permute.xlu0 %436 }
 0x2df   :  { %v10613_v62 = vpop.eup %10054  ;;  %10060 = vpow2.f32 %v546_v6 }
 0x2e0   :  { %v425_v63 = vsel %vm284_vm6, %v10613_v62, 0.0 }
 0x2e1   :  { %426 = vadd.xlane.f32.xlu1 %v425_v63 }
 0x2e3   :  { %v10617_v0 = vpop.eup %10056 }
 0x2e4   :  { %v428_v1 = vsel %vm288_vm7, %v10617_v0, 0.0 }
 0x2e5   :  { %429 = vadd.xlane.f32.xlu0 %v428_v1 }
 0x2e7   :  { %v10621_v2 = vpop.eup %10058 }
 0x2e8   :  { %v548_v3 = vsel %vm284_vm6, %v10621_v2, 0.0 }
 0x2e9   :  { %549 = vadd.xlane.f32.xlu1 %v548_v3  ;;  %v10636_v34 = vpop.eup %10060 }
 0x2fb   :  { %852 = vrot.lane.b32.xlu0 %v10466_v28, %s12426_s21 }
 0x30d   :  { %v661_v12 = vpop.xlane.xlu1 %660 }
 0x30e   :  { %v665_v14 = vsub.f32 %v10554_v11, %v661_v12 }
 0x30f   :  { %v664_v16 = vpop.xlane.xlu0 %663 }
 0x310   :  { %v667_v19 = vmul.f32 1.442695, %v665_v14  ;;  %v666_v21 = vsub.f32 %v10556_v13, %v664_v16 }
 0x311   :  { %v831_v23 = vpop.xlane.xlu1 %830 }
 0x312   :  { %10062 = vpow2.f32 %v667_v19  ;;  %v669_v25 = vmul.f32 1.442695, %v666_v21  ;;  %v835_v27 = vsub.f32 %v10558_v15, %v831_v23  ;;  %v551_v15 = vsel %vm288_vm7, %v10636_v34, 0.0 }
 0x313   :  { %v834_v30 = vpop.xlane.xlu0 %833 }
 0x314   :  { %10064 = vpow2.f32 %v669_v25  ;;  %v837_v8 = vmul.f32 1.442695, %v835_v27  ;;  %v836_v32 = vsub.f32 %v10560_v18, %v834_v30  ;;  %v442_v30 = vand.u32 %v10630_v10, %v10502_v45 }
 0x315   :  { %v954_v33 = vpop.xlane.xlu1 %953 }
 0x316   :  { %10066 = vpow2.f32 %v837_v8  ;;  %v839_v35 = vmul.f32 1.442695, %v836_v32  ;;  %v958_v11 = vsub.f32 %v10564_v20, %v954_v33 }
 0x317   :  { %v957_v36 = vpop.xlane.xlu0 %956 }
 0x318   :  { %10068 = vpow2.f32 %v839_v35  ;;  %v960_v13 = vmul.f32 1.442695, %v958_v11  ;;  %v959_v37 = vsub.f32 %v10568_v22, %v957_v36 }
 0x319   :  { %v1077_v38 = vpop.xlane.xlu1 %1076 }
 0x31a   :  { %552 = vadd.xlane.f32.xlu0 %v551_v15  ;;  %10070 = vpow2.f32 %v960_v13  ;;  %v962_v18 = vmul.f32 1.442695, %v959_v37  ;;  %v1081_v40 = vsub.f32 %v10570_v24, %v1077_v38 }
 0x31b   :  { %v1080_v56 = vpop.xlane.xlu0 %1079 }
 0x31c   :  { %v10642_v39 = vpop.eup %10062  ;;  %10072 = vpow2.f32 %v962_v18  ;;  %v1083_v22 = vmul.f32 1.442695, %v1081_v40  ;;  %v1082_v59 = vsub.f32 %v10572_v26, %v1080_v56 }
 0x31d   :  { %v1200_v41 = vpop.xlane.xlu1 %1199  ;;  %v671_v20 = vsel %vm284_vm6, %v10642_v39, 0.0 }
 0x31e   :  { %v10647_v42 = vpop.eup %10064  ;;  %672 = vadd.xlane.f32.xlu0 %v671_v20  ;;  %v1204_v44 = vsub.f32 %v10574_v29, %v1200_v41  ;;  %10074 = vpow2.f32 %v1083_v22  ;;  %v1085_v61 = vmul.f32 1.442695, %v1082_v59 }
 0x31f   :  { %v674_v46 = vsel %vm288_vm7, %v10647_v42, 0.0  ;;  %v1203_v60 = vpop.xlane.xlu0 %1202 }
 0x320   :  { %v10649_v43 = vpop.eup %10066  ;;  %v1206_v48 = vmul.f32 1.442695, %v1204_v44  ;;  %v1205_v63 = vsub.f32 %v10576_v31, %v1203_v60 }
 0x321   :  { %v841_v47 = vsel %vm284_vm6, %v10649_v43, 0.0  ;;  %v683_v6 = vpop.permute.xlu1 %682 }
 0x322   :  { %v10656_v24 = vpop.eup %10068  ;;  %675 = vadd.xlane.f32.xlu0 %v674_v46  ;;  %842 = vadd.xlane.f32.xlu1 %v841_v47  ;;  %10076 = vpow2.f32 %v1206_v48  ;;  %v1208_v1 = vmul.f32 1.442695, %v1205_v63  ;;  %v688_v40 = vand.u32 %v683_v6, %v10502_v45 }
 0x323   :  { %v844_v49 = vsel %vm288_vm7, %v10656_v24, 0.0  ;;  %10078 = vpow2.f32 %v1085_v61 }
 0x324   :  { %v10660_v50 = vpop.eup %10070  ;;  %10080 = vpow2.f32 %v1208_v1 }
 0x325   :  { %v964_v29 = vsel %vm284_vm6, %v10660_v50, 0.0 }
 0x326   :  { %845 = vadd.xlane.f32.xlu0 %v844_v49  ;;  %v10664_v51 = vpop.eup %10072 }
 0x327   :  { %v967_v52 = vsel %vm288_vm7, %v10664_v51, 0.0 }
 0x328   :  { %v10668_v53 = vpop.eup %10074 }
 0x329   :  { %v1087_v54 = vsel %vm284_vm6, %v10668_v53, 0.0 }
 0x32a   :  { %965 = vadd.xlane.f32.xlu0 %v964_v29 }
 0x32c   :  { %v10672_v17 = vpop.eup %10076 }
 0x32d   :  { %v1210_v57 = vsel %vm284_vm6, %v10672_v17, 0.0  ;;  %v10682_v3 = vpop.eup %10078 }
 0x32e   :  { %968 = vadd.xlane.f32.xlu0 %v967_v52  ;;  %v1090_v4 = vsel %vm288_vm7, %v10682_v3, 0.0  ;;  %v10686_v5 = vpop.eup %10080 }
 0x32f   :  { %v1213_v26 = vsel %vm288_vm7, %v10686_v5, 0.0 }
 0x332   :  { %1088 = vadd.xlane.f32.xlu0 %v1087_v54 }
 0x333   :  { %975 = vrot.lane.b32.xlu1 %v10466_v28, %s12428_s23 }
 0x336   :  { %1211 = vadd.xlane.f32.xlu0 %v1210_v57 }
 0x34c   :  { %1098 = vrot.lane.b32.xlu0 %v10466_v28, %s12424_s22 }
 0x357   :  { %1091 = vadd.xlane.f32.xlu1 %v1090_v4 }
 0x35b   :  { %1214 = vadd.xlane.f32.xlu1 %v1213_v26 }
 0x366   :  { %v300_v31 = vpop.xlane.xlu1 %299 }
 0x367   :  { %10082 = vrcp.f32 %v300_v31 }
 0x368   :  { %v303_v12 = vpop.xlane.xlu0 %302 }
 0x369   :  { %10084 = vrcp.f32 %v303_v12 }
 0x36c   :  { %1221 = vrot.lane.b32.xlu1 %v10466_v28, %s12416_s24 }
 0x36e   :  { %v427_v14 = vpop.xlane.xlu1 %426 }
 0x36f   :  { %10086 = vrcp.f32 %v427_v14 }
 0x371   :  { %v10083_v16 = vpop.eup %10082 }
 0x372   :  { %v430_v19 = vpop.xlane.xlu0 %429  ;;  %v306_v23 = vmul.f32 %v10083_v16, %v10604_v55 }
 0x373   :  { %v10085_v21 = vpop.eup %10084  ;;  %10088 = vrcp.f32 %v430_v19 }
 0x374   :  { %v307_v25 = vmul.f32 %v10085_v21, %v10608_v58  ;;  %v565_v58 = vand.u32 %v10628_v9, %v10502_v45 }
 0x376   :  { %v308_v27 = vpack.c.bf16 %v307_v25, %v306_v23  ;;  %v853_v10 = vpop.permute.xlu0 %852  ;;  %v550_v35 = vpop.xlane.xlu1 %549 }
 0x377   :  { %10090 = vrcp.f32 %v550_v35  ;;  %v858_v48 = vand.u32 %v853_v10, %v10502_v45 }
 0x378   :  { %9070 = vmatmul.mubr.msk.bf16.vlgmr.msra.gmra.mrb[4].mxu0 %vm284_vm6, %v308_v27 }
 0x379   :  { %9080 = vmatpush3.bf16.msra.mxu0 %v442_v30  ;;  %9081 = vmatprep.mubr.msk.bf16.mxu0 %vm10371_vm1, %v10370_v7  ;;  %v10087_v28 = vpop.eup %10086 }
 0x37a   :  { %9091 = vmatprep.subr.bf16.mxu0 %v10370_v7  ;;  %v433_v32 = vmul.f32 %v10087_v28, %v10613_v62 }
 0x37d   :  { %v10089_v8 = vpop.eup %10088 }
 0x37e   :  { %v434_v55 = vmul.f32 %v10089_v8, %v10617_v0 }
 0x380   :  { %v435_v33 = vpack.c.bf16 %v434_v55, %v433_v32 }
 0x381   :  { %v10091_v36 = vpop.eup %10090 }
 0x382   :  { %9082 = vmatmul.mubr.msk.bf16.vlgmr.msra.gmra.mrb[8].mxu0 %vm284_vm6, %v435_v33  ;;  %v556_v9 = vmul.f32 %v10091_v36, %v10621_v2 }
 0x383   :  { %9092 = vmatpush3.bf16.msra.mxu0 %v565_v58  ;;  %9093 = vmatprep.mubr.msk.bf16.mxu0 %vm10371_vm1, %v10370_v7 }
 0x384   :  { %9103 = vmatprep.subr.bf16.mxu0 %v10370_v7 }
 0x3a7   :  { %v553_v11 = vpop.xlane.xlu0 %552 }
 0x3a8   :  { %10092 = vrcp.f32 %v553_v11 }
 0x3ab   :  { %v673_v62 = vpop.xlane.xlu0 %672 }
 0x3ac   :  { %10094 = vrcp.f32 %v673_v62 }
 0x3af   :  { %v676_v0 = vpop.xlane.xlu0 %675  ;;  %v843_v38 = vpop.xlane.xlu1 %842 }
 0x3b0   :  { %10096 = vrcp.f32 %v676_v0 }
 0x3b2   :  { %v10093_v13 = vpop.eup %10092 }
 0x3b3   :  { %v557_v37 = vmul.f32 %v10093_v13, %v10636_v34  ;;  %v846_v15 = vpop.xlane.xlu0 %845 }
 0x3b4   :  { %10098 = vrcp.f32 %v846_v15 }
 0x3b5   :  { %v558_v18 = vpack.c.bf16 %v557_v37, %v556_v9  ;;  %10100 = vrcp.f32 %v843_v38 }
 0x3b6   :  { %v10095_v20 = vpop.eup %10094 }
 0x3b7   :  { %v966_v41 = vpop.xlane.xlu0 %965  ;;  %9094 = vmatmul.mubr.msk.bf16.vlgmr.msra.gmra.mrb[12].mxu0 %vm284_vm6, %v558_v18  ;;  %v679_v34 = vmul.f32 %v10095_v20, %v10642_v39 }
 0x3b8   :  { %9104 = vmatpush3.bf16.msra.mxu0 %v688_v40  ;;  %9105 = vmatprep.mubr.msk.bf16.mxu0 %vm10371_vm1, %v10370_v7 }
 0x3b9   :  { %9115 = vmatprep.subr.bf16.mxu0 %v10370_v7 }
 0x3ba   :  { %v10097_v2 = vpop.eup %10096 }
 0x3bb   :  { %v680_v22 = vmul.f32 %v10097_v2, %v10647_v42  ;;  %v969_v44 = vpop.xlane.xlu0 %968  ;;  %v976_v42 = vpop.permute.xlu1 %975 }
 0x3bc   :  { %10102 = vrcp.f32 %v969_v44  ;;  %v981_v59 = vand.u32 %v976_v42, %v10502_v45 }
 0x3bd   :  { %v681_v46 = vpack.c.bf16 %v680_v22, %v679_v34  ;;  %10104 = vrcp.f32 %v966_v41 }
 0x3be   :  { %v10099_v47 = vpop.eup %10098 }
 0x3bf   :  { %v1089_v49 = vpop.xlane.xlu0 %1088  ;;  %9106 = vmatmul.mubr.msk.bf16.vlgmr.msra.gmra.mrb[16].mxu0 %vm284_vm6, %v681_v46  ;;  %v10101_v29 = vpop.eup %10100  ;;  %v850_v52 = vmul.f32 %v10099_v47, %v10656_v24  ;;  %v9998_v47 = vld [vmem:[%s10755_s30] sm:$0xff]  }
 0x3c0   :  { %9116 = vmatpush3.bf16.msra.mxu0 %v858_v48  ;;  %9117 = vmatprep.mubr.msk.bf16.mxu0 %vm10371_vm1, %v10370_v7  ;;  %v849_v39 = vmul.f32 %v10101_v29, %v10649_v43  ;;  %10106 = vrcp.f32 %v1089_v49  ;;  %v9999_v29 = vld [vmem:[%s10755_s30 + $0x8] sm:$0xff]  }
 0x3c1   :  { %9127 = vmatprep.subr.bf16.mxu0 %v10370_v7  ;;  %9157 = vmatprep.subr.bf16.mxu1 %v9998_v47 }
 0x3c2   :  { %v851_v57 = vpack.c.bf16 %v850_v52, %v849_v39  ;;  %9158 = vmatpush3.bf16.msra.mxu1 %v9998_v47 }
 0x3c3   :  { %v1212_v54 = vpop.xlane.xlu0 %1211  ;;  %9159 = vmatprep.subr.bf16.mxu1 %v9999_v29 }
 0x3c6   :  { %v10103_v56 = vpop.eup %10102  ;;  %9160 = vmatpush3.bf16.msra.mxu1 %v9999_v29 }
 0x3c7   :  { %9118 = vmatmul.mubr.msk.bf16.vlgmr.msra.gmra.mrb[20].mxu0 %vm284_vm6, %v851_v57  ;;  %v10105_v60 = vpop.eup %10104  ;;  %v973_v61 = vmul.f32 %v10103_v56, %v10664_v51  ;;  %v1099_v43 = vpop.permute.xlu0 %1098 }
 0x3c8   :  { %9128 = vmatpush3.bf16.msra.mxu0 %v981_v59  ;;  %9129 = vmatprep.mubr.msk.bf16.mxu0 %vm10371_vm1, %v10370_v7  ;;  %v972_v24 = vmul.f32 %v10105_v60, %v10660_v50  ;;  %v1104_v1 = vand.u32 %v1099_v43, %v10502_v45 }
 0x3c9   :  { %9139 = vmatprep.subr.bf16.mxu0 %v10370_v7 }
 0x3ca   :  { %v974_v63 = vpack.c.bf16 %v973_v61, %v972_v24  ;;  %v10107_v26 = vpop.eup %10106 }
 0x3cb   :  { %v1095_v6 = vmul.f32 %v10107_v26, %v10668_v53 }
 0x3cf   :  { %9130 = vmatmul.mubr.msk.bf16.vlgmr.msra.gmra.mrb[24].mxu0 %vm284_vm6, %v974_v63 }
 0x3d0   :  { %9140 = vmatpush3.bf16.msra.mxu0 %v1104_v1  ;;  %9141 = vmatprep.mubr.msk.bf16.mxu0 %vm10371_vm1, %v10370_v7 }
 0x3d1   :  { %9151 = vmatprep.subr.bf16.mxu0 %v10370_v7 }
 0x3e4   :  { %v1092_v4 = vpop.xlane.xlu1 %1091 }
 0x3e5   :  { %10108 = vrcp.f32 %v1092_v4 }
 0x3e8   :  { %v1215_v51 = vpop.xlane.xlu1 %1214 }
 0x3e9   :  { %10110 = vrcp.f32 %v1215_v51 }
 0x3ea   :  { %10112 = vrcp.f32 %v1212_v54 }
 0x3ec   :  { %v1222_v12 = vpop.permute.xlu1 %1221 }
 0x3ed   :  { %v1227_v19 = vand.u32 %v1222_v12, %v10502_v45 }
 0x3ef   :  { %v10109_v50 = vpop.eup %10108 }
 0x3f0   :  { %v1096_v31 = vmul.f32 %v10109_v50, %v10682_v3 }
 0x3f2   :  { %v1097_v14 = vpack.c.bf16 %v1096_v31, %v1095_v6 }
 0x3f3   :  { %v10111_v16 = vpop.eup %10110 }
 0x3f4   :  { %9142 = vmatmul.mubr.msk.bf16.vlgmr.msra.gmra.mrb[28].mxu0 %vm284_vm6, %v1097_v14  ;;  %v10113_v21 = vpop.eup %10112  ;;  %v1219_v23 = vmul.f32 %v10111_v16, %v10686_v5 }
 0x3f5   :  { %9152 = vmatpush3.bf16.msra.mxu0 %v1227_v19  ;;  %9153 = vmatprep.mubr.msk.bf16.mxu0 %vm10371_vm1, %v10370_v7  ;;  %v1218_v25 = vmul.f32 %v10113_v21, %v10672_v17 }
 0x3f7   :  { %v1220_v27 = vpack.c.bf16 %v1219_v23, %v1218_v25 }
 0x3fc   :  { %9154 = vmatmul.mubr.msk.bf16.vlgmr.msra.gmra.mrb[32].mxu0 %vm284_vm6, %v1220_v27 }
 0x44b   :  { %v10745_v53 = vpop.f32.mrb[4].mxu0 }
 0x44c   :  { %v9071_v3 = vpop.f32.mrb[5].mxu0 }
 0x44d   :  { %v10747_v30 = vpop.f32.mrb[6].mxu0 }
 0x44e   :  { %v9072_v28 = vpop.f32.mrb[7].mxu0 }
 0x455   :  { %v478_v8 = vpop.f32.mrb[8].mxu0 }
 0x456   :  { %v9083_v32 = vpop.f32.mrb[9].mxu0 }
 0x457   :  { %v481_v55 = vpop.f32.mrb[10].mxu0 }
 0x458   :  { %v9876_v33 = vpack.i.bf16 %v478_v8, %v481_v55  ;;  %v9084_v58 = vpop.f32.mrb[11].mxu0 }
 0x45a   :  { %9877 = vrot.lane.b32.xlu1 %v9876_v33, %s12422_s25 }
 0x48a   :  { %v601_v5 = vpop.f32.mrb[12].mxu0 }
 0x48b   :  { %v9095_v10 = vpop.f32.mrb[13].mxu0 }
 0x48c   :  { %v604_v17 = vpop.f32.mrb[14].mxu0 }
 0x48d   :  { %v9881_v35 = vpack.i.bf16 %v601_v5, %v604_v17  ;;  %v9096_v11 = vpop.f32.mrb[15].mxu0 }
 0x48f   :  { %9882 = vrot.lane.b32.xlu0 %v9881_v35, %s12420_s26 }
 0x492   :  { %v724_v62 = vpop.f32.mrb[16].mxu0 }
 0x493   :  { %v9107_v0 = vpop.f32.mrb[17].mxu0 }
 0x494   :  { %v727_v36 = vpop.f32.mrb[18].mxu0 }
 0x495   :  { %v9901_v13 = vpack.i.bf16 %v724_v62, %v727_v36  ;;  %v9108_v9 = vpop.f32.mrb[19].mxu0 }
 0x49a   :  { %v894_v37 = vpop.f32.mrb[20].mxu0 }
 0x49b   :  { %v9119_v38 = vpop.f32.mrb[21].mxu0 }
 0x49c   :  { %v897_v15 = vpop.f32.mrb[22].mxu0  ;;  %v10364_v38 = vld [vmem:[%s10428_s9 + $0x10] sm:$0x3] }
 0x49d   :  { %v9120_v18 = vpop.f32.mrb[23].mxu0 }
 0x4a2   :  { %v1017_v40 = vpop.f32.mrb[24].mxu0 }
 0x4a3   :  { %v9131_v41 = vpop.f32.mrb[25].mxu0 }
 0x4a4   :  { %v1020_v20 = vpop.f32.mrb[26].mxu0  ;;  %v10365_v41 = vld [vmem:[%s10428_s9] sm:$0xff] }
 0x4a5   :  { %v9886_v2 = vpack.i.bf16 %v1020_v20, %v1017_v40  ;;  %v9132_v34 = vpop.f32.mrb[27].mxu0 }
 0x4a6   :  { %v10366_v34 = vld [vmem:[%s10428_s9 + $0x8] sm:$0xff]  ;;  %s10833_s9 = sld [smem:[%s12415_s0 + %s12422_s25]]  }
 0x4a7   :  { %9887 = vrot.lane.b32.xlu1 %v9886_v2, %s12422_s25 }
 0x4c7   :  { %v1140_v22 = vpop.f32.mrb[28].mxu0 }
 0x4c8   :  { %v9143_v44 = vpop.f32.mrb[29].mxu0 }
 0x4c9   :  { %v1143_v46 = vpop.f32.mrb[30].mxu0 }
 0x4ca   :  { %v9891_v48 = vpack.i.bf16 %v1143_v46, %v1140_v22  ;;  %v9144_v49 = vpop.f32.mrb[31].mxu0 }
 0x4cc   :  { %9892 = vrot.lane.b32.xlu1 %v9891_v48, %s12420_s26  ;;  %v9878_v56 = vpop.permute.xlu1 %9877 }
 0x4cd   :  { %v9880_v4 = vunpack.i.h.bf16 %v9878_v56  ;;  %v9879_v51 = vunpack.i.l.bf16 %v9878_v56  ;;  %v10003_v56 = vld [vmem:[%s10820_s28 + $0x8] sm:$0xff]  }
 0x4cf   :  { %v1263_v52 = vpop.f32.mrb[32].mxu0  ;;  %v755_v8 = vsel %vm236_vm3, %v10745_v53, %v9880_v4  ;;  %v756_v32 = vsel %vm236_vm3, %v10747_v30, %v9879_v51  ;;  %v8481_v30 = vld [vmem:[%s10783_s5] ss:$0 sm:$0xff] }
 0x4d0   :  { %v9155_v39 = vpop.f32.mrb[33].mxu0 }
 0x4d1   :  { %v1266_v42 = vpop.f32.mrb[34].mxu0 }
 0x4d2   :  { %v9896_v54 = vpack.i.bf16 %v1266_v42, %v1263_v52  ;;  %v9156_v57 = vpop.f32.mrb[35].mxu0  ;;  %v10000_v42 = vld [vmem:[%s10813_s10] sm:$0xff]  }
 0x4d3   :  { %9165 = vmatprep.subr.bf16.mxu0 %v10000_v42  ;;  %v10002_v57 = vld [vmem:[%s10820_s28] sm:$0xff]  }
 0x4d4   :  { %9897 = vrot.lane.b32.xlu1 %v9896_v54, %s12418_s1  ;;  %v10001_v54 = vld [vmem:[%s10813_s10 + $0x8] sm:$0xff]   ;;  %9166 = vmatpush3.bf16.msra.mxu0 %v10000_v42 }
 0x4d5   :  { %9167 = vmatprep.subr.bf16.mxu0 %v10001_v54  ;;  %9173 = vmatprep.subr.bf16.mxu1 %v10002_v57 }
 0x4d8   :  { %9902 = vrot.lane.b32.xlu1 %v9901_v13, %s12418_s1  ;;  %9168 = vmatpush3.bf16.msra.mxu0 %v10001_v54 }
 0x501   :  { %v9883_v1 = vpop.permute.xlu0 %9882 }
 0x502   :  { %v9885_v14 = vunpack.i.h.bf16 %v9883_v1  ;;  %v9884_v16 = vunpack.i.l.bf16 %v9883_v1 }
 0x504   :  { %v758_v58 = vsel %vm757_vm8, %v755_v8, %v9885_v14  ;;  %v759_v5 = vsel %vm757_vm8, %v756_v32, %v9884_v16 }
 0x519   :  { %v9888_v59 = vpop.permute.xlu1 %9887 }
 0x51a   :  { %v9890_v61 = vunpack.i.h.bf16 %v9888_v59  ;;  %v9889_v24 = vunpack.i.l.bf16 %v9888_v59 }
 0x51c   :  { %v1295_v50 = vsel %vm236_vm3, %v897_v15, %v9890_v61  ;;  %v1294_v6 = vsel %vm236_vm3, %v894_v37, %v9889_v24 }
 0x53e   :  { %v9893_v60 = vpop.permute.xlu1 %9892 }
 0x53f   :  { %v9895_v43 = vunpack.i.h.bf16 %v9893_v60  ;;  %v9894_v63 = vunpack.i.l.bf16 %v9893_v60 }
 0x541   :  { %v1296_v19 = vsel %vm757_vm8, %v1294_v6, %v9894_v63  ;;  %v1297_v21 = vsel %vm757_vm8, %v1295_v50, %v9895_v43 }
 0x546   :  { %v9898_v26 = vpop.permute.xlu1 %9897 }
 0x547   :  { %v9900_v31 = vunpack.i.h.bf16 %v9898_v26  ;;  %v9899_v12 = vunpack.i.l.bf16 %v9898_v26 }
 0x549   :  { %v1298_v23 = vsel %vm760_vm9, %v1296_v19, %v9899_v12  ;;  %v1299_v25 = vsel %vm760_vm9, %v1297_v21, %v9900_v31 }
 0x54a   :  { %v1303_v27 = vrot.slane %v1298_v23, 7  ;;  %v1304_v3 = vrot.slane %v1299_v25, 7  ;;  %v9903_v28 = vpop.permute.xlu1 %9902 }
 0x54b   :  { %v9905_v55 = vunpack.i.h.bf16 %v9903_v28  ;;  %v9904_v33 = vunpack.i.l.bf16 %v9903_v28 }
 0x54c   :  { %v1305_v10 = vsel %vm1302_vm10, %v1303_v27, %v1304_v3  ;;  %v8486_v3 = vld [vmem:[%s10827_s4] ss:$0 sm:$0xff] }
 0x54d   :  { %v761_v17 = vsel %vm760_vm9, %v758_v58, %v9905_v55  ;;  %v762_v35 = vsel %vm760_vm9, %v759_v5, %v9904_v33  ;;  %v1310_v53 = vpack.c.bf16 %v1305_v10, %v1305_v10  ;;  %v8487_v58 = vld [vmem:[%s10833_s9] ss:$0 sm:$0xff] }
 0x54e   :  { %v1308_v11 = vsel %vm1302_vm10, %v762_v35, %v1303_v27 }
 0x54f   :  { %v1309_v62 = vpack.c.bf16 %v1308_v11, %v761_v17 }
 0x551   :  { %9161 = vmatprep.mubr.msk.bf16.mxu1 %vm171_vm0, %v1309_v62 }
 0x552   :  { %9162 = vmatmul.mubr.msk.bf16.vlgmr.msra.gmra.mrb[32].mxu1 %vm171_vm0, %v1310_v53 }
 0x553   :  { %9174 = vmatpush3.bf16.msra.mxu1 %v10002_v57 }
 0x554   :  { %9175 = vmatprep.subr.bf16.mxu1 %v10003_v56 }
 0x557   :  { %9176 = vmatpush3.bf16.msra.mxu1 %v10003_v56 }
 0x625   :  { %v9163_v0 = vpop.f32.mrb[32].mxu1 }
 0x626   :  { %v1378_v36 = vadd.f32 %v9163_v0, %v8481_v30  ;;  %v1369_v13 = vpop.f32.mrb[33].mxu1 }
 0x627   :  { %v1370_v9 = vadd.f32 %v8481_v30, %v1369_v13  ;;  %v9164_v37 = vpop.f32.mrb[34].mxu1 }
 0x628   :  { %v10787_v15 = vadd.f32 %v10364_v38, %v1378_v36  ;;  %v1372_v18 = vpop.f32.mrb[35].mxu1  ;;  %v10004_v37 = vld [vmem:[%s10820_s28 + $0x10] sm:$0xff]   ;;  %v10005_v38 = vld [vmem:[%s10820_s28 + $0x18] sm:$0xff]  }
 0x629   :  { %v1373_v40 = vadd.f32 %v8481_v30, %v1372_v18  ;;  %v10790_v20 = vadd.f32 %v10365_v41, %v1370_v9  ;;  %9177 = vmatprep.subr.bf16.mxu1 %v10004_v37 }
 0x62a   :  { %v1393_v2 = vsel %vm1392_vm11, %v10787_v15, 0.0  ;;  %v1402_v52 = vmul.f32 %v10787_v15, %v10787_v15  ;;  %9178 = vmatpush3.bf16.msra.mxu1 %v10004_v37 }
 0x62b   :  { %v10795_v22 = vadd.f32 %v10366_v34, %v1373_v40  ;;  %1394 = vadd.xlane.f32.xlu0 %v1393_v2  ;;  %v1386_v47 = vsel %vm171_vm0, %v10790_v20, 0.0  ;;  %v1400_v48 = vmul.f32 %v10790_v20, %v10790_v20  ;;  %9179 = vmatprep.subr.bf16.mxu1 %v10005_v38 }
 0x62c   :  { %v1409_v39 = vsel %vm1392_vm11, %v1402_v52, 0.0 }
 0x62d   :  { %v1389_v44 = vsel %vm171_vm0, %v10795_v22, 0.0  ;;  %v1401_v46 = vmul.f32 %v10795_v22, %v10795_v22  ;;  %v1403_v29 = vsel %vm171_vm0, %v1400_v48, 0.0 }
 0x62e   :  { %1390 = vadd.xlane.f32.xlu1 %v1389_v44  ;;  %9180 = vmatpush3.bf16.msra.mxu1 %v10005_v38 }
 0x62f   :  { %1387 = vadd.xlane.f32.xlu0 %v1386_v47  ;;  %v1406_v49 = vsel %vm171_vm0, %v1401_v46, 0.0  ;;  %9199 = vmatprep.subr.bf16.mxu1 %v10370_v7 }
 0x632   :  { %1407 = vadd.xlane.f32.xlu1 %v1406_v49 }
 0x633   :  { %1404 = vadd.xlane.f32.xlu0 %v1403_v29  ;;  %v8493_v29 = vld [vmem:[%s10858_s8] ss:$0 sm:$0xff] }
 0x637   :  { %1410 = vadd.xlane.f32.xlu0 %v1409_v39 }
 0x6b8   :  { %v1395_v59 = vpop.xlane.xlu0 %1394 }
 0x6b9   :  { %v1399_v26 = vmul.f32 0.03125, %v1395_v59 }
 0x6bb   :  { %v1391_v60 = vpop.xlane.xlu1 %1390  ;;  %v1417_v19 = vmul.f32 %v1399_v26, %v1399_v26  ;;  %v1429_v62 = vsub.f32 %v10787_v15, %v1399_v26  ;;  %v8488_v15 = vld [vmem:[%s10848_s29] ss:$0 sm:$0xff] }
 0x6bc   :  { %v1398_v61 = vmul.f32 0.03125, %v1391_v60  ;;  %v1388_v24 = vpop.xlane.xlu0 %1387 }
 0x6bd   :  { %v1397_v43 = vmul.f32 0.03125, %v1388_v24 }
 0x6be   :  { %v1416_v1 = vmul.f32 %v1398_v61, %v1398_v61  ;;  %v1428_v32 = vsub.f32 %v10795_v22, %v1398_v61 }
 0x6bf   :  { %v1408_v63 = vpop.xlane.xlu1 %1407  ;;  %v1415_v50 = vmul.f32 %v1397_v43, %v1397_v43  ;;  %v1427_v33 = vsub.f32 %v10790_v20, %v1397_v43 }
 0x6c0   :  { %v1413_v4 = vmul.f32 0.03125, %v1408_v63  ;;  %v1405_v51 = vpop.xlane.xlu0 %1404 }
 0x6c1   :  { %v1412_v6 = vmul.f32 0.03125, %v1405_v51 }
 0x6c2   :  { %v1419_v31 = vsub.f32 %v1413_v4, %v1416_v1 }
 0x6c3   :  { %v1418_v12 = vsub.f32 %v1412_v6, %v1415_v50 }
 0x6c4   :  { %v1422_v14 = vadd.f32 1e-05, %v1419_v31  ;;  %v1411_v16 = vpop.xlane.xlu0 %1410 }
 0x6c5   :  { %v1421_v21 = vadd.f32 1e-05, %v1418_v12  ;;  %v1414_v23 = vmul.f32 0.03125, %v1411_v16  ;;  %v10006_v12 = vld [vmem:[%s10423_s6 + $0x10] sm:$0xff]  }
 0x6c6   :  { %10114 = vrsqrt.f32 %v1422_v14  ;;  %v10007_v14 = vld [vmem:[%s10423_s6 + $0x18] sm:$0xff]   ;;  %9185 = vmatprep.subr.bf16.mxu0 %v10006_v12  ;;  %s10394_s6 = smov 13  }
 0x6c7   :  { %10116 = vrsqrt.f32 %v1421_v21  ;;  %v1420_v25 = vsub.f32 %v1414_v23, %v1417_v19 }
 0x6c9   :  { %v1423_v27 = vadd.f32 1e-05, %v1420_v25 }
 0x6cb   :  { %10118 = vrsqrt.f32 %v1423_v27 }
 0x6d0   :  { %v10115_v28 = vpop.eup %10114 }
 0x6d1   :  { %v10117_v8 = vpop.eup %10116  ;;  %v1437_v55 = vmul.f32 %v10115_v28, %v8486_v3 }
 0x6d2   :  { %v1436_v5 = vmul.f32 %v10117_v8, %v8486_v3 }
 0x6d3   :  { %v1440_v10 = vmul.f32 %v1437_v55, %v1428_v32 }
 0x6d4   :  { %v1439_v17 = vmul.f32 %v1436_v5, %v1427_v33 }
 0x6d5   :  { %v10119_v35 = vpop.eup %10118  ;;  %v1449_v11 = vadd.f32 %v8487_v58, %v1440_v10 }
 0x6d6   :  { %v1438_v53 = vmul.f32 %v10119_v35, %v8486_v3  ;;  %v1448_v30 = vadd.f32 %v8487_v58, %v1439_v17 }
 0x6d8   :  { %v1451_v0 = vpack.c.bf16 %v1449_v11, %v1448_v30  ;;  %v1441_v36 = vmul.f32 %v1438_v53, %v1429_v62 }
 0x6da   :  { %9169 = vmatprep.mubr.msk.bf16.mxu0 %vm171_vm0, %v1451_v0  ;;  %v1450_v13 = vadd.f32 %v8487_v58, %v1441_v36  ;;  %v8500_v0 = vld [vmem:[%s10827_s4 + $0x1] ss:$0 sm:$0xff] }
 0x6dc   :  { %v1452_v9 = vpack.c.bf16 %v1450_v13, %v1450_v13 }
 0x6de   :  { %9170 = vmatmul.mubr.msk.bf16.vlgmr.msra.gmra.mrb[36].mxu0 %vm171_vm0, %v1452_v9 }
 0x6df   :  { %9186 = vmatpush3.bf16.msra.mxu0 %v10006_v12 }
 0x6e0   :  { %9187 = vmatprep.subr.bf16.mxu0 %v10007_v14 }
 0x6e3   :  { %9188 = vmatpush3.bf16.msra.mxu0 %v10007_v14 }
 0x6e4   :  { %9193 = vmatprep.subr.bf16.mxu0 %v10370_v7 }
 0x7b1   :  { %v9171_v18 = vpop.f32.mrb[36].mxu0 }
 0x7b2   :  { %v1525_v40 = vadd.f32 %v9171_v18, %v8488_v15  ;;  %v1516_v41 = vpop.f32.mrb[37].mxu0 }
 0x7b3   :  { %v1517_v20 = vadd.f32 %v8488_v15, %v1516_v41  ;;  %v9172_v2 = vpop.f32.mrb[38].mxu0 }
 0x7b4   :  { %v1519_v34 = vpop.f32.mrb[39].mxu0  ;;  %v1532_v44 = vmax.f32 %v1525_v40, 0.0 }
 0x7b5   :  { %v1520_v22 = vadd.f32 %v8488_v15, %v1519_v34  ;;  %v1530_v46 = vmax.f32 %v1517_v20, 0.0  ;;  %v8501_v15 = vld [vmem:[%s10833_s9 + $0x1] ss:$0 sm:$0xff] }
 0x7b6   :  { %v1534_v49 = vpack.c.bf16 %v1532_v44, %v1532_v44 }
 0x7b7   :  { %v1531_v47 = vmax.f32 %v1520_v22, 0.0 }
 0x7b9   :  { %v1533_v48 = vpack.c.bf16 %v1531_v47, %v1530_v46 }
 0x7bb   :  { %9181 = vmatprep.mubr.msk.bf16.mxu1 %vm1574_vm12, %v1533_v48 }
 0x7bc   :  { %9182 = vmatmul.mubr.msk.bf16.vlgmr.msra.gmra.mrb[36].mxu1 %vm1574_vm12, %v1534_v49 }
 0x7bd   :  { %9201 = vmatprep.mubr.msk.bf16.mxu1 %vm10371_vm1, %v10370_v7 }
 0x88f   :  { %v9183_v52 = vpop.f32.mrb[36].mxu1 }
 0x890   :  { %v1624_v39 = vadd.f32 %v9183_v52, %v8493_v29  ;;  %v1615_v42 = vpop.f32.mrb[37].mxu1 }
 0x891   :  { %v1616_v54 = vadd.f32 %v8493_v29, %v1615_v42  ;;  %v9184_v57 = vpop.f32.mrb[38].mxu1 }
 0x892   :  { %v10861_v56 = vadd.f32 %v1624_v39, %v1450_v13  ;;  %v1618_v59 = vpop.f32.mrb[39].mxu1 }
 0x893   :  { %v1629_v60 = vadd.f32 %v1616_v54, %v1448_v30  ;;  %v1619_v61 = vadd.f32 %v8493_v29, %v1618_v59  ;;  %v8511_v29 = vld [vmem:[%s10440_s13 + $0x1] ss:$0 sm:$0xff]  ;;  %s11617_s13 = sld [smem:[%s12415_s0 + %s10402_s3]]  }
 0x894   :  { %v1638_v24 = vsel %vm1392_vm11, %v10861_v56, 0.0  ;;  %v1646_v50 = vmul.f32 %v10861_v56, %v10861_v56 }
 0x895   :  { %v1630_v43 = vadd.f32 %v1619_v61, %v1449_v11  ;;  %1639 = vadd.xlane.f32.xlu1 %v1638_v24  ;;  %v1644_v1 = vmul.f32 %v1629_v60, %v1629_v60  ;;  %v1632_v4 = vsel %vm171_vm0, %v1629_v60, 0.0 }
 0x896   :  { %v1653_v31 = vsel %vm1392_vm11, %v1646_v50, 0.0 }
 0x897   :  { %v1635_v63 = vsel %vm171_vm0, %v1630_v43, 0.0  ;;  %v1645_v51 = vmul.f32 %v1630_v43, %v1630_v43  ;;  %v1647_v26 = vsel %vm171_vm0, %v1644_v1, 0.0 }
 0x898   :  { %1636 = vadd.xlane.f32.xlu0 %v1635_v63 }
 0x899   :  { %1633 = vadd.xlane.f32.xlu1 %v1632_v4  ;;  %v1650_v6 = vsel %vm171_vm0, %v1645_v51, 0.0 }
 0x89c   :  { %1648 = vadd.xlane.f32.xlu0 %v1647_v26 }
 0x89d   :  { %1651 = vadd.xlane.f32.xlu1 %v1650_v6 }
 0x8a0   :  { %1654 = vadd.xlane.f32.xlu0 %v1653_v31 }
 0x922   :  { %v1640_v16 = vpop.xlane.xlu1 %1639 }
 0x923   :  { %v1643_v28 = vmul.f32 0.03125, %v1640_v16 }
 0x925   :  { %v1637_v19 = vpop.xlane.xlu0 %1636  ;;  %v1661_v17 = vmul.f32 %v1643_v28, %v1643_v28  ;;  %v1673_v2 = vsub.f32 %v10861_v56, %v1643_v28 }
 0x926   :  { %v1634_v21 = vpop.xlane.xlu1 %1633  ;;  %v1642_v23 = vmul.f32 0.03125, %v1637_v19 }
 0x927   :  { %v1641_v25 = vmul.f32 0.03125, %v1634_v21 }
 0x928   :  { %v1660_v55 = vmul.f32 %v1642_v23, %v1642_v23  ;;  %v1672_v38 = vsub.f32 %v1630_v43, %v1642_v23 }
 0x929   :  { %v1659_v27 = vmul.f32 %v1641_v25, %v1641_v25  ;;  %v1649_v3 = vpop.xlane.xlu0 %1648  ;;  %v1671_v9 = vsub.f32 %v1629_v60, %v1641_v25 }
 0x92a   :  { %v1656_v8 = vmul.f32 0.03125, %v1649_v3  ;;  %v1652_v32 = vpop.xlane.xlu1 %1651 }
 0x92b   :  { %v1657_v33 = vmul.f32 0.03125, %v1652_v32 }
 0x92c   :  { %v1662_v58 = vsub.f32 %v1656_v8, %v1659_v27 }
 0x92d   :  { %v1663_v5 = vsub.f32 %v1657_v33, %v1660_v55  ;;  %v1655_v10 = vpop.xlane.xlu0 %1654 }
 0x92e   :  { %v1665_v35 = vadd.f32 1e-05, %v1662_v58  ;;  %v1658_v11 = vmul.f32 0.03125, %v1655_v10 }
 0x92f   :  { %v1666_v62 = vadd.f32 1e-05, %v1663_v5 }
 0x930   :  { %10120 = vrsqrt.f32 %v1665_v35  ;;  %v1664_v53 = vsub.f32 %v1658_v11, %v1661_v17 }
 0x931   :  { %10122 = vrsqrt.f32 %v1666_v62 }
 0x932   :  { %v1667_v30 = vadd.f32 1e-05, %v1664_v53 }
 0x934   :  { %10124 = vrsqrt.f32 %v1667_v30 }
 0x93a   :  { %v10121_v36 = vpop.eup %10120 }
 0x93b   :  { %v10123_v13 = vpop.eup %10122  ;;  %v1680_v37 = vmul.f32 %v10121_v36, %v8500_v0 }
 0x93c   :  { %v1681_v18 = vmul.f32 %v10123_v13, %v8500_v0 }
 0x93d   :  { %v1683_v40 = vmul.f32 %v1680_v37, %v1671_v9 }
 0x93e   :  { %v10125_v41 = vpop.eup %10124  ;;  %v1684_v20 = vmul.f32 %v1681_v18, %v1672_v38 }
 0x93f   :  { %v1682_v34 = vmul.f32 %v10125_v41, %v8500_v0  ;;  %v10878_v22 = vadd.f32 %v8501_v15, %v1683_v40 }
 0x940   :  { %v10880_v44 = vadd.f32 %v8501_v15, %v1684_v20 }
 0x941   :  { %v1685_v46 = vmul.f32 %v1682_v34, %v1673_v2 }
 0x942   :  { %v1701_v47 = vpack.c.bf16 %v10880_v44, %v10878_v22 }
 0x943   :  { %v10884_v48 = vadd.f32 %v8501_v15, %v1685_v46 }
 0x944   :  { %9189 = vmatprep.mubr.msk.bf16.mxu0 %vm171_vm0, %v1701_v47 }
 0x945   :  { %v1702_v49 = vpack.c.bf16 %v10884_v48, %v10884_v48 }
 0x947   :  { %9190 = vmatmul.mubr.msk.bf16.vlgmr.msra.gmra.mrb[40].mxu0 %vm171_vm0, %v1702_v49 }
 0x948   :  { %9195 = vmatprep.mubr.msk.bf16.mxu0 %vm10371_vm1, %v10370_v7 }
 0xa1a   :  { %v9191_v52 = vpop.f32.mrb[40].mxu0 }
 0xa1b   :  { %v1777_v39 = vadd.f32 %v9191_v52, %v8511_v29  ;;  %v1768_v42 = vpop.f32.mrb[41].mxu0 }
 0xa1c   :  { %v9192_v54 = vpop.f32.mrb[42].mxu0  ;;  %v1769_v56 = vadd.f32 %v8511_v29, %v1768_v42 }
 0xa1d   :  { %v1771_v57 = vpop.f32.mrb[43].mxu0  ;;  %v1783_v60 = vpack.c.bf16 %v1777_v39, %v1777_v39 }
 0xa1e   :  { %v1772_v59 = vadd.f32 %v8511_v29, %v1771_v57 }
 0xa1f   :  { %v2320_v63 = vshrl.u32 %v1783_v60, 16  ;;  %v2323_v1 = vshll.u32 %v1783_v60, 16 }
 0xa20   :  { %v10893_v61 = vpack.c.bf16 %v1772_v59, %v1769_v56 }
 0xa21   :  { %v2322_v26 = vrot.slane %v2320_v63, 4  ;;  %v2325_v50 = vrot.slane %v2323_v1, 5 }
 0xa22   :  { %1915 = vrot.lane.b32.xlu0 %v10893_v61, %s10375_s17  ;;  %1792 = vrot.lane.b32.xlu1 %v10893_v61, %s10373_s15  ;;  %v2312_v24 = vshrl.u32 %v10893_v61, 16  ;;  %v2315_v43 = vshll.u32 %v10893_v61, 16 }
 0xa23   :  { %v2326_v31 = vor.u32 %v2325_v50, %v2322_v26 }
 0xa24   :  { %v2314_v4 = vrot.slane %v2312_v24, 4  ;;  %v2317_v51 = vrot.slane %v2315_v43, 5 }
 0xa26   :  { %2036 = vrot.lane.b32.xlu0 %v10893_v61, %s10377_s19  ;;  %1913 = vrot.lane.b32.xlu1 %v10893_v61, %s10372_s14  ;;  %v2318_v6 = vor.u32 %v2317_v51, %v2314_v4 }
 0xa28   :  { %v10910_v12 = vsel %vm763_vm2, %v2318_v6, %v2326_v31 }
 0xa2a   :  { %2159 = vrot.lane.b32.xlu0 %v10893_v61, %s10378_s20  ;;  %2038 = vrot.lane.b32.xlu1 %v10893_v61, %s10374_s16 }
 0xa2e   :  { %2161 = vrot.lane.b32.xlu1 %v10893_v61, %s10376_s18  ;;  %2451 = vrot.lane.b32.xlu0 %v10910_v12, %s10375_s17 }
 0xa32   :  { %2574 = vrot.lane.b32.xlu0 %v10910_v12, %s10374_s16  ;;  %2328 = vrot.lane.b32.xlu1 %v10910_v12, %s10373_s15 }
 0xa36   :  { %2697 = vrot.lane.b32.xlu0 %v10910_v12, %s10376_s18  ;;  %2449 = vrot.lane.b32.xlu1 %v10910_v12, %s10372_s14 }
 0xa3a   :  { %2572 = vrot.lane.b32.xlu1 %v10910_v12, %s10377_s19 }
 0xa3e   :  { %2695 = vrot.lane.b32.xlu1 %v10910_v12, %s10378_s20 }
 0xa42   :  { %1864 = vrot.lane.b32.xlu1 %v10893_v61, %s12426_s21 }
 0xa94   :  { %v1793_v14 = vpop.permute.xlu1 %1792  ;;  %v1916_v21 = vpop.permute.xlu0 %1915 }
 0xa95   :  { %v1798_v16 = vsel %vm236_vm3, %v1793_v14, 0  ;;  %v1921_v25 = vsel %vm236_vm3, %v1916_v21, 0 }
 0xa96   :  { %9194 = vmatpush3.bf16.xpose.msra.mxu0 %v1798_v16 }
 0xa97   :  { %9205 = vmatprep.subr.bf16.mxu0 %v10370_v7 }
 0xa98   :  { %v1914_v19 = vpop.permute.xlu1 %1913  ;;  %v2037_v32 = vpop.permute.xlu0 %2036 }
 0xa9c   :  { %v2039_v23 = vpop.permute.xlu1 %2038  ;;  %v2160_v5 = vpop.permute.xlu0 %2159 }
 0xa9d   :  { %9196 = vmatmul.mubr.msk.bf16.vlgmr.msra.gmra.mrb[44].mxu0 %vm236_vm3, %v10893_v61  ;;  %v2044_v28 = vsel %vm236_vm3, %v2039_v23, 0 }
 0xa9e   :  { %9206 = vmatpush3.bf16.xpose.msra.mxu0 %v1921_v25  ;;  %9207 = vmatprep.mubr.msk.bf16.mxu0 %vm10371_vm1, %v10370_v7 }
 0xa9f   :  { %9217 = vmatprep.subr.bf16.mxu0 %v10370_v7 }
 0xaa0   :  { %v2162_v27 = vpop.permute.xlu1 %2161  ;;  %v2452_v11 = vpop.permute.xlu0 %2451 }
 0xaa1   :  { %v2167_v33 = vsel %vm236_vm3, %v2162_v27, 0  ;;  %v2457_v62 = vsel %vm236_vm3, %v2452_v11, 0 }
 0xaa4   :  { %v2329_v3 = vpop.permute.xlu1 %2328  ;;  %v2575_v53 = vpop.permute.xlu0 %2574 }
 0xaa5   :  { %9208 = vmatmul.mubr.msk.bf16.vlgmr.msra.gmra.mrb[48].mxu0 %vm236_vm3, %v1914_v19  ;;  %v2334_v17 = vsel %vm236_vm3, %v2329_v3, 0  ;;  %v2580_v30 = vsel %vm236_vm3, %v2575_v53, 0 }
 0xaa6   :  { %9218 = vmatpush3.bf16.xpose.msra.mxu0 %v2044_v28  ;;  %9219 = vmatprep.mubr.msk.bf16.mxu0 %vm10371_vm1, %v10370_v7 }
 0xaa7   :  { %9229 = vmatprep.subr.bf16.mxu0 %v10370_v7 }
 0xaa8   :  { %v2450_v8 = vpop.permute.xlu1 %2449  ;;  %v2698_v0 = vpop.permute.xlu0 %2697 }
 0xaa9   :  { %v2703_v36 = vsel %vm236_vm3, %v2698_v0, 0 }
 0xaac   :  { %v2573_v55 = vpop.permute.xlu1 %2572 }
 0xaad   :  { %9220 = vmatmul.mubr.msk.bf16.vlgmr.msra.gmra.mrb[52].mxu0 %vm236_vm3, %v2037_v32 }
 0xaae   :  { %9230 = vmatpush3.bf16.xpose.msra.mxu0 %v2167_v33  ;;  %9231 = vmatprep.mubr.msk.bf16.mxu0 %vm10371_vm1, %v10370_v7 }
 0xaaf   :  { %9241 = vmatprep.subr.bf16.mxu0 %v10370_v7 }
 0xab0   :  { %v2696_v58 = vpop.permute.xlu1 %2695 }
 0xab4   :  { %v1865_v10 = vpop.permute.xlu1 %1864 }
 0xab5   :  { %v1870_v35 = vand.u32 %v1865_v10, %v10502_v45  ;;  %9232 = vmatmul.mubr.msk.bf16.vlgmr.msra.gmra.mrb[56].mxu0 %vm236_vm3, %v2160_v5 }
 0xab6   :  { %9242 = vmatpush3.bf16.xpose.msra.mxu0 %v2334_v17  ;;  %9243 = vmatprep.mubr.msk.bf16.mxu0 %vm10371_vm1, %v10370_v7 }
 0xab7   :  { %9200 = vmatpush3.bf16.msra.mxu1 %v1870_v35  ;;  %9253 = vmatprep.subr.bf16.mxu0 %v10370_v7 }
 0xab8   :  { %9211 = vmatprep.subr.bf16.mxu1 %v10370_v7 }
 0xabd   :  { %9244 = vmatmul.mubr.msk.bf16.vlgmr.msra.gmra.mrb[60].mxu0 %vm236_vm3, %v10910_v12 }
 0xabe   :  { %9254 = vmatpush3.bf16.xpose.msra.mxu0 %v2457_v62  ;;  %9255 = vmatprep.mubr.msk.bf16.mxu0 %vm10371_vm1, %v10370_v7 }
 0xabf   :  { %9265 = vmatprep.subr.bf16.mxu0 %v10370_v7 }
 0xac5   :  { %9256 = vmatmul.mubr.msk.bf16.vlgmr.msra.gmra.mrb[64].mxu0 %vm236_vm3, %v2450_v8 }
 0xac6   :  { %9266 = vmatpush3.bf16.xpose.msra.mxu0 %v2580_v30  ;;  %9267 = vmatprep.mubr.msk.bf16.mxu0 %vm10371_vm1, %v10370_v7 }
 0xac7   :  { %9277 = vmatprep.subr.bf16.mxu0 %v10370_v7 }
 0xacd   :  { %9268 = vmatmul.mubr.msk.bf16.vlgmr.msra.gmra.mrb[68].mxu0 %vm236_vm3, %v2573_v55 }
 0xace   :  { %9278 = vmatpush3.bf16.xpose.msra.mxu0 %v2703_v36  ;;  %9279 = vmatprep.mubr.msk.bf16.mxu0 %vm10371_vm1, %v10370_v7 }
 0xad5   :  { %9280 = vmatmul.mubr.msk.bf16.vlgmr.msra.gmra.mrb[72].mxu0 %vm236_vm3, %v2696_v58 }
 0xb70   :  { %v10971_v13 = vpop.f32.mrb[44].mxu0 }
 0xb71   :  { %v9197_v9 = vpop.f32.mrb[45].mxu0  ;;  %v1841_v37 = vsel %vm284_vm6, %v10971_v13, -inf }
 0xb72   :  { %v10975_v38 = vpop.f32.mrb[46].mxu0  ;;  %1842 = vmax.xlane.f32.xlu0 %v1841_v37 }
 0xb73   :  { %v9198_v15 = vpop.f32.mrb[47].mxu0  ;;  %v1844_v18 = vsel %vm288_vm7, %v10975_v38, -inf }
 0xb74   :  { %1845 = vmax.xlane.f32.xlu1 %v1844_v18 }
 0xb78   :  { %v10979_v40 = vpop.f32.mrb[48].mxu0 }
 0xb79   :  { %v9209_v41 = vpop.f32.mrb[49].mxu0  ;;  %v1964_v20 = vsel %vm284_vm6, %v10979_v40, -inf }
 0xb7a   :  { %v10983_v2 = vpop.f32.mrb[50].mxu0  ;;  %1965 = vmax.xlane.f32.xlu0 %v1964_v20 }
 0xb7b   :  { %v9210_v34 = vpop.f32.mrb[51].mxu0  ;;  %v1967_v46 = vsel %vm288_vm7, %v10983_v2, -inf }
 0xb7e   :  { %1968 = vmax.xlane.f32.xlu0 %v1967_v46 }
 0xb80   :  { %v10987_v47 = vpop.f32.mrb[52].mxu0 }
 0xb81   :  { %v9221_v49 = vpop.f32.mrb[53].mxu0  ;;  %v2087_v29 = vsel %vm284_vm6, %v10987_v47, -inf }
 0xb82   :  { %v10991_v52 = vpop.f32.mrb[54].mxu0  ;;  %2088 = vmax.xlane.f32.xlu1 %v2087_v29 }
 0xb83   :  { %v9222_v39 = vpop.f32.mrb[55].mxu0  ;;  %v2090_v42 = vsel %vm288_vm7, %v10991_v52, -inf }
 0xb84   :  { %2091 = vmax.xlane.f32.xlu0 %v2090_v42 }
 0xb88   :  { %v10995_v54 = vpop.f32.mrb[56].mxu0 }
 0xb89   :  { %v9233_v57 = vpop.f32.mrb[57].mxu0  ;;  %v2210_v25 = vsel %vm284_vm6, %v10995_v54, -inf }
 0xb8a   :  { %v10997_v56 = vpop.f32.mrb[58].mxu0 }
 0xb8b   :  { %v9234_v59 = vpop.f32.mrb[59].mxu0  ;;  %v2213_v27 = vsel %vm288_vm7, %v10997_v56, -inf }
 0xb90   :  { %v10999_v60 = vpop.f32.mrb[60].mxu0 }
 0xb91   :  { %v9245_v24 = vpop.f32.mrb[61].mxu0  ;;  %v2377_v3 = vsel %vm284_vm6, %v10999_v60, -inf }
 0xb92   :  { %v11001_v43 = vpop.f32.mrb[62].mxu0 }
 0xb93   :  { %2110 = vrot.lane.b32.xlu1 %v10893_v61, %s12424_s22  ;;  %v9246_v63 = vpop.f32.mrb[63].mxu0  ;;  %v2380_v28 = vsel %vm288_vm7, %v11001_v43, -inf }
 0xb98   :  { %v11005_v1 = vpop.f32.mrb[64].mxu0 }
 0xb99   :  { %v9257_v4 = vpop.f32.mrb[65].mxu0  ;;  %v2500_v8 = vsel %vm284_vm6, %v11005_v1, -inf }
 0xb9a   :  { %1987 = vrot.lane.b32.xlu0 %v10893_v61, %s12428_s23  ;;  %v11009_v51 = vpop.f32.mrb[66].mxu0 }
 0xb9b   :  { %v9258_v26 = vpop.f32.mrb[67].mxu0  ;;  %v2503_v32 = vsel %vm288_vm7, %v11009_v51, -inf }
 0xba0   :  { %v11011_v50 = vpop.f32.mrb[68].mxu0 }
 0xba1   :  { %v9269_v6 = vpop.f32.mrb[69].mxu0  ;;  %v2623_v55 = vsel %vm284_vm6, %v11011_v50, -inf }
 0xba2   :  { %v11013_v31 = vpop.f32.mrb[70].mxu0 }
 0xba3   :  { %v9270_v14 = vpop.f32.mrb[71].mxu0  ;;  %v2626_v33 = vsel %vm288_vm7, %v11013_v31, -inf }
 0xba8   :  { %v11015_v16 = vpop.f32.mrb[72].mxu0 }
 0xba9   :  { %v9281_v19 = vpop.f32.mrb[73].mxu0  ;;  %v2746_v58 = vsel %vm284_vm6, %v11015_v16, -inf }
 0xbaa   :  { %v11017_v21 = vpop.f32.mrb[74].mxu0 }
 0xbab   :  { %v9282_v23 = vpop.f32.mrb[75].mxu0  ;;  %v2749_v5 = vsel %vm288_vm7, %v11017_v21, -inf }
 0xbb7   :  { %2211 = vmax.xlane.f32.xlu1 %v2210_v25 }
 0xbb9   :  { %2214 = vmax.xlane.f32.xlu0 %v2213_v27 }
 0xbbb   :  { %2378 = vmax.xlane.f32.xlu1 %v2377_v3 }
 0xbbd   :  { %2381 = vmax.xlane.f32.xlu0 %v2380_v28 }
 0xbbf   :  { %2501 = vmax.xlane.f32.xlu1 %v2500_v8 }
 0xbc1   :  { %2504 = vmax.xlane.f32.xlu0 %v2503_v32 }
 0xbc3   :  { %2624 = vmax.xlane.f32.xlu1 %v2623_v55 }
 0xbc5   :  { %2627 = vmax.xlane.f32.xlu0 %v2626_v33 }
 0xbc7   :  { %2747 = vmax.xlane.f32.xlu1 %v2746_v58 }
 0xbc9   :  { %2750 = vmax.xlane.f32.xlu0 %v2749_v5 }
 0xbd8   :  { %2233 = vrot.lane.b32.xlu1 %v10893_v61, %s12416_s24 }
 0xbff   :  { %v1843_v10 = vpop.xlane.xlu0 %1842 }
 0xc00   :  { %v1847_v17 = vsub.f32 %v10971_v13, %v1843_v10 }
 0xc01   :  { %v1846_v35 = vpop.xlane.xlu1 %1845 }
 0xc02   :  { %v1849_v11 = vmul.f32 1.442695, %v1847_v17  ;;  %v1848_v62 = vsub.f32 %v10975_v38, %v1846_v35 }
 0xc04   :  { %10126 = vpow2.f32 %v1849_v11  ;;  %v1851_v53 = vmul.f32 1.442695, %v1848_v62 }
 0xc06   :  { %10128 = vpow2.f32 %v1851_v53 }
 0xc07   :  { %v1966_v30 = vpop.xlane.xlu0 %1965 }
 0xc08   :  { %v1970_v0 = vsub.f32 %v10979_v40, %v1966_v30 }
 0xc0a   :  { %v1972_v36 = vmul.f32 1.442695, %v1970_v0 }
 0xc0b   :  { %v1969_v9 = vpop.xlane.xlu0 %1968 }
 0xc0c   :  { %10130 = vpow2.f32 %v1972_v36  ;;  %v1971_v37 = vsub.f32 %v10983_v2, %v1969_v9 }
 0xc0e   :  { %v11045_v15 = vpop.eup %10126  ;;  %v1974_v61 = vmul.f32 1.442695, %v1971_v37 }
 0xc0f   :  { %v2089_v18 = vpop.xlane.xlu1 %2088  ;;  %v1853_v13 = vsel %vm284_vm6, %v11045_v15, 0.0 }
 0xc10   :  { %v11049_v41 = vpop.eup %10128  ;;  %10132 = vpow2.f32 %v1974_v61  ;;  %v2093_v38 = vsub.f32 %v10987_v47, %v2089_v18  ;;  %1854 = vadd.xlane.f32.xlu1 %v1853_v13 }
 0xc11   :  { %v1856_v40 = vsel %vm288_vm7, %v11049_v41, 0.0  ;;  %v2092_v39 = vpop.xlane.xlu0 %2091 }
 0xc12   :  { %v2095_v20 = vmul.f32 1.442695, %v2093_v38  ;;  %1857 = vadd.xlane.f32.xlu0 %v1856_v40  ;;  %v2094_v42 = vsub.f32 %v10991_v52, %v2092_v39 }
 0xc13   :  { %v11069_v59 = vpop.permute.xlu1 %2110 }
 0xc14   :  { %10134 = vpow2.f32 %v2095_v20  ;;  %v2097_v57 = vmul.f32 1.442695, %v2094_v42 }
 0xc15   :  { %v11071_v24 = vpop.permute.xlu0 %1987 }
 0xc16   :  { %v11054_v2 = vpop.eup %10130  ;;  %10136 = vpow2.f32 %v2097_v57 }
 0xc17   :  { %v1976_v34 = vsel %vm284_vm6, %v11054_v2, 0.0 }
 0xc18   :  { %1977 = vadd.xlane.f32.xlu1 %v1976_v34 }
 0xc1a   :  { %v11058_v46 = vpop.eup %10132 }
 0xc1b   :  { %v1979_v49 = vsel %vm288_vm7, %v11058_v46, 0.0 }
 0xc1c   :  { %1980 = vadd.xlane.f32.xlu0 %v1979_v49 }
 0xc1e   :  { %v11062_v47 = vpop.eup %10134 }
 0xc1f   :  { %v2099_v29 = vsel %vm284_vm6, %v11062_v47, 0.0 }
 0xc20   :  { %2100 = vadd.xlane.f32.xlu1 %v2099_v29  ;;  %v11077_v8 = vpop.eup %10136 }
 0xc32   :  { %2400 = vrot.lane.b32.xlu0 %v10910_v12, %s12426_s21 }
 0xc44   :  { %v2212_v63 = vpop.xlane.xlu1 %2211 }
 0xc45   :  { %v2216_v4 = vsub.f32 %v10995_v54, %v2212_v63 }
 0xc46   :  { %v2215_v26 = vpop.xlane.xlu0 %2214 }
 0xc47   :  { %v2218_v6 = vmul.f32 1.442695, %v2216_v4  ;;  %v2217_v14 = vsub.f32 %v10997_v56, %v2215_v26 }
 0xc48   :  { %v2379_v19 = vpop.xlane.xlu1 %2378 }
 0xc49   :  { %10138 = vpow2.f32 %v2218_v6  ;;  %v2220_v23 = vmul.f32 1.442695, %v2217_v14  ;;  %v2383_v25 = vsub.f32 %v10999_v60, %v2379_v19  ;;  %v2102_v60 = vsel %vm288_vm7, %v11077_v8, 0.0 }
 0xc4a   :  { %v2382_v27 = vpop.xlane.xlu0 %2381 }
 0xc4b   :  { %10140 = vpow2.f32 %v2220_v23  ;;  %v2385_v52 = vmul.f32 1.442695, %v2383_v25  ;;  %v2384_v3 = vsub.f32 %v11001_v43, %v2382_v27 }
 0xc4c   :  { %v2502_v28 = vpop.xlane.xlu1 %2501 }
 0xc4d   :  { %10142 = vpow2.f32 %v2385_v52  ;;  %v2387_v32 = vmul.f32 1.442695, %v2384_v3  ;;  %v2506_v54 = vsub.f32 %v11005_v1, %v2502_v28  ;;  %v1993_v28 = vand.u32 %v11071_v24, %v10502_v45 }
 0xc4e   :  { %v2505_v55 = vpop.xlane.xlu0 %2504 }
 0xc4f   :  { %10144 = vpow2.f32 %v2387_v32  ;;  %v2508_v56 = vmul.f32 1.442695, %v2506_v54  ;;  %v2507_v33 = vsub.f32 %v11009_v51, %v2505_v55 }
 0xc50   :  { %v2625_v58 = vpop.xlane.xlu1 %2624 }
 0xc51   :  { %2103 = vadd.xlane.f32.xlu0 %v2102_v60  ;;  %10146 = vpow2.f32 %v2508_v56  ;;  %v2510_v43 = vmul.f32 1.442695, %v2507_v33  ;;  %v2629_v10 = vsub.f32 %v11011_v50, %v2625_v58 }
 0xc52   :  { %v2628_v20 = vpop.xlane.xlu0 %2627 }
 0xc53   :  { %v11083_v5 = vpop.eup %10138  ;;  %10148 = vpow2.f32 %v2510_v43  ;;  %v2631_v51 = vmul.f32 1.442695, %v2629_v10  ;;  %v2630_v34 = vsub.f32 %v11013_v31, %v2628_v20 }
 0xc54   :  { %v2748_v17 = vpop.xlane.xlu1 %2747  ;;  %v2222_v1 = vsel %vm284_vm6, %v11083_v5, 0.0 }
 0xc55   :  { %v11088_v35 = vpop.eup %10140  ;;  %2223 = vadd.xlane.f32.xlu0 %v2222_v1  ;;  %v2752_v62 = vsub.f32 %v11015_v16, %v2748_v17  ;;  %10150 = vpow2.f32 %v2631_v51  ;;  %v2633_v29 = vmul.f32 1.442695, %v2630_v34 }
 0xc56   :  { %v2225_v53 = vsel %vm288_vm7, %v11088_v35, 0.0  ;;  %v2751_v49 = vpop.xlane.xlu0 %2750 }
 0xc57   :  { %v11090_v11 = vpop.eup %10142  ;;  %v2754_v0 = vmul.f32 1.442695, %v2752_v62  ;;  %v2753_v39 = vsub.f32 %v11017_v21, %v2751_v49 }
 0xc58   :  { %v2389_v30 = vsel %vm284_vm6, %v11090_v11, 0.0  ;;  %v2234_v26 = vpop.permute.xlu1 %2233 }
 0xc59   :  { %v11097_v50 = vpop.eup %10144  ;;  %2226 = vadd.xlane.f32.xlu0 %v2225_v53  ;;  %2390 = vadd.xlane.f32.xlu1 %v2389_v30  ;;  %10152 = vpow2.f32 %v2754_v0  ;;  %v2756_v42 = vmul.f32 1.442695, %v2753_v39  ;;  %v2239_v51 = vand.u32 %v2234_v26, %v10502_v45 }
 0xc5a   :  { %v2392_v36 = vsel %vm288_vm7, %v11097_v50, 0.0  ;;  %10154 = vpow2.f32 %v2633_v29 }
 0xc5b   :  { %v11101_v9 = vpop.eup %10146  ;;  %10156 = vpow2.f32 %v2756_v42 }
 0xc5c   :  { %v2512_v16 = vsel %vm284_vm6, %v11101_v9, 0.0 }
 0xc5d   :  { %2393 = vadd.xlane.f32.xlu0 %v2392_v36  ;;  %v11105_v37 = vpop.eup %10148 }
 0xc5e   :  { %v2515_v61 = vsel %vm288_vm7, %v11105_v37, 0.0 }
 0xc5f   :  { %v11109_v18 = vpop.eup %10150 }
 0xc60   :  { %v2635_v13 = vsel %vm284_vm6, %v11109_v18, 0.0 }
 0xc61   :  { %2513 = vadd.xlane.f32.xlu0 %v2512_v16 }
 0xc63   :  { %v11113_v38 = vpop.eup %10152 }
 0xc64   :  { %v2758_v40 = vsel %vm284_vm6, %v11113_v38, 0.0  ;;  %v11123_v57 = vpop.eup %10154 }
 0xc65   :  { %2516 = vadd.xlane.f32.xlu0 %v2515_v61  ;;  %v2638_v63 = vsel %vm288_vm7, %v11123_v57, 0.0  ;;  %v11127_v4 = vpop.eup %10156 }
 0xc66   :  { %v2761_v31 = vsel %vm288_vm7, %v11127_v4, 0.0 }
 0xc69   :  { %2636 = vadd.xlane.f32.xlu0 %v2635_v13 }
 0xc6a   :  { %2523 = vrot.lane.b32.xlu1 %v10910_v12, %s12428_s23 }
 0xc6d   :  { %2759 = vadd.xlane.f32.xlu0 %v2758_v40 }
 0xc83   :  { %2646 = vrot.lane.b32.xlu0 %v10910_v12, %s12424_s22 }
 0xc8e   :  { %2639 = vadd.xlane.f32.xlu1 %v2638_v63 }
 0xc92   :  { %2762 = vadd.xlane.f32.xlu1 %v2761_v31 }
 0xc9d   :  { %v1855_v21 = vpop.xlane.xlu1 %1854 }
 0xc9e   :  { %10158 = vrcp.f32 %v1855_v21 }
 0xc9f   :  { %v1858_v6 = vpop.xlane.xlu0 %1857 }
 0xca0   :  { %10160 = vrcp.f32 %v1858_v6 }
 0xca3   :  { %2769 = vrot.lane.b32.xlu1 %v10910_v12, %s12416_s24 }
 0xca5   :  { %v1978_v14 = vpop.xlane.xlu1 %1977 }
 0xca6   :  { %10162 = vrcp.f32 %v1978_v14 }
 0xca8   :  { %v10159_v19 = vpop.eup %10158 }
 0xca9   :  { %v1981_v23 = vpop.xlane.xlu0 %1980  ;;  %v1861_v27 = vmul.f32 %v10159_v19, %v11045_v15 }
 0xcaa   :  { %v10161_v25 = vpop.eup %10160  ;;  %10164 = vrcp.f32 %v1981_v23 }
 0xcab   :  { %v1862_v52 = vmul.f32 %v10161_v25, %v11049_v41  ;;  %v2116_v41 = vand.u32 %v11069_v59, %v10502_v45 }
 0xcad   :  { %v1863_v3 = vpack.c.bf16 %v1862_v52, %v1861_v27  ;;  %v2401_v24 = vpop.permute.xlu0 %2400  ;;  %v2101_v56 = vpop.xlane.xlu1 %2100 }
 0xcae   :  { %10166 = vrcp.f32 %v2101_v56  ;;  %v2406_v61 = vand.u32 %v2401_v24, %v10502_v45 }
 0xcaf   :  { %9202 = vmatmul.mubr.msk.bf16.vlgmr.msra.gmra.mrb[40].mxu1 %vm284_vm6, %v1863_v3 }
 0xcb0   :  { %9212 = vmatpush3.bf16.msra.mxu1 %v1993_v28  ;;  %9213 = vmatprep.mubr.msk.bf16.mxu1 %vm10371_vm1, %v10370_v7  ;;  %v10163_v12 = vpop.eup %10162 }
 0xcb1   :  { %9223 = vmatprep.subr.bf16.mxu1 %v10370_v7  ;;  %v1984_v54 = vmul.f32 %v10163_v12, %v11054_v2 }
 0xcb4   :  { %v10165_v32 = vpop.eup %10164 }
 0xcb5   :  { %v1985_v15 = vmul.f32 %v10165_v32, %v11058_v46 }
 0xcb7   :  { %v1986_v55 = vpack.c.bf16 %v1985_v15, %v1984_v54 }
 0xcb8   :  { %v10167_v58 = vpop.eup %10166 }
 0xcb9   :  { %9214 = vmatmul.mubr.msk.bf16.vlgmr.msra.gmra.mrb[44].mxu1 %vm284_vm6, %v1986_v55  ;;  %v2107_v59 = vmul.f32 %v10167_v58, %v11062_v47 }
 0xcba   :  { %9224 = vmatpush3.bf16.msra.mxu1 %v2116_v41  ;;  %9225 = vmatprep.mubr.msk.bf16.mxu1 %vm10371_vm1, %v10370_v7 }
 0xcbb   :  { %9235 = vmatprep.subr.bf16.mxu1 %v10370_v7 }
 0xcde   :  { %v2104_v33 = vpop.xlane.xlu0 %2103 }
 0xcdf   :  { %10168 = vrcp.f32 %v2104_v33 }
 0xce2   :  { %v2224_v2 = vpop.xlane.xlu0 %2223 }
 0xce3   :  { %10170 = vrcp.f32 %v2224_v2 }
 0xce6   :  { %v2227_v46 = vpop.xlane.xlu0 %2226  ;;  %v2391_v10 = vpop.xlane.xlu1 %2390 }
 0xce7   :  { %10172 = vrcp.f32 %v2227_v46 }
 0xce9   :  { %v10169_v60 = vpop.eup %10168 }
 0xcea   :  { %v2108_v43 = vmul.f32 %v10169_v60, %v11077_v8  ;;  %v2394_v17 = vpop.xlane.xlu0 %2393 }
 0xceb   :  { %10174 = vrcp.f32 %v2394_v17 }
 0xcec   :  { %v2109_v1 = vpack.c.bf16 %v2108_v43, %v2107_v59  ;;  %10176 = vrcp.f32 %v2391_v10 }
 0xced   :  { %v10171_v53 = vpop.eup %10170 }
 0xcee   :  { %v2514_v62 = vpop.xlane.xlu0 %2513  ;;  %9226 = vmatmul.mubr.msk.bf16.vlgmr.msra.gmra.mrb[48].mxu1 %vm284_vm6, %v2109_v1  ;;  %v2230_v8 = vmul.f32 %v10171_v53, %v11083_v5 }
 0xcef   :  { %9236 = vmatpush3.bf16.msra.mxu1 %v2239_v51  ;;  %9237 = vmatprep.mubr.msk.bf16.mxu1 %vm10371_vm1, %v10370_v7 }
 0xcf0   :  { %9247 = vmatprep.subr.bf16.mxu1 %v10370_v7 }
 0xcf1   :  { %v10173_v47 = vpop.eup %10172 }
 0xcf2   :  { %v2231_v30 = vmul.f32 %v10173_v47, %v11088_v35  ;;  %v2517_v0 = vpop.xlane.xlu0 %2516  ;;  %v2524_v35 = vpop.permute.xlu1 %2523 }
 0xcf3   :  { %10178 = vrcp.f32 %v2517_v0  ;;  %v2529_v39 = vand.u32 %v2524_v35, %v10502_v45  ;;  %v10009_v35 = vld [vmem:[%s10755_s30 + $0x18] sm:$0xff]  }
 0xcf4   :  { %v2232_v36 = vpack.c.bf16 %v2231_v30, %v2230_v8  ;;  %10180 = vrcp.f32 %v2514_v62 }
 0xcf5   :  { %v10175_v16 = vpop.eup %10174 }
 0xcf6   :  { %v2637_v13 = vpop.xlane.xlu0 %2636  ;;  %9238 = vmatmul.mubr.msk.bf16.vlgmr.msra.gmra.mrb[52].mxu1 %vm284_vm6, %v2232_v36  ;;  %v10177_v40 = vpop.eup %10176  ;;  %v2398_v20 = vmul.f32 %v10175_v16, %v11097_v50 }
 0xcf7   :  { %9248 = vmatpush3.bf16.msra.mxu1 %v2406_v61  ;;  %9249 = vmatprep.mubr.msk.bf16.mxu1 %vm10371_vm1, %v10370_v7  ;;  %v2397_v5 = vmul.f32 %v10177_v40, %v11090_v11  ;;  %10182 = vrcp.f32 %v2637_v13  ;;  %v10008_v40 = vld [vmem:[%s10755_s30 + $0x10] sm:$0xff]  }
 0xcf8   :  { %9259 = vmatprep.subr.bf16.mxu1 %v10370_v7  ;;  %9289 = vmatprep.subr.bf16.mxu0 %v10008_v40 }
 0xcf9   :  { %v2399_v49 = vpack.c.bf16 %v2398_v20, %v2397_v5  ;;  %9290 = vmatpush3.bf16.msra.mxu0 %v10008_v40 }
 0xcfa   :  { %v2760_v34 = vpop.xlane.xlu0 %2759  ;;  %9291 = vmatprep.subr.bf16.mxu0 %v10009_v35 }
 0xcfd   :  { %v10179_v29 = vpop.eup %10178  ;;  %9292 = vmatpush3.bf16.msra.mxu0 %v10009_v35  ;;  %v10010_v35 = vld [vmem:[%s10813_s10 + $0x10] sm:$0xff]  }
 0xcfe   :  { %9250 = vmatmul.mubr.msk.bf16.vlgmr.msra.gmra.mrb[56].mxu1 %vm284_vm6, %v2399_v49  ;;  %v10181_v42 = vpop.eup %10180  ;;  %v2521_v63 = vmul.f32 %v10179_v29, %v11105_v37  ;;  %v2647_v11 = vpop.permute.xlu0 %2646 }
 0xcff   :  { %9260 = vmatpush3.bf16.msra.mxu1 %v2529_v39  ;;  %9261 = vmatprep.mubr.msk.bf16.mxu1 %vm10371_vm1, %v10370_v7  ;;  %v2520_v50 = vmul.f32 %v10181_v42, %v11101_v9  ;;  %v2652_v26 = vand.u32 %v2647_v11, %v10502_v45 }
 0xd00   :  { %9271 = vmatprep.subr.bf16.mxu1 %v10370_v7 }
 0xd01   :  { %v2522_v31 = vpack.c.bf16 %v2521_v63, %v2520_v50  ;;  %v10183_v6 = vpop.eup %10182 }
 0xd02   :  { %v2643_v14 = vmul.f32 %v10183_v6, %v11109_v18 }
 0xd06   :  { %9262 = vmatmul.mubr.msk.bf16.vlgmr.msra.gmra.mrb[60].mxu1 %vm284_vm6, %v2522_v31 }
 0xd07   :  { %9272 = vmatpush3.bf16.msra.mxu1 %v2652_v26  ;;  %9273 = vmatprep.mubr.msk.bf16.mxu1 %vm10371_vm1, %v10370_v7 }
 0xd08   :  { %9283 = vmatprep.subr.bf16.mxu1 %v10370_v7 }
 0xd1b   :  { %v2640_v21 = vpop.xlane.xlu1 %2639 }
 0xd1c   :  { %10184 = vrcp.f32 %v2640_v21 }
 0xd1f   :  { %v2763_v37 = vpop.xlane.xlu1 %2762 }
 0xd20   :  { %10186 = vrcp.f32 %v2763_v37 }
 0xd21   :  { %10188 = vrcp.f32 %v2760_v34 }
 0xd23   :  { %v2770_v23 = vpop.permute.xlu1 %2769 }
 0xd24   :  { %v2775_v52 = vand.u32 %v2770_v23, %v10502_v45 }
 0xd26   :  { %v10185_v9 = vpop.eup %10184 }
 0xd27   :  { %v2644_v19 = vmul.f32 %v10185_v9, %v11123_v57 }
 0xd29   :  { %v2645_v25 = vpack.c.bf16 %v2644_v19, %v2643_v14 }
 0xd2a   :  { %v10187_v27 = vpop.eup %10186 }
 0xd2b   :  { %9274 = vmatmul.mubr.msk.bf16.vlgmr.msra.gmra.mrb[64].mxu1 %vm284_vm6, %v2645_v25  ;;  %v10189_v3 = vpop.eup %10188  ;;  %v2767_v28 = vmul.f32 %v10187_v27, %v11127_v4 }
 0xd2c   :  { %9284 = vmatpush3.bf16.msra.mxu1 %v2775_v52  ;;  %9285 = vmatprep.mubr.msk.bf16.mxu1 %vm10371_vm1, %v10370_v7  ;;  %v2766_v12 = vmul.f32 %v10189_v3, %v11113_v38 }
 0xd2d   :  { %9297 = vmatprep.subr.bf16.mxu1 %v10010_v35 }
 0xd2e   :  { %v2768_v32 = vpack.c.bf16 %v2767_v28, %v2766_v12 }
 0xd33   :  { %9286 = vmatmul.mubr.msk.bf16.vlgmr.msra.gmra.mrb[68].mxu1 %vm284_vm6, %v2768_v32 }
 0xd34   :  { %9298 = vmatpush3.bf16.msra.mxu1 %v10010_v35 }
 0xd82   :  { %v11186_v18 = vpop.f32.mrb[40].mxu1 }
 0xd83   :  { %v9203_v57 = vpop.f32.mrb[41].mxu1 }
 0xd84   :  { %v11188_v54 = vpop.f32.mrb[42].mxu1 }
 0xd85   :  { %v9204_v15 = vpop.f32.mrb[43].mxu1 }
 0xd8c   :  { %v2029_v55 = vpop.f32.mrb[44].mxu1 }
 0xd8d   :  { %v9215_v41 = vpop.f32.mrb[45].mxu1 }
 0xd8e   :  { %v2032_v24 = vpop.f32.mrb[46].mxu1 }
 0xd8f   :  { %v9906_v56 = vpack.i.bf16 %v2029_v55, %v2032_v24  ;;  %v9216_v33 = vpop.f32.mrb[47].mxu1 }
 0xd91   :  { %9907 = vrot.lane.b32.xlu1 %v9906_v56, %s12422_s25 }
 0xdc1   :  { %v2152_v2 = vpop.f32.mrb[48].mxu1 }
 0xdc2   :  { %v9227_v4 = vpop.f32.mrb[49].mxu1 }
 0xdc3   :  { %v2155_v46 = vpop.f32.mrb[50].mxu1 }
 0xdc4   :  { %v9911_v38 = vpack.i.bf16 %v2152_v2, %v2155_v46  ;;  %v9228_v58 = vpop.f32.mrb[51].mxu1 }
 0xdc6   :  { %9912 = vrot.lane.b32.xlu0 %v9911_v38, %s12420_s26 }
 0xdc9   :  { %v2275_v60 = vpop.f32.mrb[52].mxu1 }
 0xdca   :  { %v9239_v59 = vpop.f32.mrb[53].mxu1 }
 0xdcb   :  { %v2278_v43 = vpop.f32.mrb[54].mxu1 }
 0xdcc   :  { %v9931_v10 = vpack.i.bf16 %v2275_v60, %v2278_v43  ;;  %v9240_v17 = vpop.f32.mrb[55].mxu1 }
 0xdd1   :  { %v2442_v1 = vpop.f32.mrb[56].mxu1 }
 0xdd2   :  { %v9251_v51 = vpop.f32.mrb[57].mxu1 }
 0xdd3   :  { %v2445_v62 = vpop.f32.mrb[58].mxu1 }
 0xdd4   :  { %v9252_v53 = vpop.f32.mrb[59].mxu1 }
 0xdd9   :  { %v2565_v47 = vpop.f32.mrb[60].mxu1 }
 0xdda   :  { %v9263_v8 = vpop.f32.mrb[61].mxu1 }
 0xddb   :  { %v2568_v30 = vpop.f32.mrb[62].mxu1 }
 0xddc   :  { %v9916_v0 = vpack.i.bf16 %v2568_v30, %v2565_v47  ;;  %v9264_v36 = vpop.f32.mrb[63].mxu1 }
 0xdde   :  { %9917 = vrot.lane.b32.xlu1 %v9916_v0, %s12422_s25 }
 0xdfe   :  { %v2688_v16 = vpop.f32.mrb[64].mxu1 }
 0xdff   :  { %v9275_v61 = vpop.f32.mrb[65].mxu1 }
 0xe00   :  { %v2691_v13 = vpop.f32.mrb[66].mxu1 }
 0xe01   :  { %v9921_v20 = vpack.i.bf16 %v2691_v13, %v2688_v16  ;;  %v9276_v5 = vpop.f32.mrb[67].mxu1 }
 0xe03   :  { %9922 = vrot.lane.b32.xlu1 %v9921_v20, %s12420_s26  ;;  %v9908_v63 = vpop.permute.xlu1 %9907 }
 0xe04   :  { %v9910_v9 = vunpack.i.h.bf16 %v9908_v63  ;;  %v9909_v14 = vunpack.i.l.bf16 %v9908_v63 }
 0xe06   :  { %v2811_v34 = vpop.f32.mrb[68].mxu1  ;;  %v2306_v56 = vsel %vm236_vm3, %v11186_v18, %v9910_v9  ;;  %v2307_v33 = vsel %vm236_vm3, %v11188_v54, %v9909_v14  ;;  %v8537_v18 = vld [vmem:[%s10783_s5 + $0x1] ss:$0 sm:$0xff]  ;;  %s11246_s5 = sld [smem:[%s12415_s0 + %s10394_s6]]  }
 0xe07   :  { %v9287_v49 = vpop.f32.mrb[69].mxu1  ;;  %s11293_s6 = sld [smem:[%s12415_s0 + %s10396_s2]]  }
 0xe08   :  { %v2814_v29 = vpop.f32.mrb[70].mxu1  ;;  %v10014_v49 = vld [vmem:[%s10820_s28 + $0x20] sm:$0xff]  }
 0xe09   :  { %v9926_v39 = vpack.i.bf16 %v2814_v29, %v2811_v34  ;;  %v9288_v42 = vpop.f32.mrb[71].mxu1  ;;  %v10011_v34 = vld [vmem:[%s10813_s10 + $0x18] sm:$0xff]   ;;  %v10015_v29 = vld [vmem:[%s10820_s28 + $0x28] sm:$0xff]   ;;  %9305 = vmatprep.subr.bf16.mxu0 %v10014_v49  ;;  %s10395_s10 = smov 1  }
 0xe0a   :  { %9299 = vmatprep.subr.bf16.mxu1 %v10011_v34  ;;  %s8427_s27 = sld [smem:[%s12415_s0 + %s10395_s10]]   ;;  %s10398_s10 = smov 15  }
 0xe0b   :  { %9927 = vrot.lane.b32.xlu1 %v9926_v39, %s12418_s1  ;;  %9300 = vmatpush3.bf16.msra.mxu1 %v10011_v34 }
 0xe0c   :  { %9317 = vmatprep.subr.bf16.mxu1 %v10370_v7 }
 0xe0d   :  { %v8574_v34 = vld [vmem:[%s11293_s6] ss:$0 sm:$0xff] }
 0xe0f   :  { %9932 = vrot.lane.b32.xlu1 %v9931_v10, %s12418_s1 }
 0xe38   :  { %v9913_v6 = vpop.permute.xlu0 %9912 }
 0xe39   :  { %v9915_v3 = vunpack.i.h.bf16 %v9913_v6  ;;  %v9914_v28 = vunpack.i.l.bf16 %v9913_v6 }
 0xe3b   :  { %v2308_v46 = vsel %vm757_vm8, %v2306_v56, %v9915_v3  ;;  %v2309_v38 = vsel %vm757_vm8, %v2307_v33, %v9914_v28  ;;  %v8543_v33 = vld [vmem:[%s10833_s9 + $0x2] ss:$0 sm:$0xff] }
 0xe50   :  { %v9918_v50 = vpop.permute.xlu1 %9917 }
 0xe51   :  { %v9920_v31 = vunpack.i.h.bf16 %v9918_v50  ;;  %v9919_v26 = vunpack.i.l.bf16 %v9918_v50 }
 0xe53   :  { %v2843_v23 = vsel %vm236_vm3, %v2445_v62, %v9920_v31  ;;  %v2842_v25 = vsel %vm236_vm3, %v2442_v1, %v9919_v26 }
 0xe75   :  { %v9923_v11 = vpop.permute.xlu1 %9922 }
 0xe76   :  { %v9925_v21 = vunpack.i.h.bf16 %v9923_v11  ;;  %v9924_v37 = vunpack.i.l.bf16 %v9923_v11 }
 0xe78   :  { %v2844_v12 = vsel %vm757_vm8, %v2842_v25, %v9924_v37  ;;  %v2845_v32 = vsel %vm757_vm8, %v2843_v23, %v9925_v21 }
 0xe7d   :  { %v9928_v19 = vpop.permute.xlu1 %9927 }
 0xe7e   :  { %v9930_v27 = vunpack.i.h.bf16 %v9928_v19  ;;  %v9929_v52 = vunpack.i.l.bf16 %v9928_v19 }
 0xe80   :  { %v2846_v57 = vsel %vm760_vm9, %v2844_v12, %v9929_v52  ;;  %v2847_v15 = vsel %vm760_vm9, %v2845_v32, %v9930_v27 }
 0xe81   :  { %v2850_v55 = vrot.slane %v2846_v57, 7  ;;  %v2851_v41 = vrot.slane %v2847_v15, 7  ;;  %v9933_v24 = vpop.permute.xlu1 %9932  ;;  %v8542_v57 = vld [vmem:[%s10827_s4 + $0x2] ss:$0 sm:$0xff] }
 0xe82   :  { %v9935_v2 = vunpack.i.h.bf16 %v9933_v24  ;;  %v9934_v4 = vunpack.i.l.bf16 %v9933_v24 }
 0xe83   :  { %v2852_v58 = vsel %vm1302_vm10, %v2850_v55, %v2851_v41 }
 0xe84   :  { %v2310_v60 = vsel %vm760_vm9, %v2308_v46, %v9935_v2  ;;  %v2311_v59 = vsel %vm760_vm9, %v2309_v38, %v9934_v4  ;;  %v2857_v17 = vpack.c.bf16 %v2852_v58, %v2852_v58 }
 0xe85   :  { %v2855_v43 = vsel %vm1302_vm10, %v2311_v59, %v2850_v55 }
 0xe86   :  { %v2856_v10 = vpack.c.bf16 %v2855_v43, %v2310_v60 }
 0xe88   :  { %9293 = vmatprep.mubr.msk.bf16.mxu0 %vm171_vm0, %v2856_v10 }
 0xe89   :  { %9294 = vmatmul.mubr.msk.bf16.vlgmr.msra.gmra.mrb[76].mxu0 %vm171_vm0, %v2857_v17 }
 0xe8a   :  { %9306 = vmatpush3.bf16.msra.mxu0 %v10014_v49 }
 0xe8b   :  { %9307 = vmatprep.subr.bf16.mxu0 %v10015_v29 }
 0xe8e   :  { %9308 = vmatpush3.bf16.msra.mxu0 %v10015_v29 }
 0xf5c   :  { %v9295_v54 = vpop.f32.mrb[76].mxu0 }
 0xf5d   :  { %v2925_v1 = vadd.f32 %v9295_v54, %v8537_v18  ;;  %v2916_v51 = vpop.f32.mrb[77].mxu0  ;;  %v10012_v54 = vld [vmem:[%s11246_s5] sm:$0xff]  }
 0xf5e   :  { %v2917_v62 = vadd.f32 %v8537_v18, %v2916_v51  ;;  %v9296_v53 = vpop.f32.mrb[78].mxu0  ;;  %v10013_v51 = vld [vmem:[%s11246_s5 + $0x8] sm:$0xff]  }
 0xf5f   :  { %v11218_v47 = vadd.f32 %v2925_v1, %v10884_v48  ;;  %v2919_v8 = vpop.f32.mrb[79].mxu0  ;;  %v11277_v53 = vld [vmem:[%s8427_s27 + $0x8] sm:$0xff] }
 0xf60   :  { %v2920_v30 = vadd.f32 %v8537_v18, %v2919_v8  ;;  %v11221_v0 = vadd.f32 %v2917_v62, %v10878_v22  ;;  %v11275_v62 = vld [vmem:[%s8427_s27] sm:$0xff]  ;;  %v10016_v8 = vld [vmem:[%s10820_s28 + $0x30] sm:$0xff]   ;;  %s11500_s27 = sld [smem:[%s12415_s0 + %s10398_s10]]   ;;  %s10403_s10 = smov 23  }
 0xf61   :  { %v2939_v36 = vsel %vm1392_vm11, %v11218_v47, 0.0  ;;  %v2947_v20 = vmul.f32 %v11218_v47, %v11218_v47  ;;  %9309 = vmatprep.subr.bf16.mxu0 %v10016_v8 }
 0xf62   :  { %v11226_v16 = vadd.f32 %v2920_v30, %v10880_v44  ;;  %2940 = vadd.xlane.f32.xlu0 %v2939_v36  ;;  %v2933_v22 = vsel %vm171_vm0, %v11221_v0, 0.0  ;;  %v2945_v13 = vmul.f32 %v11221_v0, %v11221_v0  ;;  %9310 = vmatpush3.bf16.msra.mxu0 %v10016_v8  ;;  %v10017_v30 = vld [vmem:[%s10820_s28 + $0x38] sm:$0xff]   ;;  %s10397_s28 = smov 2  }
 0xf63   :  { %v2954_v5 = vsel %vm1392_vm11, %v2947_v20, 0.0  ;;  %9311 = vmatprep.subr.bf16.mxu0 %v10017_v30  ;;  %s11384_s30 = sld [smem:[%s12415_s0 + %s10397_s28]]  }
 0xf64   :  { %v2936_v61 = vsel %vm171_vm0, %v11226_v16, 0.0  ;;  %v2946_v48 = vmul.f32 %v11226_v16, %v11226_v16  ;;  %v2948_v44 = vsel %vm171_vm0, %v2945_v13, 0.0  ;;  %s11582_s28 = sld [smem:[%s12415_s0 + %s12420_s26]]  }
 0xf65   :  { %2937 = vadd.xlane.f32.xlu1 %v2936_v61 }
 0xf66   :  { %2934 = vadd.xlane.f32.xlu0 %v2933_v22  ;;  %v2951_v40 = vsel %vm171_vm0, %v2946_v48, 0.0  ;;  %9312 = vmatpush3.bf16.msra.mxu0 %v10017_v30 }
 0xf67   :  { %9331 = vmatprep.subr.bf16.mxu0 %v10370_v7 }
 0xf69   :  { %2952 = vadd.xlane.f32.xlu1 %v2951_v40 }
 0xf6a   :  { %2949 = vadd.xlane.f32.xlu0 %v2948_v44 }
 0xf6e   :  { %2955 = vadd.xlane.f32.xlu0 %v2954_v5 }
 0xfef   :  { %v2941_v39 = vpop.xlane.xlu0 %2940 }
 0xff0   :  { %v2944_v6 = vmul.f32 0.03125, %v2941_v39 }
 0xff2   :  { %v2938_v42 = vpop.xlane.xlu1 %2937  ;;  %v2962_v52 = vmul.f32 %v2944_v6, %v2944_v6  ;;  %v2974_v60 = vsub.f32 %v11218_v47, %v2944_v6  ;;  %v3319_v47 = vpack.c.bf16 %v11277_v53, %v11275_v62 }
 0xff3   :  { %v2943_v63 = vmul.f32 0.03125, %v2938_v42  ;;  %v2935_v50 = vpop.xlane.xlu0 %2934 }
 0xff4   :  { %v2942_v11 = vmul.f32 0.03125, %v2935_v50 }
 0xff5   :  { %v2961_v26 = vmul.f32 %v2943_v63, %v2943_v63  ;;  %v2973_v41 = vsub.f32 %v11226_v16, %v2943_v63 }
 0xff6   :  { %v2953_v31 = vpop.xlane.xlu1 %2952  ;;  %v2960_v9 = vmul.f32 %v2942_v11, %v2942_v11  ;;  %v2972_v56 = vsub.f32 %v11221_v0, %v2942_v11  ;;  %v8549_v0 = vld [vmem:[%s10848_s29 + $0x1] ss:$0 sm:$0xff]  ;;  %s10400_s29 = smov 29  }
 0xff7   :  { %v2958_v21 = vmul.f32 0.03125, %v2953_v31  ;;  %v2950_v37 = vpop.xlane.xlu0 %2949  ;;  %s11604_s11 = sld [smem:[%s12415_s0 + %s10400_s29]]  }
 0xff8   :  { %v2957_v14 = vmul.f32 0.03125, %v2950_v37  ;;  %s11644_s29 = sld [smem:[%s12415_s0 + %s12418_s1]]  }
 0xff9   :  { %v2964_v19 = vsub.f32 %v2958_v21, %v2961_v26 }
 0xffa   :  { %v2963_v23 = vsub.f32 %v2957_v14, %v2960_v9 }
 0xffb   :  { %v2967_v25 = vadd.f32 1e-05, %v2964_v19  ;;  %v2956_v27 = vpop.xlane.xlu0 %2955 }
 0xffc   :  { %v2966_v3 = vadd.f32 1e-05, %v2963_v23  ;;  %v2959_v28 = vmul.f32 0.03125, %v2956_v27 }
 0xffd   :  { %10190 = vrsqrt.f32 %v2967_v25 }
 0xffe   :  { %10192 = vrsqrt.f32 %v2966_v3  ;;  %v2965_v12 = vsub.f32 %v2959_v28, %v2962_v52 }
0x1000   :  { %v2968_v32 = vadd.f32 1e-05, %v2965_v12 }
0x1002   :  { %10194 = vrsqrt.f32 %v2968_v32 }
0x1007   :  { %v10191_v15 = vpop.eup %10190 }
0x1008   :  { %v10193_v55 = vpop.eup %10192  ;;  %v2982_v24 = vmul.f32 %v10191_v15, %v8542_v57 }
0x1009   :  { %v2981_v2 = vmul.f32 %v10193_v55, %v8542_v57 }
0x100a   :  { %v2985_v4 = vmul.f32 %v2982_v24, %v2973_v41 }
0x100b   :  { %v2984_v46 = vmul.f32 %v2981_v2, %v2972_v56 }
0x100c   :  { %v10195_v38 = vpop.eup %10194  ;;  %v11255_v58 = vadd.f32 %v8543_v33, %v2985_v4 }
0x100d   :  { %v2983_v59 = vmul.f32 %v10195_v38, %v8542_v57  ;;  %v11258_v43 = vadd.f32 %v8543_v33, %v2984_v46 }
0x100f   :  { %v2996_v10 = vpack.c.bf16 %v11255_v58, %v11258_v43  ;;  %v2986_v17 = vmul.f32 %v2983_v59, %v2974_v60  ;;  %v3310_v59 = vld [vmem:[%s11384_s30] sm:$0xff] }
0x1011   :  { %9301 = vmatprep.mubr.msk.bf16.mxu1 %vm171_vm0, %v2996_v10  ;;  %v11266_v18 = vadd.f32 %v8543_v33, %v2986_v17 }
0x1013   :  { %v2997_v1 = vpack.c.bf16 %v11266_v18, %v11266_v18 }
0x1015   :  { %9302 = vmatmul.mubr.msk.bf16.vlgmr.msra.gmra.mrb[72].mxu1 %vm171_vm0, %v2997_v1 }
0x1016   :  { %9318 = vmatpush3.bf16.msra.mxu1 %v10012_v54  ;;  %9321 = vmatprep.mubr.msk.bf16.mxu1 %vm10371_vm1, %v10370_v7 }
0x1017   :  { %9319 = vmatprep.subr.bf16.mxu1 %v10370_v7 }
0x101a   :  { %9320 = vmatpush3.bf16.msra.mxu1 %v10013_v51 }
0x101b   :  { %9325 = vmatprep.subr.bf16.mxu1 %v10370_v7 }
0x101d   :  { %9322 = vmatmul.mubr.msk.bf16.vlgmr.msra.gmra.mrb[76].mxu1 %vm171_vm0, %v3319_v47 }
0x101e   :  { %9327 = vmatprep.mubr.msk.bf16.mxu1 %vm10371_vm1, %v10370_v7 }
0x10e8   :  { %v9303_v36 = vpop.f32.mrb[72].mxu1 }
0x10e9   :  { %v3072_v16 = vadd.f32 %v9303_v36, %v8549_v0  ;;  %v3063_v61 = vpop.f32.mrb[73].mxu1 }
0x10ea   :  { %v3064_v48 = vadd.f32 %v8549_v0, %v3063_v61  ;;  %v9304_v22 = vpop.f32.mrb[74].mxu1 }
0x10eb   :  { %v3066_v13 = vpop.f32.mrb[75].mxu1  ;;  %v3079_v44 = vmax.f32 %v3072_v16, 0.0 }
0x10ec   :  { %v3067_v40 = vadd.f32 %v8549_v0, %v3066_v13  ;;  %v3077_v20 = vmax.f32 %v3064_v48, 0.0 }
0x10ed   :  { %v3081_v29 = vpack.c.bf16 %v3079_v44, %v3079_v44 }
0x10ee   :  { %v3078_v5 = vmax.f32 %v3067_v40, 0.0 }
0x10f0   :  { %v3080_v35 = vpack.c.bf16 %v3078_v5, %v3077_v20  ;;  %v3380_v49 = vpop.f32.mrb[76].mxu1 }
0x10f1   :  { %v9323_v39 = vpop.f32.mrb[77].mxu1  ;;  %v3381_v63 = vadd.f32 %v8574_v34, %v3380_v49 }
0x10f2   :  { %9313 = vmatprep.mubr.msk.bf16.mxu0 %vm1574_vm12, %v3080_v35  ;;  %v3383_v42 = vpop.f32.mrb[78].mxu1 }
0x10f3   :  { %v3384_v50 = vadd.f32 %v8574_v34, %v3383_v42  ;;  %9314 = vmatmul.mubr.msk.bf16.vlgmr.msra.gmra.mrb[80].mxu0 %vm1574_vm12, %v3081_v29  ;;  %v9324_v11 = vpop.f32.mrb[79].mxu1 }
0x10f4   :  { %9333 = vmatprep.mubr.msk.bf16.mxu0 %vm10371_vm1, %v10370_v7 }
0x10f5   :  { %v11300_v31 = vpack.c.bf16 %v3384_v50, %v3381_v63 }
0x10f7   :  { %3504 = vrot.lane.b32.xlu0 %v11300_v31, %s10375_s17  ;;  %3394 = vrot.lane.b32.xlu1 %v11300_v31, %s10373_s15  ;;  %v11315_v26 = vrot.slane %v11300_v31, 4 }
0x10fb   :  { %3612 = vrot.lane.b32.xlu0 %v11300_v31, %s10377_s19  ;;  %3502 = vrot.lane.b32.xlu1 %v11300_v31, %s10372_s14 }
0x10ff   :  { %3722 = vrot.lane.b32.xlu0 %v11300_v31, %s10378_s20  ;;  %3614 = vrot.lane.b32.xlu1 %v11300_v31, %s10374_s16 }
0x1103   :  { %3724 = vrot.lane.b32.xlu1 %v11300_v31, %s10376_s18  ;;  %3958 = vrot.lane.b32.xlu0 %v11315_v26, %s10375_s17 }
0x1107   :  { %4068 = vrot.lane.b32.xlu0 %v11315_v26, %s10374_s16  ;;  %3848 = vrot.lane.b32.xlu1 %v11315_v26, %s10373_s15 }
0x110b   :  { %4178 = vrot.lane.b32.xlu0 %v11315_v26, %s10376_s18  ;;  %3956 = vrot.lane.b32.xlu1 %v11315_v26, %s10372_s14 }
0x110f   :  { %4066 = vrot.lane.b32.xlu1 %v11315_v26, %s10377_s19 }
0x1113   :  { %4176 = vrot.lane.b32.xlu1 %v11315_v26, %s10378_s20 }
0x1169   :  { %v3395_v21 = vpop.permute.xlu1 %3394  ;;  %v3505_v6 = vpop.permute.xlu0 %3504 }
0x116a   :  { %v3400_v37 = vsel %vm236_vm3, %v3395_v21, 0  ;;  %v3510_v14 = vsel %vm236_vm3, %v3505_v6, 0 }
0x116b   :  { %9326 = vmatpush3.bf16.xpose.msra.mxu1 %v3400_v37 }
0x116c   :  { %9337 = vmatprep.subr.bf16.mxu1 %v10370_v7 }
0x116d   :  { %v3503_v9 = vpop.permute.xlu1 %3502  ;;  %v3613_v27 = vpop.permute.xlu0 %3612 }
0x1171   :  { %v3615_v19 = vpop.permute.xlu1 %3614  ;;  %v3723_v28 = vpop.permute.xlu0 %3722 }
0x1172   :  { %9328 = vmatmul.mubr.msk.bf16.vlgmr.msra.gmra.mrb[80].mxu1 %vm236_vm3, %v11300_v31  ;;  %v3620_v23 = vsel %vm236_vm3, %v3615_v19, 0 }
0x1173   :  { %9338 = vmatpush3.bf16.xpose.msra.mxu1 %v3510_v14  ;;  %9339 = vmatprep.mubr.msk.bf16.mxu1 %vm10371_vm1, %v10370_v7 }
0x1174   :  { %9349 = vmatprep.subr.bf16.mxu1 %v10370_v7 }
0x1175   :  { %v3725_v25 = vpop.permute.xlu1 %3724  ;;  %v3959_v32 = vpop.permute.xlu0 %3958 }
0x1176   :  { %v3730_v52 = vsel %vm236_vm3, %v3725_v25, 0  ;;  %v3964_v57 = vsel %vm236_vm3, %v3959_v32, 0 }
0x1179   :  { %v3849_v3 = vpop.permute.xlu1 %3848  ;;  %v4069_v15 = vpop.permute.xlu0 %4068 }
0x117a   :  { %9340 = vmatmul.mubr.msk.bf16.vlgmr.msra.gmra.mrb[84].mxu1 %vm236_vm3, %v3503_v9  ;;  %v3854_v12 = vsel %vm236_vm3, %v3849_v3, 0  ;;  %v4074_v41 = vsel %vm236_vm3, %v4069_v15, 0 }
0x117b   :  { %9350 = vmatpush3.bf16.xpose.msra.mxu1 %v3620_v23  ;;  %9351 = vmatprep.mubr.msk.bf16.mxu1 %vm10371_vm1, %v10370_v7 }
0x117c   :  { %9361 = vmatprep.subr.bf16.mxu1 %v10370_v7 }
0x117d   :  { %v3957_v55 = vpop.permute.xlu1 %3956  ;;  %v4179_v24 = vpop.permute.xlu0 %4178 }
0x117e   :  { %v4184_v33 = vsel %vm236_vm3, %v4179_v24, 0 }
0x1181   :  { %v4067_v56 = vpop.permute.xlu1 %4066 }
0x1182   :  { %9352 = vmatmul.mubr.msk.bf16.vlgmr.msra.gmra.mrb[88].mxu1 %vm236_vm3, %v3613_v27 }
0x1183   :  { %9362 = vmatpush3.bf16.xpose.msra.mxu1 %v3730_v52  ;;  %9363 = vmatprep.mubr.msk.bf16.mxu1 %vm10371_vm1, %v10370_v7 }
0x1184   :  { %9373 = vmatprep.subr.bf16.mxu1 %v10370_v7 }
0x1185   :  { %v4177_v2 = vpop.permute.xlu1 %4176 }
0x118a   :  { %9364 = vmatmul.mubr.msk.bf16.vlgmr.msra.gmra.mrb[92].mxu1 %vm236_vm3, %v3723_v28 }
0x118b   :  { %9374 = vmatpush3.bf16.xpose.msra.mxu1 %v3854_v12  ;;  %9375 = vmatprep.mubr.msk.bf16.mxu1 %vm10371_vm1, %v10370_v7 }
0x118c   :  { %9385 = vmatprep.subr.bf16.mxu1 %v10370_v7 }
0x1192   :  { %9376 = vmatmul.mubr.msk.bf16.vlgmr.msra.gmra.mrb[96].mxu1 %vm236_vm3, %v11315_v26 }
0x1193   :  { %9386 = vmatpush3.bf16.xpose.msra.mxu1 %v3964_v57  ;;  %9387 = vmatprep.mubr.msk.bf16.mxu1 %vm10371_vm1, %v10370_v7 }
0x1194   :  { %9397 = vmatprep.subr.bf16.mxu1 %v10370_v7 }
0x119a   :  { %9388 = vmatmul.mubr.msk.bf16.vlgmr.msra.gmra.mrb[100].mxu1 %vm236_vm3, %v3957_v55 }
0x119b   :  { %9398 = vmatpush3.bf16.xpose.msra.mxu1 %v4074_v41  ;;  %9399 = vmatprep.mubr.msk.bf16.mxu1 %vm10371_vm1, %v10370_v7 }
0x119c   :  { %9409 = vmatprep.subr.bf16.mxu1 %v10370_v7 }
0x11a2   :  { %9400 = vmatmul.mubr.msk.bf16.vlgmr.msra.gmra.mrb[104].mxu1 %vm236_vm3, %v4067_v56 }
0x11a3   :  { %9410 = vmatpush3.bf16.xpose.msra.mxu1 %v4184_v33  ;;  %9411 = vmatprep.mubr.msk.bf16.mxu1 %vm10371_vm1, %v10370_v7 }
0x11a4   :  { %9421 = vmatprep.subr.bf16.mxu1 %v10370_v7 }
0x11aa   :  { %9412 = vmatmul.mubr.msk.bf16.vlgmr.msra.gmra.mrb[108].mxu1 %vm236_vm3, %v4177_v2 }
0x11ab   :  { %9425 = vmatprep.mubr.msk.bf16.mxu1 %vm10371_vm1, %v10370_v7 }
0x11c6   :  { %v11375_v4 = vpop.f32.mrb[80].mxu0 }
0x11c7   :  { %v11377_v46 = vpop.f32.mrb[81].mxu0 }
0x11c8   :  { %v9316_v38 = vpop.f32.mrb[82].mxu0 }
0x11c9   :  { %v11379_v60 = vpop.f32.mrb[83].mxu0 }
0x1245   :  { %v3436_v10 = vpop.f32.mrb[80].mxu1 }
0x1246   :  { %v3437_v17 = vadd.f32 %v3436_v10, %v3310_v59  ;;  %v9329_v54 = vpop.f32.mrb[81].mxu1 }
0x1247   :  { %v3439_v1 = vpop.f32.mrb[82].mxu1 }
0x1248   :  { %v9330_v51 = vpop.f32.mrb[83].mxu1  ;;  %v3442_v47 = vsel %vm236_vm3, %v3437_v17, -inf }
0x1249   :  { %3443 = vmax.xlane.f32.xlu0 %v3442_v47 }
0x124d   :  { %v3546_v8 = vpop.f32.mrb[84].mxu1 }
0x124e   :  { %v3547_v30 = vadd.f32 %v3546_v8, %v3310_v59  ;;  %v9341_v0 = vpop.f32.mrb[85].mxu1 }
0x124f   :  { %v3549_v36 = vpop.f32.mrb[86].mxu1 }
0x1250   :  { %v9342_v16 = vpop.f32.mrb[87].mxu1  ;;  %v3552_v61 = vsel %vm236_vm3, %v3547_v30, -inf }
0x1251   :  { %3553 = vmax.xlane.f32.xlu1 %v3552_v61 }
0x1255   :  { %v3656_v48 = vpop.f32.mrb[88].mxu1 }
0x1256   :  { %v3657_v22 = vadd.f32 %v3656_v48, %v3310_v59  ;;  %v9353_v13 = vpop.f32.mrb[89].mxu1 }
0x1257   :  { %v3659_v40 = vpop.f32.mrb[90].mxu1 }
0x1258   :  { %v9354_v44 = vpop.f32.mrb[91].mxu1  ;;  %v3662_v20 = vsel %vm236_vm3, %v3657_v22, -inf }
0x1259   :  { %3663 = vmax.xlane.f32.xlu0 %v3662_v20 }
0x125d   :  { %v3766_v5 = vpop.f32.mrb[92].mxu1 }
0x125e   :  { %v11390_v35 = vadd.f32 %v3766_v5, %v3310_v59  ;;  %v9365_v34 = vpop.f32.mrb[93].mxu1 }
0x125f   :  { %v3769_v49 = vpop.f32.mrb[94].mxu1 }
0x1260   :  { %v9366_v29 = vpop.f32.mrb[95].mxu1  ;;  %v3772_v39 = vsel %vm236_vm3, %v11390_v35, -inf }
0x1261   :  { %3773 = vmax.xlane.f32.xlu0 %v3772_v39 }
0x1265   :  { %v3890_v42 = vpop.f32.mrb[96].mxu1 }
0x1266   :  { %v11394_v63 = vadd.f32 %v3890_v42, %v3310_v59  ;;  %v9377_v50 = vpop.f32.mrb[97].mxu1 }
0x1267   :  { %v3893_v11 = vpop.f32.mrb[98].mxu1 }
0x1268   :  { %v9378_v21 = vpop.f32.mrb[99].mxu1  ;;  %v3896_v37 = vsel %vm236_vm3, %v11394_v63, -inf }
0x1269   :  { %3897 = vmax.xlane.f32.xlu1 %v3896_v37 }
0x126d   :  { %v4000_v6 = vpop.f32.mrb[100].mxu1 }
0x126e   :  { %v4001_v9 = vadd.f32 %v4000_v6, %v3310_v59  ;;  %v9389_v14 = vpop.f32.mrb[101].mxu1 }
0x126f   :  { %v4003_v19 = vpop.f32.mrb[102].mxu1 }
0x1270   :  { %v9390_v23 = vpop.f32.mrb[103].mxu1  ;;  %v4006_v25 = vsel %vm236_vm3, %v4001_v9, -inf }
0x1271   :  { %4007 = vmax.xlane.f32.xlu0 %v4006_v25 }
0x1275   :  { %v4110_v27 = vpop.f32.mrb[104].mxu1 }
0x1276   :  { %v4111_v52 = vadd.f32 %v4110_v27, %v3310_v59  ;;  %v9401_v3 = vpop.f32.mrb[105].mxu1 }
0x1277   :  { %v4113_v28 = vpop.f32.mrb[106].mxu1 }
0x1278   :  { %v9402_v12 = vpop.f32.mrb[107].mxu1  ;;  %v4116_v32 = vsel %vm236_vm3, %v4111_v52, -inf }
0x1279   :  { %4117 = vmax.xlane.f32.xlu1 %v4116_v32 }
0x127d   :  { %v4220_v57 = vpop.f32.mrb[108].mxu1 }
0x127e   :  { %v9413_v15 = vpop.f32.mrb[109].mxu1  ;;  %v4221_v24 = vadd.f32 %v4220_v57, %v3310_v59 }
0x127f   :  { %v4223_v55 = vpop.f32.mrb[110].mxu1 }
0x1280   :  { %v9414_v41 = vpop.f32.mrb[111].mxu1  ;;  %v4226_v56 = vsel %vm236_vm3, %v4221_v24, -inf }
0x1287   :  { %3564 = vrot.lane.b32.xlu0 %v11300_v31, %s12428_s23 }
0x128a   :  { %3454 = vrot.lane.b32.xlu1 %v11300_v31, %s12426_s21 }
0x12a6   :  { %4227 = vmax.xlane.f32.xlu0 %v4226_v56 }
0x12d6   :  { %v3444_v33 = vpop.xlane.xlu0 %3443 }
0x12d7   :  { %v3445_v2 = vsub.f32 %v3437_v17, %v3444_v33 }
0x12d9   :  { %v3446_v38 = vmul.f32 1.442695, %v3445_v2 }
0x12db   :  { %10196 = vpow2.f32 %v3446_v38 }
0x12de   :  { %v3554_v10 = vpop.xlane.xlu1 %3553 }
0x12df   :  { %v3555_v54 = vsub.f32 %v3547_v30, %v3554_v10 }
0x12e1   :  { %v3556_v1 = vmul.f32 1.442695, %v3555_v54 }
0x12e3   :  { %10198 = vpow2.f32 %v3556_v1 }
0x12e5   :  { %v11405_v51 = vpop.eup %10196 }
0x12e6   :  { %v3664_v47 = vpop.xlane.xlu0 %3663  ;;  %v3448_v8 = vsel %vm236_vm3, %v11405_v51, 0.0 }
0x12e7   :  { %v3665_v0 = vsub.f32 %v3657_v22, %v3664_v47  ;;  %3449 = vadd.xlane.f32.xlu1 %v3448_v8 }
0x12e9   :  { %v3666_v59 = vmul.f32 1.442695, %v3665_v0 }
0x12eb   :  { %10200 = vpow2.f32 %v3666_v59 }
0x12ed   :  { %v11409_v36 = vpop.eup %10198 }
0x12ee   :  { %v3558_v17 = vsel %vm236_vm3, %v11409_v36, 0.0  ;;  %v3774_v13 = vpop.xlane.xlu0 %3773 }
0x12ef   :  { %3559 = vadd.xlane.f32.xlu0 %v3558_v17  ;;  %v3775_v44 = vsub.f32 %v11390_v35, %v3774_v13 }
0x12f1   :  { %v3776_v20 = vmul.f32 1.442695, %v3775_v44 }
0x12f3   :  { %10202 = vpow2.f32 %v3776_v20 }
0x12f5   :  { %v11413_v16 = vpop.eup %10200 }
0x12f6   :  { %v3668_v30 = vsel %vm236_vm3, %v11413_v16, 0.0  ;;  %v3898_v61 = vpop.xlane.xlu1 %3897 }
0x12f7   :  { %3669 = vadd.xlane.f32.xlu1 %v3668_v30  ;;  %v3899_v5 = vsub.f32 %v11394_v63, %v3898_v61 }
0x12f9   :  { %v3900_v29 = vmul.f32 1.442695, %v3899_v5 }
0x12fb   :  { %10204 = vpow2.f32 %v3900_v29 }
0x12fd   :  { %v10203_v50 = vpop.eup %10202 }
0x12fe   :  { %v4008_v34 = vpop.xlane.xlu0 %4007  ;;  %v3778_v11 = vsel %vm236_vm3, %v10203_v50, 0.0 }
0x12ff   :  { %v4009_v49 = vsub.f32 %v4001_v9, %v4008_v34 }
0x1301   :  { %v4010_v42 = vmul.f32 1.442695, %v4009_v49 }
0x1302   :  { %v3565_v14 = vpop.permute.xlu0 %3564 }
0x1303   :  { %10206 = vpow2.f32 %v4010_v42  ;;  %v3570_v15 = vsel %vm314_vm4, %v3565_v14, 0 }
0x1305   :  { %3674 = vrot.lane.b32.xlu0 %v11300_v31, %s12424_s22  ;;  %v11426_v21 = vpop.eup %10204 }
0x1306   :  { %v4118_v48 = vpop.xlane.xlu1 %4117  ;;  %v3902_v63 = vsel %vm236_vm3, %v11426_v21, 0.0 }
0x1307   :  { %v4119_v39 = vsub.f32 %v4111_v52, %v4118_v48 }
0x1308   :  { %3784 = vrot.lane.b32.xlu1 %v11300_v31, %s12416_s24 }
0x1309   :  { %v4120_v31 = vmul.f32 1.442695, %v4119_v39 }
0x130a   :  { %v3455_v22 = vpop.permute.xlu1 %3454 }
0x130b   :  { %v3460_v40 = vsel %vm314_vm4, %v3455_v22, 0  ;;  %10208 = vpow2.f32 %v4120_v31 }
0x130c   :  { %9332 = vmatpush3.bf16.msra.mxu0 %v3460_v40 }
0x130d   :  { %9343 = vmatprep.subr.bf16.mxu0 %v10370_v7  ;;  %v11428_v35 = vpop.eup %10206 }
0x130e   :  { %v4012_v6 = vsel %vm236_vm3, %v11428_v35, 0.0 }
0x1315   :  { %v11432_v37 = vpop.eup %10208 }
0x1316   :  { %v4122_v9 = vsel %vm236_vm3, %v11432_v37, 0.0 }
0x1324   :  { %3779 = vadd.xlane.f32.xlu0 %v3778_v11 }
0x1328   :  { %3903 = vadd.xlane.f32.xlu0 %v3902_v63 }
0x132c   :  { %4013 = vadd.xlane.f32.xlu1 %v4012_v6  ;;  %4123 = vadd.xlane.f32.xlu0 %v4122_v9 }
0x1333   :  { %v4228_v19 = vpop.xlane.xlu0 %4227 }
0x1334   :  { %v4229_v23 = vsub.f32 %v4221_v24, %v4228_v19 }
0x1336   :  { %v4230_v25 = vmul.f32 1.442695, %v4229_v23 }
0x1338   :  { %10210 = vpow2.f32 %v4230_v25 }
0x133d   :  { %4018 = vrot.lane.b32.xlu1 %v11315_v26, %s12428_s23 }
0x1341   :  { %4128 = vrot.lane.b32.xlu1 %v11315_v26, %s12424_s22 }
0x1342   :  { %v11442_v27 = vpop.eup %10210 }
0x1343   :  { %v4232_v52 = vsel %vm236_vm3, %v11442_v27, 0.0 }
0x1344   :  { %4233 = vadd.xlane.f32.xlu0 %v4232_v52 }
0x1345   :  { %4238 = vrot.lane.b32.xlu1 %v11315_v26, %s12416_s24 }
0x135a   :  { %3908 = vrot.lane.b32.xlu0 %v11315_v26, %s12426_s21  ;;  %s10410_s21 = smov 26  }
0x1374   :  { %v3450_v3 = vpop.xlane.xlu1 %3449 }
0x1375   :  { %10212 = vrcp.f32 %v3450_v3 }
0x137c   :  { %v3560_v28 = vpop.xlane.xlu0 %3559 }
0x137d   :  { %10214 = vrcp.f32 %v3560_v28 }
0x137f   :  { %v10213_v12 = vpop.eup %10212 }
0x1380   :  { %v3452_v32 = vmul.f32 %v10213_v12, %v11405_v51  ;;  %v3675_v24 = vpop.permute.xlu0 %3674 }
0x1381   :  { %v3680_v33 = vsel %vm314_vm4, %v3675_v24, 0 }
0x1382   :  { %v3453_v57 = vpack.c.bf16 %v3452_v32, %v3452_v32 }
0x1384   :  { %v3670_v55 = vpop.xlane.xlu1 %3669  ;;  %9334 = vmatmul.mubr.msk.bf16.vlgmr.msra.gmra.mrb[84].mxu0 %vm236_vm3, %v3453_v57 }
0x1385   :  { %10216 = vrcp.f32 %v3670_v55  ;;  %9344 = vmatpush3.bf16.msra.mxu0 %v3570_v15  ;;  %9345 = vmatprep.mubr.msk.bf16.mxu0 %vm10371_vm1, %v10370_v7 }
0x1386   :  { %9355 = vmatprep.subr.bf16.mxu0 %v10370_v7 }
0x1387   :  { %v10215_v26 = vpop.eup %10214 }
0x1388   :  { %v3562_v41 = vmul.f32 %v10215_v26, %v11409_v36  ;;  %v3785_v10 = vpop.permute.xlu1 %3784 }
0x1389   :  { %v3790_v1 = vsel %vm314_vm4, %v3785_v10, 0 }
0x138a   :  { %v3563_v56 = vpack.c.bf16 %v3562_v41, %v3562_v41 }
0x138c   :  { %9346 = vmatmul.mubr.msk.bf16.vlgmr.msra.gmra.mrb[88].mxu0 %vm236_vm3, %v3563_v56 }
0x138d   :  { %9356 = vmatpush3.bf16.msra.mxu0 %v3680_v33  ;;  %9357 = vmatprep.mubr.msk.bf16.mxu0 %vm10371_vm1, %v10370_v7 }
0x138e   :  { %9367 = vmatprep.subr.bf16.mxu0 %v10370_v7 }
0x138f   :  { %v10217_v2 = vpop.eup %10216 }
0x1390   :  { %v3672_v38 = vmul.f32 %v10217_v2, %v11413_v16 }
0x1392   :  { %v3673_v54 = vpack.c.bf16 %v3672_v38, %v3672_v38 }
0x1394   :  { %9358 = vmatmul.mubr.msk.bf16.vlgmr.msra.gmra.mrb[92].mxu0 %vm236_vm3, %v3673_v54 }
0x1395   :  { %9368 = vmatpush3.bf16.msra.mxu0 %v3790_v1  ;;  %9369 = vmatprep.mubr.msk.bf16.mxu0 %vm10371_vm1, %v10370_v7  ;;  %v10018_v1 = vld [vmem:[%s11500_s27] sm:$0xff]  }
0x1396   :  { %9379 = vmatprep.subr.bf16.mxu0 %v10370_v7  ;;  %9422 = vmatpush3.bf16.msra.mxu1 %v10018_v1 }
0x1397   :  { %9423 = vmatprep.subr.bf16.mxu1 %v10370_v7 }
0x13b1   :  { %v3780_v51 = vpop.xlane.xlu0 %3779 }
0x13b2   :  { %10218 = vrcp.f32 %v3780_v51  ;;  %v10019_v51 = vld [vmem:[%s11500_s27 + $0x8] sm:$0xff]  }
0x13b3   :  { %9424 = vmatpush3.bf16.msra.mxu1 %v10019_v51 }
0x13b5   :  { %v3904_v59 = vpop.xlane.xlu0 %3903 }
0x13b6   :  { %10220 = vrcp.f32 %v3904_v59 }
0x13b9   :  { %v4014_v36 = vpop.xlane.xlu1 %4013  ;;  %v4124_v17 = vpop.xlane.xlu0 %4123 }
0x13ba   :  { %10222 = vrcp.f32 %v4014_v36 }
0x13bb   :  { %10224 = vrcp.f32 %v4124_v17 }
0x13bc   :  { %v10219_v47 = vpop.eup %10218 }
0x13bd   :  { %v3782_v8 = vmul.f32 %v10219_v47, %v10203_v50  ;;  %v4019_v13 = vpop.permute.xlu1 %4018 }
0x13be   :  { %v4024_v20 = vsel %vm314_vm4, %v4019_v13, 0 }
0x13bf   :  { %v3783_v0 = vpack.c.bf16 %v3782_v8, %v3782_v8 }
0x13c0   :  { %v10221_v16 = vpop.eup %10220 }
0x13c1   :  { %9370 = vmatmul.mubr.msk.bf16.vlgmr.msra.gmra.mrb[96].mxu0 %vm236_vm3, %v3783_v0  ;;  %v3906_v61 = vmul.f32 %v10221_v16, %v11426_v21  ;;  %v4129_v34 = vpop.permute.xlu1 %4128 }
0x13c2   :  { %9381 = vmatprep.mubr.msk.bf16.mxu0 %vm10371_vm1, %v10370_v7  ;;  %v4134_v39 = vsel %vm314_vm4, %v4129_v34, 0 }
0x13c3   :  { %v3907_v40 = vpack.c.bf16 %v3906_v61, %v3906_v61 }
0x13c4   :  { %v10223_v44 = vpop.eup %10222 }
0x13c5   :  { %v4016_v5 = vmul.f32 %v10223_v44, %v11428_v35  ;;  %v10225_v29 = vpop.eup %10224  ;;  %v4239_v31 = vpop.permute.xlu1 %4238 }
0x13c6   :  { %v4126_v42 = vmul.f32 %v10225_v29, %v11432_v37  ;;  %v4244_v21 = vsel %vm314_vm4, %v4239_v31, 0 }
0x13c7   :  { %v4017_v49 = vpack.c.bf16 %v4016_v5, %v4016_v5 }
0x13c8   :  { %v4127_v50 = vpack.c.bf16 %v4126_v42, %v4126_v42 }
0x13d1   :  { %v4234_v30 = vpop.xlane.xlu0 %4233 }
0x13d2   :  { %10226 = vrcp.f32 %v4234_v30 }
0x13d5   :  { %v3909_v48 = vpop.permute.xlu0 %3908 }
0x13d6   :  { %v3914_v22 = vsel %vm314_vm4, %v3909_v48, 0 }
0x13d7   :  { %9380 = vmatpush3.bf16.msra.mxu0 %v3914_v22  ;;  %v8563_v22 = vld [vmem:[%s10858_s8 + $0x1] ss:$0 sm:$0xff]  ;;  %s11609_s8 = sld [smem:[%s12415_s0 + %s10401_s12]]   ;;  %s12435_s12 = smov 16  }
0x13d8   :  { %9391 = vmatprep.subr.bf16.mxu0 %v10370_v7  ;;  %v3164_v13 = vadd.f32 %v8563_v22, %v11377_v46  ;;  %v3172_v44 = vadd.f32 %v11375_v4, %v8563_v22 }
0x13da   :  { %9382 = vmatmul.mubr.msk.bf16.vlgmr.msra.gmra.mrb[100].mxu0 %vm236_vm3, %v3907_v40  ;;  %v3167_v40 = vadd.f32 %v8563_v22, %v11379_v60  ;;  %v11519_v34 = vadd.f32 %v3172_v44, %v11266_v18 }
0x13db   :  { %9392 = vmatpush3.bf16.msra.mxu0 %v4024_v20  ;;  %9393 = vmatprep.mubr.msk.bf16.mxu0 %vm10371_vm1, %v10370_v7  ;;  %v11513_v20 = vadd.f32 %v3164_v13, %v11258_v43 }
0x13dc   :  { %9403 = vmatprep.subr.bf16.mxu0 %v10370_v7  ;;  %v10227_v11 = vpop.eup %10226  ;;  %v11516_v5 = vadd.f32 %v3167_v40, %v11255_v58  ;;  %v3194_v58 = vmul.f32 %v11519_v34, %v11519_v34  ;;  %v3186_v18 = vsel %vm1392_vm11, %v11519_v34, 0.0 }
0x13dd   :  { %v4236_v35 = vmul.f32 %v10227_v11, %v11442_v27  ;;  %v3192_v29 = vmul.f32 %v11513_v20, %v11513_v20 }
0x13de   :  { %v3183_v46 = vsel %vm171_vm0, %v11516_v5, 0.0  ;;  %v3193_v4 = vmul.f32 %v11516_v5, %v11516_v5  ;;  %v3201_v60 = vsel %vm1392_vm11, %v3194_v58, 0.0 }
0x13df   :  { %v4237_v63 = vpack.c.bf16 %v4236_v35, %v4236_v35  ;;  %v3195_v43 = vsel %vm171_vm0, %v3192_v29, 0.0 }
0x13e2   :  { %9394 = vmatmul.mubr.msk.bf16.vlgmr.msra.gmra.mrb[104].mxu0 %vm236_vm3, %v4017_v49  ;;  %v3180_v49 = vsel %vm171_vm0, %v11513_v20, 0.0 }
0x13e3   :  { %9404 = vmatpush3.bf16.msra.mxu0 %v4134_v39  ;;  %9405 = vmatprep.mubr.msk.bf16.mxu0 %vm10371_vm1, %v10370_v7  ;;  %v3198_v39 = vsel %vm171_vm0, %v3193_v4, 0.0 }
0x13e4   :  { %9415 = vmatprep.subr.bf16.mxu0 %v10370_v7 }
0x13ea   :  { %9406 = vmatmul.mubr.msk.bf16.vlgmr.msra.gmra.mrb[108].mxu0 %vm236_vm3, %v4127_v50 }
0x13eb   :  { %9416 = vmatpush3.bf16.msra.mxu0 %v4244_v21  ;;  %9417 = vmatprep.mubr.msk.bf16.mxu0 %vm10371_vm1, %v10370_v7 }
0x13ec   :  { %9429 = vmatprep.subr.bf16.mxu0 %v10370_v7 }
0x13f2   :  { %9418 = vmatmul.mubr.msk.bf16.vlgmr.msra.gmra.mrb[112].mxu0 %vm236_vm3, %v4237_v63 }
0x13f3   :  { %9433 = vmatprep.mubr.msk.bf16.mxu0 %vm10371_vm1, %v10370_v7 }
0x1457   :  { %v11495_v37 = vpop.f32.mrb[84].mxu0 }
0x1458   :  { %v9335_v6 = vpop.f32.mrb[85].mxu0 }
0x1459   :  { %v3499_v9 = vpop.f32.mrb[86].mxu0 }
0x145a   :  { %v9336_v14 = vpop.f32.mrb[87].mxu0 }
0x145f   :  { %v3606_v19 = vpop.f32.mrb[88].mxu0 }
0x1460   :  { %v9347_v23 = vpop.f32.mrb[89].mxu0 }
0x1461   :  { %v3609_v25 = vpop.f32.mrb[90].mxu0 }
0x1462   :  { %v9348_v52 = vpop.f32.mrb[91].mxu0 }
0x1467   :  { %v3716_v3 = vpop.f32.mrb[92].mxu0 }
0x1468   :  { %v9359_v28 = vpop.f32.mrb[93].mxu0 }
0x1469   :  { %v3719_v27 = vpop.f32.mrb[94].mxu0 }
0x146a   :  { %v9360_v12 = vpop.f32.mrb[95].mxu0 }
0x1494   :  { %v3826_v32 = vpop.f32.mrb[96].mxu0 }
0x1495   :  { %v9371_v57 = vpop.f32.mrb[97].mxu0 }
0x1496   :  { %v3829_v15 = vpop.f32.mrb[98].mxu0 }
0x1497   :  { %v9372_v55 = vpop.f32.mrb[99].mxu0 }
0x14ad   :  { %v3950_v26 = vpop.f32.mrb[100].mxu0 }
0x14ae   :  { %v9383_v41 = vpop.f32.mrb[101].mxu0 }
0x14af   :  { %v3953_v24 = vpop.f32.mrb[102].mxu0 }
0x14b0   :  { %v9384_v56 = vpop.f32.mrb[103].mxu0 }
0x14b5   :  { %v4060_v33 = vpop.f32.mrb[104].mxu0 }
0x14b6   :  { %v9936_v2 = vpack.i.bf16 %v4060_v33, %v3606_v19  ;;  %v9395_v38 = vpop.f32.mrb[105].mxu0 }
0x14b7   :  { %v4063_v10 = vpop.f32.mrb[106].mxu0 }
0x14b8   :  { %9937 = vrot.lane.b32.xlu1 %v9936_v2, %s12422_s25  ;;  %v9396_v54 = vpop.f32.mrb[107].mxu0 }
0x14bd   :  { %v4170_v47 = vpop.f32.mrb[108].mxu0 }
0x14be   :  { %v9941_v8 = vpack.i.bf16 %v4170_v47, %v3716_v3  ;;  %v9407_v0 = vpop.f32.mrb[109].mxu0 }
0x14bf   :  { %v4173_v59 = vpop.f32.mrb[110].mxu0 }
0x14c0   :  { %9942 = vrot.lane.b32.xlu1 %v9941_v8, %s12420_s26  ;;  %v9408_v36 = vpop.f32.mrb[111].mxu0  ;;  %v8570_v59 = vld [vmem:[%s10827_s4 + $0x3] ss:$0 sm:$0xff]  ;;  %s10399_s4 = smov 19  }
0x14c1   :  { %s11573_s2 = sld [smem:[%s12415_s0 + %s10399_s4]]  }
0x14c2   :  { %s11675_s4 = sld [smem:[%s12415_s0 + %s10405_s7]]   ;;  %s10406_s7 = smov 21  }
0x14c3   :  { %s11853_s24 = sld [smem:[%s12415_s0 + %s10406_s7]]   ;;  %s10407_s7 = smov 22  }
0x14c5   :  { %v4280_v17 = vpop.f32.mrb[112].mxu0 }
0x14c6   :  { %v9946_v16 = vpack.i.bf16 %v4280_v17, %v3826_v32  ;;  %v9419_v30 = vpop.f32.mrb[113].mxu0 }
0x14c7   :  { %v4283_v61 = vpop.f32.mrb[114].mxu0  ;;  %v8571_v30 = vld [vmem:[%s10833_s9 + $0x3] ss:$0 sm:$0xff]  ;;  %s11638_s9 = sld [smem:[%s12415_s0 + %s10403_s10]]   ;;  %s10404_s10 = smov 20  }
0x14c8   :  { %9947 = vrot.lane.b32.xlu0 %v9946_v16, %s12418_s1  ;;  %v9420_v48 = vpop.f32.mrb[115].mxu0  ;;  %s11662_s3 = sld [smem:[%s12415_s0 + %s10404_s10]]   ;;  %s10411_s10 = smov 28  }
0x14c9   :  { %s11922_s22 = sld [smem:[%s12415_s0 + %s10411_s10]]   ;;  %s12434_s10 = smov 8  }
0x14e4   :  { %3181 = vadd.xlane.f32.xlu1 %v3180_v49 }
0x14e7   :  { %3184 = vadd.xlane.f32.xlu0 %v3183_v46 }
0x14e8   :  { %3196 = vadd.xlane.f32.xlu1 %v3195_v43 }
0x14eb   :  { %3187 = vadd.xlane.f32.xlu0 %v3186_v18 }
0x14ec   :  { %3202 = vadd.xlane.f32.xlu1 %v3201_v60 }
0x14ef   :  { %3199 = vadd.xlane.f32.xlu0 %v3198_v39 }
0x152a   :  { %v9938_v42 = vpop.permute.xlu1 %9937 }
0x152b   :  { %v9940_v50 = vunpack.i.h.bf16 %v9938_v42  ;;  %v9939_v11 = vunpack.i.l.bf16 %v9938_v42 }
0x152d   :  { %v4298_v6 = vsel %vm236_vm3, %v3950_v26, %v9940_v50  ;;  %v3844_v9 = vsel %vm236_vm3, %v11495_v37, %v9939_v11  ;;  %v10020_v11 = vld [vmem:[%s11573_s2] sm:$0xff]  }
0x152e   :  { %9437 = vmatprep.subr.bf16.mxu1 %v10020_v11 }
0x1532   :  { %v9943_v31 = vpop.permute.xlu1 %9942 }
0x1533   :  { %v9945_v21 = vunpack.i.h.bf16 %v9943_v31  ;;  %v9944_v35 = vunpack.i.l.bf16 %v9943_v31 }
0x1535   :  { %v4299_v23 = vsel %vm757_vm8, %v4298_v6, %v9945_v21  ;;  %v3845_v25 = vsel %vm757_vm8, %v3844_v9, %v9944_v35  ;;  %v10021_v21 = vld [vmem:[%s11573_s2 + $0x8] sm:$0xff]   ;;  %v8594_v35 = vld [vmem:[%s11582_s28] ss:$0 sm:$0xff] }
0x153a   :  { %v9948_v63 = vpop.permute.xlu0 %9947 }
0x153b   :  { %v9950_v14 = vunpack.i.h.bf16 %v9948_v63  ;;  %v9949_v19 = vunpack.i.l.bf16 %v9948_v63 }
0x153d   :  { %v4300_v52 = vsel %vm760_vm9, %v4299_v23, %v9950_v14  ;;  %v3846_v3 = vsel %vm760_vm9, %v3845_v25, %v9949_v19 }
0x153e   :  { %v4301_v28 = vpack.c.bf16 %v4300_v52, %v3846_v3 }
0x1540   :  { %9426 = vmatmul.mubr.msk.bf16.vlgmr.msra.gmra.mrb[112].mxu1 %vm171_vm0, %v4301_v28 }
0x1541   :  { %9438 = vmatpush3.bf16.msra.mxu1 %v10020_v11 }
0x1542   :  { %9439 = vmatprep.subr.bf16.mxu1 %v10021_v21 }
0x1545   :  { %9440 = vmatpush3.bf16.msra.mxu1 %v10021_v21 }
0x1546   :  { %9451 = vmatprep.subr.bf16.mxu1 %v10370_v7 }
0x1571   :  { %v3182_v27 = vpop.xlane.xlu1 %3181 }
0x1572   :  { %v3189_v12 = vmul.f32 0.03125, %v3182_v27 }
0x1574   :  { %v3185_v32 = vpop.xlane.xlu0 %3184  ;;  %v3207_v15 = vmul.f32 %v3189_v12, %v3189_v12  ;;  %v3219_v17 = vsub.f32 %v11513_v20, %v3189_v12 }
0x1575   :  { %v3197_v57 = vpop.xlane.xlu1 %3196  ;;  %v3190_v41 = vmul.f32 0.03125, %v3185_v32 }
0x1576   :  { %v3204_v55 = vmul.f32 0.03125, %v3197_v57 }
0x1577   :  { %v3208_v54 = vmul.f32 %v3190_v41, %v3190_v41  ;;  %v3220_v29 = vsub.f32 %v11516_v5, %v3190_v41 }
0x1578   :  { %v3210_v37 = vsub.f32 %v3204_v55, %v3207_v15  ;;  %v3188_v26 = vpop.xlane.xlu0 %3187 }
0x1579   :  { %v3191_v24 = vmul.f32 0.03125, %v3188_v26  ;;  %v3203_v56 = vpop.xlane.xlu1 %3202 }
0x157a   :  { %v3213_v33 = vadd.f32 1e-05, %v3210_v37  ;;  %v3206_v2 = vmul.f32 0.03125, %v3203_v56 }
0x157b   :  { %v3209_v38 = vmul.f32 %v3191_v24, %v3191_v24  ;;  %v3221_v13 = vsub.f32 %v11519_v34, %v3191_v24 }
0x157c   :  { %10228 = vrsqrt.f32 %v3213_v33  ;;  %v3200_v10 = vpop.xlane.xlu0 %3199 }
0x157d   :  { %v3212_v1 = vsub.f32 %v3206_v2, %v3209_v38  ;;  %v3205_v51 = vmul.f32 0.03125, %v3200_v10 }
0x157f   :  { %v3215_v47 = vadd.f32 1e-05, %v3212_v1  ;;  %v3211_v8 = vsub.f32 %v3205_v51, %v3208_v54 }
0x1581   :  { %10230 = vrsqrt.f32 %v3215_v47  ;;  %v3214_v0 = vadd.f32 1e-05, %v3211_v8 }
0x1583   :  { %10232 = vrsqrt.f32 %v3214_v0 }
0x1586   :  { %v10229_v36 = vpop.eup %10228 }
0x1587   :  { %v3228_v16 = vmul.f32 %v10229_v36, %v8570_v59 }
0x1589   :  { %v3231_v61 = vmul.f32 %v3228_v16, %v3219_v17  ;;  %v8572_v17 = vld [vmem:[%s11604_s11] ss:$0 sm:$0xff] }
0x158b   :  { %v10231_v48 = vpop.eup %10230  ;;  %v11547_v22 = vadd.f32 %v8571_v30, %v3231_v61 }
0x158c   :  { %v3230_v40 = vmul.f32 %v10231_v48, %v8570_v59 }
0x158d   :  { %v10233_v44 = vpop.eup %10232  ;;  %v3245_v49 = vsel %vm171_vm0, %v11547_v22, 0.0  ;;  %v3257_v5 = vmul.f32 %v11547_v22, %v11547_v22 }
0x158e   :  { %3246 = vadd.xlane.f32.xlu0 %v3245_v49  ;;  %v3233_v46 = vmul.f32 %v3230_v40, %v3221_v13  ;;  %v3229_v43 = vmul.f32 %v10233_v44, %v8570_v59  ;;  %v8573_v49 = vld [vmem:[%s11609_s8] ss:$0 sm:$0xff] }
0x158f   :  { %v3260_v42 = vsel %vm171_vm0, %v3257_v5, 0.0 }
0x1590   :  { %v11553_v58 = vadd.f32 %v8571_v30, %v3233_v46  ;;  %v3232_v20 = vmul.f32 %v3229_v43, %v3220_v29 }
0x1592   :  { %v3251_v18 = vsel %vm1392_vm11, %v11553_v58, 0.0  ;;  %v11557_v4 = vadd.f32 %v8571_v30, %v3232_v20  ;;  %v3259_v31 = vmul.f32 %v11553_v58, %v11553_v58 }
0x1593   :  { %3252 = vadd.xlane.f32.xlu0 %v3251_v18 }
0x1594   :  { %v3248_v34 = vsel %vm171_vm0, %v11557_v4, 0.0  ;;  %v3258_v60 = vmul.f32 %v11557_v4, %v11557_v4  ;;  %v3266_v50 = vsel %vm1392_vm11, %v3259_v31, 0.0 }
0x1595   :  { %3249 = vadd.xlane.f32.xlu1 %v3248_v34 }
0x1596   :  { %v3263_v39 = vsel %vm171_vm0, %v3258_v60, 0.0  ;;  %v10022_v60 = vld [vmem:[%s11617_s13] sm:$0xff]  }
0x1597   :  { %3264 = vadd.xlane.f32.xlu0 %v3263_v39  ;;  %9430 = vmatpush3.bf16.msra.mxu0 %v10022_v60  ;;  %v10023_v39 = vld [vmem:[%s11617_s13 + $0x8] sm:$0xff]  }
0x1598   :  { %9431 = vmatprep.subr.bf16.mxu0 %v10370_v7 }
0x1599   :  { %3261 = vadd.xlane.f32.xlu1 %v3260_v42 }
0x159b   :  { %9432 = vmatpush3.bf16.msra.mxu0 %v10023_v39 }
0x159c   :  { %9445 = vmatprep.subr.bf16.mxu0 %v10370_v7 }
0x159d   :  { %3267 = vadd.xlane.f32.xlu1 %v3266_v50 }
0x1613   :  { %v4357_v63 = vpop.f32.mrb[112].mxu1 }
0x1614   :  { %v4358_v6 = vadd.f32 %v8594_v35, %v4357_v63  ;;  %v9427_v9 = vpop.f32.mrb[113].mxu1 }
0x1615   :  { %v4360_v14 = vpop.f32.mrb[114].mxu1 }
0x1616   :  { %v11586_v19 = vadd.f32 %v4358_v6, %v11275_v62  ;;  %v4361_v23 = vadd.f32 %v8594_v35, %v4360_v14  ;;  %v9428_v25 = vpop.f32.mrb[115].mxu1 }
0x1618   :  { %v11589_v52 = vadd.f32 %v4361_v23, %v11277_v53  ;;  %v4366_v3 = vsel %vm171_vm0, %v11586_v19, 0.0  ;;  %v4374_v28 = vmul.f32 %v11586_v19, %v11586_v19 }
0x1619   :  { %4367 = vadd.xlane.f32.xlu0 %v4366_v3 }
0x161a   :  { %v4369_v27 = vsel %vm171_vm0, %v11589_v52, 0.0  ;;  %v4375_v12 = vmul.f32 %v11589_v52, %v11589_v52  ;;  %v4376_v32 = vsel %vm171_vm0, %v4374_v28, 0.0 }
0x161b   :  { %v3247_v62 = vpop.xlane.xlu0 %3246  ;;  %4370 = vadd.xlane.f32.xlu1 %v4369_v27  ;;  %v8598_v27 = vld [vmem:[%s11638_s9] ss:$0 sm:$0xff] }
0x161c   :  { %v4379_v53 = vsel %vm171_vm0, %v4375_v12, 0.0  ;;  %v3254_v55 = vmul.f32 0.03125, %v3247_v62 }
0x161d   :  { %4377 = vadd.xlane.f32.xlu0 %v4376_v32 }
0x161e   :  { %v3272_v33 = vmul.f32 %v3254_v55, %v3254_v55  ;;  %v3284_v13 = vsub.f32 %v11547_v22, %v3254_v55 }
0x161f   :  { %4380 = vadd.xlane.f32.xlu1 %v4379_v53 }
0x1620   :  { %v3253_v57 = vpop.xlane.xlu0 %3252 }
0x1621   :  { %v3256_v2 = vmul.f32 0.03125, %v3253_v57 }
0x1622   :  { %v3250_v15 = vpop.xlane.xlu1 %3249 }
0x1623   :  { %v3255_v37 = vmul.f32 0.03125, %v3250_v15  ;;  %v3274_v47 = vmul.f32 %v3256_v2, %v3256_v2  ;;  %v3286_v43 = vsub.f32 %v11553_v58, %v3256_v2 }
0x1624   :  { %v3265_v26 = vpop.xlane.xlu0 %3264 }
0x1625   :  { %v3273_v41 = vmul.f32 %v3255_v37, %v3255_v37  ;;  %v3270_v24 = vmul.f32 0.03125, %v3265_v26  ;;  %v3285_v30 = vsub.f32 %v11557_v4, %v3255_v37  ;;  %v8599_v37 = vld [vmem:[%s11644_s29] ss:$0 sm:$0xff] }
0x1626   :  { %v3262_v56 = vpop.xlane.xlu1 %3261 }
0x1627   :  { %v3276_v38 = vsub.f32 %v3270_v24, %v3273_v41  ;;  %v3269_v10 = vmul.f32 0.03125, %v3262_v56 }
0x1629   :  { %v3279_v54 = vadd.f32 1e-05, %v3276_v38  ;;  %v3275_v1 = vsub.f32 %v3269_v10, %v3272_v33 }
0x162a   :  { %v3268_v51 = vpop.xlane.xlu1 %3267 }
0x162b   :  { %10234 = vrsqrt.f32 %v3279_v54  ;;  %v3278_v8 = vadd.f32 1e-05, %v3275_v1  ;;  %v3271_v0 = vmul.f32 0.03125, %v3268_v51 }
0x162d   :  { %10236 = vrsqrt.f32 %v3278_v8  ;;  %v3277_v59 = vsub.f32 %v3271_v0, %v3274_v47  ;;  %v8600_v8 = vld [vmem:[%s11675_s4] ss:$0 sm:$0xff] }
0x162f   :  { %v3280_v36 = vadd.f32 1e-05, %v3277_v59 }
0x1631   :  { %10238 = vrsqrt.f32 %v3280_v36 }
0x1635   :  { %v10235_v16 = vpop.eup %10234 }
0x1636   :  { %v3294_v61 = vmul.f32 %v10235_v16, %v8572_v17 }
0x1637   :  { %v10237_v48 = vpop.eup %10236 }
0x1638   :  { %v3293_v40 = vmul.f32 %v10237_v48, %v8572_v17  ;;  %v3297_v44 = vmul.f32 %v3294_v61, %v3285_v30 }
0x163a   :  { %v3296_v29 = vmul.f32 %v3293_v40, %v3284_v13  ;;  %v3306_v4 = vadd.f32 %v8573_v49, %v3297_v44 }
0x163b   :  { %v10239_v46 = vpop.eup %10238 }
0x163c   :  { %v3295_v20 = vmul.f32 %v10239_v46, %v8572_v17  ;;  %v3305_v18 = vadd.f32 %v8573_v49, %v3296_v29 }
0x163e   :  { %v11621_v34 = vpack.c.bf16 %v3306_v4, %v3305_v18  ;;  %v3298_v22 = vmul.f32 %v3295_v20, %v3286_v43 }
0x1640   :  { %9441 = vmatprep.mubr.msk.bf16.mxu1 %vm171_vm0, %v11621_v34  ;;  %v3307_v5 = vadd.f32 %v8573_v49, %v3298_v22 }
0x1642   :  { %v11628_v42 = vpack.c.bf16 %v3307_v5, %v3307_v5 }
0x1644   :  { %9442 = vmatmul.mubr.msk.bf16.vlgmr.msra.gmra.mrb[116].mxu1 %vm171_vm0, %v11628_v42 }
0x1645   :  { %9453 = vmatprep.mubr.msk.bf16.mxu1 %vm10371_vm1, %v10370_v7 }
0x16a6   :  { %v4368_v58 = vpop.xlane.xlu0 %4367 }
0x16a7   :  { %v4372_v31 = vmul.f32 0.03125, %v4368_v58 }
0x16a8   :  { %v4371_v50 = vpop.xlane.xlu1 %4370 }
0x16a9   :  { %v4373_v11 = vmul.f32 0.03125, %v4371_v50  ;;  %v4384_v35 = vmul.f32 %v4372_v31, %v4372_v31  ;;  %v4392_v62 = vsub.f32 %v11586_v19, %v4372_v31  ;;  %v8604_v19 = vld [vmem:[%s11662_s3] ss:$0 sm:$0xff] }
0x16aa   :  { %v4378_v21 = vpop.xlane.xlu0 %4377 }
0x16ab   :  { %v4382_v63 = vmul.f32 0.03125, %v4378_v21  ;;  %v4385_v9 = vmul.f32 %v4373_v11, %v4373_v11  ;;  %v4393_v57 = vsub.f32 %v11589_v52, %v4373_v11 }
0x16ac   :  { %v4381_v6 = vpop.xlane.xlu1 %4380 }
0x16ad   :  { %v4386_v14 = vsub.f32 %v4382_v63, %v4384_v35  ;;  %v4383_v23 = vmul.f32 0.03125, %v4381_v6 }
0x16af   :  { %v4388_v25 = vadd.f32 1e-05, %v4386_v14  ;;  %v4387_v3 = vsub.f32 %v4383_v23, %v4385_v9 }
0x16b1   :  { %10240 = vrsqrt.f32 %v4388_v25  ;;  %v4389_v28 = vadd.f32 1e-05, %v4387_v3 }
0x16b3   :  { %10242 = vrsqrt.f32 %v4389_v28 }
0x16bb   :  { %v10241_v12 = vpop.eup %10240 }
0x16bc   :  { %v4400_v32 = vmul.f32 %v10241_v12, %v8598_v27 }
0x16bd   :  { %v10243_v53 = vpop.eup %10242 }
0x16be   :  { %v4401_v15 = vmul.f32 %v10243_v53, %v8598_v27  ;;  %v4402_v55 = vmul.f32 %v4400_v32, %v4392_v62 }
0x16c0   :  { %v4403_v26 = vmul.f32 %v4401_v15, %v4393_v57  ;;  %v11650_v41 = vadd.f32 %v8599_v37, %v4402_v55 }
0x16c2   :  { %v11652_v24 = vadd.f32 %v8599_v37, %v4403_v26 }
0x16c4   :  { %v4412_v56 = vpack.c.bf16 %v11652_v24, %v11650_v41 }
0x16c6   :  { %9434 = vmatmul.mubr.msk.bf16.vlgmr.msra.gmra.mrb[116].mxu0 %vm171_vm0, %v4412_v56 }
0x16c7   :  { %9447 = vmatprep.mubr.msk.bf16.mxu0 %vm10371_vm1, %v10370_v7 }
0x1717   :  { %v9443_v52 = vpop.f32.mrb[116].mxu1 }
0x1718   :  { %v4553_v33 = vadd.f32 %v9443_v52, %v8604_v19  ;;  %v4544_v2 = vpop.f32.mrb[117].mxu1 }
0x1719   :  { %v9444_v38 = vpop.f32.mrb[118].mxu1  ;;  %v4545_v54 = vadd.f32 %v8604_v19, %v4544_v2 }
0x171a   :  { %v4547_v10 = vpop.f32.mrb[119].mxu1  ;;  %v4559_v61 = vpack.c.bf16 %v4553_v33, %v4553_v33 }
0x171b   :  { %v4548_v1 = vadd.f32 %v8604_v19, %v4547_v10 }
0x171c   :  { %v5027_v49 = vshrl.u32 %v4559_v61, 16  ;;  %v5030_v29 = vshll.u32 %v4559_v61, 16 }
0x171d   :  { %v11665_v51 = vpack.c.bf16 %v4548_v1, %v4545_v54 }
0x171e   :  { %v5029_v18 = vrot.slane %v5027_v49, 4  ;;  %v5032_v4 = vrot.slane %v5030_v29, 5 }
0x171f   :  { %4675 = vrot.lane.b32.xlu0 %v11665_v51, %s10372_s14  ;;  %v4569_v47 = vsel %vm236_vm3, %v11665_v51, 0  ;;  %v5019_v40 = vshrl.u32 %v11665_v51, 16  ;;  %v5022_v44 = vshll.u32 %v11665_v51, 16 }
0x1720   :  { %9446 = vmatpush3.bf16.xpose.msra.mxu0 %v4569_v47  ;;  %v5033_v5 = vor.u32 %v5032_v4, %v5029_v18 }
0x1721   :  { %9457 = vmatprep.subr.bf16.mxu0 %v10370_v7  ;;  %v5021_v43 = vrot.slane %v5019_v40, 4  ;;  %v5024_v20 = vrot.slane %v5022_v44, 5 }
0x1723   :  { %v5025_v60 = vor.u32 %v5024_v20, %v5021_v43 }
0x1725   :  { %v11694_v39 = vsel %vm763_vm2, %v5025_v60, %v5033_v5 }
0x1726   :  { %v5039_v6 = vsel %vm236_vm3, %v11694_v39, 0 }
0x1791   :  { %v4676_v48 = vpop.permute.xlu0 %4675 }
0x1792   :  { %v4681_v46 = vsel %vm236_vm3, %v4676_v48, 0 }
0x1799   :  { %v4473_v0 = vpop.f32.mrb[116].mxu0 }
0x179a   :  { %v9435_v59 = vpop.f32.mrb[117].mxu0  ;;  %v4474_v17 = vadd.f32 %v8600_v8, %v4473_v0 }
0x179b   :  { %v4476_v36 = vpop.f32.mrb[118].mxu0 }
0x179c   :  { %v4477_v16 = vadd.f32 %v8600_v8, %v4476_v36  ;;  %v9436_v30 = vpop.f32.mrb[119].mxu0 }
0x179e   :  { %v4480_v13 = vpack.c.bf16 %v4477_v16, %v4474_v17 }
0x17a0   :  { %4783 = vrot.lane.b32.xlu0 %v4480_v13, %s10377_s19  ;;  %4673 = vrot.lane.b32.xlu1 %v4480_v13, %s10372_s14  ;;  %v5018_v22 = vrot.slane %v4480_v13, 4 }
0x17a1   :  { %9448 = vmatmul.mubr.msk.bf16.vlgmr.msra.gmra.mrb[120].mxu0 %vm236_vm3, %v4480_v13 }
0x17a2   :  { %9458 = vmatpush3.bf16.xpose.msra.mxu0 %v4681_v46  ;;  %9459 = vmatprep.mubr.msk.bf16.mxu0 %vm10371_vm1, %v10370_v7 }
0x17a3   :  { %9469 = vmatprep.subr.bf16.mxu0 %v10370_v7 }
0x17a4   :  { %4893 = vrot.lane.b32.xlu0 %v4480_v13, %s10378_s20  ;;  %4785 = vrot.lane.b32.xlu1 %v11665_v51, %s10377_s19 }
0x17a8   :  { %4895 = vrot.lane.b32.xlu1 %v11665_v51, %s10378_s20  ;;  %5141 = vrot.lane.b32.xlu0 %v5018_v22, %s10372_s14 }
0x17ac   :  { %5143 = vrot.lane.b32.xlu1 %v11694_v39, %s10372_s14  ;;  %5251 = vrot.lane.b32.xlu0 %v5018_v22, %s10377_s19 }
0x17b0   :  { %5253 = vrot.lane.b32.xlu1 %v11694_v39, %s10377_s19  ;;  %5361 = vrot.lane.b32.xlu0 %v5018_v22, %s10378_s20 }
0x17b4   :  { %5363 = vrot.lane.b32.xlu1 %v11694_v39, %s10378_s20 }
0x1812   :  { %v4674_v58 = vpop.permute.xlu1 %4673  ;;  %v4784_v21 = vpop.permute.xlu0 %4783 }
0x1813   :  { %9460 = vmatmul.mubr.msk.bf16.vlgmr.msra.gmra.mrb[124].mxu0 %vm236_vm3, %v4674_v58 }
0x1814   :  { %9471 = vmatprep.mubr.msk.bf16.mxu0 %vm10371_vm1, %v10370_v7 }
0x1816   :  { %v4786_v31 = vpop.permute.xlu1 %4785  ;;  %v4894_v63 = vpop.permute.xlu0 %4893 }
0x1817   :  { %v4791_v50 = vsel %vm236_vm3, %v4786_v31, 0 }
0x1818   :  { %9470 = vmatpush3.bf16.xpose.msra.mxu0 %v4791_v50 }
0x1819   :  { %9481 = vmatprep.subr.bf16.mxu0 %v10370_v7 }
0x181a   :  { %v4896_v11 = vpop.permute.xlu1 %4895  ;;  %v5142_v25 = vpop.permute.xlu0 %5141 }
0x181b   :  { %v4901_v35 = vsel %vm236_vm3, %v4896_v11, 0 }
0x181e   :  { %v5144_v9 = vpop.permute.xlu1 %5143  ;;  %v5252_v27 = vpop.permute.xlu0 %5251 }
0x181f   :  { %9472 = vmatmul.mubr.msk.bf16.vlgmr.msra.gmra.mrb[128].mxu0 %vm236_vm3, %v4784_v21  ;;  %v5149_v14 = vsel %vm236_vm3, %v5144_v9, 0 }
0x1820   :  { %9482 = vmatpush3.bf16.xpose.msra.mxu0 %v4901_v35  ;;  %9483 = vmatprep.mubr.msk.bf16.mxu0 %vm10371_vm1, %v10370_v7 }
0x1821   :  { %9493 = vmatprep.subr.bf16.mxu0 %v10370_v7 }
0x1822   :  { %v5254_v23 = vpop.permute.xlu1 %5253  ;;  %v5362_v62 = vpop.permute.xlu0 %5361 }
0x1823   :  { %v5259_v3 = vsel %vm236_vm3, %v5254_v23, 0 }
0x1826   :  { %v5364_v28 = vpop.permute.xlu1 %5363 }
0x1827   :  { %9484 = vmatmul.mubr.msk.bf16.vlgmr.msra.gmra.mrb[132].mxu0 %vm236_vm3, %v4894_v63  ;;  %v5369_v12 = vsel %vm236_vm3, %v5364_v28, 0 }
0x1828   :  { %9494 = vmatpush3.bf16.xpose.msra.mxu0 %v5039_v6  ;;  %9495 = vmatprep.mubr.msk.bf16.mxu0 %vm10371_vm1, %v10370_v7 }
0x1829   :  { %9505 = vmatprep.subr.bf16.mxu0 %v10370_v7 }
0x182f   :  { %9496 = vmatmul.mubr.msk.bf16.vlgmr.msra.gmra.mrb[136].mxu0 %vm236_vm3, %v5018_v22 }
0x1830   :  { %9506 = vmatpush3.bf16.xpose.msra.mxu0 %v5149_v14  ;;  %9507 = vmatprep.mubr.msk.bf16.mxu0 %vm10371_vm1, %v10370_v7 }
0x1831   :  { %9517 = vmatprep.subr.bf16.mxu0 %v10370_v7 }
0x1837   :  { %9508 = vmatmul.mubr.msk.bf16.vlgmr.msra.gmra.mrb[140].mxu0 %vm236_vm3, %v5142_v25 }
0x1838   :  { %9518 = vmatpush3.bf16.xpose.msra.mxu0 %v5259_v3  ;;  %9519 = vmatprep.mubr.msk.bf16.mxu0 %vm10371_vm1, %v10370_v7 }
0x1839   :  { %9529 = vmatprep.subr.bf16.mxu0 %v10370_v7 }
0x183f   :  { %9520 = vmatmul.mubr.msk.bf16.vlgmr.msra.gmra.mrb[144].mxu0 %vm236_vm3, %v5252_v27 }
0x1840   :  { %9530 = vmatpush3.bf16.xpose.msra.mxu0 %v5369_v12  ;;  %9531 = vmatprep.mubr.msk.bf16.mxu0 %vm10371_vm1, %v10370_v7 }
0x1841   :  { %9541 = vmatprep.subr.bf16.mxu0 %v10370_v7 }
0x1847   :  { %9532 = vmatmul.mubr.msk.bf16.vlgmr.msra.gmra.mrb[148].mxu0 %vm236_vm3, %v5362_v62 }
0x1848   :  { %9545 = vmatprep.mubr.msk.bf16.mxu0 %vm10371_vm1, %v10370_v7 }
0x1874   :  { %v4605_v32 = vpop.f32.mrb[120].mxu0 }
0x1875   :  { %v9449_v53 = vpop.f32.mrb[121].mxu0  ;;  %v4611_v57 = vsel %vm284_vm6, %v4605_v32, -inf }
0x1876   :  { %4612 = vmax.xlane.f32.xlu1 %v4611_v57  ;;  %v4608_v15 = vpop.f32.mrb[122].mxu0 }
0x1877   :  { %v9450_v55 = vpop.f32.mrb[123].mxu0 }
0x18e6   :  { %v4717_v37 = vpop.f32.mrb[124].mxu0 }
0x18e7   :  { %v9461_v26 = vpop.f32.mrb[125].mxu0  ;;  %v4723_v56 = vsel %vm284_vm6, %v4717_v37, -inf }
0x18e8   :  { %4724 = vmax.xlane.f32.xlu0 %v4723_v56  ;;  %v4720_v19 = vpop.f32.mrb[126].mxu0 }
0x18e9   :  { %v9462_v52 = vpop.f32.mrb[127].mxu0 }
0x18f2   :  { %v4827_v33 = vpop.f32.mrb[128].mxu0 }
0x18f3   :  { %v9473_v2 = vpop.f32.mrb[129].mxu0  ;;  %v4833_v38 = vsel %vm284_vm6, %v4827_v33, -inf }
0x18f4   :  { %4834 = vmax.xlane.f32.xlu0 %v4833_v38  ;;  %v4830_v10 = vpop.f32.mrb[130].mxu0 }
0x18f5   :  { %v9474_v54 = vpop.f32.mrb[131].mxu0 }
0x18fa   :  { %v4937_v1 = vpop.f32.mrb[132].mxu0 }
0x18fb   :  { %v9485_v47 = vpop.f32.mrb[133].mxu0  ;;  %v4943_v8 = vsel %vm284_vm6, %v4937_v1, -inf }
0x18fc   :  { %4944 = vmax.xlane.f32.xlu1 %v4943_v8  ;;  %v4940_v0 = vpop.f32.mrb[134].mxu0 }
0x18fd   :  { %v9486_v59 = vpop.f32.mrb[135].mxu0 }
0x1902   :  { %v5075_v36 = vpop.f32.mrb[136].mxu0 }
0x1903   :  { %v4613_v17 = vpop.xlane.xlu1 %4612  ;;  %v9497_v16 = vpop.f32.mrb[137].mxu0  ;;  %v5081_v30 = vsel %vm284_vm6, %v5075_v36, -inf }
0x1904   :  { %v4614_v61 = vsub.f32 %v4605_v32, %v4613_v17  ;;  %5082 = vmax.xlane.f32.xlu0 %v5081_v30  ;;  %v5078_v48 = vpop.f32.mrb[138].mxu0 }
0x1905   :  { %v9498_v13 = vpop.f32.mrb[139].mxu0 }
0x1906   :  { %v4615_v40 = vmul.f32 1.442695, %v4614_v61 }
0x1908   :  { %10244 = vpow2.f32 %v4615_v40 }
0x190a   :  { %v11743_v44 = vpop.f32.mrb[140].mxu0 }
0x190b   :  { %v9509_v49 = vpop.f32.mrb[141].mxu0  ;;  %v5191_v29 = vsel %vm284_vm6, %v11743_v44, -inf }
0x190c   :  { %5192 = vmax.xlane.f32.xlu1 %v5191_v29  ;;  %v5188_v46 = vpop.f32.mrb[142].mxu0 }
0x190d   :  { %v9510_v43 = vpop.f32.mrb[143].mxu0 }
0x1912   :  { %v11747_v20 = vpop.f32.mrb[144].mxu0  ;;  %v10245_v22 = vpop.eup %10244 }
0x1913   :  { %v9521_v18 = vpop.f32.mrb[145].mxu0  ;;  %v5301_v4 = vsel %vm284_vm6, %v11747_v20, -inf  ;;  %v4617_v58 = vsel %vm284_vm6, %v10245_v22, 0.0 }
0x1914   :  { %5302 = vmax.xlane.f32.xlu0 %v5301_v4  ;;  %v5298_v60 = vpop.f32.mrb[146].mxu0 }
0x1915   :  { %v9522_v5 = vpop.f32.mrb[147].mxu0 }
0x1918   :  { %4618 = vadd.xlane.f32.xlu0 %v4617_v58 }
0x191a   :  { %v11752_v31 = vpop.f32.mrb[148].mxu0 }
0x191b   :  { %v9533_v50 = vpop.f32.mrb[149].mxu0  ;;  %v5411_v11 = vsel %vm284_vm6, %v11752_v31, -inf }
0x191c   :  { %5412 = vmax.xlane.f32.xlu1 %v5411_v11  ;;  %v5408_v21 = vpop.f32.mrb[150].mxu0 }
0x191d   :  { %v9534_v35 = vpop.f32.mrb[151].mxu0 }
0x192d   :  { %4624 = vrot.lane.b32.xlu1 %v11665_v51, %s10373_s15 }
0x192e   :  { %4735 = vrot.lane.b32.xlu0 %v11665_v51, %s10375_s17 }
0x1932   :  { %4845 = vrot.lane.b32.xlu0 %v11665_v51, %s10374_s16 }
0x1975   :  { %v4725_v63 = vpop.xlane.xlu0 %4724 }
0x1976   :  { %v4726_v6 = vsub.f32 %v4717_v37, %v4725_v63 }
0x1978   :  { %v4727_v9 = vmul.f32 1.442695, %v4726_v6 }
0x197a   :  { %10246 = vpow2.f32 %v4727_v9 }
0x1981   :  { %v4835_v14 = vpop.xlane.xlu0 %4834 }
0x1982   :  { %v4836_v23 = vsub.f32 %v4827_v33, %v4835_v14 }
0x1984   :  { %v11762_v25 = vpop.eup %10246  ;;  %v4837_v3 = vmul.f32 1.442695, %v4836_v23 }
0x1985   :  { %v4729_v28 = vsel %vm284_vm6, %v11762_v25, 0.0 }
0x1986   :  { %10248 = vpow2.f32 %v4837_v3  ;;  %4730 = vadd.xlane.f32.xlu1 %v4729_v28 }
0x1989   :  { %v4945_v27 = vpop.xlane.xlu1 %4944 }
0x198a   :  { %v4946_v12 = vsub.f32 %v4937_v1, %v4945_v27 }
0x198c   :  { %v4947_v62 = vmul.f32 1.442695, %v4946_v12 }
0x198e   :  { %10250 = vpow2.f32 %v4947_v62 }
0x1990   :  { %v11766_v32 = vpop.eup %10248 }
0x1991   :  { %v5083_v53 = vpop.xlane.xlu0 %5082  ;;  %v4839_v57 = vsel %vm284_vm6, %v11766_v32, 0.0 }
0x1992   :  { %v5084_v15 = vsub.f32 %v5075_v36, %v5083_v53  ;;  %4840 = vadd.xlane.f32.xlu0 %v4839_v57 }
0x1994   :  { %v5085_v55 = vmul.f32 1.442695, %v5084_v15 }
0x1996   :  { %10252 = vpow2.f32 %v5085_v55 }
0x1998   :  { %v11770_v37 = vpop.eup %10250 }
0x1999   :  { %v4949_v26 = vsel %vm284_vm6, %v11770_v37, 0.0  ;;  %v5193_v33 = vpop.xlane.xlu1 %5192 }
0x199a   :  { %4950 = vadd.xlane.f32.xlu0 %v4949_v26  ;;  %v5194_v36 = vsub.f32 %v11743_v44, %v5193_v33 }
0x199c   :  { %v5195_v17 = vmul.f32 1.442695, %v5194_v36 }
0x19a0   :  { %v11774_v56 = vpop.eup %10252 }
0x19a1   :  { %v5303_v19 = vpop.xlane.xlu0 %5302  ;;  %v5087_v52 = vsel %vm284_vm6, %v11774_v56, 0.0 }
0x19a2   :  { %5088 = vadd.xlane.f32.xlu1 %v5087_v52  ;;  %v5304_v16 = vsub.f32 %v11747_v20, %v5303_v19 }
0x19a4   :  { %v5305_v30 = vmul.f32 1.442695, %v5304_v16 }
0x19a5   :  { %v4619_v2 = vpop.xlane.xlu0 %4618 }
0x19a6   :  { %10254 = vrcp.f32 %v4619_v2 }
0x19a7   :  { %10256 = vpow2.f32 %v5195_v17 }
0x19a8   :  { %10258 = vpow2.f32 %v5305_v30 }
0x19a9   :  { %v5413_v38 = vpop.xlane.xlu1 %5412  ;;  %v4736_v47 = vpop.permute.xlu0 %4735 }
0x19aa   :  { %v4741_v59 = vand.u32 %v4736_v47, %v10502_v45 }
0x19ad   :  { %v4625_v10 = vpop.permute.xlu1 %4624  ;;  %v4846_v43 = vpop.permute.xlu0 %4845 }
0x19ae   :  { %v4630_v54 = vand.u32 %v4625_v10, %v10502_v45  ;;  %v4851_v60 = vand.u32 %v4846_v43, %v10502_v45 }
0x19b0   :  { %5093 = vrot.lane.b32.xlu0 %v11694_v39, %s10373_s15  ;;  %9452 = vmatpush3.bf16.msra.mxu1 %v4630_v54  ;;  %v10255_v1 = vpop.eup %10254 }
0x19b1   :  { %9463 = vmatprep.subr.bf16.mxu1 %v10370_v7  ;;  %v4621_v8 = vmul.f32 %v10255_v1, %v10245_v22  ;;  %v11792_v48 = vpop.eup %10256 }
0x19b2   :  { %v5197_v13 = vsel %vm284_vm6, %v11792_v48, 0.0  ;;  %v11796_v40 = vpop.eup %10258 }
0x19b3   :  { %4955 = vrot.lane.b32.xlu1 %v11665_v51, %s10376_s18  ;;  %v4622_v0 = vpack.c.bf16 %v4621_v8, %v4621_v8  ;;  %v5414_v51 = vsub.f32 %v11752_v31, %v5413_v38  ;;  %v5307_v44 = vsel %vm284_vm6, %v11796_v40, 0.0 }
0x19b5   :  { %9454 = vmatmul.mubr.msk.bf16.vlgmr.msra.gmra.mrb[120].mxu1 %vm284_vm6, %v4622_v0  ;;  %v5415_v61 = vmul.f32 1.442695, %v5414_v51 }
0x19b6   :  { %9464 = vmatpush3.bf16.msra.mxu1 %v4741_v59  ;;  %9465 = vmatprep.mubr.msk.bf16.mxu1 %vm10371_vm1, %v10370_v7 }
0x19b7   :  { %9475 = vmatprep.subr.bf16.mxu1 %v10370_v7  ;;  %10260 = vpow2.f32 %v5415_v61 }
0x19c1   :  { %v11800_v49 = vpop.eup %10260 }
0x19c2   :  { %v5417_v29 = vsel %vm284_vm6, %v11800_v49, 0.0 }
0x19cf   :  { %5198 = vadd.xlane.f32.xlu0 %v5197_v13 }
0x19d3   :  { %5308 = vadd.xlane.f32.xlu0 %v5307_v44 }
0x19d7   :  { %5418 = vadd.xlane.f32.xlu1 %v5417_v29 }
0x19e9   :  { %5203 = vrot.lane.b32.xlu0 %v11694_v39, %s10375_s17 }
0x19ed   :  { %5313 = vrot.lane.b32.xlu0 %v11694_v39, %s10374_s16 }
0x19f1   :  { %5423 = vrot.lane.b32.xlu0 %v11694_v39, %s10376_s18 }
0x1a13   :  { %v4731_v46 = vpop.xlane.xlu1 %4730 }
0x1a14   :  { %10262 = vrcp.f32 %v4731_v46 }
0x1a1e   :  { %v10263_v20 = vpop.eup %10262 }
0x1a1f   :  { %v4841_v18 = vpop.xlane.xlu0 %4840  ;;  %v4733_v4 = vmul.f32 %v10263_v20, %v11762_v25 }
0x1a20   :  { %10264 = vrcp.f32 %v4841_v18 }
0x1a21   :  { %v4734_v22 = vpack.c.bf16 %v4733_v4, %v4733_v4 }
0x1a23   :  { %9466 = vmatmul.mubr.msk.bf16.vlgmr.msra.gmra.mrb[124].mxu1 %vm284_vm6, %v4734_v22 }
0x1a24   :  { %9476 = vmatpush3.bf16.msra.mxu1 %v4851_v60  ;;  %9477 = vmatprep.mubr.msk.bf16.mxu1 %vm10371_vm1, %v10370_v7 }
0x1a25   :  { %9487 = vmatprep.subr.bf16.mxu1 %v10370_v7 }
0x1a27   :  { %v4951_v39 = vpop.xlane.xlu0 %4950 }
0x1a28   :  { %10266 = vrcp.f32 %v4951_v39  ;;  %v10024_v39 = vld [vmem:[%s11853_s24] sm:$0xff]  }
0x1a29   :  { %9542 = vmatpush3.bf16.msra.mxu0 %v10024_v39 }
0x1a2a   :  { %v10265_v5 = vpop.eup %10264  ;;  %9543 = vmatprep.subr.bf16.mxu0 %v10370_v7 }
0x1a2b   :  { %v4843_v58 = vmul.f32 %v10265_v5, %v11766_v32  ;;  %v5094_v6 = vpop.permute.xlu0 %5093 }
0x1a2c   :  { %v5099_v14 = vand.u32 %v5094_v6, %v10502_v45 }
0x1a2d   :  { %v4844_v31 = vpack.c.bf16 %v4843_v58, %v4843_v58  ;;  %v10025_v58 = vld [vmem:[%s11853_s24 + $0x8] sm:$0xff]  }
0x1a2e   :  { %9544 = vmatpush3.bf16.msra.mxu0 %v10025_v58 }
0x1a2f   :  { %9478 = vmatmul.mubr.msk.bf16.vlgmr.msra.gmra.mrb[128].mxu1 %vm284_vm6, %v4844_v31  ;;  %v5089_v50 = vpop.xlane.xlu1 %5088  ;;  %9557 = vmatprep.subr.bf16.mxu0 %v10370_v7 }
0x1a30   :  { %10268 = vrcp.f32 %v5089_v50  ;;  %9489 = vmatprep.mubr.msk.bf16.mxu1 %vm10371_vm1, %v10370_v7 }
0x1a32   :  { %v10267_v11 = vpop.eup %10266 }
0x1a33   :  { %v4956_v21 = vpop.permute.xlu1 %4955  ;;  %v4953_v35 = vmul.f32 %v10267_v11, %v11770_v37 }
0x1a34   :  { %v4961_v63 = vand.u32 %v4956_v21, %v10502_v45 }
0x1a35   :  { %v4954_v9 = vpack.c.bf16 %v4953_v35, %v4953_v35 }
0x1a36   :  { %9488 = vmatpush3.bf16.msra.mxu1 %v4961_v63 }
0x1a37   :  { %9499 = vmatprep.subr.bf16.mxu1 %v10370_v7 }
0x1a39   :  { %9490 = vmatmul.mubr.msk.bf16.vlgmr.msra.gmra.mrb[132].mxu1 %vm284_vm6, %v4954_v9 }
0x1a3a   :  { %v10269_v23 = vpop.eup %10268  ;;  %9500 = vmatpush3.bf16.msra.mxu1 %v5099_v14  ;;  %9501 = vmatprep.mubr.msk.bf16.mxu1 %vm10371_vm1, %v10370_v7 }
0x1a3b   :  { %v5091_v25 = vmul.f32 %v10269_v23, %v11774_v56  ;;  %9511 = vmatprep.subr.bf16.mxu1 %v10370_v7 }
0x1a3d   :  { %v5092_v3 = vpack.c.bf16 %v5091_v25, %v5091_v25 }
0x1a41   :  { %9502 = vmatmul.mubr.msk.bf16.vlgmr.msra.gmra.mrb[136].mxu1 %vm284_vm6, %v5092_v3 }
0x1a42   :  { %9513 = vmatprep.mubr.msk.bf16.mxu1 %vm10371_vm1, %v10370_v7 }
0x1a5c   :  { %v5199_v28 = vpop.xlane.xlu0 %5198 }
0x1a5d   :  { %10270 = vrcp.f32 %v5199_v28 }
0x1a60   :  { %v5309_v27 = vpop.xlane.xlu0 %5308 }
0x1a61   :  { %10272 = vrcp.f32 %v5309_v27 }
0x1a64   :  { %v5204_v12 = vpop.permute.xlu0 %5203  ;;  %v5419_v32 = vpop.xlane.xlu1 %5418 }
0x1a65   :  { %v5209_v62 = vand.u32 %v5204_v12, %v10502_v45  ;;  %10274 = vrcp.f32 %v5419_v32 }
0x1a67   :  { %v10271_v53 = vpop.eup %10270  ;;  %9512 = vmatpush3.bf16.msra.mxu1 %v5209_v62 }
0x1a68   :  { %v5314_v57 = vpop.permute.xlu0 %5313  ;;  %9523 = vmatprep.subr.bf16.mxu1 %v10370_v7  ;;  %v5201_v15 = vmul.f32 %v10271_v53, %v11792_v48 }
0x1a69   :  { %v5319_v55 = vand.u32 %v5314_v57, %v10502_v45 }
0x1a6a   :  { %v5202_v37 = vpack.c.bf16 %v5201_v15, %v5201_v15 }
0x1a6b   :  { %v10273_v26 = vpop.eup %10272 }
0x1a6c   :  { %9514 = vmatmul.mubr.msk.bf16.vlgmr.msra.gmra.mrb[140].mxu1 %vm284_vm6, %v5202_v37  ;;  %v5311_v56 = vmul.f32 %v10273_v26, %v11796_v40  ;;  %v5424_v19 = vpop.permute.xlu0 %5423 }
0x1a6d   :  { %9524 = vmatpush3.bf16.msra.mxu1 %v5319_v55  ;;  %9525 = vmatprep.mubr.msk.bf16.mxu1 %vm10371_vm1, %v10370_v7  ;;  %v5429_v2 = vand.u32 %v5424_v19, %v10502_v45 }
0x1a6e   :  { %9535 = vmatprep.subr.bf16.mxu1 %v10370_v7  ;;  %v5312_v52 = vpack.c.bf16 %v5311_v56, %v5311_v56 }
0x1a6f   :  { %v10275_v33 = vpop.eup %10274 }
0x1a70   :  { %v5421_v38 = vmul.f32 %v10275_v33, %v11800_v49 }
0x1a72   :  { %v5422_v10 = vpack.c.bf16 %v5421_v38, %v5421_v38 }
0x1a74   :  { %9526 = vmatmul.mubr.msk.bf16.vlgmr.msra.gmra.mrb[144].mxu1 %vm284_vm6, %v5312_v52 }
0x1a75   :  { %9536 = vmatpush3.bf16.msra.mxu1 %v5429_v2  ;;  %9537 = vmatprep.mubr.msk.bf16.mxu1 %vm10371_vm1, %v10370_v7 }
0x1a76   :  { %9549 = vmatprep.subr.bf16.mxu1 %v10370_v7 }
0x1a7c   :  { %9538 = vmatmul.mubr.msk.bf16.vlgmr.msra.gmra.mrb[148].mxu1 %vm284_vm6, %v5422_v10 }
0x1a7d   :  { %9553 = vmatprep.mubr.msk.bf16.mxu1 %vm10371_vm1, %v10370_v7 }
0x1a88   :  { %v4666_v54 = vpop.f32.mrb[120].mxu1 }
0x1a89   :  { %v9455_v1 = vpop.f32.mrb[121].mxu1 }
0x1a8a   :  { %v4669_v47 = vpop.f32.mrb[122].mxu1 }
0x1a8b   :  { %v9456_v8 = vpop.f32.mrb[123].mxu1 }
0x1af6   :  { %v4777_v0 = vpop.f32.mrb[124].mxu1 }
0x1af7   :  { %v9467_v59 = vpop.f32.mrb[125].mxu1 }
0x1af8   :  { %v4780_v36 = vpop.f32.mrb[126].mxu1 }
0x1af9   :  { %v9468_v17 = vpop.f32.mrb[127].mxu1 }
0x1b02   :  { %v4887_v16 = vpop.f32.mrb[128].mxu1 }
0x1b03   :  { %v9479_v30 = vpop.f32.mrb[129].mxu1 }
0x1b04   :  { %v4890_v51 = vpop.f32.mrb[130].mxu1 }
0x1b05   :  { %v9480_v61 = vpop.f32.mrb[131].mxu1 }
0x1b0c   :  { %v4997_v48 = vpop.f32.mrb[132].mxu1 }
0x1b0d   :  { %v9491_v13 = vpop.f32.mrb[133].mxu1 }
0x1b0e   :  { %v5000_v40 = vpop.f32.mrb[134].mxu1 }
0x1b0f   :  { %v9492_v44 = vpop.f32.mrb[135].mxu1 }
0x1b14   :  { %v5135_v49 = vpop.f32.mrb[136].mxu1 }
0x1b15   :  { %v9503_v29 = vpop.f32.mrb[137].mxu1 }
0x1b16   :  { %v5138_v46 = vpop.f32.mrb[138].mxu1 }
0x1b17   :  { %v9504_v43 = vpop.f32.mrb[139].mxu1 }
0x1b3f   :  { %v5245_v20 = vpop.f32.mrb[140].mxu1 }
0x1b40   :  { %v9951_v18 = vpack.i.bf16 %v5245_v20, %v4777_v0  ;;  %v9515_v4 = vpop.f32.mrb[141].mxu1 }
0x1b41   :  { %v5248_v22 = vpop.f32.mrb[142].mxu1 }
0x1b42   :  { %9952 = vrot.lane.b32.xlu0 %v9951_v18, %s12422_s25  ;;  %v9516_v60 = vpop.f32.mrb[143].mxu1  ;;  %s10409_s25 = smov 27  }
0x1b43   :  { %s11895_s23 = sld [smem:[%s12415_s0 + %s10409_s25]]   ;;  %s12433_s25 = smov 40  }
0x1b47   :  { %v5355_v5 = vpop.f32.mrb[144].mxu1 }
0x1b48   :  { %v9956_v31 = vpack.i.bf16 %v5355_v5, %v4887_v16  ;;  %v9527_v50 = vpop.f32.mrb[145].mxu1  ;;  %v8629_v5 = vld [vmem:[%s11638_s9 + $0x1] ss:$0 sm:$0xff] }
0x1b49   :  { %v5358_v11 = vpop.f32.mrb[146].mxu1  ;;  %v10028_v51 = vld [vmem:[%s11895_s23] sm:$0xff]   ;;  %v10029_v61 = vld [vmem:[%s11895_s23 + $0x8] sm:$0xff]  }
0x1b4a   :  { %9957 = vrot.lane.b32.xlu0 %v9956_v31, %s12420_s26  ;;  %v9528_v21 = vpop.f32.mrb[147].mxu1 }
0x1b4f   :  { %v5465_v35 = vpop.f32.mrb[148].mxu1 }
0x1b50   :  { %v9961_v63 = vpack.i.bf16 %v5465_v35, %v4997_v48  ;;  %v9539_v6 = vpop.f32.mrb[149].mxu1 }
0x1b51   :  { %v5468_v9 = vpop.f32.mrb[150].mxu1  ;;  %v8630_v6 = vld [vmem:[%s11644_s29 + $0x1] ss:$0 sm:$0xff] }
0x1b52   :  { %9962 = vrot.lane.b32.xlu1 %v9961_v63, %s12418_s1  ;;  %v9540_v14 = vpop.f32.mrb[151].mxu1  ;;  %s11874_s1 = sld [smem:[%s12415_s0 + %s10407_s7]]   ;;  %s10408_s7 = smov 25  }
0x1b53   :  { %s11886_s26 = sld [smem:[%s12415_s0 + %s10408_s7]]  }
0x1b54   :  { %s11913_s7 = sld [smem:[%s12415_s0 + %s10410_s21]]   ;;  %s12436_s21 = smov 24  }
0x1b58   :  { %v8625_v52 = vld [vmem:[%s11874_s1] ss:$0 sm:$0xff] }
0x1bb4   :  { %v9953_v23 = vpop.permute.xlu0 %9952 }
0x1bb5   :  { %v9955_v3 = vunpack.i.h.bf16 %v9953_v23  ;;  %v9954_v28 = vunpack.i.l.bf16 %v9953_v23 }
0x1bb7   :  { %v5483_v32 = vsel %vm236_vm3, %v5135_v49, %v9955_v3  ;;  %v5015_v53 = vsel %vm236_vm3, %v4666_v54, %v9954_v28  ;;  %v10030_v3 = vld [vmem:[%s11895_s23 + $0x10] sm:$0xff]   ;;  %v10031_v28 = vld [vmem:[%s11895_s23 + $0x18] sm:$0xff]  }
0x1bbc   :  { %v9958_v25 = vpop.permute.xlu0 %9957 }
0x1bbd   :  { %v9960_v27 = vunpack.i.h.bf16 %v9958_v25  ;;  %v9959_v12 = vunpack.i.l.bf16 %v9958_v25 }
0x1bbf   :  { %v5484_v55 = vsel %vm757_vm8, %v5483_v32, %v9960_v27  ;;  %v5016_v37 = vsel %vm757_vm8, %v5015_v53, %v9959_v12  ;;  %v8631_v27 = vld [vmem:[%s11913_s7] ss:$0 sm:$0xff] }
0x1bc4   :  { %v9963_v62 = vpop.permute.xlu1 %9962 }
0x1bc5   :  { %v9965_v57 = vunpack.i.h.bf16 %v9963_v62  ;;  %v9964_v15 = vunpack.i.l.bf16 %v9963_v62 }
0x1bc7   :  { %v5485_v26 = vsel %vm760_vm9, %v5484_v55, %v9965_v57  ;;  %v5017_v56 = vsel %vm760_vm9, %v5016_v37, %v9964_v15 }
0x1bc8   :  { %v5486_v19 = vpack.c.bf16 %v5485_v26, %v5017_v56  ;;  %v8635_v56 = vld [vmem:[%s11922_s22] ss:$0 sm:$0xff] }
0x1bca   :  { %9546 = vmatmul.mubr.msk.bf16.vlgmr.msra.gmra.mrb[152].mxu0 %vm171_vm0, %v5486_v19 }
0x1bcb   :  { %9565 = vmatprep.mubr.msk.bf16.mxu0 %vm10371_vm1, %v10370_v7  ;;  %9558 = vmatpush3.bf16.msra.mxu0 %v10028_v51 }
0x1bcc   :  { %9559 = vmatprep.subr.bf16.mxu0 %v10370_v7 }
0x1bcf   :  { %9560 = vmatpush3.bf16.msra.mxu0 %v10029_v61 }
0x1bd0   :  { %9561 = vmatprep.subr.bf16.mxu0 %v10370_v7 }
0x1bd3   :  { %9562 = vmatpush3.bf16.msra.mxu0 %v10030_v3 }
0x1bd4   :  { %9563 = vmatprep.subr.bf16.mxu0 %v10370_v7 }
0x1bd7   :  { %9564 = vmatpush3.bf16.msra.mxu0 %v10031_v28 }
0x1bd8   :  { %9583 = vmatprep.subr.bf16.mxu0 %v10370_v7 }
0x1c9d   :  { %v5542_v33 = vpop.f32.mrb[152].mxu0 }
0x1c9e   :  { %v5543_v2 = vadd.f32 %v8625_v52, %v5542_v33  ;;  %v9547_v38 = vpop.f32.mrb[153].mxu0 }
0x1c9f   :  { %v5545_v10 = vpop.f32.mrb[154].mxu0 }
0x1ca0   :  { %v5549_v54 = vadd.f32 %v5543_v2, %v11650_v41  ;;  %v5546_v1 = vadd.f32 %v8625_v52, %v5545_v10  ;;  %v9548_v47 = vpop.f32.mrb[155].mxu0  ;;  %v10026_v41 = vld [vmem:[%s11886_s26] sm:$0xff]  }
0x1ca1   :  { %9550 = vmatpush3.bf16.msra.mxu1 %v10026_v41 }
0x1ca2   :  { %v5550_v8 = vadd.f32 %v5546_v1, %v11652_v24  ;;  %v5551_v0 = vsel %vm171_vm0, %v5549_v54, 0.0  ;;  %v5559_v59 = vmul.f32 %v5549_v54, %v5549_v54  ;;  %v10027_v24 = vld [vmem:[%s11886_s26 + $0x8] sm:$0xff]   ;;  %9551 = vmatprep.subr.bf16.mxu1 %v10370_v7 }
0x1ca3   :  { %5552 = vadd.xlane.f32.xlu0 %v5551_v0 }
0x1ca4   :  { %v5554_v36 = vsel %vm171_vm0, %v5550_v8, 0.0  ;;  %v5561_v17 = vsel %vm171_vm0, %v5559_v59, 0.0  ;;  %v5560_v16 = vmul.f32 %v5550_v8, %v5550_v8 }
0x1ca5   :  { %5555 = vadd.xlane.f32.xlu1 %v5554_v36  ;;  %9552 = vmatpush3.bf16.msra.mxu1 %v10027_v24 }
0x1ca6   :  { %v5564_v30 = vsel %vm171_vm0, %v5560_v16, 0.0  ;;  %9569 = vmatprep.subr.bf16.mxu1 %v10370_v7  ;;  %v10032_v16 = vld [vmem:[%s11246_s5 + $0x10] sm:$0xff]  }
0x1ca7   :  { %5562 = vadd.xlane.f32.xlu0 %v5561_v17 }
0x1cab   :  { %5565 = vadd.xlane.f32.xlu0 %v5564_v30  ;;  %v10033_v30 = vld [vmem:[%s11246_s5 + $0x18] sm:$0xff]   ;;  %s12430_s5 = smov 56  }
0x1d30   :  { %v5553_v48 = vpop.xlane.xlu0 %5552 }
0x1d31   :  { %v5557_v13 = vmul.f32 0.03125, %v5553_v48 }
0x1d32   :  { %v5556_v40 = vpop.xlane.xlu1 %5555 }
0x1d33   :  { %v5569_v49 = vmul.f32 %v5557_v13, %v5557_v13  ;;  %v5558_v29 = vmul.f32 0.03125, %v5556_v40  ;;  %v5577_v50 = vsub.f32 %v5549_v54, %v5557_v13 }
0x1d34   :  { %v5563_v44 = vpop.xlane.xlu0 %5562 }
0x1d35   :  { %v5567_v46 = vmul.f32 0.03125, %v5563_v44  ;;  %v5570_v18 = vmul.f32 %v5558_v29, %v5558_v29  ;;  %v5578_v21 = vsub.f32 %v5550_v8, %v5558_v29 }
0x1d37   :  { %v5571_v43 = vsub.f32 %v5567_v46, %v5569_v49 }
0x1d38   :  { %v5566_v20 = vpop.xlane.xlu0 %5565 }
0x1d39   :  { %v5573_v4 = vadd.f32 1e-05, %v5571_v43  ;;  %v5568_v22 = vmul.f32 0.03125, %v5566_v20 }
0x1d3b   :  { %10276 = vrsqrt.f32 %v5573_v4  ;;  %v5572_v60 = vsub.f32 %v5568_v22, %v5570_v18  ;;  %v8641_v4 = vld [vmem:[%s11638_s9 + $0x2] ss:$0 sm:$0xff] }
0x1d3d   :  { %v5574_v39 = vadd.f32 1e-05, %v5572_v60 }
0x1d3f   :  { %10278 = vrsqrt.f32 %v5574_v39 }
0x1d45   :  { %v10277_v58 = vpop.eup %10276 }
0x1d46   :  { %v5585_v31 = vmul.f32 %v10277_v58, %v8629_v5 }
0x1d48   :  { %v5587_v63 = vmul.f32 %v5585_v31, %v5577_v50 }
0x1d49   :  { %v10279_v11 = vpop.eup %10278 }
0x1d4a   :  { %v5586_v35 = vmul.f32 %v10279_v11, %v8629_v5  ;;  %v5595_v14 = vadd.f32 %v8630_v6, %v5587_v63  ;;  %v8642_v11 = vld [vmem:[%s11644_s29 + $0x2] ss:$0 sm:$0xff] }
0x1d4c   :  { %v5588_v9 = vmul.f32 %v5586_v35, %v5578_v21 }
0x1d4e   :  { %v5596_v23 = vadd.f32 %v8630_v6, %v5588_v9  ;;  %v8654_v9 = vld [vmem:[%s11293_s6 + $0x1] ss:$0 sm:$0xff]  ;;  %s12431_s6 = smov 64  }
0x1d50   :  { %v5597_v25 = vpack.c.bf16 %v5596_v23, %v5595_v14 }
0x1d52   :  { %9554 = vmatmul.mubr.msk.bf16.vlgmr.msra.gmra.mrb[152].mxu1 %vm171_vm0, %v5597_v25 }
0x1d53   :  { %9573 = vmatprep.mubr.msk.bf16.mxu1 %vm10371_vm1, %v10370_v7  ;;  %9570 = vmatpush3.bf16.msra.mxu1 %v10032_v16 }
0x1d54   :  { %9571 = vmatprep.subr.bf16.mxu1 %v10370_v7 }
0x1d57   :  { %9572 = vmatpush3.bf16.msra.mxu1 %v10033_v30  ;;  %v10367_v30 = vld [vmem:[%s11384_s30] sm:$0xff]  ;;  %s12432_s30 = smov 48  }
0x1d58   :  { %9577 = vmatprep.subr.bf16.mxu1 %v10370_v7 }
0x1e25   :  { %v5658_v12 = vpop.f32.mrb[152].mxu1 }
0x1e26   :  { %v5659_v62 = vadd.f32 %v8631_v27, %v5658_v12  ;;  %v9555_v32 = vpop.f32.mrb[153].mxu1 }
0x1e27   :  { %v5661_v53 = vpop.f32.mrb[154].mxu1 }
0x1e28   :  { %v5662_v57 = vadd.f32 %v8631_v27, %v5661_v53  ;;  %v9556_v15 = vpop.f32.mrb[155].mxu1  ;;  %v5665_v55 = vmax.f32 %v5659_v62, 0.0 }
0x1e2a   :  { %v5666_v37 = vmax.f32 %v5662_v57, 0.0 }
0x1e2c   :  { %v5667_v26 = vpack.c.bf16 %v5666_v37, %v5665_v55 }
0x1e2e   :  { %9566 = vmatmul.mubr.msk.bf16.vlgmr.msra.gmra.mrb[156].mxu0 %vm1574_vm12, %v5667_v26 }
0x1e2f   :  { %9585 = vmatprep.mubr.msk.bf16.mxu0 %vm10371_vm1, %v10370_v7 }
0x1f01   :  { %v5744_v19 = vpop.f32.mrb[156].mxu0 }
0x1f02   :  { %v5745_v52 = vadd.f32 %v8635_v56, %v5744_v19  ;;  %v9567_v33 = vpop.f32.mrb[157].mxu0 }
0x1f03   :  { %v5747_v2 = vpop.f32.mrb[158].mxu0 }
0x1f04   :  { %v5751_v38 = vadd.f32 %v5745_v52, %v5595_v14  ;;  %v5748_v10 = vadd.f32 %v8635_v56, %v5747_v2  ;;  %v9568_v54 = vpop.f32.mrb[159].mxu0 }
0x1f06   :  { %v5752_v1 = vadd.f32 %v5748_v10, %v5596_v23  ;;  %v5753_v47 = vsel %vm171_vm0, %v5751_v38, 0.0  ;;  %v5761_v36 = vmul.f32 %v5751_v38, %v5751_v38 }
0x1f07   :  { %5754 = vadd.xlane.f32.xlu0 %v5753_v47 }
0x1f08   :  { %v5762_v8 = vmul.f32 %v5752_v1, %v5752_v1  ;;  %v5756_v59 = vsel %vm171_vm0, %v5752_v1, 0.0  ;;  %v5763_v17 = vsel %vm171_vm0, %v5761_v36, 0.0 }
0x1f0a   :  { %v5766_v0 = vsel %vm171_vm0, %v5762_v8, 0.0 }
0x1f0b   :  { %5767 = vadd.xlane.f32.xlu1 %v5766_v0  ;;  %5757 = vadd.xlane.f32.xlu0 %v5756_v59 }
0x1f0f   :  { %5764 = vadd.xlane.f32.xlu0 %v5763_v17 }
0x1f94   :  { %v5755_v41 = vpop.xlane.xlu0 %5754 }
0x1f95   :  { %v5759_v61 = vmul.f32 0.03125, %v5755_v41 }
0x1f97   :  { %v5771_v49 = vmul.f32 %v5759_v61, %v5759_v61  ;;  %v5779_v58 = vsub.f32 %v5751_v38, %v5759_v61 }
0x1f98   :  { %v5768_v24 = vpop.xlane.xlu1 %5767  ;;  %v5758_v51 = vpop.xlane.xlu0 %5757 }
0x1f99   :  { %v5760_v48 = vmul.f32 0.03125, %v5758_v51  ;;  %v5770_v13 = vmul.f32 0.03125, %v5768_v24 }
0x1f9b   :  { %v5772_v40 = vmul.f32 %v5760_v48, %v5760_v48  ;;  %v5780_v60 = vsub.f32 %v5752_v1, %v5760_v48 }
0x1f9c   :  { %v5765_v44 = vpop.xlane.xlu0 %5764 }
0x1f9d   :  { %v5774_v29 = vsub.f32 %v5770_v13, %v5772_v40  ;;  %v5769_v46 = vmul.f32 0.03125, %v5765_v44 }
0x1f9f   :  { %v5776_v43 = vadd.f32 1e-05, %v5774_v29  ;;  %v5773_v20 = vsub.f32 %v5769_v46, %v5771_v49 }
0x1fa1   :  { %10280 = vrsqrt.f32 %v5776_v43  ;;  %v5775_v18 = vadd.f32 1e-05, %v5773_v20 }
0x1fa3   :  { %10282 = vrsqrt.f32 %v5775_v18 }
0x1fab   :  { %v10281_v22 = vpop.eup %10280 }
0x1fac   :  { %v5788_v39 = vmul.f32 %v10281_v22, %v8641_v4 }
0x1fad   :  { %v10283_v5 = vpop.eup %10282 }
0x1fae   :  { %v5790_v31 = vmul.f32 %v5788_v39, %v5780_v60  ;;  %v5787_v50 = vmul.f32 %v10283_v5, %v8641_v4 }
0x1fb0   :  { %v5789_v21 = vmul.f32 %v5787_v50, %v5779_v58  ;;  %v11935_v35 = vadd.f32 %v8642_v11, %v5790_v31 }
0x1fb2   :  { %v11937_v63 = vadd.f32 %v8642_v11, %v5789_v21 }
0x1fb4   :  { %v5807_v6 = vpack.c.bf16 %v11935_v35, %v11937_v63 }
0x1fb6   :  { %9574 = vmatmul.mubr.msk.bf16.vlgmr.msra.gmra.mrb[156].mxu1 %vm171_vm0, %v5807_v6 }
0x1fb7   :  { %9579 = vmatprep.mubr.msk.bf16.mxu1 %vm10371_vm1, %v10370_v7 }
0x2089   :  { %v5870_v14 = vpop.f32.mrb[156].mxu1 }
0x208a   :  { %v9575_v23 = vpop.f32.mrb[157].mxu1  ;;  %v5871_v3 = vadd.f32 %v8654_v9, %v5870_v14 }
0x208b   :  { %v5873_v25 = vpop.f32.mrb[158].mxu1 }
0x208c   :  { %v5874_v28 = vadd.f32 %v8654_v9, %v5873_v25  ;;  %v9576_v27 = vpop.f32.mrb[159].mxu1 }
0x208e   :  { %v11945_v12 = vpack.c.bf16 %v5874_v28, %v5871_v3 }
0x2090   :  { %5996 = vrot.lane.b32.xlu1 %v11945_v12, %s10375_s17  ;;  %5886 = vrot.lane.b32.xlu0 %v11945_v12, %s10373_s15  ;;  %v11960_v62 = vrot.slane %v11945_v12, 4 }
0x2094   :  { %5994 = vrot.lane.b32.xlu1 %v11945_v12, %s10372_s14  ;;  %6106 = vrot.lane.b32.xlu0 %v11945_v12, %s10374_s16 }
0x2098   :  { %6104 = vrot.lane.b32.xlu1 %v11945_v12, %s10377_s19  ;;  %6216 = vrot.lane.b32.xlu0 %v11945_v12, %s10376_s18 }
0x209c   :  { %6214 = vrot.lane.b32.xlu1 %v11945_v12, %s10378_s20  ;;  %6340 = vrot.lane.b32.xlu0 %v11960_v62, %s10373_s15 }
0x20a0   :  { %6450 = vrot.lane.b32.xlu1 %v11960_v62, %s10375_s17  ;;  %6448 = vrot.lane.b32.xlu0 %v11960_v62, %s10372_s14 }
0x20a4   :  { %6560 = vrot.lane.b32.xlu1 %v11960_v62, %s10374_s16  ;;  %6558 = vrot.lane.b32.xlu0 %v11960_v62, %s10377_s19 }
0x20a8   :  { %6670 = vrot.lane.b32.xlu1 %v11960_v62, %s10376_s18  ;;  %6668 = vrot.lane.b32.xlu0 %v11960_v62, %s10378_s20 }
0x2102   :  { %v5887_v32 = vpop.permute.xlu0 %5886  ;;  %v5997_v57 = vpop.permute.xlu1 %5996 }
0x2103   :  { %v5892_v53 = vsel %vm236_vm3, %v5887_v32, 0  ;;  %v6002_v15 = vsel %vm236_vm3, %v5997_v57, 0 }
0x2104   :  { %9578 = vmatpush3.bf16.xpose.msra.mxu1 %v5892_v53 }
0x2105   :  { %9589 = vmatprep.subr.bf16.mxu1 %v10370_v7 }
0x2106   :  { %v6107_v55 = vpop.permute.xlu0 %6106  ;;  %v5995_v37 = vpop.permute.xlu1 %5994 }
0x2107   :  { %v6112_v26 = vsel %vm236_vm3, %v6107_v55, 0 }
0x210a   :  { %v6217_v56 = vpop.permute.xlu0 %6216  ;;  %v6105_v19 = vpop.permute.xlu1 %6104 }
0x210b   :  { %9580 = vmatmul.mubr.msk.bf16.vlgmr.msra.gmra.mrb[160].mxu1 %vm236_vm3, %v11945_v12  ;;  %v6222_v52 = vsel %vm236_vm3, %v6217_v56, 0 }
0x210c   :  { %9590 = vmatpush3.bf16.xpose.msra.mxu1 %v6002_v15  ;;  %9591 = vmatprep.mubr.msk.bf16.mxu1 %vm10371_vm1, %v10370_v7 }
0x210d   :  { %9601 = vmatprep.subr.bf16.mxu1 %v10370_v7 }
0x210e   :  { %v6341_v33 = vpop.permute.xlu0 %6340  ;;  %v6215_v2 = vpop.permute.xlu1 %6214 }
0x210f   :  { %v6346_v38 = vsel %vm236_vm3, %v6341_v33, 0 }
0x2112   :  { %v6451_v10 = vpop.permute.xlu1 %6450  ;;  %v6449_v47 = vpop.permute.xlu0 %6448 }
0x2113   :  { %9592 = vmatmul.mubr.msk.bf16.vlgmr.msra.gmra.mrb[164].mxu1 %vm236_vm3, %v5995_v37  ;;  %v6456_v54 = vsel %vm236_vm3, %v6451_v10, 0 }
0x2114   :  { %9602 = vmatpush3.bf16.xpose.msra.mxu1 %v6112_v26  ;;  %9603 = vmatprep.mubr.msk.bf16.mxu1 %vm10371_vm1, %v10370_v7 }
0x2115   :  { %9613 = vmatprep.subr.bf16.mxu1 %v10370_v7 }
0x2116   :  { %v6561_v1 = vpop.permute.xlu1 %6560  ;;  %v6559_v59 = vpop.permute.xlu0 %6558 }
0x2117   :  { %v6566_v8 = vsel %vm236_vm3, %v6561_v1, 0 }
0x211a   :  { %v6671_v0 = vpop.permute.xlu1 %6670  ;;  %v6669_v17 = vpop.permute.xlu0 %6668 }
0x211b   :  { %9604 = vmatmul.mubr.msk.bf16.vlgmr.msra.gmra.mrb[168].mxu1 %vm236_vm3, %v6105_v19  ;;  %v6676_v36 = vsel %vm236_vm3, %v6671_v0, 0 }
0x211c   :  { %9614 = vmatpush3.bf16.xpose.msra.mxu1 %v6222_v52  ;;  %9615 = vmatprep.mubr.msk.bf16.mxu1 %vm10371_vm1, %v10370_v7 }
0x211d   :  { %9625 = vmatprep.subr.bf16.mxu1 %v10370_v7 }
0x2123   :  { %9616 = vmatmul.mubr.msk.bf16.vlgmr.msra.gmra.mrb[172].mxu1 %vm236_vm3, %v6215_v2 }
0x2124   :  { %9626 = vmatpush3.bf16.xpose.msra.mxu1 %v6346_v38  ;;  %9627 = vmatprep.mubr.msk.bf16.mxu1 %vm10371_vm1, %v10370_v7 }
0x2125   :  { %9637 = vmatprep.subr.bf16.mxu1 %v10370_v7 }
0x212b   :  { %9628 = vmatmul.mubr.msk.bf16.vlgmr.msra.gmra.mrb[176].mxu1 %vm236_vm3, %v11960_v62 }
0x212c   :  { %9638 = vmatpush3.bf16.xpose.msra.mxu1 %v6456_v54  ;;  %9639 = vmatprep.mubr.msk.bf16.mxu1 %vm10371_vm1, %v10370_v7 }
0x212d   :  { %9649 = vmatprep.subr.bf16.mxu1 %v10370_v7 }
0x2133   :  { %9640 = vmatmul.mubr.msk.bf16.vlgmr.msra.gmra.mrb[180].mxu1 %vm236_vm3, %v6449_v47 }
0x2134   :  { %9650 = vmatpush3.bf16.xpose.msra.mxu1 %v6566_v8  ;;  %9651 = vmatprep.mubr.msk.bf16.mxu1 %vm10371_vm1, %v10370_v7 }
0x2135   :  { %9661 = vmatprep.subr.bf16.mxu1 %v10370_v7 }
0x213b   :  { %9652 = vmatmul.mubr.msk.bf16.vlgmr.msra.gmra.mrb[184].mxu1 %vm236_vm3, %v6559_v59 }
0x213c   :  { %9662 = vmatpush3.bf16.xpose.msra.mxu1 %v6676_v36  ;;  %9663 = vmatprep.mubr.msk.bf16.mxu1 %vm10371_vm1, %v10370_v7 }
0x213d   :  { %9673 = vmatprep.subr.bf16.mxu1 %v10370_v7 }
0x2143   :  { %9664 = vmatmul.mubr.msk.bf16.vlgmr.msra.gmra.mrb[188].mxu1 %vm236_vm3, %v6669_v17 }
0x2144   :  { %9677 = vmatprep.mubr.msk.bf16.mxu1 %vm10371_vm1, %v10370_v7 }
0x21de   :  { %v5928_v16 = vpop.f32.mrb[160].mxu1 }
0x21df   :  { %v5929_v41 = vadd.f32 %v10367_v30, %v5928_v16  ;;  %v9581_v24 = vpop.f32.mrb[161].mxu1 }
0x21e0   :  { %v5931_v51 = vpop.f32.mrb[162].mxu1 }
0x21e1   :  { %v9582_v61 = vpop.f32.mrb[163].mxu1  ;;  %v5934_v48 = vsel %vm236_vm3, %v5929_v41, -inf }
0x21e2   :  { %5935 = vmax.xlane.f32.xlu1 %v5934_v48 }
0x21e6   :  { %v6038_v13 = vpop.f32.mrb[164].mxu1 }
0x21e7   :  { %v6039_v40 = vadd.f32 %v10367_v30, %v6038_v13  ;;  %v9593_v44 = vpop.f32.mrb[165].mxu1 }
0x21e8   :  { %v6041_v49 = vpop.f32.mrb[166].mxu1 }
0x21e9   :  { %v9594_v29 = vpop.f32.mrb[167].mxu1  ;;  %v6044_v46 = vsel %vm236_vm3, %v6039_v40, -inf }
0x21ea   :  { %6045 = vmax.xlane.f32.xlu0 %v6044_v46 }
0x21ee   :  { %v6148_v43 = vpop.f32.mrb[168].mxu1 }
0x21ef   :  { %v6149_v20 = vadd.f32 %v10367_v30, %v6148_v43  ;;  %v9605_v18 = vpop.f32.mrb[169].mxu1 }
0x21f0   :  { %v6151_v4 = vpop.f32.mrb[170].mxu1 }
0x21f1   :  { %v9606_v22 = vpop.f32.mrb[171].mxu1  ;;  %v6154_v60 = vsel %vm236_vm3, %v6149_v20, -inf }
0x21f2   :  { %6155 = vmax.xlane.f32.xlu0 %v6154_v60 }
0x21f6   :  { %v6258_v39 = vpop.f32.mrb[172].mxu1 }
0x21f7   :  { %v6259_v5 = vadd.f32 %v10367_v30, %v6258_v39  ;;  %v9617_v58 = vpop.f32.mrb[173].mxu1 }
0x21f8   :  { %v6261_v31 = vpop.f32.mrb[174].mxu1 }
0x21f9   :  { %v9618_v50 = vpop.f32.mrb[175].mxu1  ;;  %v6264_v11 = vsel %vm236_vm3, %v6259_v5, -inf }
0x21fa   :  { %6265 = vmax.xlane.f32.xlu1 %v6264_v11 }
0x21fe   :  { %v6382_v21 = vpop.f32.mrb[176].mxu1 }
0x21ff   :  { %v6383_v6 = vadd.f32 %v10367_v30, %v6382_v21  ;;  %v9629_v9 = vpop.f32.mrb[177].mxu1 }
0x2200   :  { %v6385_v14 = vpop.f32.mrb[178].mxu1 }
0x2201   :  { %v9630_v23 = vpop.f32.mrb[179].mxu1  ;;  %v6388_v25 = vsel %vm236_vm3, %v6383_v6, -inf }
0x2202   :  { %6389 = vmax.xlane.f32.xlu0 %v6388_v25 }
0x2206   :  { %v6492_v3 = vpop.f32.mrb[180].mxu1 }
0x2207   :  { %v12026_v28 = vadd.f32 %v10367_v30, %v6492_v3  ;;  %v9641_v27 = vpop.f32.mrb[181].mxu1 }
0x2208   :  { %v6495_v32 = vpop.f32.mrb[182].mxu1 }
0x2209   :  { %v9642_v53 = vpop.f32.mrb[183].mxu1  ;;  %v6498_v57 = vsel %vm236_vm3, %v12026_v28, -inf }
0x220a   :  { %6499 = vmax.xlane.f32.xlu1 %v6498_v57 }
0x220e   :  { %v6602_v15 = vpop.f32.mrb[184].mxu1 }
0x220f   :  { %v6603_v55 = vadd.f32 %v10367_v30, %v6602_v15  ;;  %v9653_v37 = vpop.f32.mrb[185].mxu1 }
0x2210   :  { %v6605_v26 = vpop.f32.mrb[186].mxu1 }
0x2211   :  { %v9654_v56 = vpop.f32.mrb[187].mxu1  ;;  %v6608_v19 = vsel %vm236_vm3, %v6603_v55, -inf }
0x2212   :  { %6609 = vmax.xlane.f32.xlu0 %v6608_v19 }
0x2216   :  { %v6712_v52 = vpop.f32.mrb[188].mxu1 }
0x2217   :  { %v9665_v33 = vpop.f32.mrb[189].mxu1  ;;  %v6713_v10 = vadd.f32 %v10367_v30, %v6712_v52 }
0x2218   :  { %v6715_v2 = vpop.f32.mrb[190].mxu1 }
0x2219   :  { %v9666_v38 = vpop.f32.mrb[191].mxu1  ;;  %v6718_v54 = vsel %vm236_vm3, %v6713_v10, -inf }
0x221b   :  { %6056 = vrot.lane.b32.xlu1 %v11945_v12, %s12430_s5 }
0x2228   :  { %5946 = vrot.lane.b32.xlu0 %v11945_v12, %s12431_s6 }
0x223f   :  { %6719 = vmax.xlane.f32.xlu1 %v6718_v54 }
0x2250   :  { %6166 = vrot.lane.b32.xlu1 %v11945_v12, %s12432_s30 }
0x226f   :  { %v5936_v1 = vpop.xlane.xlu1 %5935 }
0x2270   :  { %v5937_v47 = vsub.f32 %v5929_v41, %v5936_v1 }
0x2272   :  { %v5938_v8 = vmul.f32 1.442695, %v5937_v47 }
0x2274   :  { %10284 = vpow2.f32 %v5938_v8 }
0x2277   :  { %v6046_v0 = vpop.xlane.xlu0 %6045 }
0x2278   :  { %v6047_v59 = vsub.f32 %v6039_v40, %v6046_v0 }
0x227a   :  { %v6048_v36 = vmul.f32 1.442695, %v6047_v59 }
0x227c   :  { %10286 = vpow2.f32 %v6048_v36 }
0x227e   :  { %v12038_v17 = vpop.eup %10284 }
0x227f   :  { %v6156_v16 = vpop.xlane.xlu0 %6155  ;;  %v5940_v30 = vsel %vm236_vm3, %v12038_v17, 0.0 }
0x2280   :  { %v6157_v24 = vsub.f32 %v6149_v20, %v6156_v16  ;;  %5941 = vadd.xlane.f32.xlu0 %v5940_v30 }
0x2282   :  { %v6158_v51 = vmul.f32 1.442695, %v6157_v24 }
0x2284   :  { %10288 = vpow2.f32 %v6158_v51 }
0x2286   :  { %v12042_v61 = vpop.eup %10286 }
0x2287   :  { %v6266_v48 = vpop.xlane.xlu1 %6265  ;;  %v6050_v41 = vsel %vm236_vm3, %v12042_v61, 0.0 }
0x2288   :  { %v6267_v13 = vsub.f32 %v6259_v5, %v6266_v48  ;;  %6051 = vadd.xlane.f32.xlu1 %v6050_v41 }
0x228a   :  { %v6268_v40 = vmul.f32 1.442695, %v6267_v13 }
0x228c   :  { %10290 = vpow2.f32 %v6268_v40 }
0x228e   :  { %v12046_v44 = vpop.eup %10288 }
0x228f   :  { %v6390_v49 = vpop.xlane.xlu0 %6389  ;;  %v6160_v29 = vsel %vm236_vm3, %v12046_v44, 0.0 }
0x2290   :  { %v6391_v46 = vsub.f32 %v6383_v6, %v6390_v49  ;;  %6161 = vadd.xlane.f32.xlu0 %v6160_v29 }
0x2292   :  { %v6392_v43 = vmul.f32 1.442695, %v6391_v46 }
0x2294   :  { %10292 = vpow2.f32 %v6392_v43 }
0x2296   :  { %v12050_v20 = vpop.eup %10290 }
0x2297   :  { %v6270_v18 = vsel %vm236_vm3, %v12050_v20, 0.0  ;;  %v6500_v50 = vpop.xlane.xlu1 %6499 }
0x2298   :  { %6271 = vadd.xlane.f32.xlu1 %v6270_v18  ;;  %v6501_v21 = vsub.f32 %v12026_v28, %v6500_v50 }
0x229a   :  { %v6502_v9 = vmul.f32 1.442695, %v6501_v21 }
0x229e   :  { %v12054_v4 = vpop.eup %10292 }
0x229f   :  { %v6610_v22 = vpop.xlane.xlu0 %6609  ;;  %v6394_v60 = vsel %vm236_vm3, %v12054_v4, 0.0 }
0x22a0   :  { %v6611_v39 = vsub.f32 %v6603_v55, %v6610_v22  ;;  %6395 = vadd.xlane.f32.xlu1 %v6394_v60 }
0x22a2   :  { %v6612_v5 = vmul.f32 1.442695, %v6611_v39 }
0x22a3   :  { %v5947_v58 = vpop.permute.xlu0 %5946 }
0x22a4   :  { %10294 = vpow2.f32 %v6612_v5  ;;  %v5952_v31 = vsel %vm314_vm4, %v5947_v58, 0 }
0x22a5   :  { %9584 = vmatpush3.bf16.msra.mxu0 %v5952_v31  ;;  %10296 = vpow2.f32 %v6502_v9 }
0x22a6   :  { %6276 = vrot.lane.b32.xlu0 %v11945_v12, %s12433_s25  ;;  %9595 = vmatprep.subr.bf16.mxu0 %v10370_v7  ;;  %v6057_v12 = vpop.permute.xlu1 %6056 }
0x22a7   :  { %v6062_v56 = vsel %vm314_vm4, %v6057_v12, 0 }
0x22ae   :  { %v12062_v11 = vpop.eup %10294 }
0x22af   :  { %v6614_v6 = vsel %vm236_vm3, %v12062_v11, 0.0  ;;  %v12067_v14 = vpop.eup %10296 }
0x22b0   :  { %6615 = vadd.xlane.f32.xlu1 %v6614_v6  ;;  %v6504_v23 = vsel %vm236_vm3, %v12067_v14, 0.0 }
0x22c5   :  { %6505 = vadd.xlane.f32.xlu0 %v6504_v23 }
0x22cc   :  { %v6720_v25 = vpop.xlane.xlu1 %6719 }
0x22cd   :  { %v6721_v3 = vsub.f32 %v6713_v10, %v6720_v25 }
0x22cf   :  { %v6722_v27 = vmul.f32 1.442695, %v6721_v3 }
0x22d0   :  { %v6167_v57 = vpop.permute.xlu1 %6166 }
0x22d1   :  { %10298 = vpow2.f32 %v6722_v27  ;;  %v6172_v2 = vsel %vm314_vm4, %v6167_v57, 0 }
0x22db   :  { %v12071_v32 = vpop.eup %10298  ;;  %6510 = vrot.lane.b32.xlu0 %v11960_v62, %s12430_s5 }
0x22dc   :  { %v6724_v28 = vsel %vm236_vm3, %v12071_v32, 0.0 }
0x22dd   :  { %6725 = vadd.xlane.f32.xlu1 %v6724_v28 }
0x22df   :  { %6620 = vrot.lane.b32.xlu0 %v11960_v62, %s12432_s30 }
0x22e3   :  { %6730 = vrot.lane.b32.xlu0 %v11960_v62, %s12433_s25 }
0x22ee   :  { %6400 = vrot.lane.b32.xlu1 %v11960_v62, %s12431_s6 }
0x230d   :  { %v5942_v53 = vpop.xlane.xlu0 %5941 }
0x230e   :  { %10300 = vrcp.f32 %v5942_v53 }
0x2315   :  { %v6052_v15 = vpop.xlane.xlu1 %6051 }
0x2316   :  { %10302 = vrcp.f32 %v6052_v15 }
0x2318   :  { %v10301_v55 = vpop.eup %10300 }
0x2319   :  { %v5944_v37 = vmul.f32 %v10301_v55, %v12038_v17 }
0x231b   :  { %v5945_v26 = vpack.c.bf16 %v5944_v37, %v5944_v37 }
0x231d   :  { %9586 = vmatmul.mubr.msk.bf16.vlgmr.msra.gmra.mrb[160].mxu0 %vm236_vm3, %v5945_v26  ;;  %v6162_v19 = vpop.xlane.xlu0 %6161 }
0x231e   :  { %9596 = vmatpush3.bf16.msra.mxu0 %v6062_v56  ;;  %10304 = vrcp.f32 %v6162_v19  ;;  %9597 = vmatprep.mubr.msk.bf16.mxu0 %vm10371_vm1, %v10370_v7 }
0x231f   :  { %9607 = vmatprep.subr.bf16.mxu0 %v10370_v7 }
0x2320   :  { %v10303_v62 = vpop.eup %10302 }
0x2321   :  { %v6054_v52 = vmul.f32 %v10303_v62, %v12042_v61  ;;  %v6277_v1 = vpop.permute.xlu0 %6276  ;;  %v10034_v62 = vld [vmem:[%s11500_s27 + $0x10] sm:$0xff]  }
0x2322   :  { %v6282_v8 = vsel %vm314_vm4, %v6277_v1, 0  ;;  %9674 = vmatpush3.bf16.msra.mxu1 %v10034_v62 }
0x2323   :  { %v6055_v33 = vpack.c.bf16 %v6054_v52, %v6054_v52  ;;  %9675 = vmatprep.subr.bf16.mxu1 %v10370_v7 }
0x2325   :  { %9598 = vmatmul.mubr.msk.bf16.vlgmr.msra.gmra.mrb[164].mxu0 %vm236_vm3, %v6055_v33  ;;  %v6272_v38 = vpop.xlane.xlu1 %6271 }
0x2326   :  { %9608 = vmatpush3.bf16.msra.mxu0 %v6172_v2  ;;  %10306 = vrcp.f32 %v6272_v38  ;;  %9609 = vmatprep.mubr.msk.bf16.mxu0 %vm10371_vm1, %v10370_v7 }
0x2327   :  { %9619 = vmatprep.subr.bf16.mxu0 %v10370_v7 }
0x2328   :  { %v10305_v10 = vpop.eup %10304 }
0x2329   :  { %v6164_v54 = vmul.f32 %v10305_v10, %v12046_v44 }
0x232b   :  { %v6165_v47 = vpack.c.bf16 %v6164_v54, %v6164_v54  ;;  %v10035_v54 = vld [vmem:[%s11500_s27 + $0x18] sm:$0xff]  }
0x232c   :  { %9676 = vmatpush3.bf16.msra.mxu1 %v10035_v54 }
0x232d   :  { %9610 = vmatmul.mubr.msk.bf16.vlgmr.msra.gmra.mrb[168].mxu0 %vm236_vm3, %v6165_v47  ;;  %v6396_v17 = vpop.xlane.xlu1 %6395 }
0x232e   :  { %9620 = vmatpush3.bf16.msra.mxu0 %v6282_v8  ;;  %9621 = vmatprep.mubr.msk.bf16.mxu0 %vm10371_vm1, %v10370_v7  ;;  %10308 = vrcp.f32 %v6396_v17 }
0x232f   :  { %9631 = vmatprep.subr.bf16.mxu0 %v10370_v7 }
0x2330   :  { %v10307_v0 = vpop.eup %10306 }
0x2331   :  { %v6274_v59 = vmul.f32 %v10307_v0, %v12050_v20 }
0x2333   :  { %v6275_v36 = vpack.c.bf16 %v6274_v59, %v6274_v59  ;;  %v10036_v59 = vld [vmem:[%s11573_s2 + $0x10] sm:$0xff]  }
0x2334   :  { %9689 = vmatprep.subr.bf16.mxu1 %v10036_v59 }
0x2335   :  { %9622 = vmatmul.mubr.msk.bf16.vlgmr.msra.gmra.mrb[172].mxu0 %vm236_vm3, %v6275_v36 }
0x2336   :  { %9633 = vmatprep.mubr.msk.bf16.mxu0 %vm10371_vm1, %v10370_v7 }
0x2338   :  { %v10309_v24 = vpop.eup %10308 }
0x2339   :  { %v6398_v61 = vmul.f32 %v10309_v24, %v12054_v4 }
0x233b   :  { %v6399_v40 = vpack.c.bf16 %v6398_v61, %v6398_v61 }
0x233d   :  { %v6616_v30 = vpop.xlane.xlu1 %6615 }
0x2352   :  { %v6506_v16 = vpop.xlane.xlu0 %6505 }
0x2353   :  { %10310 = vrcp.f32 %v6506_v16 }
0x2354   :  { %10312 = vrcp.f32 %v6616_v30 }
0x2356   :  { %v6511_v13 = vpop.permute.xlu0 %6510 }
0x2357   :  { %v6516_v49 = vsel %vm314_vm4, %v6511_v13, 0 }
0x235a   :  { %v6621_v46 = vpop.permute.xlu0 %6620 }
0x235b   :  { %v6626_v18 = vsel %vm314_vm4, %v6621_v46, 0 }
0x235d   :  { %v10311_v44 = vpop.eup %10310 }
0x235e   :  { %v6508_v29 = vmul.f32 %v10311_v44, %v12067_v14  ;;  %v10313_v20 = vpop.eup %10312  ;;  %v6731_v22 = vpop.permute.xlu0 %6730 }
0x235f   :  { %v6618_v4 = vmul.f32 %v10313_v20, %v12062_v11  ;;  %v6736_v5 = vsel %vm314_vm4, %v6731_v22, 0 }
0x2360   :  { %v6509_v43 = vpack.c.bf16 %v6508_v29, %v6508_v29 }
0x2361   :  { %v6619_v60 = vpack.c.bf16 %v6618_v4, %v6618_v4 }
0x236a   :  { %v6726_v51 = vpop.xlane.xlu1 %6725 }
0x236b   :  { %10314 = vrcp.f32 %v6726_v51 }
0x236e   :  { %v6401_v48 = vpop.permute.xlu1 %6400 }
0x236f   :  { %v6406_v41 = vsel %vm314_vm4, %v6401_v48, 0 }
0x2370   :  { %9632 = vmatpush3.bf16.msra.mxu0 %v6406_v41 }
0x2371   :  { %9643 = vmatprep.subr.bf16.mxu0 %v10370_v7 }
0x2373   :  { %9634 = vmatmul.mubr.msk.bf16.vlgmr.msra.gmra.mrb[176].mxu0 %vm236_vm3, %v6399_v40 }
0x2374   :  { %9644 = vmatpush3.bf16.msra.mxu0 %v6516_v49  ;;  %9645 = vmatprep.mubr.msk.bf16.mxu0 %vm10371_vm1, %v10370_v7 }
0x2375   :  { %9655 = vmatprep.subr.bf16.mxu0 %v10370_v7  ;;  %v10315_v39 = vpop.eup %10314 }
0x2376   :  { %v6728_v58 = vmul.f32 %v10315_v39, %v12071_v32  ;;  %v10037_v39 = vld [vmem:[%s11573_s2 + $0x18] sm:$0xff]  }
0x2378   :  { %v6729_v31 = vpack.c.bf16 %v6728_v58, %v6728_v58 }
0x237b   :  { %9646 = vmatmul.mubr.msk.bf16.vlgmr.msra.gmra.mrb[180].mxu0 %vm236_vm3, %v6509_v43 }
0x237c   :  { %9656 = vmatpush3.bf16.msra.mxu0 %v6626_v18  ;;  %9657 = vmatprep.mubr.msk.bf16.mxu0 %vm10371_vm1, %v10370_v7 }
0x237d   :  { %9667 = vmatprep.subr.bf16.mxu0 %v10370_v7 }
0x2383   :  { %9658 = vmatmul.mubr.msk.bf16.vlgmr.msra.gmra.mrb[184].mxu0 %vm236_vm3, %v6619_v60 }
0x2384   :  { %9668 = vmatpush3.bf16.msra.mxu0 %v6736_v5  ;;  %9669 = vmatprep.mubr.msk.bf16.mxu0 %vm10371_vm1, %v10370_v7  ;;  %v8679_v5 = vld [vmem:[%s11582_s28 + $0x1] ss:$0 sm:$0xff] }
0x2385   :  { %9681 = vmatprep.subr.bf16.mxu0 %v10370_v7 }
0x238b   :  { %9670 = vmatmul.mubr.msk.bf16.vlgmr.msra.gmra.mrb[188].mxu0 %vm236_vm3, %v6729_v31 }
0x238c   :  { %9685 = vmatprep.mubr.msk.bf16.mxu0 %vm10371_vm1, %v10370_v7 }
0x23f0   :  { %v5988_v50 = vpop.f32.mrb[160].mxu0 }
0x23f1   :  { %v9587_v11 = vpop.f32.mrb[161].mxu0 }
0x23f2   :  { %v5991_v21 = vpop.f32.mrb[162].mxu0 }
0x23f3   :  { %v9588_v6 = vpop.f32.mrb[163].mxu0 }
0x23f8   :  { %v6098_v9 = vpop.f32.mrb[164].mxu0 }
0x23f9   :  { %v9599_v14 = vpop.f32.mrb[165].mxu0 }
0x23fa   :  { %v6101_v23 = vpop.f32.mrb[166].mxu0 }
0x23fb   :  { %v9600_v12 = vpop.f32.mrb[167].mxu0 }
0x23fc   :  { %v8699_v12 = vld [vmem:[%s11662_s3 + $0x1] ss:$0 sm:$0xff] }
0x2400   :  { %v6208_v25 = vpop.f32.mrb[168].mxu0 }
0x2401   :  { %v9611_v3 = vpop.f32.mrb[169].mxu0 }
0x2402   :  { %v6211_v27 = vpop.f32.mrb[170].mxu0 }
0x2403   :  { %v9612_v32 = vpop.f32.mrb[171].mxu0 }
0x2408   :  { %v6318_v28 = vpop.f32.mrb[172].mxu0 }
0x2409   :  { %v9623_v53 = vpop.f32.mrb[173].mxu0 }
0x240a   :  { %v6321_v57 = vpop.f32.mrb[174].mxu0 }
0x240b   :  { %v9624_v15 = vpop.f32.mrb[175].mxu0 }
0x2446   :  { %v6442_v55 = vpop.f32.mrb[176].mxu0 }
0x2447   :  { %v9635_v37 = vpop.f32.mrb[177].mxu0 }
0x2448   :  { %v6445_v26 = vpop.f32.mrb[178].mxu0  ;;  %v10038_v37 = vld [vmem:[%s11617_s13 + $0x10] sm:$0xff]  }
0x2449   :  { %v9636_v56 = vpop.f32.mrb[179].mxu0  ;;  %9682 = vmatpush3.bf16.msra.mxu0 %v10038_v37  ;;  %v10039_v26 = vld [vmem:[%s11617_s13 + $0x18] sm:$0xff]  }
0x244a   :  { %9683 = vmatprep.subr.bf16.mxu0 %v10370_v7 }
0x244d   :  { %9684 = vmatpush3.bf16.msra.mxu0 %v10039_v26 }
0x244e   :  { %v6552_v19 = vpop.f32.mrb[180].mxu0  ;;  %9697 = vmatprep.subr.bf16.mxu0 %v10370_v7 }
0x244f   :  { %v9966_v52 = vpack.i.bf16 %v6552_v19, %v6098_v9  ;;  %v9647_v33 = vpop.f32.mrb[181].mxu0 }
0x2450   :  { %v6555_v2 = vpop.f32.mrb[182].mxu0 }
0x2451   :  { %9967 = vrot.lane.b32.xlu1 %v9966_v52, %s12434_s10  ;;  %v9648_v38 = vpop.f32.mrb[183].mxu0 }
0x2456   :  { %v6662_v10 = vpop.f32.mrb[184].mxu0 }
0x2457   :  { %v9971_v1 = vpack.i.bf16 %v6662_v10, %v6208_v25  ;;  %v9659_v47 = vpop.f32.mrb[185].mxu0 }
0x2458   :  { %v6665_v8 = vpop.f32.mrb[186].mxu0 }
0x2459   :  { %9972 = vrot.lane.b32.xlu0 %v9971_v1, %s12435_s12  ;;  %v9660_v0 = vpop.f32.mrb[187].mxu0 }
0x245e   :  { %v6772_v36 = vpop.f32.mrb[188].mxu0 }
0x245f   :  { %v9976_v17 = vpack.i.bf16 %v6772_v36, %v6318_v28  ;;  %v9671_v16 = vpop.f32.mrb[189].mxu0  ;;  %v8683_v36 = vld [vmem:[%s11638_s9 + $0x3] ss:$0 sm:$0xff] }
0x2460   :  { %v6775_v30 = vpop.f32.mrb[190].mxu0 }
0x2461   :  { %9977 = vrot.lane.b32.xlu1 %v9976_v17, %s12436_s21  ;;  %v9672_v24 = vpop.f32.mrb[191].mxu0 }
0x24c3   :  { %v9968_v51 = vpop.permute.xlu1 %9967 }
0x24c4   :  { %v9970_v48 = vunpack.i.h.bf16 %v9968_v51  ;;  %v9969_v41 = vunpack.i.l.bf16 %v9968_v51 }
0x24c6   :  { %v6790_v49 = vsel %vm236_vm3, %v6442_v55, %v9970_v48  ;;  %v6336_v29 = vsel %vm236_vm3, %v5988_v50, %v9969_v41  ;;  %v8684_v41 = vld [vmem:[%s11644_s29 + $0x3] ss:$0 sm:$0xff] }
0x24cb   :  { %v9973_v61 = vpop.permute.xlu0 %9972 }
0x24cc   :  { %v9975_v13 = vunpack.i.h.bf16 %v9973_v61  ;;  %v9974_v40 = vunpack.i.l.bf16 %v9973_v61 }
0x24ce   :  { %v6791_v20 = vsel %vm757_vm8, %v6790_v49, %v9975_v13  ;;  %v6337_v18 = vsel %vm757_vm8, %v6336_v29, %v9974_v40 }
0x24d3   :  { %v9978_v44 = vpop.permute.xlu1 %9977 }
0x24d4   :  { %v9980_v46 = vunpack.i.h.bf16 %v9978_v44  ;;  %v9979_v43 = vunpack.i.l.bf16 %v9978_v44 }
0x24d6   :  { %v6792_v4 = vsel %vm760_vm9, %v6791_v20, %v9980_v46  ;;  %v6338_v22 = vsel %vm760_vm9, %v6337_v18, %v9979_v43  ;;  %v8690_v43 = vld [vmem:[%s11675_s4 + $0x1] ss:$0 sm:$0xff] }
0x24d7   :  { %v6793_v60 = vpack.c.bf16 %v6792_v4, %v6338_v22 }
0x24d9   :  { %9678 = vmatmul.mubr.msk.bf16.vlgmr.msra.gmra.mrb[192].mxu1 %vm171_vm0, %v6793_v60 }
0x24da   :  { %9690 = vmatpush3.bf16.msra.mxu1 %v10036_v59  ;;  %9693 = vmatprep.mubr.msk.bf16.mxu1 %vm171_vm0, %v11621_v34 }
0x24db   :  { %9691 = vmatprep.subr.bf16.mxu1 %v10037_v39 }
0x24de   :  { %9692 = vmatpush3.bf16.msra.mxu1 %v10037_v39 }
0x24df   :  { %9703 = vmatprep.subr.bf16.mxu1 %v10370_v7 }
0x24e1   :  { %9694 = vmatmul.mubr.msk.bf16.vlgmr.msra.gmra.mrb[196].mxu1 %vm171_vm0, %v11628_v42 }
0x24e2   :  { %9705 = vmatprep.mubr.msk.bf16.mxu1 %vm10371_vm1, %v10370_v7 }
0x25ac   :  { %v6849_v58 = vpop.f32.mrb[192].mxu1 }
0x25ad   :  { %v6850_v31 = vadd.f32 %v8679_v5, %v6849_v58  ;;  %v9679_v50 = vpop.f32.mrb[193].mxu1 }
0x25ae   :  { %v6852_v11 = vpop.f32.mrb[194].mxu1 }
0x25af   :  { %v6856_v21 = vadd.f32 %v6850_v31, %v11937_v63  ;;  %v6853_v6 = vadd.f32 %v8679_v5, %v6852_v11  ;;  %v9680_v34 = vpop.f32.mrb[195].mxu1 }
0x25b1   :  { %v6857_v9 = vadd.f32 %v6853_v6, %v11935_v35  ;;  %v6858_v14 = vsel %vm171_vm0, %v6856_v21, 0.0  ;;  %v6866_v23 = vmul.f32 %v6856_v21, %v6856_v21 }
0x25b2   :  { %6859 = vadd.xlane.f32.xlu0 %v6858_v14 }
0x25b3   :  { %v6861_v42 = vsel %vm171_vm0, %v6857_v9, 0.0  ;;  %v6868_v32 = vsel %vm171_vm0, %v6866_v23, 0.0  ;;  %v6867_v63 = vmul.f32 %v6857_v9, %v6857_v9 }
0x25b4   :  { %6862 = vadd.xlane.f32.xlu1 %v6861_v42  ;;  %v9695_v25 = vpop.f32.mrb[196].mxu1 }
0x25b5   :  { %v7043_v3 = vadd.f32 %v9695_v25, %v8699_v12  ;;  %v7034_v27 = vpop.f32.mrb[197].mxu1  ;;  %v6871_v15 = vsel %vm171_vm0, %v6867_v63, 0.0 }
0x25b6   :  { %6869 = vadd.xlane.f32.xlu0 %v6868_v32  ;;  %v9696_v28 = vpop.f32.mrb[198].mxu1  ;;  %v7035_v35 = vadd.f32 %v8699_v12, %v7034_v27 }
0x25b7   :  { %v7037_v53 = vpop.f32.mrb[199].mxu1  ;;  %v7049_v46 = vpack.c.bf16 %v7043_v3, %v7043_v3 }
0x25b8   :  { %v7038_v57 = vadd.f32 %v8699_v12, %v7037_v53 }
0x25b9   :  { %v7519_v31 = vshrl.u32 %v7049_v46, 16  ;;  %v7522_v50 = vshll.u32 %v7049_v46, 16 }
0x25ba   :  { %v12159_v55 = vpack.c.bf16 %v7038_v57, %v7035_v35  ;;  %6872 = vadd.xlane.f32.xlu0 %v6871_v15 }
0x25bb   :  { %v7524_v14 = vrot.slane %v7522_v50, 5 }
0x25bc   :  { %v7061_v29 = vsel %vm236_vm3, %v12159_v55, 0  ;;  %v7511_v22 = vshrl.u32 %v12159_v55, 16  ;;  %v7514_v60 = vshll.u32 %v12159_v55, 16 }
0x25be   :  { %v7513_v6 = vrot.slane %v7511_v22, 4  ;;  %v7516_v34 = vrot.slane %v7514_v60, 5 }
0x25c0   :  { %v7517_v12 = vor.u32 %v7516_v34, %v7513_v6 }
0x25c5   :  { %7167 = vrot.lane.b32.xlu1 %v12159_v55, %s10372_s14 }
0x25c9   :  { %7277 = vrot.lane.b32.xlu1 %v12159_v55, %s10377_s19 }
0x263f   :  { %v6860_v56 = vpop.xlane.xlu0 %6859 }
0x2640   :  { %v6864_v19 = vmul.f32 0.03125, %v6860_v56 }
0x2641   :  { %v6863_v62 = vpop.xlane.xlu1 %6862 }
0x2642   :  { %v6876_v33 = vmul.f32 %v6864_v19, %v6864_v19  ;;  %v6865_v2 = vmul.f32 0.03125, %v6863_v62  ;;  %v6884_v30 = vsub.f32 %v6856_v21, %v6864_v19 }
0x2643   :  { %v6870_v52 = vpop.xlane.xlu0 %6869 }
0x2644   :  { %v6874_v38 = vmul.f32 0.03125, %v6870_v52  ;;  %v6877_v1 = vmul.f32 %v6865_v2, %v6865_v2  ;;  %v6885_v51 = vsub.f32 %v6857_v9, %v6865_v2  ;;  %v7521_v9 = vrot.slane %v7519_v31, 4 }
0x2645   :  { %v7168_v11 = vpop.permute.xlu1 %7167 }
0x2646   :  { %v6878_v10 = vsub.f32 %v6874_v38, %v6876_v33  ;;  %v7173_v23 = vsel %vm236_vm3, %v7168_v11, 0  ;;  %v7525_v42 = vor.u32 %v7524_v14, %v7521_v9 }
0x2647   :  { %v6873_v54 = vpop.xlane.xlu0 %6872 }
0x2648   :  { %v6880_v47 = vadd.f32 1e-05, %v6878_v10  ;;  %v6875_v8 = vmul.f32 0.03125, %v6873_v54  ;;  %v12197_v3 = vsel %vm763_vm2, %v7517_v12, %v7525_v42 }
0x2649   :  { %v7278_v27 = vpop.permute.xlu1 %7277  ;;  %v7531_v15 = vsel %vm236_vm3, %v12197_v3, 0 }
0x264a   :  { %10316 = vrsqrt.f32 %v6880_v47  ;;  %v6879_v0 = vsub.f32 %v6875_v8, %v6877_v1  ;;  %v7283_v63 = vsel %vm236_vm3, %v7278_v27, 0 }
0x264c   :  { %v6881_v59 = vadd.f32 1e-05, %v6879_v0 }
0x264e   :  { %10318 = vrsqrt.f32 %v6881_v59 }
0x2654   :  { %v10317_v17 = vpop.eup %10316 }
0x2655   :  { %v6892_v16 = vmul.f32 %v10317_v17, %v8683_v36 }
0x2657   :  { %v6894_v48 = vmul.f32 %v6892_v16, %v6884_v30 }
0x2658   :  { %v10319_v24 = vpop.eup %10318 }
0x2659   :  { %v6893_v61 = vmul.f32 %v10319_v24, %v8683_v36  ;;  %v12171_v40 = vadd.f32 %v8684_v41, %v6894_v48 }
0x265b   :  { %v6895_v13 = vmul.f32 %v6893_v61, %v6885_v51 }
0x265d   :  { %v12173_v44 = vadd.f32 %v8684_v41, %v6895_v13 }
0x265f   :  { %v6904_v49 = vpack.c.bf16 %v12173_v44, %v12171_v40 }
0x2661   :  { %9686 = vmatmul.mubr.msk.bf16.vlgmr.msra.gmra.mrb[192].mxu0 %vm171_vm0, %v6904_v49 }
0x2662   :  { %9698 = vmatpush3.bf16.xpose.msra.mxu0 %v7061_v29  ;;  %9699 = vmatprep.mubr.msk.bf16.mxu0 %vm10371_vm1, %v10370_v7 }
0x2663   :  { %9709 = vmatprep.subr.bf16.mxu0 %v10370_v7 }
0x2734   :  { %v6967_v20 = vpop.f32.mrb[192].mxu0 }
0x2735   :  { %v9687_v18 = vpop.f32.mrb[193].mxu0  ;;  %v6968_v39 = vadd.f32 %v8690_v43, %v6967_v20 }
0x2736   :  { %v6970_v4 = vpop.f32.mrb[194].mxu0 }
0x2737   :  { %v6971_v5 = vadd.f32 %v8690_v43, %v6970_v4  ;;  %v9688_v58 = vpop.f32.mrb[195].mxu0 }
0x2739   :  { %v6974_v21 = vpack.c.bf16 %v6971_v5, %v6968_v39 }
0x273b   :  { %7275 = vrot.lane.b32.xlu1 %v6974_v21, %s10377_s19  ;;  %7165 = vrot.lane.b32.xlu0 %v6974_v21, %s10372_s14  ;;  %v7510_v25 = vrot.slane %v6974_v21, 4 }
0x273c   :  { %9700 = vmatmul.mubr.msk.bf16.vlgmr.msra.gmra.mrb[196].mxu0 %vm236_vm3, %v6974_v21 }
0x273d   :  { %9710 = vmatpush3.bf16.xpose.msra.mxu0 %v7173_v23  ;;  %9711 = vmatprep.mubr.msk.bf16.mxu0 %vm10371_vm1, %v10370_v7 }
0x273e   :  { %9721 = vmatprep.subr.bf16.mxu0 %v10370_v7 }
0x273f   :  { %7385 = vrot.lane.b32.xlu1 %v6974_v21, %s10378_s20  ;;  %7387 = vrot.lane.b32.xlu0 %v12159_v55, %s10378_s20 }
0x2743   :  { %7635 = vrot.lane.b32.xlu0 %v12197_v3, %s10372_s14  ;;  %7633 = vrot.lane.b32.xlu1 %v7510_v25, %s10372_s14  ;;  %s10412_s14 = smov 31  }
0x2747   :  { %7745 = vrot.lane.b32.xlu0 %v12197_v3, %s10377_s19  ;;  %7743 = vrot.lane.b32.xlu1 %v7510_v25, %s10377_s19 }
0x274b   :  { %7855 = vrot.lane.b32.xlu0 %v12197_v3, %s10378_s20  ;;  %7853 = vrot.lane.b32.xlu1 %v7510_v25, %s10378_s20 }
0x27ad   :  { %v7166_v32 = vpop.permute.xlu0 %7165  ;;  %v7276_v53 = vpop.permute.xlu1 %7275 }
0x27ae   :  { %9712 = vmatmul.mubr.msk.bf16.vlgmr.msra.gmra.mrb[200].mxu0 %vm236_vm3, %v7166_v32 }
0x27af   :  { %9722 = vmatpush3.bf16.xpose.msra.mxu0 %v7283_v63  ;;  %9723 = vmatprep.mubr.msk.bf16.mxu0 %vm10371_vm1, %v10370_v7 }
0x27b0   :  { %9733 = vmatprep.subr.bf16.mxu0 %v10370_v7 }
0x27b1   :  { %v7388_v28 = vpop.permute.xlu0 %7387  ;;  %v7386_v57 = vpop.permute.xlu1 %7385 }
0x27b2   :  { %v7393_v35 = vsel %vm236_vm3, %v7388_v28, 0 }
0x27b5   :  { %v7636_v37 = vpop.permute.xlu0 %7635  ;;  %v7634_v19 = vpop.permute.xlu1 %7633 }
0x27b6   :  { %9724 = vmatmul.mubr.msk.bf16.vlgmr.msra.gmra.mrb[204].mxu0 %vm236_vm3, %v7276_v53  ;;  %v7641_v26 = vsel %vm236_vm3, %v7636_v37, 0 }
0x27b7   :  { %9734 = vmatpush3.bf16.xpose.msra.mxu0 %v7393_v35  ;;  %9735 = vmatprep.mubr.msk.bf16.mxu0 %vm10371_vm1, %v10370_v7 }
0x27b8   :  { %9745 = vmatprep.subr.bf16.mxu0 %v10370_v7 }
0x27b9   :  { %v7746_v56 = vpop.permute.xlu0 %7745  ;;  %v7744_v33 = vpop.permute.xlu1 %7743 }
0x27ba   :  { %v7751_v62 = vsel %vm236_vm3, %v7746_v56, 0 }
0x27bd   :  { %v7856_v52 = vpop.permute.xlu0 %7855  ;;  %v7854_v38 = vpop.permute.xlu1 %7853 }
0x27be   :  { %9736 = vmatmul.mubr.msk.bf16.vlgmr.msra.gmra.mrb[208].mxu0 %vm236_vm3, %v7386_v57  ;;  %v7861_v2 = vsel %vm236_vm3, %v7856_v52, 0 }
0x27bf   :  { %9746 = vmatpush3.bf16.xpose.msra.mxu0 %v7531_v15  ;;  %9747 = vmatprep.mubr.msk.bf16.mxu0 %vm10371_vm1, %v10370_v7 }
0x27c0   :  { %9757 = vmatprep.subr.bf16.mxu0 %v10370_v7 }
0x27c6   :  { %9748 = vmatmul.mubr.msk.bf16.vlgmr.msra.gmra.mrb[212].mxu0 %vm236_vm3, %v7510_v25 }
0x27c7   :  { %9758 = vmatpush3.bf16.xpose.msra.mxu0 %v7641_v26  ;;  %9759 = vmatprep.mubr.msk.bf16.mxu0 %vm10371_vm1, %v10370_v7 }
0x27c8   :  { %9769 = vmatprep.subr.bf16.mxu0 %v10370_v7 }
0x27ce   :  { %9760 = vmatmul.mubr.msk.bf16.vlgmr.msra.gmra.mrb[216].mxu0 %vm236_vm3, %v7634_v19 }
0x27cf   :  { %9770 = vmatpush3.bf16.xpose.msra.mxu0 %v7751_v62  ;;  %9771 = vmatprep.mubr.msk.bf16.mxu0 %vm10371_vm1, %v10370_v7 }
0x27d0   :  { %9781 = vmatprep.subr.bf16.mxu0 %v10370_v7 }
0x27d6   :  { %9772 = vmatmul.mubr.msk.bf16.vlgmr.msra.gmra.mrb[220].mxu0 %vm236_vm3, %v7744_v33 }
0x27d7   :  { %9782 = vmatpush3.bf16.xpose.msra.mxu0 %v7861_v2  ;;  %9783 = vmatprep.mubr.msk.bf16.mxu0 %vm10371_vm1, %v10370_v7 }
0x27d8   :  { %9793 = vmatprep.subr.bf16.mxu0 %v10370_v7 }
0x27de   :  { %9784 = vmatmul.mubr.msk.bf16.vlgmr.msra.gmra.mrb[224].mxu0 %vm236_vm3, %v7854_v38 }
0x27df   :  { %9797 = vmatprep.mubr.msk.bf16.mxu0 %vm10371_vm1, %v10370_v7 }
0x280f   :  { %v7097_v10 = vpop.f32.mrb[196].mxu0 }
0x2810   :  { %v9701_v54 = vpop.f32.mrb[197].mxu0  ;;  %v7103_v1 = vsel %vm284_vm6, %v7097_v10, -inf }
0x2811   :  { %7104 = vmax.xlane.f32.xlu0 %v7103_v1  ;;  %v7100_v47 = vpop.f32.mrb[198].mxu0 }
0x2812   :  { %v9702_v8 = vpop.f32.mrb[199].mxu0 }
0x2881   :  { %v7209_v0 = vpop.f32.mrb[200].mxu0 }
0x2882   :  { %v9713_v59 = vpop.f32.mrb[201].mxu0  ;;  %v7215_v36 = vsel %vm284_vm6, %v7209_v0, -inf }
0x2883   :  { %7216 = vmax.xlane.f32.xlu1 %v7215_v36  ;;  %v7212_v17 = vpop.f32.mrb[202].mxu0 }
0x2884   :  { %v9714_v16 = vpop.f32.mrb[203].mxu0 }
0x2889   :  { %v7319_v30 = vpop.f32.mrb[204].mxu0 }
0x288a   :  { %v9725_v24 = vpop.f32.mrb[205].mxu0  ;;  %v7325_v51 = vsel %vm284_vm6, %v7319_v30, -inf }
0x288b   :  { %7326 = vmax.xlane.f32.xlu0 %v7325_v51  ;;  %v7322_v61 = vpop.f32.mrb[206].mxu0 }
0x288c   :  { %v9726_v48 = vpop.f32.mrb[207].mxu0 }
0x2891   :  { %v7429_v41 = vpop.f32.mrb[208].mxu0 }
0x2892   :  { %v9737_v13 = vpop.f32.mrb[209].mxu0  ;;  %v7435_v49 = vsel %vm284_vm6, %v7429_v41, -inf }
0x2893   :  { %7436 = vmax.xlane.f32.xlu0 %v7435_v49  ;;  %v7432_v29 = vpop.f32.mrb[210].mxu0 }
0x2894   :  { %v9738_v46 = vpop.f32.mrb[211].mxu0 }
0x2899   :  { %v7567_v43 = vpop.f32.mrb[212].mxu0 }
0x289a   :  { %v9749_v20 = vpop.f32.mrb[213].mxu0  ;;  %v7573_v18 = vsel %vm284_vm6, %v7567_v43, -inf }
0x289b   :  { %7574 = vmax.xlane.f32.xlu1 %v7573_v18  ;;  %v7570_v4 = vpop.f32.mrb[214].mxu0 }
0x289c   :  { %v9750_v22 = vpop.f32.mrb[215].mxu0 }
0x289e   :  { %v7105_v60 = vpop.xlane.xlu0 %7104 }
0x289f   :  { %v7106_v39 = vsub.f32 %v7097_v10, %v7105_v60 }
0x28a1   :  { %v7107_v5 = vmul.f32 1.442695, %v7106_v39  ;;  %v12247_v58 = vpop.f32.mrb[216].mxu0 }
0x28a2   :  { %v9761_v31 = vpop.f32.mrb[217].mxu0  ;;  %v7683_v50 = vsel %vm284_vm6, %v12247_v58, -inf }
0x28a3   :  { %10320 = vpow2.f32 %v7107_v5  ;;  %7684 = vmax.xlane.f32.xlu0 %v7683_v50  ;;  %v7680_v11 = vpop.f32.mrb[218].mxu0 }
0x28a4   :  { %v9762_v21 = vpop.f32.mrb[219].mxu0 }
0x28a9   :  { %v12251_v6 = vpop.f32.mrb[220].mxu0 }
0x28aa   :  { %v9773_v34 = vpop.f32.mrb[221].mxu0  ;;  %v7793_v9 = vsel %vm284_vm6, %v12251_v6, -inf }
0x28ab   :  { %7794 = vmax.xlane.f32.xlu1 %v7793_v9  ;;  %v7790_v14 = vpop.f32.mrb[222].mxu0 }
0x28ac   :  { %v9774_v23 = vpop.f32.mrb[223].mxu0 }
0x28ad   :  { %v10321_v12 = vpop.eup %10320 }
0x28ae   :  { %v7109_v42 = vsel %vm284_vm6, %v10321_v12, 0.0 }
0x28af   :  { %7110 = vadd.xlane.f32.xlu1 %v7109_v42 }
0x28b1   :  { %v12256_v25 = vpop.f32.mrb[224].mxu0 }
0x28b2   :  { %v9785_v27 = vpop.f32.mrb[225].mxu0  ;;  %v7903_v32 = vsel %vm284_vm6, %v12256_v25, -inf }
0x28b3   :  { %7904 = vmax.xlane.f32.xlu0 %v7903_v32  ;;  %v7900_v63 = vpop.f32.mrb[226].mxu0 }
0x28b4   :  { %v9786_v28 = vpop.f32.mrb[227].mxu0 }
0x28c0   :  { %7227 = vrot.lane.b32.xlu1 %v12159_v55, %s10375_s17 }
0x28c4   :  { %7337 = vrot.lane.b32.xlu1 %v12159_v55, %s10374_s16 }
0x28c9   :  { %7116 = vrot.lane.b32.xlu0 %v12159_v55, %s10373_s15 }
0x2910   :  { %v7217_v53 = vpop.xlane.xlu1 %7216 }
0x2911   :  { %v7218_v35 = vsub.f32 %v7209_v0, %v7217_v53 }
0x2913   :  { %v7219_v57 = vmul.f32 1.442695, %v7218_v35 }
0x2915   :  { %10322 = vpow2.f32 %v7219_v57 }
0x2918   :  { %v7327_v15 = vpop.xlane.xlu0 %7326 }
0x2919   :  { %v7328_v37 = vsub.f32 %v7319_v30, %v7327_v15 }
0x291b   :  { %v7329_v26 = vmul.f32 1.442695, %v7328_v37 }
0x291d   :  { %10324 = vpow2.f32 %v7329_v26 }
0x291f   :  { %v12266_v56 = vpop.eup %10322 }
0x2920   :  { %v7437_v19 = vpop.xlane.xlu0 %7436  ;;  %v7221_v62 = vsel %vm284_vm6, %v12266_v56, 0.0 }
0x2921   :  { %v7438_v52 = vsub.f32 %v7429_v41, %v7437_v19  ;;  %7222 = vadd.xlane.f32.xlu0 %v7221_v62 }
0x2923   :  { %v7439_v33 = vmul.f32 1.442695, %v7438_v52 }
0x2925   :  { %10326 = vpow2.f32 %v7439_v33 }
0x2927   :  { %v12270_v2 = vpop.eup %10324 }
0x2928   :  { %v7575_v38 = vpop.xlane.xlu1 %7574  ;;  %v7331_v10 = vsel %vm284_vm6, %v12270_v2, 0.0 }
0x2929   :  { %v7576_v54 = vsub.f32 %v7567_v43, %v7575_v38  ;;  %7332 = vadd.xlane.f32.xlu1 %v7331_v10 }
0x292b   :  { %v7577_v1 = vmul.f32 1.442695, %v7576_v54 }
0x292d   :  { %10328 = vpow2.f32 %v7577_v1 }
0x292f   :  { %v12274_v47 = vpop.eup %10326 }
0x2930   :  { %v7441_v8 = vsel %vm284_vm6, %v12274_v47, 0.0  ;;  %v7685_v17 = vpop.xlane.xlu0 %7684 }
0x2931   :  { %7442 = vadd.xlane.f32.xlu1 %v7441_v8  ;;  %v7686_v29 = vsub.f32 %v12247_v58, %v7685_v17 }
0x2933   :  { %v7687_v46 = vmul.f32 1.442695, %v7686_v29 }
0x2937   :  { %v12278_v0 = vpop.eup %10328 }
0x2938   :  { %v7795_v59 = vpop.xlane.xlu1 %7794  ;;  %v7579_v36 = vsel %vm284_vm6, %v12278_v0, 0.0 }
0x2939   :  { %7580 = vadd.xlane.f32.xlu0 %v7579_v36  ;;  %v7796_v43 = vsub.f32 %v12251_v6, %v7795_v59 }
0x293b   :  { %v7797_v20 = vmul.f32 1.442695, %v7796_v43 }
0x293c   :  { %v7111_v16 = vpop.xlane.xlu1 %7110 }
0x293d   :  { %10330 = vrcp.f32 %v7111_v16 }
0x293e   :  { %10332 = vpow2.f32 %v7687_v46 }
0x293f   :  { %10334 = vpow2.f32 %v7797_v20 }
0x2940   :  { %v7905_v30 = vpop.xlane.xlu0 %7904  ;;  %v7228_v41 = vpop.permute.xlu1 %7227 }
0x2941   :  { %v7233_v49 = vand.u32 %v7228_v41, %v10502_v45  ;;  %v7906_v18 = vsub.f32 %v12256_v25, %v7905_v30 }
0x2942   :  { %7585 = vrot.lane.b32.xlu1 %v12197_v3, %s10373_s15 }
0x2943   :  { %v7907_v4 = vmul.f32 1.442695, %v7906_v18 }
0x2944   :  { %v7117_v24 = vpop.permute.xlu0 %7116  ;;  %v7338_v50 = vpop.permute.xlu1 %7337 }
0x2945   :  { %v7122_v51 = vand.u32 %v7117_v24, %v10502_v45  ;;  %10336 = vpow2.f32 %v7907_v4  ;;  %v7343_v9 = vand.u32 %v7338_v50, %v10502_v45 }
0x2947   :  { %9704 = vmatpush3.bf16.msra.mxu1 %v7122_v51  ;;  %v10331_v61 = vpop.eup %10330 }
0x2948   :  { %9715 = vmatprep.subr.bf16.mxu1 %v10370_v7  ;;  %v7113_v48 = vmul.f32 %v10331_v61, %v10321_v12  ;;  %v10333_v22 = vpop.eup %10332 }
0x2949   :  { %v7689_v60 = vsel %vm284_vm6, %v10333_v22, 0.0  ;;  %v12297_v39 = vpop.eup %10334 }
0x294a   :  { %v7114_v13 = vpack.c.bf16 %v7113_v48, %v7113_v48 }
0x294c   :  { %9706 = vmatmul.mubr.msk.bf16.vlgmr.msra.gmra.mrb[200].mxu1 %vm284_vm6, %v7114_v13 }
0x294d   :  { %9716 = vmatpush3.bf16.msra.mxu1 %v7233_v49  ;;  %9717 = vmatprep.mubr.msk.bf16.mxu1 %vm10371_vm1, %v10370_v7 }
0x294e   :  { %9727 = vmatprep.subr.bf16.mxu1 %v10370_v7 }
0x294f   :  { %7447 = vrot.lane.b32.xlu0 %v12159_v55, %s10376_s18  ;;  %v7799_v55 = vsel %vm284_vm6, %v12297_v39, 0.0  ;;  %v12301_v5 = vpop.eup %10336 }
0x2950   :  { %v7909_v58 = vsel %vm284_vm6, %v12301_v5, 0.0 }
0x2966   :  { %7690 = vadd.xlane.f32.xlu1 %v7689_v60 }
0x296a   :  { %7800 = vadd.xlane.f32.xlu1 %v7799_v55 }
0x296e   :  { %7910 = vadd.xlane.f32.xlu0 %v7909_v58 }
0x297b   :  { %7695 = vrot.lane.b32.xlu1 %v12197_v3, %s10375_s17  ;;  %s8457_s17 = sld [smem:[%s12415_s0 + %s10412_s14]]  }
0x297f   :  { %7805 = vrot.lane.b32.xlu1 %v12197_v3, %s10374_s16 }
0x2983   :  { %7915 = vrot.lane.b32.xlu1 %v12197_v3, %s10376_s18  ;;  %s10413_s18 = smov 32  }
0x29ae   :  { %v7223_v31 = vpop.xlane.xlu0 %7222 }
0x29af   :  { %10338 = vrcp.f32 %v7223_v31  ;;  %v10040_v31 = vld [vmem:[%s11853_s24 + $0x10] sm:$0xff]  }
0x29b0   :  { %9794 = vmatpush3.bf16.msra.mxu0 %v10040_v31 }
0x29b1   :  { %9795 = vmatprep.subr.bf16.mxu0 %v10370_v7 }
0x29b6   :  { %v7333_v11 = vpop.xlane.xlu1 %7332 }
0x29b7   :  { %10340 = vrcp.f32 %v7333_v11 }
0x29b9   :  { %v10339_v21 = vpop.eup %10338 }
0x29ba   :  { %v7225_v6 = vmul.f32 %v10339_v21, %v12266_v56 }
0x29bc   :  { %v7226_v34 = vpack.c.bf16 %v7225_v6, %v7225_v6 }
0x29be   :  { %v7443_v14 = vpop.xlane.xlu1 %7442  ;;  %9718 = vmatmul.mubr.msk.bf16.vlgmr.msra.gmra.mrb[204].mxu1 %vm284_vm6, %v7226_v34 }
0x29bf   :  { %10342 = vrcp.f32 %v7443_v14  ;;  %9728 = vmatpush3.bf16.msra.mxu1 %v7343_v9  ;;  %9729 = vmatprep.mubr.msk.bf16.mxu1 %vm10371_vm1, %v10370_v7  ;;  %v10041_v9 = vld [vmem:[%s11853_s24 + $0x18] sm:$0xff]   ;;  %s10414_s24 = smov 33  }
0x29c0   :  { %9739 = vmatprep.subr.bf16.mxu1 %v10370_v7  ;;  %9796 = vmatpush3.bf16.msra.mxu0 %v10041_v9  ;;  %s8459_s27 = sld [smem:[%s12415_s0 + %s10414_s24]]  }
0x29c1   :  { %v10341_v3 = vpop.eup %10340  ;;  %9809 = vmatprep.subr.bf16.mxu0 %v10370_v7 }
0x29c2   :  { %v7335_v23 = vmul.f32 %v10341_v3, %v12270_v2  ;;  %v7586_v28 = vpop.permute.xlu1 %7585 }
0x29c3   :  { %v7591_v35 = vand.u32 %v7586_v28, %v10502_v45 }
0x29c4   :  { %v7336_v12 = vpack.c.bf16 %v7335_v23, %v7335_v23 }
0x29c6   :  { %9730 = vmatmul.mubr.msk.bf16.vlgmr.msra.gmra.mrb[208].mxu1 %vm284_vm6, %v7336_v12  ;;  %v7581_v42 = vpop.xlane.xlu0 %7580 }
0x29c7   :  { %10344 = vrcp.f32 %v7581_v42  ;;  %9741 = vmatprep.mubr.msk.bf16.mxu1 %vm10371_vm1, %v10370_v7 }
0x29c9   :  { %v10343_v25 = vpop.eup %10342 }
0x29ca   :  { %v7445_v27 = vmul.f32 %v10343_v25, %v12274_v47  ;;  %v7448_v32 = vpop.permute.xlu0 %7447 }
0x29cb   :  { %v7453_v63 = vand.u32 %v7448_v32, %v10502_v45 }
0x29cc   :  { %v7446_v53 = vpack.c.bf16 %v7445_v27, %v7445_v27 }
0x29cd   :  { %9740 = vmatpush3.bf16.msra.mxu1 %v7453_v63 }
0x29ce   :  { %9751 = vmatprep.subr.bf16.mxu1 %v10370_v7 }
0x29d0   :  { %9742 = vmatmul.mubr.msk.bf16.vlgmr.msra.gmra.mrb[212].mxu1 %vm284_vm6, %v7446_v53 }
0x29d1   :  { %v10345_v57 = vpop.eup %10344  ;;  %9752 = vmatpush3.bf16.msra.mxu1 %v7591_v35  ;;  %9753 = vmatprep.mubr.msk.bf16.mxu1 %vm10371_vm1, %v10370_v7 }
0x29d2   :  { %v7583_v15 = vmul.f32 %v10345_v57, %v12278_v0  ;;  %9763 = vmatprep.subr.bf16.mxu1 %v10370_v7 }
0x29d4   :  { %v7584_v37 = vpack.c.bf16 %v7583_v15, %v7583_v15 }
0x29d8   :  { %9754 = vmatmul.mubr.msk.bf16.vlgmr.msra.gmra.mrb[216].mxu1 %vm284_vm6, %v7584_v37 }
0x29d9   :  { %9765 = vmatprep.mubr.msk.bf16.mxu1 %vm10371_vm1, %v10370_v7 }
0x29f3   :  { %v7691_v26 = vpop.xlane.xlu1 %7690 }
0x29f4   :  { %10346 = vrcp.f32 %v7691_v26 }
0x29f7   :  { %v7801_v56 = vpop.xlane.xlu1 %7800 }
0x29f8   :  { %10348 = vrcp.f32 %v7801_v56 }
0x29fb   :  { %v7696_v19 = vpop.permute.xlu1 %7695  ;;  %v7911_v52 = vpop.xlane.xlu0 %7910 }
0x29fc   :  { %v7701_v62 = vand.u32 %v7696_v19, %v10502_v45  ;;  %10350 = vrcp.f32 %v7911_v52 }
0x29fe   :  { %v10347_v33 = vpop.eup %10346  ;;  %9764 = vmatpush3.bf16.msra.mxu1 %v7701_v62 }
0x29ff   :  { %v7693_v2 = vmul.f32 %v10347_v33, %v10333_v22  ;;  %v7806_v38 = vpop.permute.xlu1 %7805  ;;  %9775 = vmatprep.subr.bf16.mxu1 %v10370_v7 }
0x2a00   :  { %v7811_v10 = vand.u32 %v7806_v38, %v10502_v45 }
0x2a01   :  { %v7694_v54 = vpack.c.bf16 %v7693_v2, %v7693_v2 }
0x2a02   :  { %v10349_v1 = vpop.eup %10348 }
0x2a03   :  { %9766 = vmatmul.mubr.msk.bf16.vlgmr.msra.gmra.mrb[220].mxu1 %vm284_vm6, %v7694_v54  ;;  %v7803_v47 = vmul.f32 %v10349_v1, %v12297_v39  ;;  %v7916_v8 = vpop.permute.xlu1 %7915  ;;  %v8725_v1 = vld [vmem:[%s11874_s1 + $0x1] ss:$0 sm:$0xff] }
0x2a04   :  { %9776 = vmatpush3.bf16.msra.mxu1 %v7811_v10  ;;  %9777 = vmatprep.mubr.msk.bf16.mxu1 %vm10371_vm1, %v10370_v7  ;;  %v7921_v36 = vand.u32 %v7916_v8, %v10502_v45 }
0x2a05   :  { %9787 = vmatprep.subr.bf16.mxu1 %v10370_v7  ;;  %v7804_v0 = vpack.c.bf16 %v7803_v47, %v7803_v47 }
0x2a06   :  { %v10351_v59 = vpop.eup %10350 }
0x2a07   :  { %v7913_v17 = vmul.f32 %v10351_v59, %v12301_v5 }
0x2a09   :  { %v7914_v16 = vpack.c.bf16 %v7913_v17, %v7913_v17 }
0x2a0b   :  { %9778 = vmatmul.mubr.msk.bf16.vlgmr.msra.gmra.mrb[224].mxu1 %vm284_vm6, %v7804_v0 }
0x2a0c   :  { %9788 = vmatpush3.bf16.msra.mxu1 %v7921_v36  ;;  %9789 = vmatprep.mubr.msk.bf16.mxu1 %vm10371_vm1, %v10370_v7 }
0x2a0d   :  { %9801 = vmatprep.subr.bf16.mxu1 %v10370_v7 }
0x2a13   :  { %9790 = vmatmul.mubr.msk.bf16.vlgmr.msra.gmra.mrb[228].mxu1 %vm284_vm6, %v7914_v16 }
0x2a14   :  { %9805 = vmatprep.mubr.msk.bf16.mxu1 %vm10371_vm1, %v10370_v7 }
0x2a1f   :  { %v7158_v30 = vpop.f32.mrb[200].mxu1 }
0x2a20   :  { %v9707_v24 = vpop.f32.mrb[201].mxu1 }
0x2a21   :  { %v7161_v51 = vpop.f32.mrb[202].mxu1 }
0x2a22   :  { %v9708_v45 = vpop.f32.mrb[203].mxu1 }
0x2a91   :  { %v7269_v61 = vpop.f32.mrb[204].mxu1 }
0x2a92   :  { %v9719_v48 = vpop.f32.mrb[205].mxu1 }
0x2a93   :  { %v7272_v41 = vpop.f32.mrb[206].mxu1 }
0x2a94   :  { %v9720_v13 = vpop.f32.mrb[207].mxu1  ;;  %v10042_v41 = vld [vmem:[%s11886_s26 + $0x10] sm:$0xff]  }
0x2a95   :  { %9802 = vmatpush3.bf16.msra.mxu1 %v10042_v41  ;;  %v10043_v13 = vld [vmem:[%s11886_s26 + $0x18] sm:$0xff]  }
0x2a96   :  { %9803 = vmatprep.subr.bf16.mxu1 %v10370_v7 }
0x2a99   :  { %v7379_v49 = vpop.f32.mrb[208].mxu1  ;;  %9804 = vmatpush3.bf16.msra.mxu1 %v10043_v13 }
0x2a9a   :  { %v9731_v29 = vpop.f32.mrb[209].mxu1  ;;  %9821 = vmatprep.subr.bf16.mxu1 %v10370_v7 }
0x2a9b   :  { %v7382_v46 = vpop.f32.mrb[210].mxu1 }
0x2a9c   :  { %v9732_v43 = vpop.f32.mrb[211].mxu1 }
0x2aa3   :  { %v7489_v20 = vpop.f32.mrb[212].mxu1 }
0x2aa4   :  { %v9743_v18 = vpop.f32.mrb[213].mxu1 }
0x2aa5   :  { %v7492_v4 = vpop.f32.mrb[214].mxu1 }
0x2aa6   :  { %v9744_v22 = vpop.f32.mrb[215].mxu1 }
0x2aab   :  { %v7627_v60 = vpop.f32.mrb[216].mxu1 }
0x2aac   :  { %v9755_v39 = vpop.f32.mrb[217].mxu1 }
0x2aad   :  { %v7630_v55 = vpop.f32.mrb[218].mxu1 }
0x2aae   :  { %v9756_v5 = vpop.f32.mrb[219].mxu1 }
0x2ad6   :  { %v7737_v58 = vpop.f32.mrb[220].mxu1 }
0x2ad7   :  { %v9981_v50 = vpack.i.bf16 %v7737_v58, %v7269_v61  ;;  %v9767_v11 = vpop.f32.mrb[221].mxu1 }
0x2ad8   :  { %v7740_v21 = vpop.f32.mrb[222].mxu1  ;;  %v8729_v11 = vld [vmem:[%s11638_s9 + $0x4] ss:$0 sm:$0xff] }
0x2ad9   :  { %9982 = vrot.lane.b32.xlu1 %v9981_v50, %s12434_s10  ;;  %v9768_v6 = vpop.f32.mrb[223].mxu1 }
0x2ade   :  { %v7847_v34 = vpop.f32.mrb[224].mxu1 }
0x2adf   :  { %v9986_v14 = vpack.i.bf16 %v7847_v34, %v7379_v49  ;;  %v9779_v3 = vpop.f32.mrb[225].mxu1  ;;  %v10045_v49 = vld [vmem:[%s11895_s23 + $0x28] sm:$0xff]  }
0x2ae0   :  { %v7850_v23 = vpop.f32.mrb[226].mxu1 }
0x2ae1   :  { %9987 = vrot.lane.b32.xlu1 %v9986_v14, %s12435_s12  ;;  %v9780_v12 = vpop.f32.mrb[227].mxu1 }
0x2ae2   :  { %v8730_v12 = vld [vmem:[%s11644_s29 + $0x4] ss:$0 sm:$0xff] }
0x2ae6   :  { %v7957_v42 = vpop.f32.mrb[228].mxu1 }
0x2ae7   :  { %v9991_v25 = vpack.i.bf16 %v7957_v42, %v7489_v20  ;;  %v9791_v27 = vpop.f32.mrb[229].mxu1 }
0x2ae8   :  { %v7960_v32 = vpop.f32.mrb[230].mxu1 }
0x2ae9   :  { %9992 = vrot.lane.b32.xlu1 %v9991_v25, %s12436_s21  ;;  %v9792_v63 = vpop.f32.mrb[231].mxu1 }
0x2aea   :  { %v10046_v63 = vld [vmem:[%s11895_s23 + $0x30] sm:$0xff]  }
0x2b4b   :  { %v9983_v28 = vpop.permute.xlu1 %9982 }
0x2b4c   :  { %v9985_v35 = vunpack.i.h.bf16 %v9983_v28  ;;  %v9984_v57 = vunpack.i.l.bf16 %v9983_v28  ;;  %v10047_v28 = vld [vmem:[%s11895_s23 + $0x38] sm:$0xff]  }
0x2b4e   :  { %v7975_v56 = vsel %vm236_vm3, %v7627_v60, %v9985_v35  ;;  %v7507_v19 = vsel %vm236_vm3, %v7158_v30, %v9984_v57 }
0x2b53   :  { %v9988_v53 = vpop.permute.xlu1 %9987 }
0x2b54   :  { %v9990_v15 = vunpack.i.h.bf16 %v9988_v53  ;;  %v9989_v37 = vunpack.i.l.bf16 %v9988_v53  ;;  %v8736_v53 = vld [vmem:[%s11913_s7 + $0x1] ss:$0 sm:$0xff] }
0x2b56   :  { %v7976_v33 = vsel %vm757_vm8, %v7975_v56, %v9990_v15  ;;  %v7508_v2 = vsel %vm757_vm8, %v7507_v19, %v9989_v37 }
0x2b5b   :  { %v9993_v26 = vpop.permute.xlu1 %9992 }
0x2b5c   :  { %v9995_v62 = vunpack.i.h.bf16 %v9993_v26  ;;  %v9994_v52 = vunpack.i.l.bf16 %v9993_v26 }
0x2b5e   :  { %v7977_v38 = vsel %vm760_vm9, %v7976_v33, %v9995_v62  ;;  %v7509_v10 = vsel %vm760_vm9, %v7508_v2, %v9994_v52  ;;  %v8749_v33 = vld [vmem:[%s11922_s22 + $0x1] ss:$0 sm:$0xff] }
0x2b5f   :  { %v7978_v54 = vpack.c.bf16 %v7977_v38, %v7509_v10 }
0x2b61   :  { %9798 = vmatmul.mubr.msk.bf16.vlgmr.msra.gmra.mrb[228].mxu0 %vm171_vm0, %v7978_v54 }
0x2b62   :  { %9817 = vmatprep.mubr.msk.bf16.mxu0 %vm10371_vm1, %v10370_v7 }
0x2c34   :  { %v8034_v47 = vpop.f32.mrb[228].mxu0 }
0x2c35   :  { %v8035_v8 = vadd.f32 %v8725_v1, %v8034_v47  ;;  %v9799_v0 = vpop.f32.mrb[229].mxu0 }
0x2c36   :  { %v8037_v59 = vpop.f32.mrb[230].mxu0 }
0x2c37   :  { %v8041_v36 = vadd.f32 %v8035_v8, %v12171_v40  ;;  %v8038_v17 = vadd.f32 %v8725_v1, %v8037_v59  ;;  %v9800_v16 = vpop.f32.mrb[231].mxu0 }
0x2c39   :  { %v8042_v30 = vadd.f32 %v8038_v17, %v12173_v44  ;;  %v8043_v24 = vsel %vm171_vm0, %v8041_v36, 0.0  ;;  %v8051_v51 = vmul.f32 %v8041_v36, %v8041_v36  ;;  %v10044_v44 = vld [vmem:[%s11895_s23 + $0x20] sm:$0xff]   ;;  %s8458_s23 = sld [smem:[%s12415_s0 + %s10413_s18]]  }
0x2c3a   :  { %8044 = vadd.xlane.f32.xlu0 %v8043_v24  ;;  %9810 = vmatpush3.bf16.msra.mxu0 %v10044_v44 }
0x2c3b   :  { %v8046_v45 = vsel %vm171_vm0, %v8042_v30, 0.0  ;;  %v8053_v61 = vsel %vm171_vm0, %v8051_v51, 0.0  ;;  %v8052_v48 = vmul.f32 %v8042_v30, %v8042_v30  ;;  %9811 = vmatprep.subr.bf16.mxu0 %v10370_v7 }
0x2c3c   :  { %8047 = vadd.xlane.f32.xlu1 %v8046_v45 }
0x2c3d   :  { %v8056_v40 = vsel %vm171_vm0, %v8052_v48, 0.0 }
0x2c3e   :  { %8054 = vadd.xlane.f32.xlu0 %v8053_v61  ;;  %9812 = vmatpush3.bf16.msra.mxu0 %v10045_v49 }
0x2c3f   :  { %9813 = vmatprep.subr.bf16.mxu0 %v10370_v7 }
0x2c42   :  { %8057 = vadd.xlane.f32.xlu0 %v8056_v40  ;;  %9814 = vmatpush3.bf16.msra.mxu0 %v10046_v63 }
0x2c43   :  { %9815 = vmatprep.subr.bf16.mxu0 %v10370_v7 }
0x2c46   :  { %9816 = vmatpush3.bf16.msra.mxu0 %v10047_v28 }
0x2cc7   :  { %v8045_v29 = vpop.xlane.xlu0 %8044 }
0x2cc8   :  { %v8049_v46 = vmul.f32 0.03125, %v8045_v29 }
0x2cc9   :  { %v8048_v43 = vpop.xlane.xlu1 %8047 }
0x2cca   :  { %v8061_v18 = vmul.f32 %v8049_v46, %v8049_v46  ;;  %v8050_v4 = vmul.f32 0.03125, %v8048_v43  ;;  %v8069_v34 = vsub.f32 %v8041_v36, %v8049_v46 }
0x2ccb   :  { %v8055_v20 = vpop.xlane.xlu0 %8054 }
0x2ccc   :  { %v8059_v22 = vmul.f32 0.03125, %v8055_v20  ;;  %v8062_v55 = vmul.f32 %v8050_v4, %v8050_v4  ;;  %v8070_v14 = vsub.f32 %v8042_v30, %v8050_v4  ;;  %v8755_v4 = vld [vmem:[%s11638_s9 + $0x5] ss:$0 sm:$0xff] }
0x2cce   :  { %v8063_v60 = vsub.f32 %v8059_v22, %v8061_v18 }
0x2ccf   :  { %v8058_v39 = vpop.xlane.xlu0 %8057 }
0x2cd0   :  { %v8065_v5 = vadd.f32 1e-05, %v8063_v60  ;;  %v8060_v58 = vmul.f32 0.03125, %v8058_v39 }
0x2cd2   :  { %10352 = vrsqrt.f32 %v8065_v5  ;;  %v8064_v31 = vsub.f32 %v8060_v58, %v8062_v55  ;;  %v8756_v55 = vld [vmem:[%s11644_s29 + $0x5] ss:$0 sm:$0xff] }
0x2cd4   :  { %v8066_v50 = vadd.f32 1e-05, %v8064_v31 }
0x2cd6   :  { %10354 = vrsqrt.f32 %v8066_v50 }
0x2cdc   :  { %v10353_v21 = vpop.eup %10352 }
0x2cdd   :  { %v8077_v6 = vmul.f32 %v10353_v21, %v8729_v11 }
0x2cdf   :  { %v8079_v23 = vmul.f32 %v8077_v6, %v8069_v34 }
0x2ce0   :  { %v10355_v9 = vpop.eup %10354 }
0x2ce1   :  { %v8078_v3 = vmul.f32 %v10355_v9, %v8729_v11  ;;  %v8087_v25 = vadd.f32 %v8730_v12, %v8079_v23 }
0x2ce3   :  { %v8080_v42 = vmul.f32 %v8078_v3, %v8070_v14 }
0x2ce5   :  { %v8088_v27 = vadd.f32 %v8730_v12, %v8080_v42  ;;  %v10048_v42 = vld [vmem:[%s8457_s17] sm:$0xff]  }
0x2ce7   :  { %v8089_v32 = vpack.c.bf16 %v8088_v27, %v8087_v25 }
0x2ce9   :  { %9806 = vmatmul.mubr.msk.bf16.vlgmr.msra.gmra.mrb[232].mxu1 %vm171_vm0, %v8089_v32 }
0x2cea   :  { %9825 = vmatprep.mubr.msk.bf16.mxu1 %vm10371_vm1, %v10370_v7  ;;  %9822 = vmatpush3.bf16.msra.mxu1 %v10048_v42 }
0x2ceb   :  { %9823 = vmatprep.subr.bf16.mxu1 %v10370_v7  ;;  %v8759_v7 = vld [vmem:[%s11604_s11 + $0x1] ss:$0 sm:$0xff] }
0x2dbc   :  { %v8152_v35 = vpop.f32.mrb[232].mxu1 }
0x2dbd   :  { %v8153_v57 = vadd.f32 %v8736_v53, %v8152_v35  ;;  %v9807_v15 = vpop.f32.mrb[233].mxu1 }
0x2dbe   :  { %v8155_v37 = vpop.f32.mrb[234].mxu1 }
0x2dbf   :  { %v8156_v26 = vadd.f32 %v8736_v53, %v8155_v37  ;;  %v9808_v56 = vpop.f32.mrb[235].mxu1  ;;  %v8159_v19 = vmax.f32 %v8153_v57, 0.0 }
0x2dc1   :  { %v8160_v62 = vmax.f32 %v8156_v26, 0.0 }
0x2dc3   :  { %v8161_v52 = vpack.c.bf16 %v8160_v62, %v8159_v19 }
0x2dc5   :  { %9818 = vmatmul.mubr.msk.bf16.vlgmr.msra.gmra.mrb[232].mxu0 %vm1574_vm12, %v8161_v52 }
0x2e98   :  { %v8240_v2 = vpop.f32.mrb[232].mxu0 }
0x2e99   :  { %v8241_v38 = vadd.f32 %v8749_v33, %v8240_v2  ;;  %v9819_v10 = vpop.f32.mrb[233].mxu0 }
0x2e9a   :  { %v8243_v54 = vpop.f32.mrb[234].mxu0 }
0x2e9b   :  { %v8247_v1 = vadd.f32 %v8241_v38, %v8087_v25  ;;  %v8244_v47 = vadd.f32 %v8749_v33, %v8243_v54  ;;  %v9820_v8 = vpop.f32.mrb[235].mxu0  ;;  %v10049_v25 = vld [vmem:[%s8457_s17 + $0x8] sm:$0xff]  }
0x2e9c   :  { %9824 = vmatpush3.bf16.msra.mxu1 %v10049_v25  ;;  %v8760_v8 = vld [vmem:[%s11609_s8 + $0x1] ss:$0 sm:$0xff] }
0x2e9d   :  { %v8248_v0 = vadd.f32 %v8244_v47, %v8088_v27  ;;  %v8249_v59 = vsel %vm171_vm0, %v8247_v1, 0.0  ;;  %v8257_v17 = vmul.f32 %v8247_v1, %v8247_v1 }
0x2e9e   :  { %8250 = vadd.xlane.f32.xlu0 %v8249_v59 }
0x2e9f   :  { %v8252_v36 = vsel %vm171_vm0, %v8248_v0, 0.0  ;;  %v8259_v16 = vsel %vm171_vm0, %v8257_v17, 0.0  ;;  %v8258_v30 = vmul.f32 %v8248_v0, %v8248_v0 }
0x2ea1   :  { %v8262_v24 = vsel %vm171_vm0, %v8258_v30, 0.0 }
0x2ea2   :  { %8253 = vadd.xlane.f32.xlu0 %v8252_v36 }
0x2ea6   :  { %8260 = vadd.xlane.f32.xlu0 %v8259_v16  ;;  %v8761_v16 = vld [vmem:[%s8458_s23] ss:$0 sm:$0xff] }
0x2eaa   :  { %8263 = vadd.xlane.f32.xlu0 %v8262_v24 }
0x2f2b   :  { %v8251_v51 = vpop.xlane.xlu0 %8250 }
0x2f2c   :  { %v8255_v61 = vmul.f32 0.03125, %v8251_v51 }
0x2f2e   :  { %v8267_v40 = vmul.f32 %v8255_v61, %v8255_v61  ;;  %v8275_v60 = vsub.f32 %v8247_v1, %v8255_v61 }
0x2f2f   :  { %v8254_v45 = vpop.xlane.xlu0 %8253 }
0x2f30   :  { %v8256_v41 = vmul.f32 0.03125, %v8254_v45 }
0x2f32   :  { %v8268_v29 = vmul.f32 %v8256_v41, %v8256_v41  ;;  %v8276_v31 = vsub.f32 %v8248_v0, %v8256_v41 }
0x2f33   :  { %v8261_v48 = vpop.xlane.xlu0 %8260 }
0x2f34   :  { %v8265_v13 = vmul.f32 0.03125, %v8261_v48 }
0x2f36   :  { %v8269_v44 = vsub.f32 %v8265_v13, %v8267_v40 }
0x2f37   :  { %v8264_v49 = vpop.xlane.xlu0 %8263 }
0x2f38   :  { %v8271_v46 = vadd.f32 1e-05, %v8269_v44  ;;  %v8266_v43 = vmul.f32 0.03125, %v8264_v49 }
0x2f3a   :  { %10356 = vrsqrt.f32 %v8271_v46  ;;  %v8270_v20 = vsub.f32 %v8266_v43, %v8268_v29 }
0x2f3c   :  { %v8272_v18 = vadd.f32 1e-05, %v8270_v20 }
0x2f3e   :  { %10358 = vrsqrt.f32 %v8272_v18 }
0x2f44   :  { %v10357_v22 = vpop.eup %10356 }
0x2f45   :  { %v8283_v39 = vmul.f32 %v10357_v22, %v8755_v4 }
0x2f47   :  { %v8285_v5 = vmul.f32 %v8283_v39, %v8275_v60 }
0x2f48   :  { %v10359_v58 = vpop.eup %10358 }
0x2f49   :  { %v8293_v50 = vadd.f32 %v8756_v55, %v8285_v5  ;;  %v8284_v11 = vmul.f32 %v10359_v58, %v8755_v4 }
0x2f4b   :  { %v8299_v21 = vsel %vm171_vm0, %v8293_v50, 0.0  ;;  %v8286_v6 = vmul.f32 %v8284_v11, %v8276_v31  ;;  %v8307_v3 = vmul.f32 %v8293_v50, %v8293_v50 }
0x2f4c   :  { %8300 = vadd.xlane.f32.xlu0 %v8299_v21 }
0x2f4d   :  { %v8294_v34 = vadd.f32 %v8756_v55, %v8286_v6  ;;  %v8309_v12 = vsel %vm171_vm0, %v8307_v3, 0.0 }
0x2f4f   :  { %v8302_v9 = vsel %vm171_vm0, %v8294_v34, 0.0  ;;  %v8308_v14 = vmul.f32 %v8294_v34, %v8294_v34 }
0x2f50   :  { %8303 = vadd.xlane.f32.xlu0 %v8302_v9 }
0x2f51   :  { %v8312_v23 = vsel %vm171_vm0, %v8308_v14, 0.0 }
0x2f52   :  { %8313 = vadd.xlane.f32.xlu1 %v8312_v23 }
0x2f54   :  { %8310 = vadd.xlane.f32.xlu0 %v8309_v12 }
0x2fd9   :  { %v8301_v27 = vpop.xlane.xlu0 %8300 }
0x2fda   :  { %v8305_v63 = vmul.f32 0.03125, %v8301_v27 }
0x2fdc   :  { %v8317_v37 = vmul.f32 %v8305_v63, %v8305_v63  ;;  %v8325_v54 = vsub.f32 %v8293_v50, %v8305_v63 }
0x2fdd   :  { %v8304_v32 = vpop.xlane.xlu0 %8303 }
0x2fde   :  { %v8306_v28 = vmul.f32 0.03125, %v8304_v32 }
0x2fdf   :  { %v8314_v53 = vpop.xlane.xlu1 %8313 }
0x2fe0   :  { %v8318_v35 = vmul.f32 %v8306_v28, %v8306_v28  ;;  %v8316_v57 = vmul.f32 0.03125, %v8314_v53  ;;  %v8326_v2 = vsub.f32 %v8294_v34, %v8306_v28 }
0x2fe1   :  { %v8311_v15 = vpop.xlane.xlu0 %8310 }
0x2fe2   :  { %v8320_v26 = vsub.f32 %v8316_v57, %v8318_v35  ;;  %v8315_v56 = vmul.f32 0.03125, %v8311_v15 }
0x2fe4   :  { %v8322_v19 = vadd.f32 1e-05, %v8320_v26  ;;  %v8319_v62 = vsub.f32 %v8315_v56, %v8317_v37 }
0x2fe6   :  { %10360 = vrsqrt.f32 %v8322_v19  ;;  %v8321_v52 = vadd.f32 1e-05, %v8319_v62 }
0x2fe8   :  { %10362 = vrsqrt.f32 %v8321_v52 }
0x2ff0   :  { %v10361_v33 = vpop.eup %10360 }
0x2ff1   :  { %v8334_v38 = vmul.f32 %v10361_v33, %v8759_v7 }
0x2ff2   :  { %v10363_v10 = vpop.eup %10362 }
0x2ff3   :  { %v8336_v1 = vmul.f32 %v8334_v38, %v8326_v2  ;;  %v8333_v47 = vmul.f32 %v10363_v10, %v8759_v7 }
0x2ff5   :  { %v8335_v0 = vmul.f32 %v8333_v47, %v8325_v54  ;;  %v8344_v36 = vadd.f32 %v8760_v8, %v8336_v1 }
0x2ff7   :  { %v8343_v59 = vadd.f32 %v8760_v8, %v8335_v0 }
0x2ff9   :  { %v8345_v17 = vpack.c.bf16 %v8344_v36, %v8343_v59 }
0x2ffb   :  { %9826 = vmatmul.mubr.msk.bf16.vlgmr.msra.gmra.mrb[236].mxu1 %vm171_vm0, %v8345_v17 }
0x30ce   :  { %v8406_v30 = vpop.f32.mrb[236].mxu1 }
0x30cf   :  { %v9827_v24 = vpop.f32.mrb[237].mxu1  ;;  %v8407_v45 = vadd.f32 %v8761_v16, %v8406_v30 }
0x30d0   :  { %v8409_v51 = vpop.f32.mrb[238].mxu1 }
0x30d1   :  { %v8410_v61 = vadd.f32 %v8761_v16, %v8409_v51  ;;  %v9828_v48 = vpop.f32.mrb[239].mxu1 }
0x30d3   :  { %v8772_v40 = vpack.c.bf16 %v8410_v61, %v8407_v45 }
0x30d5   :  { %8773 = vst [vmem:[%s8459_s27] sm:$0xff] %v8772_v40  }

</bundles_post_ra>
